<compile_context>
chip_gen: v7x
topology: tpu7x:2x2x1
jax: 0.10.0
libtpu: 0.0.40
codegen_flags: <defaults>
</compile_context>

<pallas_src>
import functools

import jax
import jax.numpy as jnp
from jax.experimental import pallas as pl
from jax.experimental.pallas import tpu as pltpu


# ----------------------------------------------------------------------------
# Generation-aware sizing helpers
# ----------------------------------------------------------------------------
@functools.lru_cache(maxsize=1)
def _tile_maxima():
    """(tm_max, tn_max, tk_max) per TPU generation."""
    kind = ""
    try:
        kind = jax.devices()[0].device_kind.lower()
    except Exception:
        pass
    if "v5" in kind:
        return (512, 256, 512)     # 1 vst slot: keep output tiles lane-dense
    if "v6" in kind:
        return (512, 512, 512)     # 128 MiB VMEM: big tiles
    if "v7" in kind:
        return (256, 256, 512)     # 64 MiB VMEM per TC: smaller output tiles
    return (256, 256, 512)


@functools.lru_cache(maxsize=1)
def _vmem_limit_bytes():
    """Request at most half of physical VMEM (v7x-safe); fall back to 32 MiB."""
    try:
        cap = int(pltpu.get_tpu_info().vmem_capacity_bytes)
        return int(min(cap // 2, 64 << 20))
    except Exception:
        return 32 << 20


def _round_up(x, m):
    return (x + m - 1) // m * m


def _pick_tile(padded, maximum, base):
    """Largest tile <= maximum (multiple of base) that divides `padded`."""
    t = min(maximum, padded)
    while padded % t:
        t -= base
    return t


def _pad2d(a, mp, np_):
    m, n = a.shape
    if m == mp and n == np_:
        return a
    return jnp.pad(a, ((0, mp - m), (0, np_ - n)))


# ----------------------------------------------------------------------------
# Pallas kernel: tiled  out = act(x @ w + b) [+ residual]
# ----------------------------------------------------------------------------
def _mm_kernel(x_ref, w_ref, b_ref, *rest, act, has_res):
    if has_res:
        r_ref, o_ref, acc_ref = rest
    else:
        o_ref, acc_ref = rest
        r_ref = None

    k = pl.program_id(2)

    @pl.when(k == 0)
    def _init():
        acc_ref[...] = jnp.zeros_like(acc_ref)

    acc_ref[...] += jnp.dot(x_ref[...], w_ref[...],
                            preferred_element_type=jnp.float32)

    @pl.when(k == pl.num_programs(2) - 1)
    def _finish():
        out = acc_ref[...] + b_ref[...]          # (1, tn) bias broadcasts
        if act == "relu":
            out = jnp.maximum(out, 0.0)
        elif act == "exp":
            out = jnp.exp(out)
        # activation first, then residual add (matches the PyTorch reference)
        if r_ref is not None:
            out = out + r_ref[...].astype(jnp.float32)
        o_ref[...] = out.astype(o_ref.dtype)


def matmul_bias_act(x, w, b, act="none", residual=None, out_dtype=jnp.bfloat16):
    """x: (M, K), w: (K, N), b: (N,) [, residual: (M, N)] -> (M, N) out_dtype."""
    M, K = x.shape
    K2, N = w.shape
    assert K == K2

    tm_max, tn_max, tk_max = _tile_maxima()
    Mp = _round_up(M, 8)
    Kp = _round_up(K, 128)
    Np = _round_up(N, 128)
    tm = _pick_tile(Mp, tm_max, 8)
    tk = _pick_tile(Kp, tk_max, 128)
    tn = _pick_tile(Np, tn_max, 128)

    xp = _pad2d(x.astype(jnp.bfloat16), Mp, Kp)
    wp = _pad2d(w.astype(jnp.bfloat16), Kp, Np)
    bp = jnp.pad(b.astype(jnp.float32), (0, Np - N)).reshape(1, Np)

    in_specs = [
        pl.BlockSpec((tm, tk), lambda i, j, k: (i, k)),
        pl.BlockSpec((tk, tn), lambda i, j, k: (k, j)),
        pl.BlockSpec((1, tn), lambda i, j, k: (0, j)),
    ]
    operands = [xp, wp, bp]
    has_res = residual is not None
    if has_res:
        rp = _pad2d(residual.astype(jnp.bfloat16), Mp, Np)
        in_specs.append(pl.BlockSpec((tm, tn), lambda i, j, k: (i, j)))
        operands.append(rp)

    kernel = functools.partial(_mm_kernel, act=act, has_res=has_res)
    out = pl.pallas_call(
        kernel,
        out_shape=jax.ShapeDtypeStruct((Mp, Np), out_dtype),
        grid=(Mp // tm, Np // tn, Kp // tk),
        in_specs=in_specs,
        out_specs=pl.BlockSpec((tm, tn), lambda i, j, k: (i, j)),
        scratch_shapes=[pltpu.VMEM((tm, tn), jnp.float32)],
        compiler_params=pltpu.CompilerParams(
            dimension_semantics=("parallel", "parallel", "arbitrary"),
            vmem_limit_bytes=_vmem_limit_bytes(),
        ),
    )(*operands)
    return out[:M, :N]


# ----------------------------------------------------------------------------
# Convolution = im2col / reshape (JAX glue) + fused Pallas matmul kernel
# ----------------------------------------------------------------------------
def _im2col(x, kh, kw, stride, pad):
    """x: (N, H, W, C) -> patches (N*Ho*Wo, kh*kw*C), plus output spatial."""
    n, h, w, c = x.shape
    if pad > 0:
        x = jnp.pad(x, ((0, 0), (pad, pad), (pad, pad), (0, 0)))
    ho = (h + 2 * pad - kh) // stride + 1
    wo = (w + 2 * pad - kw) // stride + 1
    cols = []
    for i in range(kh):
        for j in range(kw):
            cols.append(x[:, i:i + stride * ho:stride, j:j + stride * wo:stride, :])
    patches = jnp.concatenate(cols, axis=-1)           # (N, Ho, Wo, kh*kw*C)
    return patches.reshape(n * ho * wo, kh * kw * c), (n, ho, wo)


def conv2d(x, w, b, stride=1, pad=0, act="none", residual=None,
           out_dtype=jnp.bfloat16):
    """x: (N,H,W,Cin) NHWC, w: (KH,KW,Cin,Cout) HWIO, b: (Cout,)."""
    kh, kw, cin, cout = w.shape
    n, h, ww, _ = x.shape
    if kh == 1 and kw == 1 and stride == 1 and pad == 0:
        patches = x.reshape(n * h * ww, cin)
        ho, wo = h, ww
    else:
        patches, (n, ho, wo) = _im2col(x, kh, kw, stride, pad)
    res2d = residual.reshape(n * ho * wo, cout) if residual is not None else None
    out = matmul_bias_act(patches, w.reshape(kh * kw * cin, cout), b,
                          act=act, residual=res2d, out_dtype=out_dtype)
    return out.reshape(n, ho, wo, cout)


# ----------------------------------------------------------------------------
# Parameters (Xavier-uniform like ESAC_SCNet.init_weights, biases = 0)
# ----------------------------------------------------------------------------
def _xavier(key, kh, kw, cin, cout):
    fan_in = kh * kw * cin
    fan_out = kh * kw * cout
    limit = (6.0 / (fan_in + fan_out)) ** 0.5
    return jax.random.uniform(key, (kh, kw, cin, cout), jnp.float32,
                              -limit, limit)


_LAYER_DEFS = {
    "conv1": (3, 3, 3, 32),
    "conv2": (3, 3, 32, 64),
    "conv3": (3, 3, 64, 128),
    "conv4": (3, 3, 128, 256),
    "res1_conv1": (3, 3, 256, 256),
    "res1_conv2": (1, 1, 256, 256),
    "res1_conv3": (3, 3, 256, 256),
    "res2_conv1": (3, 3, 256, 512),
    "res2_conv2": (1, 1, 512, 512),
    "res2_conv3": (3, 3, 512, 512),
    "res2_skip": (1, 1, 256, 512),
    "res3_conv1": (3, 3, 512, 512),
    "res3_conv2": (1, 1, 512, 512),
    "res3_conv3": (3, 3, 512, 512),
    "fc1": (1, 1, 512, 512),
    "fc2": (1, 1, 512, 512),
    "fc3": (1, 1, 512, 3),
    "fc1_1": (1, 1, 512, 512),
    "fc2_1": (1, 1, 512, 512),
    "fc3_1": (1, 1, 512, 1),
}


def init_params(key):
    params = {}
    keys = jax.random.split(key, len(_LAYER_DEFS))
    for k, (name, (kh, kw, cin, cout)) in zip(keys, _LAYER_DEFS.items()):
        params[name] = {"w": _xavier(k, kh, kw, cin, cout),
                        "b": jnp.zeros((cout,), jnp.float32)}
    return params


def _block_diag(a, b):
    m1, n1 = a.shape
    m2, n2 = b.shape
    top = jnp.concatenate([a, jnp.zeros((m1, n2), a.dtype)], axis=1)
    bot = jnp.concatenate([jnp.zeros((m2, n1), b.dtype), b], axis=1)
    return jnp.concatenate([top, bot], axis=0)


# ----------------------------------------------------------------------------
# Forward pass (mirrors ESAC_SCNet.forward)
# ----------------------------------------------------------------------------
def esac_scnet_forward(inputs_nchw, params, mean, uncertainty=True):
    # NCHW -> NHWC, bf16 activations (f32 accumulation inside every kernel).
    x = jnp.transpose(inputs_nchw, (0, 2, 3, 1)).astype(jnp.bfloat16)

    def c(name, x, stride=1, pad=1, act="relu", residual=None):
        p = params[name]
        return conv2d(x, p["w"], p["b"], stride=stride, pad=pad, act=act,
                      residual=residual)

    # encoder
    x = c("conv1", x, stride=1, pad=1)
    x = c("conv2", x, stride=2, pad=1)
    x = c("conv3", x, stride=2, pad=1)
    res = c("conv4", x, stride=2, pad=1)

    # res block 1 (residual add fused into the last conv's epilogue)
    x = c("res1_conv1", res, stride=1, pad=1)
    x = c("res1_conv2", x, stride=1, pad=0)
    res = c("res1_conv3", x, stride=1, pad=1, residual=res)

    # res block 2 (skip 1x1 conv; its output fused as the residual)
    x = c("res2_conv1", res, stride=1, pad=1)
    x = c("res2_conv2", x, stride=1, pad=0)
    skip = c("res2_skip", res, stride=1, pad=0, act="none")
    res = c("res2_conv3", x, stride=1, pad=1, residual=skip)

    # res block 3
    x = c("res3_conv1", res, stride=1, pad=1)
    x = c("res3_conv2", x, stride=1, pad=0)
    res = c("res3_conv3", x, stride=1, pad=1, residual=res)

    bsz, ho, wo, cch = res.shape
    res_flat = res.reshape(bsz * ho * wo, cch)

    if uncertainty:
        # --- fused two-head MLP (1x1 convs) -> three lane-dense matmuls ---
        w1 = jnp.concatenate([params["fc1"]["w"].reshape(512, 512),
                              params["fc1_1"]["w"].reshape(512, 512)], axis=1)
        b1 = jnp.concatenate([params["fc1"]["b"], params["fc1_1"]["b"]])
        h1 = matmul_bias_act(res_flat, w1, b1, act="relu")            # (M,1024)

        w2 = _block_diag(params["fc2"]["w"].reshape(512, 512),
                         params["fc2_1"]["w"].reshape(512, 512))
        b2 = jnp.concatenate([params["fc2"]["b"], params["fc2_1"]["b"]])
        h2 = matmul_bias_act(h1, w2, b2, act="relu")                  # (M,1024)

        w3 = _block_diag(params["fc3"]["w"].reshape(512, 3),
                         params["fc3_1"]["w"].reshape(512, 1))
        b3 = jnp.concatenate([params["fc3"]["b"] + mean,              # mean fused
                              params["fc3_1"]["b"]])
        h3 = matmul_bias_act(h2, w3, b3, act="none",
                             out_dtype=jnp.float32)                   # (M, 4)

        sc = h3[:, :3].reshape(bsz, ho, wo, 3)
        un = jnp.exp(h3[:, 3:4]).reshape(bsz, ho, wo, 1)
        un = jnp.transpose(un, (0, 3, 1, 2))                          # NCHW
    else:
        sc = matmul_bias_act(res_flat, params["fc1"]["w"].reshape(512, 512),
                             params["fc1"]["b"], act="relu")
        sc = matmul_bias_act(sc, params["fc2"]["w"].reshape(512, 512),
                             params["fc2"]["b"], act="relu")
        sc = matmul_bias_act(sc, params["fc3"]["w"].reshape(512, 3),
                             params["fc3"]["b"] + mean, act="none",
                             out_dtype=jnp.float32)
        sc = sc.reshape(bsz, ho, wo, 3)
        un = None

    sc = jnp.transpose(sc, (0, 3, 1, 2))                              # NCHW
    return sc, un


# ----------------------------------------------------------------------------
# Main
# ----------------------------------------------------------------------------
if __name__ == "__main__":
    key = jax.random.PRNGKey(0)
    k_params, k_input = jax.random.split(key)

    params = init_params(k_params)
    mean = jnp.array([1.0, 2.0, 3.0], jnp.float32)   # scene-coordinate mean

    # Small input consistent with the module: NCHW, 3 channels, 16x16 spatial.
    B, C, H, W = 2, 3, 16, 16
    x = jax.random.normal(k_input, (B, C, H, W), jnp.float32)

    fwd = jax.jit(esac_scnet_forward, static_argnames=("uncertainty",))
    sc, un = fwd(x, params, mean, uncertainty=True)
    sc = jax.block_until_ready(sc)
    un = jax.block_until_ready(un)

    assert sc.shape == (B, 3, H // 8, W // 8), sc.shape
    assert un.shape == (B, 1, H // 8, W // 8), un.shape
    assert bool(jnp.all(jnp.isfinite(sc))) and bool(jnp.all(un > 0))
    print("KERNEL_OK")
</pallas_src>

<mosaic_0001>
module attributes {stable_mosaic.version = 11 : i64} {
  func.func @_mm_kernel(%arg0: i32, %arg1: i32, %arg2: i32, %arg3: memref<256x128xbf16, #tpu.memory_space<vmem>>, %arg4: memref<128x128xbf16, #tpu.memory_space<vmem>>, %arg5: memref<1x128xf32, #tpu.memory_space<vmem>>, %arg6: memref<256x128xbf16, #tpu.memory_space<vmem>>, %arg7: memref<256x128xf32, #tpu.memory_space<vmem>>) attributes {dimension_semantics = [#tpu.dimension_semantics<parallel>, #tpu.dimension_semantics<parallel>, #tpu.dimension_semantics<arbitrary>], iteration_bounds = array<i64: 2, 1, 1>, scalar_prefetch = 0 : i64, scratch_operands = 1 : i64, tpu.core_type = #tpu.core_type<tc>, window_params = [{transform_indices = @transform_0, window_bounds = array<i64: 256, 128>}, {transform_indices = @transform_1, window_bounds = array<i64: 128, 128>}, {transform_indices = @transform_2, window_bounds = array<i64: 1, 128>}, {transform_indices = @transform_3, window_bounds = array<i64: 256, 128>}]} {
    %c0_i32 = arith.constant 0 : i32
    %0 = arith.cmpi eq, %arg2, %c0_i32 : i32
    %1 = arith.extui %0 : i1 to i32
    %c0_i32_0 = arith.constant 0 : i32
    %2 = arith.cmpi ne, %1, %c0_i32_0 : i32
    scf.if %2 {
      %cst_10 = arith.constant 0.000000e+00 : f32
      %12 = vector.broadcast %cst_10 : f32 to vector<256x128xf32>
      %c0_11 = arith.constant 0 : index
      %c0_12 = arith.constant 0 : index
      %13 = vector.load %arg7[%c0_11, %c0_12] : memref<256x128xf32, #tpu.memory_space<vmem>>, vector<256x128xf32>
      tpu.vector_store %arg7[%c0_11, %c0_12], %12 {strides = array<i32>} : memref<256x128xf32, #tpu.memory_space<vmem>>, vector<256x128xf32>,
    } else {
    }
    %c0 = arith.constant 0 : index
    %c0_1 = arith.constant 0 : index
    %3 = vector.load %arg7[%c0, %c0_1] : memref<256x128xf32, #tpu.memory_space<vmem>>, vector<256x128xf32>
    %c0_2 = arith.constant 0 : index
    %c0_3 = arith.constant 0 : index
    %4 = vector.load %arg3[%c0_2, %c0_3] : memref<256x128xbf16, #tpu.memory_space<vmem>>, vector<256x128xbf16>
    %c0_4 = arith.constant 0 : index
    %c0_5 = arith.constant 0 : index
    %5 = vector.load %arg4[%c0_4, %c0_5] : memref<128x128xbf16, #tpu.memory_space<vmem>>, vector<128x128xbf16>
    %cst = arith.constant dense<0.000000e+00> : vector<256x128xf32>
    %6 = tpu.matmul %4, %5, %cst {dimension_numbers = #tpu.dot_dimension_numbers<[1], [0], [0], [1], [0, 0, 1, 1], [], []>} : vector<256x128xbf16>, vector<128x128xbf16>, vector<256x128xf32> -> vector<256x128xf32>
    %7 = arith.addf %3, %6 : vector<256x128xf32>
    %c0_6 = arith.constant 0 : index
    %c0_7 = arith.constant 0 : index
    %8 = vector.load %arg7[%c0_6, %c0_7] : memref<256x128xf32, #tpu.memory_space<vmem>>, vector<256x128xf32>
    tpu.vector_store %arg7[%c0_6, %c0_7], %7 {strides = array<i32>} : memref<256x128xf32, #tpu.memory_space<vmem>>, vector<256x128xf32>,
    %c0_i32_8 = arith.constant 0 : i32
    %9 = arith.cmpi eq, %arg2, %c0_i32_8 : i32
    %10 = arith.extui %9 : i1 to i32
    %c0_i32_9 = arith.constant 0 : i32
    %11 = arith.cmpi ne, %10, %c0_i32_9 : i32
    scf.if %11 {
      %c0_10 = arith.constant 0 : index
      %c0_11 = arith.constant 0 : index
      %12 = vector.load %arg7[%c0_10, %c0_11] : memref<256x128xf32, #tpu.memory_space<vmem>>, vector<256x128xf32>
      %c0_12 = arith.constant 0 : index
      %c0_13 = arith.constant 0 : index
      %13 = vector.load %arg5[%c0_12, %c0_13] : memref<1x128xf32, #tpu.memory_space<vmem>>, vector<1x128xf32>
      %14 = vector.broadcast %13 : vector<1x128xf32> to vector<256x128xf32>
      %15 = arith.addf %12, %14 : vector<256x128xf32>
      %cst_14 = arith.constant 0.000000e+00 : f32
      %16 = vector.broadcast %cst_14 : f32 to vector<256x128xf32>
      %17 = arith.maximumf %15, %16 : vector<256x128xf32>
      %18 = arith.truncf %17 : vector<256x128xf32> to vector<256x128xbf16>
      %c0_15 = arith.constant 0 : index
      %c0_16 = arith.constant 0 : index
      %19 = vector.load %arg6[%c0_15, %c0_16] : memref<256x128xbf16, #tpu.memory_space<vmem>>, vector<256x128xbf16>
      tpu.vector_store %arg6[%c0_15, %c0_16], %18 {strides = array<i32>} : memref<256x128xbf16, #tpu.memory_space<vmem>>, vector<256x128xbf16>,
    } else {
    }
    return
  }
  func.func @transform_0(%arg0: i32, %arg1: i32, %arg2: i32) -> (i32, i32) {
    %c0_i32 = arith.constant 0 : i32
    return %arg0, %arg2 : i32, i32
  }
  func.func @transform_1(%arg0: i32, %arg1: i32, %arg2: i32) -> (i32, i32) {
    %c0_i32 = arith.constant 0 : i32
    return %arg2, %arg1 : i32, i32
  }
  func.func @transform_2(%arg0: i32, %arg1: i32, %arg2: i32) -> (i32, i32) {
    %c0_i32 = arith.constant 0 : i32
    %c0_i32_0 = arith.constant 0 : i32
    return %c0_i32, %arg1 : i32, i32
  }
  func.func @transform_3(%arg0: i32, %arg1: i32, %arg2: i32) -> (i32, i32) {
    %c0_i32 = arith.constant 0 : i32
    return %arg0, %arg1 : i32, i32
  }
}

module attributes {stable_mosaic.version = 11 : i64} {
  func.func @_mm_kernel(%arg0: i32, %arg1: i32, %arg2: i32, %arg3: memref<128x384xbf16, #tpu.memory_space<vmem>>, %arg4: memref<384x128xbf16, #tpu.memory_space<vmem>>, %arg5: memref<1x128xf32, #tpu.memory_space<vmem>>, %arg6: memref<128x128xbf16, #tpu.memory_space<vmem>>, %arg7: memref<128x128xf32, #tpu.memory_space<vmem>>) attributes {dimension_semantics = [#tpu.dimension_semantics<parallel>, #tpu.dimension_semantics<parallel>, #tpu.dimension_semantics<arbitrary>], iteration_bounds = array<i64: 1, 1, 1>, scalar_prefetch = 0 : i64, scratch_operands = 1 : i64, tpu.core_type = #tpu.core_type<tc>, window_params = [{transform_indices = @transform_0, window_bounds = array<i64: 128, 384>}, {transform_indices = @transform_1, window_bounds = array<i64: 384, 128>}, {transform_indices = @transform_2, window_bounds = array<i64: 1, 128>}, {transform_indices = @transform_3, window_bounds = array<i64: 128, 128>}]} {
    %c0_i32 = arith.constant 0 : i32
    %0 = arith.cmpi eq, %arg2, %c0_i32 : i32
    %1 = arith.extui %0 : i1 to i32
    %c0_i32_0 = arith.constant 0 : i32
    %2 = arith.cmpi ne, %1, %c0_i32_0 : i32
    scf.if %2 {
      %cst_10 = arith.constant 0.000000e+00 : f32
      %12 = vector.broadcast %cst_10 : f32 to vector<128x128xf32>
      %c0_11 = arith.constant 0 : index
      %c0_12 = arith.constant 0 : index
      %13 = vector.load %arg7[%c0_11, %c0_12] : memref<128x128xf32, #tpu.memory_space<vmem>>, vector<128x128xf32>
      tpu.vector_store %arg7[%c0_11, %c0_12], %12 {strides = array<i32>} : memref<128x128xf32, #tpu.memory_space<vmem>>, vector<128x128xf32>,
    } else {
    }
    %c0 = arith.constant 0 : index
    %c0_1 = arith.constant 0 : index
    %3 = vector.load %arg7[%c0, %c0_1] : memref<128x128xf32, #tpu.memory_space<vmem>>, vector<128x128xf32>
    %c0_2 = arith.constant 0 : index
    %c0_3 = arith.constant 0 : index
    %4 = vector.load %arg3[%c0_2, %c0_3] : memref<128x384xbf16, #tpu.memory_space<vmem>>, vector<128x384xbf16>
    %c0_4 = arith.constant 0 : index
    %c0_5 = arith.constant 0 : index
    %5 = vector.load %arg4[%c0_4, %c0_5] : memref<384x128xbf16, #tpu.memory_space<vmem>>, vector<384x128xbf16>
    %cst = arith.constant dense<0.000000e+00> : vector<128x128xf32>
    %6 = tpu.matmul %4, %5, %cst {dimension_numbers = #tpu.dot_dimension_numbers<[1], [0], [0], [1], [0, 0, 1, 1], [], []>} : vector<128x384xbf16>, vector<384x128xbf16>, vector<128x128xf32> -> vector<128x128xf32>
    %7 = arith.addf %3, %6 : vector<128x128xf32>
    %c0_6 = arith.constant 0 : index
    %c0_7 = arith.constant 0 : index
    %8 = vector.load %arg7[%c0_6, %c0_7] : memref<128x128xf32, #tpu.memory_space<vmem>>, vector<128x128xf32>
    tpu.vector_store %arg7[%c0_6, %c0_7], %7 {strides = array<i32>} : memref<128x128xf32, #tpu.memory_space<vmem>>, vector<128x128xf32>,
    %c0_i32_8 = arith.constant 0 : i32
    %9 = arith.cmpi eq, %arg2, %c0_i32_8 : i32
    %10 = arith.extui %9 : i1 to i32
    %c0_i32_9 = arith.constant 0 : i32
    %11 = arith.cmpi ne, %10, %c0_i32_9 : i32
    scf.if %11 {
      %c0_10 = arith.constant 0 : index
      %c0_11 = arith.constant 0 : index
      %12 = vector.load %arg7[%c0_10, %c0_11] : memref<128x128xf32, #tpu.memory_space<vmem>>, vector<128x128xf32>
      %c0_12 = arith.constant 0 : index
      %c0_13 = arith.constant 0 : index
      %13 = vector.load %arg5[%c0_12, %c0_13] : memref<1x128xf32, #tpu.memory_space<vmem>>, vector<1x128xf32>
      %14 = vector.broadcast %13 : vector<1x128xf32> to vector<128x128xf32>
      %15 = arith.addf %12, %14 : vector<128x128xf32>
      %cst_14 = arith.constant 0.000000e+00 : f32
      %16 = vector.broadcast %cst_14 : f32 to vector<128x128xf32>
      %17 = arith.maximumf %15, %16 : vector<128x128xf32>
      %18 = arith.truncf %17 : vector<128x128xf32> to vector<128x128xbf16>
      %c0_15 = arith.constant 0 : index
      %c0_16 = arith.constant 0 : index
      %19 = vector.load %arg6[%c0_15, %c0_16] : memref<128x128xbf16, #tpu.memory_space<vmem>>, vector<128x128xbf16>
      tpu.vector_store %arg6[%c0_15, %c0_16], %18 {strides = array<i32>} : memref<128x128xbf16, #tpu.memory_space<vmem>>, vector<128x128xbf16>,
    } else {
    }
    return
  }
  func.func @transform_0(%arg0: i32, %arg1: i32, %arg2: i32) -> (i32, i32) {
    %c0_i32 = arith.constant 0 : i32
    return %arg0, %arg2 : i32, i32
  }
  func.func @transform_1(%arg0: i32, %arg1: i32, %arg2: i32) -> (i32, i32) {
    %c0_i32 = arith.constant 0 : i32
    return %arg2, %arg1 : i32, i32
  }
  func.func @transform_2(%arg0: i32, %arg1: i32, %arg2: i32) -> (i32, i32) {
    %c0_i32 = arith.constant 0 : i32
    %c0_i32_0 = arith.constant 0 : i32
    return %c0_i32, %arg1 : i32, i32
  }
  func.func @transform_3(%arg0: i32, %arg1: i32, %arg2: i32) -> (i32, i32) {
    %c0_i32 = arith.constant 0 : i32
    return %arg0, %arg1 : i32, i32
  }
}

module attributes {stable_mosaic.version = 11 : i64} {
  func.func @_mm_kernel(%arg0: i32, %arg1: i32, %arg2: i32, %arg3: memref<32x128xbf16, #tpu.memory_space<vmem>>, %arg4: memref<128x128xbf16, #tpu.memory_space<vmem>>, %arg5: memref<1x128xf32, #tpu.memory_space<vmem>>, %arg6: memref<32x128xbf16, #tpu.memory_space<vmem>>, %arg7: memref<32x128xf32, #tpu.memory_space<vmem>>) attributes {dimension_semantics = [#tpu.dimension_semantics<parallel>, #tpu.dimension_semantics<parallel>, #tpu.dimension_semantics<arbitrary>], iteration_bounds = array<i64: 1, 1, 5>, scalar_prefetch = 0 : i64, scratch_operands = 1 : i64, tpu.core_type = #tpu.core_type<tc>, window_params = [{transform_indices = @transform_0, window_bounds = array<i64: 32, 128>}, {transform_indices = @transform_1, window_bounds = array<i64: 128, 128>}, {transform_indices = @transform_2, window_bounds = array<i64: 1, 128>}, {transform_indices = @transform_3, window_bounds = array<i64: 32, 128>}]} {
    %c0_i32 = arith.constant 0 : i32
    %0 = arith.cmpi eq, %arg2, %c0_i32 : i32
    %1 = arith.extui %0 : i1 to i32
    %c0_i32_0 = arith.constant 0 : i32
    %2 = arith.cmpi ne, %1, %c0_i32_0 : i32
    scf.if %2 {
      %cst_9 = arith.constant 0.000000e+00 : f32
      %12 = vector.broadcast %cst_9 : f32 to vector<32x128xf32>
      %c0_10 = arith.constant 0 : index
      %c0_11 = arith.constant 0 : index
      %13 = vector.load %arg7[%c0_10, %c0_11] : memref<32x128xf32, #tpu.memory_space<vmem>>, vector<32x128xf32>
      tpu.vector_store %arg7[%c0_10, %c0_11], %12 {strides = array<i32>} : memref<32x128xf32, #tpu.memory_space<vmem>>, vector<32x128xf32>,
    } else {
    }
    %c0 = arith.constant 0 : index
    %c0_1 = arith.constant 0 : index
    %3 = vector.load %arg7[%c0, %c0_1] : memref<32x128xf32, #tpu.memory_space<vmem>>, vector<32x128xf32>
    %c0_2 = arith.constant 0 : index
    %c0_3 = arith.constant 0 : index
    %4 = vector.load %arg3[%c0_2, %c0_3] : memref<32x128xbf16, #tpu.memory_space<vmem>>, vector<32x128xbf16>
    %c0_4 = arith.constant 0 : index
    %c0_5 = arith.constant 0 : index
    %5 = vector.load %arg4[%c0_4, %c0_5] : memref<128x128xbf16, #tpu.memory_space<vmem>>, vector<128x128xbf16>
    %cst = arith.constant dense<0.000000e+00> : vector<32x128xf32>
    %6 = tpu.matmul %4, %5, %cst {dimension_numbers = #tpu.dot_dimension_numbers<[1], [0], [0], [1], [0, 0, 1, 1], [], []>} : vector<32x128xbf16>, vector<128x128xbf16>, vector<32x128xf32> -> vector<32x128xf32>
    %7 = arith.addf %3, %6 : vector<32x128xf32>
    %c0_6 = arith.constant 0 : index
    %c0_7 = arith.constant 0 : index
    %8 = vector.load %arg7[%c0_6, %c0_7] : memref<32x128xf32, #tpu.memory_space<vmem>>, vector<32x128xf32>
    tpu.vector_store %arg7[%c0_6, %c0_7], %7 {strides = array<i32>} : memref<32x128xf32, #tpu.memory_space<vmem>>, vector<32x128xf32>,
    %c4_i32 = arith.constant 4 : i32
    %9 = arith.cmpi eq, %arg2, %c4_i32 : i32
    %10 = arith.extui %9 : i1 to i32
    %c0_i32_8 = arith.constant 0 : i32
    %11 = arith.cmpi ne, %10, %c0_i32_8 : i32
    scf.if %11 {
      %c0_9 = arith.constant 0 : index
      %c0_10 = arith.constant 0 : index
      %12 = vector.load %arg7[%c0_9, %c0_10] : memref<32x128xf32, #tpu.memory_space<vmem>>, vector<32x128xf32>
      %c0_11 = arith.constant 0 : index
      %c0_12 = arith.constant 0 : index
      %13 = vector.load %arg5[%c0_11, %c0_12] : memref<1x128xf32, #tpu.memory_space<vmem>>, vector<1x128xf32>
      %14 = vector.broadcast %13 : vector<1x128xf32> to vector<32x128xf32>
      %15 = arith.addf %12, %14 : vector<32x128xf32>
      %cst_13 = arith.constant 0.000000e+00 : f32
      %16 = vector.broadcast %cst_13 : f32 to vector<32x128xf32>
      %17 = arith.maximumf %15, %16 : vector<32x128xf32>
      %18 = arith.truncf %17 : vector<32x128xf32> to vector<32x128xbf16>
      %c0_14 = arith.constant 0 : index
      %c0_15 = arith.constant 0 : index
      %19 = vector.load %arg6[%c0_14, %c0_15] : memref<32x128xbf16, #tpu.memory_space<vmem>>, vector<32x128xbf16>
      tpu.vector_store %arg6[%c0_14, %c0_15], %18 {strides = array<i32>} : memref<32x128xbf16, #tpu.memory_space<vmem>>, vector<32x128xbf16>,
    } else {
    }
    return
  }
  func.func @transform_0(%arg0: i32, %arg1: i32, %arg2: i32) -> (i32, i32) {
    %c0_i32 = arith.constant 0 : i32
    return %arg0, %arg2 : i32, i32
  }
  func.func @transform_1(%arg0: i32, %arg1: i32, %arg2: i32) -> (i32, i32) {
    %c0_i32 = arith.constant 0 : i32
    return %arg2, %arg1 : i32, i32
  }
  func.func @transform_2(%arg0: i32, %arg1: i32, %arg2: i32) -> (i32, i32) {
    %c0_i32 = arith.constant 0 : i32
    %c0_i32_0 = arith.constant 0 : i32
    return %c0_i32, %arg1 : i32, i32
  }
  func.func @transform_3(%arg0: i32, %arg1: i32, %arg2: i32) -> (i32, i32) {
    %c0_i32 = arith.constant 0 : i32
    return %arg0, %arg1 : i32, i32
  }
}

module attributes {stable_mosaic.version = 11 : i64} {
  func.func @_mm_kernel(%arg0: i32, %arg1: i32, %arg2: i32, %arg3: memref<8x384xbf16, #tpu.memory_space<vmem>>, %arg4: memref<384x256xbf16, #tpu.memory_space<vmem>>, %arg5: memref<1x256xf32, #tpu.memory_space<vmem>>, %arg6: memref<8x256xbf16, #tpu.memory_space<vmem>>, %arg7: memref<8x256xf32, #tpu.memory_space<vmem>>) attributes {dimension_semantics = [#tpu.dimension_semantics<parallel>, #tpu.dimension_semantics<parallel>, #tpu.dimension_semantics<arbitrary>], iteration_bounds = array<i64: 1, 1, 3>, scalar_prefetch = 0 : i64, scratch_operands = 1 : i64, tpu.core_type = #tpu.core_type<tc>, window_params = [{transform_indices = @transform_0, window_bounds = array<i64: 8, 384>}, {transform_indices = @transform_1, window_bounds = array<i64: 384, 256>}, {transform_indices = @transform_2, window_bounds = array<i64: 1, 256>}, {transform_indices = @transform_3, window_bounds = array<i64: 8, 256>}]} {
    %c0_i32 = arith.constant 0 : i32
    %0 = arith.cmpi eq, %arg2, %c0_i32 : i32
    %1 = arith.extui %0 : i1 to i32
    %c0_i32_0 = arith.constant 0 : i32
    %2 = arith.cmpi ne, %1, %c0_i32_0 : i32
    scf.if %2 {
      %cst_9 = arith.constant 0.000000e+00 : f32
      %12 = vector.broadcast %cst_9 : f32 to vector<8x256xf32>
      %c0_10 = arith.constant 0 : index
      %c0_11 = arith.constant 0 : index
      %13 = vector.load %arg7[%c0_10, %c0_11] : memref<8x256xf32, #tpu.memory_space<vmem>>, vector<8x256xf32>
      tpu.vector_store %arg7[%c0_10, %c0_11], %12 {strides = array<i32>} : memref<8x256xf32, #tpu.memory_space<vmem>>, vector<8x256xf32>,
    } else {
    }
    %c0 = arith.constant 0 : index
    %c0_1 = arith.constant 0 : index
    %3 = vector.load %arg7[%c0, %c0_1] : memref<8x256xf32, #tpu.memory_space<vmem>>, vector<8x256xf32>
    %c0_2 = arith.constant 0 : index
    %c0_3 = arith.constant 0 : index
    %4 = vector.load %arg3[%c0_2, %c0_3] : memref<8x384xbf16, #tpu.memory_space<vmem>>, vector<8x384xbf16>
    %c0_4 = arith.constant 0 : index
    %c0_5 = arith.constant 0 : index
    %5 = vector.load %arg4[%c0_4, %c0_5] : memref<384x256xbf16, #tpu.memory_space<vmem>>, vector<384x256xbf16>
    %cst = arith.constant dense<0.000000e+00> : vector<8x256xf32>
    %6 = tpu.matmul %4, %5, %cst {dimension_numbers = #tpu.dot_dimension_numbers<[1], [0], [0], [1], [0, 0, 1, 1], [], []>} : vector<8x384xbf16>, vector<384x256xbf16>, vector<8x256xf32> -> vector<8x256xf32>
    %7 = arith.addf %3, %6 : vector<8x256xf32>
    %c0_6 = arith.constant 0 : index
    %c0_7 = arith.constant 0 : index
    %8 = vector.load %arg7[%c0_6, %c0_7] : memref<8x256xf32, #tpu.memory_space<vmem>>, vector<8x256xf32>
    tpu.vector_store %arg7[%c0_6, %c0_7], %7 {strides = array<i32>} : memref<8x256xf32, #tpu.memory_space<vmem>>, vector<8x256xf32>,
    %c2_i32 = arith.constant 2 : i32
    %9 = arith.cmpi eq, %arg2, %c2_i32 : i32
    %10 = arith.extui %9 : i1 to i32
    %c0_i32_8 = arith.constant 0 : i32
    %11 = arith.cmpi ne, %10, %c0_i32_8 : i32
    scf.if %11 {
      %c0_9 = arith.constant 0 : index
      %c0_10 = arith.constant 0 : index
      %12 = vector.load %arg7[%c0_9, %c0_10] : memref<8x256xf32, #tpu.memory_space<vmem>>, vector<8x256xf32>
      %c0_11 = arith.constant 0 : index
      %c0_12 = arith.constant 0 : index
      %13 = vector.load %arg5[%c0_11, %c0_12] : memref<1x256xf32, #tpu.memory_space<vmem>>, vector<1x256xf32>
      %14 = vector.broadcast %13 : vector<1x256xf32> to vector<8x256xf32>
      %15 = arith.addf %12, %14 : vector<8x256xf32>
      %cst_13 = arith.constant 0.000000e+00 : f32
      %16 = vector.broadcast %cst_13 : f32 to vector<8x256xf32>
      %17 = arith.maximumf %15, %16 : vector<8x256xf32>
      %18 = arith.truncf %17 : vector<8x256xf32> to vector<8x256xbf16>
      %c0_14 = arith.constant 0 : index
      %c0_15 = arith.constant 0 : index
      %19 = vector.load %arg6[%c0_14, %c0_15] : memref<8x256xbf16, #tpu.memory_space<vmem>>, vector<8x256xbf16>
      tpu.vector_store %arg6[%c0_14, %c0_15], %18 {strides = array<i32>} : memref<8x256xbf16, #tpu.memory_space<vmem>>, vector<8x256xbf16>,
    } else {
    }
    return
  }
  func.func @transform_0(%arg0: i32, %arg1: i32, %arg2: i32) -> (i32, i32) {
    %c0_i32 = arith.constant 0 : i32
    return %arg0, %arg2 : i32, i32
  }
  func.func @transform_1(%arg0: i32, %arg1: i32, %arg2: i32) -> (i32, i32) {
    %c0_i32 = arith.constant 0 : i32
    return %arg2, %arg1 : i32, i32
  }
  func.func @transform_2(%arg0: i32, %arg1: i32, %arg2: i32) -> (i32, i32) {
    %c0_i32 = arith.constant 0 : i32
    %c0_i32_0 = arith.constant 0 : i32
    return %c0_i32, %arg1 : i32, i32
  }
  func.func @transform_3(%arg0: i32, %arg1: i32, %arg2: i32) -> (i32, i32) {
    %c0_i32 = arith.constant 0 : i32
    return %arg0, %arg1 : i32, i32
  }
}

module attributes {stable_mosaic.version = 11 : i64} {
  func.func @_mm_kernel(%arg0: i32, %arg1: i32, %arg2: i32, %arg3: memref<8x384xbf16, #tpu.memory_space<vmem>>, %arg4: memref<384x256xbf16, #tpu.memory_space<vmem>>, %arg5: memref<1x256xf32, #tpu.memory_space<vmem>>, %arg6: memref<8x256xbf16, #tpu.memory_space<vmem>>, %arg7: memref<8x256xf32, #tpu.memory_space<vmem>>) attributes {dimension_semantics = [#tpu.dimension_semantics<parallel>, #tpu.dimension_semantics<parallel>, #tpu.dimension_semantics<arbitrary>], iteration_bounds = array<i64: 1, 1, 6>, scalar_prefetch = 0 : i64, scratch_operands = 1 : i64, tpu.core_type = #tpu.core_type<tc>, window_params = [{transform_indices = @transform_0, window_bounds = array<i64: 8, 384>}, {transform_indices = @transform_1, window_bounds = array<i64: 384, 256>}, {transform_indices = @transform_2, window_bounds = array<i64: 1, 256>}, {transform_indices = @transform_3, window_bounds = array<i64: 8, 256>}]} {
    %c0_i32 = arith.constant 0 : i32
    %0 = arith.cmpi eq, %arg2, %c0_i32 : i32
    %1 = arith.extui %0 : i1 to i32
    %c0_i32_0 = arith.constant 0 : i32
    %2 = arith.cmpi ne, %1, %c0_i32_0 : i32
    scf.if %2 {
      %cst_9 = arith.constant 0.000000e+00 : f32
      %12 = vector.broadcast %cst_9 : f32 to vector<8x256xf32>
      %c0_10 = arith.constant 0 : index
      %c0_11 = arith.constant 0 : index
      %13 = vector.load %arg7[%c0_10, %c0_11] : memref<8x256xf32, #tpu.memory_space<vmem>>, vector<8x256xf32>
      tpu.vector_store %arg7[%c0_10, %c0_11], %12 {strides = array<i32>} : memref<8x256xf32, #tpu.memory_space<vmem>>, vector<8x256xf32>,
    } else {
    }
    %c0 = arith.constant 0 : index
    %c0_1 = arith.constant 0 : index
    %3 = vector.load %arg7[%c0, %c0_1] : memref<8x256xf32, #tpu.memory_space<vmem>>, vector<8x256xf32>
    %c0_2 = arith.constant 0 : index
    %c0_3 = arith.constant 0 : index
    %4 = vector.load %arg3[%c0_2, %c0_3] : memref<8x384xbf16, #tpu.memory_space<vmem>>, vector<8x384xbf16>
    %c0_4 = arith.constant 0 : index
    %c0_5 = arith.constant 0 : index
    %5 = vector.load %arg4[%c0_4, %c0_5] : memref<384x256xbf16, #tpu.memory_space<vmem>>, vector<384x256xbf16>
    %cst = arith.constant dense<0.000000e+00> : vector<8x256xf32>
    %6 = tpu.matmul %4, %5, %cst {dimension_numbers = #tpu.dot_dimension_numbers<[1], [0], [0], [1], [0, 0, 1, 1], [], []>} : vector<8x384xbf16>, vector<384x256xbf16>, vector<8x256xf32> -> vector<8x256xf32>
    %7 = arith.addf %3, %6 : vector<8x256xf32>
    %c0_6 = arith.constant 0 : index
    %c0_7 = arith.constant 0 : index
    %8 = vector.load %arg7[%c0_6, %c0_7] : memref<8x256xf32, #tpu.memory_space<vmem>>, vector<8x256xf32>
    tpu.vector_store %arg7[%c0_6, %c0_7], %7 {strides = array<i32>} : memref<8x256xf32, #tpu.memory_space<vmem>>, vector<8x256xf32>,
    %c5_i32 = arith.constant 5 : i32
    %9 = arith.cmpi eq, %arg2, %c5_i32 : i32
    %10 = arith.extui %9 : i1 to i32
    %c0_i32_8 = arith.constant 0 : i32
    %11 = arith.cmpi ne, %10, %c0_i32_8 : i32
    scf.if %11 {
      %c0_9 = arith.constant 0 : index
      %c0_10 = arith.constant 0 : index
      %12 = vector.load %arg7[%c0_9, %c0_10] : memref<8x256xf32, #tpu.memory_space<vmem>>, vector<8x256xf32>
      %c0_11 = arith.constant 0 : index
      %c0_12 = arith.constant 0 : index
      %13 = vector.load %arg5[%c0_11, %c0_12] : memref<1x256xf32, #tpu.memory_space<vmem>>, vector<1x256xf32>
      %14 = vector.broadcast %13 : vector<1x256xf32> to vector<8x256xf32>
      %15 = arith.addf %12, %14 : vector<8x256xf32>
      %cst_13 = arith.constant 0.000000e+00 : f32
      %16 = vector.broadcast %cst_13 : f32 to vector<8x256xf32>
      %17 = arith.maximumf %15, %16 : vector<8x256xf32>
      %18 = arith.truncf %17 : vector<8x256xf32> to vector<8x256xbf16>
      %c0_14 = arith.constant 0 : index
      %c0_15 = arith.constant 0 : index
      %19 = vector.load %arg6[%c0_14, %c0_15] : memref<8x256xbf16, #tpu.memory_space<vmem>>, vector<8x256xbf16>
      tpu.vector_store %arg6[%c0_14, %c0_15], %18 {strides = array<i32>} : memref<8x256xbf16, #tpu.memory_space<vmem>>, vector<8x256xbf16>,
    } else {
    }
    return
  }
  func.func @transform_0(%arg0: i32, %arg1: i32, %arg2: i32) -> (i32, i32) {
    %c0_i32 = arith.constant 0 : i32
    return %arg0, %arg2 : i32, i32
  }
  func.func @transform_1(%arg0: i32, %arg1: i32, %arg2: i32) -> (i32, i32) {
    %c0_i32 = arith.constant 0 : i32
    return %arg2, %arg1 : i32, i32
  }
  func.func @transform_2(%arg0: i32, %arg1: i32, %arg2: i32) -> (i32, i32) {
    %c0_i32 = arith.constant 0 : i32
    %c0_i32_0 = arith.constant 0 : i32
    return %c0_i32, %arg1 : i32, i32
  }
  func.func @transform_3(%arg0: i32, %arg1: i32, %arg2: i32) -> (i32, i32) {
    %c0_i32 = arith.constant 0 : i32
    return %arg0, %arg1 : i32, i32
  }
}

module attributes {stable_mosaic.version = 11 : i64} {
  func.func @_mm_kernel(%arg0: i32, %arg1: i32, %arg2: i32, %arg3: memref<8x384xbf16, #tpu.memory_space<vmem>>, %arg4: memref<384x256xbf16, #tpu.memory_space<vmem>>, %arg5: memref<1x256xf32, #tpu.memory_space<vmem>>, %arg6: memref<8x256xbf16, #tpu.memory_space<vmem>>, %arg7: memref<8x256xbf16, #tpu.memory_space<vmem>>, %arg8: memref<8x256xf32, #tpu.memory_space<vmem>>) attributes {dimension_semantics = [#tpu.dimension_semantics<parallel>, #tpu.dimension_semantics<parallel>, #tpu.dimension_semantics<arbitrary>], iteration_bounds = array<i64: 1, 1, 6>, scalar_prefetch = 0 : i64, scratch_operands = 1 : i64, tpu.core_type = #tpu.core_type<tc>, window_params = [{transform_indices = @transform_0, window_bounds = array<i64: 8, 384>}, {transform_indices = @transform_1, window_bounds = array<i64: 384, 256>}, {transform_indices = @transform_2, window_bounds = array<i64: 1, 256>}, {transform_indices = @transform_3, window_bounds = array<i64: 8, 256>}, {transform_indices = @transform_4, window_bounds = array<i64: 8, 256>}]} {
    %c0_i32 = arith.constant 0 : i32
    %0 = arith.cmpi eq, %arg2, %c0_i32 : i32
    %1 = arith.extui %0 : i1 to i32
    %c0_i32_0 = arith.constant 0 : i32
    %2 = arith.cmpi ne, %1, %c0_i32_0 : i32
    scf.if %2 {
      %cst_9 = arith.constant 0.000000e+00 : f32
      %12 = vector.broadcast %cst_9 : f32 to vector<8x256xf32>
      %c0_10 = arith.constant 0 : index
      %c0_11 = arith.constant 0 : index
      %13 = vector.load %arg8[%c0_10, %c0_11] : memref<8x256xf32, #tpu.memory_space<vmem>>, vector<8x256xf32>
      tpu.vector_store %arg8[%c0_10, %c0_11], %12 {strides = array<i32>} : memref<8x256xf32, #tpu.memory_space<vmem>>, vector<8x256xf32>,
    } else {
    }
    %c0 = arith.constant 0 : index
    %c0_1 = arith.constant 0 : index
    %3 = vector.load %arg8[%c0, %c0_1] : memref<8x256xf32, #tpu.memory_space<vmem>>, vector<8x256xf32>
    %c0_2 = arith.constant 0 : index
    %c0_3 = arith.constant 0 : index
    %4 = vector.load %arg3[%c0_2, %c0_3] : memref<8x384xbf16, #tpu.memory_space<vmem>>, vector<8x384xbf16>
    %c0_4 = arith.constant 0 : index
    %c0_5 = arith.constant 0 : index
    %5 = vector.load %arg4[%c0_4, %c0_5] : memref<384x256xbf16, #tpu.memory_space<vmem>>, vector<384x256xbf16>
    %cst = arith.constant dense<0.000000e+00> : vector<8x256xf32>
    %6 = tpu.matmul %4, %5, %cst {dimension_numbers = #tpu.dot_dimension_numbers<[1], [0], [0], [1], [0, 0, 1, 1], [], []>} : vector<8x384xbf16>, vector<384x256xbf16>, vector<8x256xf32> -> vector<8x256xf32>
    %7 = arith.addf %3, %6 : vector<8x256xf32>
    %c0_6 = arith.constant 0 : index
    %c0_7 = arith.constant 0 : index
    %8 = vector.load %arg8[%c0_6, %c0_7] : memref<8x256xf32, #tpu.memory_space<vmem>>, vector<8x256xf32>
    tpu.vector_store %arg8[%c0_6, %c0_7], %7 {strides = array<i32>} : memref<8x256xf32, #tpu.memory_space<vmem>>, vector<8x256xf32>,
    %c5_i32 = arith.constant 5 : i32
    %9 = arith.cmpi eq, %arg2, %c5_i32 : i32
    %10 = arith.extui %9 : i1 to i32
    %c0_i32_8 = arith.constant 0 : i32
    %11 = arith.cmpi ne, %10, %c0_i32_8 : i32
    scf.if %11 {
      %c0_9 = arith.constant 0 : index
      %c0_10 = arith.constant 0 : index
      %12 = vector.load %arg8[%c0_9, %c0_10] : memref<8x256xf32, #tpu.memory_space<vmem>>, vector<8x256xf32>
      %c0_11 = arith.constant 0 : index
      %c0_12 = arith.constant 0 : index
      %13 = vector.load %arg5[%c0_11, %c0_12] : memref<1x256xf32, #tpu.memory_space<vmem>>, vector<1x256xf32>
      %14 = vector.broadcast %13 : vector<1x256xf32> to vector<8x256xf32>
      %15 = arith.addf %12, %14 : vector<8x256xf32>
      %cst_13 = arith.constant 0.000000e+00 : f32
      %16 = vector.broadcast %cst_13 : f32 to vector<8x256xf32>
      %17 = arith.maximumf %15, %16 : vector<8x256xf32>
      %c0_14 = arith.constant 0 : index
      %c0_15 = arith.constant 0 : index
      %18 = vector.load %arg6[%c0_14, %c0_15] : memref<8x256xbf16, #tpu.memory_space<vmem>>, vector<8x256xbf16>
      %19 = arith.extf %18 : vector<8x256xbf16> to vector<8x256xf32>
      %20 = arith.addf %17, %19 : vector<8x256xf32>
      %21 = arith.truncf %20 : vector<8x256xf32> to vector<8x256xbf16>
      %c0_16 = arith.constant 0 : index
      %c0_17 = arith.constant 0 : index
      %22 = vector.load %arg7[%c0_16, %c0_17] : memref<8x256xbf16, #tpu.memory_space<vmem>>, vector<8x256xbf16>
      tpu.vector_store %arg7[%c0_16, %c0_17], %21 {strides = array<i32>} : memref<8x256xbf16, #tpu.memory_space<vmem>>, vector<8x256xbf16>,
    } else {
    }
    return
  }
  func.func @transform_0(%arg0: i32, %arg1: i32, %arg2: i32) -> (i32, i32) {
    %c0_i32 = arith.constant 0 : i32
    return %arg0, %arg2 : i32, i32
  }
  func.func @transform_1(%arg0: i32, %arg1: i32, %arg2: i32) -> (i32, i32) {
    %c0_i32 = arith.constant 0 : i32
    return %arg2, %arg1 : i32, i32
  }
  func.func @transform_2(%arg0: i32, %arg1: i32, %arg2: i32) -> (i32, i32) {
    %c0_i32 = arith.constant 0 : i32
    %c0_i32_0 = arith.constant 0 : i32
    return %c0_i32, %arg1 : i32, i32
  }
  func.func @transform_3(%arg0: i32, %arg1: i32, %arg2: i32) -> (i32, i32) {
    %c0_i32 = arith.constant 0 : i32
    return %arg0, %arg1 : i32, i32
  }
  func.func @transform_4(%arg0: i32, %arg1: i32, %arg2: i32) -> (i32, i32) {
    %c0_i32 = arith.constant 0 : i32
    return %arg0, %arg1 : i32, i32
  }
}

module attributes {stable_mosaic.version = 11 : i64} {
  func.func @_mm_kernel(%arg0: i32, %arg1: i32, %arg2: i32, %arg3: memref<8x256xbf16, #tpu.memory_space<vmem>>, %arg4: memref<256x256xbf16, #tpu.memory_space<vmem>>, %arg5: memref<1x256xf32, #tpu.memory_space<vmem>>, %arg6: memref<8x256xbf16, #tpu.memory_space<vmem>>, %arg7: memref<8x256xf32, #tpu.memory_space<vmem>>) attributes {dimension_semantics = [#tpu.dimension_semantics<parallel>, #tpu.dimension_semantics<parallel>, #tpu.dimension_semantics<arbitrary>], iteration_bounds = array<i64: 1, 1, 1>, scalar_prefetch = 0 : i64, scratch_operands = 1 : i64, tpu.core_type = #tpu.core_type<tc>, window_params = [{transform_indices = @transform_0, window_bounds = array<i64: 8, 256>}, {transform_indices = @transform_1, window_bounds = array<i64: 256, 256>}, {transform_indices = @transform_2, window_bounds = array<i64: 1, 256>}, {transform_indices = @transform_3, window_bounds = array<i64: 8, 256>}]} {
    %c0_i32 = arith.constant 0 : i32
    %0 = arith.cmpi eq, %arg2, %c0_i32 : i32
    %1 = arith.extui %0 : i1 to i32
    %c0_i32_0 = arith.constant 0 : i32
    %2 = arith.cmpi ne, %1, %c0_i32_0 : i32
    scf.if %2 {
      %cst_10 = arith.constant 0.000000e+00 : f32
      %12 = vector.broadcast %cst_10 : f32 to vector<8x256xf32>
      %c0_11 = arith.constant 0 : index
      %c0_12 = arith.constant 0 : index
      %13 = vector.load %arg7[%c0_11, %c0_12] : memref<8x256xf32, #tpu.memory_space<vmem>>, vector<8x256xf32>
      tpu.vector_store %arg7[%c0_11, %c0_12], %12 {strides = array<i32>} : memref<8x256xf32, #tpu.memory_space<vmem>>, vector<8x256xf32>,
    } else {
    }
    %c0 = arith.constant 0 : index
    %c0_1 = arith.constant 0 : index
    %3 = vector.load %arg7[%c0, %c0_1] : memref<8x256xf32, #tpu.memory_space<vmem>>, vector<8x256xf32>
    %c0_2 = arith.constant 0 : index
    %c0_3 = arith.constant 0 : index
    %4 = vector.load %arg3[%c0_2, %c0_3] : memref<8x256xbf16, #tpu.memory_space<vmem>>, vector<8x256xbf16>
    %c0_4 = arith.constant 0 : index
    %c0_5 = arith.constant 0 : index
    %5 = vector.load %arg4[%c0_4, %c0_5] : memref<256x256xbf16, #tpu.memory_space<vmem>>, vector<256x256xbf16>
    %cst = arith.constant dense<0.000000e+00> : vector<8x256xf32>
    %6 = tpu.matmul %4, %5, %cst {dimension_numbers = #tpu.dot_dimension_numbers<[1], [0], [0], [1], [0, 0, 1, 1], [], []>} : vector<8x256xbf16>, vector<256x256xbf16>, vector<8x256xf32> -> vector<8x256xf32>
    %7 = arith.addf %3, %6 : vector<8x256xf32>
    %c0_6 = arith.constant 0 : index
    %c0_7 = arith.constant 0 : index
    %8 = vector.load %arg7[%c0_6, %c0_7] : memref<8x256xf32, #tpu.memory_space<vmem>>, vector<8x256xf32>
    tpu.vector_store %arg7[%c0_6, %c0_7], %7 {strides = array<i32>} : memref<8x256xf32, #tpu.memory_space<vmem>>, vector<8x256xf32>,
    %c0_i32_8 = arith.constant 0 : i32
    %9 = arith.cmpi eq, %arg2, %c0_i32_8 : i32
    %10 = arith.extui %9 : i1 to i32
    %c0_i32_9 = arith.constant 0 : i32
    %11 = arith.cmpi ne, %10, %c0_i32_9 : i32
    scf.if %11 {
      %c0_10 = arith.constant 0 : index
      %c0_11 = arith.constant 0 : index
      %12 = vector.load %arg7[%c0_10, %c0_11] : memref<8x256xf32, #tpu.memory_space<vmem>>, vector<8x256xf32>
      %c0_12 = arith.constant 0 : index
      %c0_13 = arith.constant 0 : index
      %13 = vector.load %arg5[%c0_12, %c0_13] : memref<1x256xf32, #tpu.memory_space<vmem>>, vector<1x256xf32>
      %14 = vector.broadcast %13 : vector<1x256xf32> to vector<8x256xf32>
      %15 = arith.addf %12, %14 : vector<8x256xf32>
      %cst_14 = arith.constant 0.000000e+00 : f32
      %16 = vector.broadcast %cst_14 : f32 to vector<8x256xf32>
      %17 = arith.maximumf %15, %16 : vector<8x256xf32>
      %18 = arith.truncf %17 : vector<8x256xf32> to vector<8x256xbf16>
      %c0_15 = arith.constant 0 : index
      %c0_16 = arith.constant 0 : index
      %19 = vector.load %arg6[%c0_15, %c0_16] : memref<8x256xbf16, #tpu.memory_space<vmem>>, vector<8x256xbf16>
      tpu.vector_store %arg6[%c0_15, %c0_16], %18 {strides = array<i32>} : memref<8x256xbf16, #tpu.memory_space<vmem>>, vector<8x256xbf16>,
    } else {
    }
    return
  }
  func.func @transform_0(%arg0: i32, %arg1: i32, %arg2: i32) -> (i32, i32) {
    %c0_i32 = arith.constant 0 : i32
    return %arg0, %arg2 : i32, i32
  }
  func.func @transform_1(%arg0: i32, %arg1: i32, %arg2: i32) -> (i32, i32) {
    %c0_i32 = arith.constant 0 : i32
    return %arg2, %arg1 : i32, i32
  }
  func.func @transform_2(%arg0: i32, %arg1: i32, %arg2: i32) -> (i32, i32) {
    %c0_i32 = arith.constant 0 : i32
    %c0_i32_0 = arith.constant 0 : i32
    return %c0_i32, %arg1 : i32, i32
  }
  func.func @transform_3(%arg0: i32, %arg1: i32, %arg2: i32) -> (i32, i32) {
    %c0_i32 = arith.constant 0 : i32
    return %arg0, %arg1 : i32, i32
  }
}

module attributes {stable_mosaic.version = 11 : i64} {
  func.func @_mm_kernel(%arg0: i32, %arg1: i32, %arg2: i32, %arg3: memref<8x384xbf16, #tpu.memory_space<vmem>>, %arg4: memref<384x256xbf16, #tpu.memory_space<vmem>>, %arg5: memref<1x256xf32, #tpu.memory_space<vmem>>, %arg6: memref<8x256xbf16, #tpu.memory_space<vmem>>, %arg7: memref<8x256xf32, #tpu.memory_space<vmem>>) attributes {dimension_semantics = [#tpu.dimension_semantics<parallel>, #tpu.dimension_semantics<parallel>, #tpu.dimension_semantics<arbitrary>], iteration_bounds = array<i64: 1, 2, 6>, scalar_prefetch = 0 : i64, scratch_operands = 1 : i64, tpu.core_type = #tpu.core_type<tc>, window_params = [{transform_indices = @transform_0, window_bounds = array<i64: 8, 384>}, {transform_indices = @transform_1, window_bounds = array<i64: 384, 256>}, {transform_indices = @transform_2, window_bounds = array<i64: 1, 256>}, {transform_indices = @transform_3, window_bounds = array<i64: 8, 256>}]} {
    %c0_i32 = arith.constant 0 : i32
    %0 = arith.cmpi eq, %arg2, %c0_i32 : i32
    %1 = arith.extui %0 : i1 to i32
    %c0_i32_0 = arith.constant 0 : i32
    %2 = arith.cmpi ne, %1, %c0_i32_0 : i32
    scf.if %2 {
      %cst_9 = arith.constant 0.000000e+00 : f32
      %12 = vector.broadcast %cst_9 : f32 to vector<8x256xf32>
      %c0_10 = arith.constant 0 : index
      %c0_11 = arith.constant 0 : index
      %13 = vector.load %arg7[%c0_10, %c0_11] : memref<8x256xf32, #tpu.memory_space<vmem>>, vector<8x256xf32>
      tpu.vector_store %arg7[%c0_10, %c0_11], %12 {strides = array<i32>} : memref<8x256xf32, #tpu.memory_space<vmem>>, vector<8x256xf32>,
    } else {
    }
    %c0 = arith.constant 0 : index
    %c0_1 = arith.constant 0 : index
    %3 = vector.load %arg7[%c0, %c0_1] : memref<8x256xf32, #tpu.memory_space<vmem>>, vector<8x256xf32>
    %c0_2 = arith.constant 0 : index
    %c0_3 = arith.constant 0 : index
    %4 = vector.load %arg3[%c0_2, %c0_3] : memref<8x384xbf16, #tpu.memory_space<vmem>>, vector<8x384xbf16>
    %c0_4 = arith.constant 0 : index
    %c0_5 = arith.constant 0 : index
    %5 = vector.load %arg4[%c0_4, %c0_5] : memref<384x256xbf16, #tpu.memory_space<vmem>>, vector<384x256xbf16>
    %cst = arith.constant dense<0.000000e+00> : vector<8x256xf32>
    %6 = tpu.matmul %4, %5, %cst {dimension_numbers = #tpu.dot_dimension_numbers<[1], [0], [0], [1], [0, 0, 1, 1], [], []>} : vector<8x384xbf16>, vector<384x256xbf16>, vector<8x256xf32> -> vector<8x256xf32>
    %7 = arith.addf %3, %6 : vector<8x256xf32>
    %c0_6 = arith.constant 0 : index
    %c0_7 = arith.constant 0 : index
    %8 = vector.load %arg7[%c0_6, %c0_7] : memref<8x256xf32, #tpu.memory_space<vmem>>, vector<8x256xf32>
    tpu.vector_store %arg7[%c0_6, %c0_7], %7 {strides = array<i32>} : memref<8x256xf32, #tpu.memory_space<vmem>>, vector<8x256xf32>,
    %c5_i32 = arith.constant 5 : i32
    %9 = arith.cmpi eq, %arg2, %c5_i32 : i32
    %10 = arith.extui %9 : i1 to i32
    %c0_i32_8 = arith.constant 0 : i32
    %11 = arith.cmpi ne, %10, %c0_i32_8 : i32
    scf.if %11 {
      %c0_9 = arith.constant 0 : index
      %c0_10 = arith.constant 0 : index
      %12 = vector.load %arg7[%c0_9, %c0_10] : memref<8x256xf32, #tpu.memory_space<vmem>>, vector<8x256xf32>
      %c0_11 = arith.constant 0 : index
      %c0_12 = arith.constant 0 : index
      %13 = vector.load %arg5[%c0_11, %c0_12] : memref<1x256xf32, #tpu.memory_space<vmem>>, vector<1x256xf32>
      %14 = vector.broadcast %13 : vector<1x256xf32> to vector<8x256xf32>
      %15 = arith.addf %12, %14 : vector<8x256xf32>
      %cst_13 = arith.constant 0.000000e+00 : f32
      %16 = vector.broadcast %cst_13 : f32 to vector<8x256xf32>
      %17 = arith.maximumf %15, %16 : vector<8x256xf32>
      %18 = arith.truncf %17 : vector<8x256xf32> to vector<8x256xbf16>
      %c0_14 = arith.constant 0 : index
      %c0_15 = arith.constant 0 : index
      %19 = vector.load %arg6[%c0_14, %c0_15] : memref<8x256xbf16, #tpu.memory_space<vmem>>, vector<8x256xbf16>
      tpu.vector_store %arg6[%c0_14, %c0_15], %18 {strides = array<i32>} : memref<8x256xbf16, #tpu.memory_space<vmem>>, vector<8x256xbf16>,
    } else {
    }
    return
  }
  func.func @transform_0(%arg0: i32, %arg1: i32, %arg2: i32) -> (i32, i32) {
    %c0_i32 = arith.constant 0 : i32
    return %arg0, %arg2 : i32, i32
  }
  func.func @transform_1(%arg0: i32, %arg1: i32, %arg2: i32) -> (i32, i32) {
    %c0_i32 = arith.constant 0 : i32
    return %arg2, %arg1 : i32, i32
  }
  func.func @transform_2(%arg0: i32, %arg1: i32, %arg2: i32) -> (i32, i32) {
    %c0_i32 = arith.constant 0 : i32
    %c0_i32_0 = arith.constant 0 : i32
    return %c0_i32, %arg1 : i32, i32
  }
  func.func @transform_3(%arg0: i32, %arg1: i32, %arg2: i32) -> (i32, i32) {
    %c0_i32 = arith.constant 0 : i32
    return %arg0, %arg1 : i32, i32
  }
}

module attributes {stable_mosaic.version = 11 : i64} {
  func.func @_mm_kernel(%arg0: i32, %arg1: i32, %arg2: i32, %arg3: memref<8x512xbf16, #tpu.memory_space<vmem>>, %arg4: memref<512x256xbf16, #tpu.memory_space<vmem>>, %arg5: memref<1x256xf32, #tpu.memory_space<vmem>>, %arg6: memref<8x256xbf16, #tpu.memory_space<vmem>>, %arg7: memref<8x256xf32, #tpu.memory_space<vmem>>) attributes {dimension_semantics = [#tpu.dimension_semantics<parallel>, #tpu.dimension_semantics<parallel>, #tpu.dimension_semantics<arbitrary>], iteration_bounds = array<i64: 1, 2, 1>, scalar_prefetch = 0 : i64, scratch_operands = 1 : i64, tpu.core_type = #tpu.core_type<tc>, window_params = [{transform_indices = @transform_0, window_bounds = array<i64: 8, 512>}, {transform_indices = @transform_1, window_bounds = array<i64: 512, 256>}, {transform_indices = @transform_2, window_bounds = array<i64: 1, 256>}, {transform_indices = @transform_3, window_bounds = array<i64: 8, 256>}]} {
    %c0_i32 = arith.constant 0 : i32
    %0 = arith.cmpi eq, %arg2, %c0_i32 : i32
    %1 = arith.extui %0 : i1 to i32
    %c0_i32_0 = arith.constant 0 : i32
    %2 = arith.cmpi ne, %1, %c0_i32_0 : i32
    scf.if %2 {
      %cst_10 = arith.constant 0.000000e+00 : f32
      %12 = vector.broadcast %cst_10 : f32 to vector<8x256xf32>
      %c0_11 = arith.constant 0 : index
      %c0_12 = arith.constant 0 : index
      %13 = vector.load %arg7[%c0_11, %c0_12] : memref<8x256xf32, #tpu.memory_space<vmem>>, vector<8x256xf32>
      tpu.vector_store %arg7[%c0_11, %c0_12], %12 {strides = array<i32>} : memref<8x256xf32, #tpu.memory_space<vmem>>, vector<8x256xf32>,
    } else {
    }
    %c0 = arith.constant 0 : index
    %c0_1 = arith.constant 0 : index
    %3 = vector.load %arg7[%c0, %c0_1] : memref<8x256xf32, #tpu.memory_space<vmem>>, vector<8x256xf32>
    %c0_2 = arith.constant 0 : index
    %c0_3 = arith.constant 0 : index
    %4 = vector.load %arg3[%c0_2, %c0_3] : memref<8x512xbf16, #tpu.memory_space<vmem>>, vector<8x512xbf16>
    %c0_4 = arith.constant 0 : index
    %c0_5 = arith.constant 0 : index
    %5 = vector.load %arg4[%c0_4, %c0_5] : memref<512x256xbf16, #tpu.memory_space<vmem>>, vector<512x256xbf16>
    %cst = arith.constant dense<0.000000e+00> : vector<8x256xf32>
    %6 = tpu.matmul %4, %5, %cst {dimension_numbers = #tpu.dot_dimension_numbers<[1], [0], [0], [1], [0, 0, 1, 1], [], []>} : vector<8x512xbf16>, vector<512x256xbf16>, vector<8x256xf32> -> vector<8x256xf32>
    %7 = arith.addf %3, %6 : vector<8x256xf32>
    %c0_6 = arith.constant 0 : index
    %c0_7 = arith.constant 0 : index
    %8 = vector.load %arg7[%c0_6, %c0_7] : memref<8x256xf32, #tpu.memory_space<vmem>>, vector<8x256xf32>
    tpu.vector_store %arg7[%c0_6, %c0_7], %7 {strides = array<i32>} : memref<8x256xf32, #tpu.memory_space<vmem>>, vector<8x256xf32>,
    %c0_i32_8 = arith.constant 0 : i32
    %9 = arith.cmpi eq, %arg2, %c0_i32_8 : i32
    %10 = arith.extui %9 : i1 to i32
    %c0_i32_9 = arith.constant 0 : i32
    %11 = arith.cmpi ne, %10, %c0_i32_9 : i32
    scf.if %11 {
      %c0_10 = arith.constant 0 : index
      %c0_11 = arith.constant 0 : index
      %12 = vector.load %arg7[%c0_10, %c0_11] : memref<8x256xf32, #tpu.memory_space<vmem>>, vector<8x256xf32>
      %c0_12 = arith.constant 0 : index
      %c0_13 = arith.constant 0 : index
      %13 = vector.load %arg5[%c0_12, %c0_13] : memref<1x256xf32, #tpu.memory_space<vmem>>, vector<1x256xf32>
      %14 = vector.broadcast %13 : vector<1x256xf32> to vector<8x256xf32>
      %15 = arith.addf %12, %14 : vector<8x256xf32>
      %cst_14 = arith.constant 0.000000e+00 : f32
      %16 = vector.broadcast %cst_14 : f32 to vector<8x256xf32>
      %17 = arith.maximumf %15, %16 : vector<8x256xf32>
      %18 = arith.truncf %17 : vector<8x256xf32> to vector<8x256xbf16>
      %c0_15 = arith.constant 0 : index
      %c0_16 = arith.constant 0 : index
      %19 = vector.load %arg6[%c0_15, %c0_16] : memref<8x256xbf16, #tpu.memory_space<vmem>>, vector<8x256xbf16>
      tpu.vector_store %arg6[%c0_15, %c0_16], %18 {strides = array<i32>} : memref<8x256xbf16, #tpu.memory_space<vmem>>, vector<8x256xbf16>,
    } else {
    }
    return
  }
  func.func @transform_0(%arg0: i32, %arg1: i32, %arg2: i32) -> (i32, i32) {
    %c0_i32 = arith.constant 0 : i32
    return %arg0, %arg2 : i32, i32
  }
  func.func @transform_1(%arg0: i32, %arg1: i32, %arg2: i32) -> (i32, i32) {
    %c0_i32 = arith.constant 0 : i32
    return %arg2, %arg1 : i32, i32
  }
  func.func @transform_2(%arg0: i32, %arg1: i32, %arg2: i32) -> (i32, i32) {
    %c0_i32 = arith.constant 0 : i32
    %c0_i32_0 = arith.constant 0 : i32
    return %c0_i32, %arg1 : i32, i32
  }
  func.func @transform_3(%arg0: i32, %arg1: i32, %arg2: i32) -> (i32, i32) {
    %c0_i32 = arith.constant 0 : i32
    return %arg0, %arg1 : i32, i32
  }
}

module attributes {stable_mosaic.version = 11 : i64} {
  func.func @_mm_kernel(%arg0: i32, %arg1: i32, %arg2: i32, %arg3: memref<8x256xbf16, #tpu.memory_space<vmem>>, %arg4: memref<256x256xbf16, #tpu.memory_space<vmem>>, %arg5: memref<1x256xf32, #tpu.memory_space<vmem>>, %arg6: memref<8x256xbf16, #tpu.memory_space<vmem>>, %arg7: memref<8x256xf32, #tpu.memory_space<vmem>>) attributes {dimension_semantics = [#tpu.dimension_semantics<parallel>, #tpu.dimension_semantics<parallel>, #tpu.dimension_semantics<arbitrary>], iteration_bounds = array<i64: 1, 2, 1>, scalar_prefetch = 0 : i64, scratch_operands = 1 : i64, tpu.core_type = #tpu.core_type<tc>, window_params = [{transform_indices = @transform_0, window_bounds = array<i64: 8, 256>}, {transform_indices = @transform_1, window_bounds = array<i64: 256, 256>}, {transform_indices = @transform_2, window_bounds = array<i64: 1, 256>}, {transform_indices = @transform_3, window_bounds = array<i64: 8, 256>}]} {
    %c0_i32 = arith.constant 0 : i32
    %0 = arith.cmpi eq, %arg2, %c0_i32 : i32
    %1 = arith.extui %0 : i1 to i32
    %c0_i32_0 = arith.constant 0 : i32
    %2 = arith.cmpi ne, %1, %c0_i32_0 : i32
    scf.if %2 {
      %cst_10 = arith.constant 0.000000e+00 : f32
      %12 = vector.broadcast %cst_10 : f32 to vector<8x256xf32>
      %c0_11 = arith.constant 0 : index
      %c0_12 = arith.constant 0 : index
      %13 = vector.load %arg7[%c0_11, %c0_12] : memref<8x256xf32, #tpu.memory_space<vmem>>, vector<8x256xf32>
      tpu.vector_store %arg7[%c0_11, %c0_12], %12 {strides = array<i32>} : memref<8x256xf32, #tpu.memory_space<vmem>>, vector<8x256xf32>,
    } else {
    }
    %c0 = arith.constant 0 : index
    %c0_1 = arith.constant 0 : index
    %3 = vector.load %arg7[%c0, %c0_1] : memref<8x256xf32, #tpu.memory_space<vmem>>, vector<8x256xf32>
    %c0_2 = arith.constant 0 : index
    %c0_3 = arith.constant 0 : index
    %4 = vector.load %arg3[%c0_2, %c0_3] : memref<8x256xbf16, #tpu.memory_space<vmem>>, vector<8x256xbf16>
    %c0_4 = arith.constant 0 : index
    %c0_5 = arith.constant 0 : index
    %5 = vector.load %arg4[%c0_4, %c0_5] : memref<256x256xbf16, #tpu.memory_space<vmem>>, vector<256x256xbf16>
    %cst = arith.constant dense<0.000000e+00> : vector<8x256xf32>
    %6 = tpu.matmul %4, %5, %cst {dimension_numbers = #tpu.dot_dimension_numbers<[1], [0], [0], [1], [0, 0, 1, 1], [], []>} : vector<8x256xbf16>, vector<256x256xbf16>, vector<8x256xf32> -> vector<8x256xf32>
    %7 = arith.addf %3, %6 : vector<8x256xf32>
    %c0_6 = arith.constant 0 : index
    %c0_7 = arith.constant 0 : index
    %8 = vector.load %arg7[%c0_6, %c0_7] : memref<8x256xf32, #tpu.memory_space<vmem>>, vector<8x256xf32>
    tpu.vector_store %arg7[%c0_6, %c0_7], %7 {strides = array<i32>} : memref<8x256xf32, #tpu.memory_space<vmem>>, vector<8x256xf32>,
    %c0_i32_8 = arith.constant 0 : i32
    %9 = arith.cmpi eq, %arg2, %c0_i32_8 : i32
    %10 = arith.extui %9 : i1 to i32
    %c0_i32_9 = arith.constant 0 : i32
    %11 = arith.cmpi ne, %10, %c0_i32_9 : i32
    scf.if %11 {
      %c0_10 = arith.constant 0 : index
      %c0_11 = arith.constant 0 : index
      %12 = vector.load %arg7[%c0_10, %c0_11] : memref<8x256xf32, #tpu.memory_space<vmem>>, vector<8x256xf32>
      %c0_12 = arith.constant 0 : index
      %c0_13 = arith.constant 0 : index
      %13 = vector.load %arg5[%c0_12, %c0_13] : memref<1x256xf32, #tpu.memory_space<vmem>>, vector<1x256xf32>
      %14 = vector.broadcast %13 : vector<1x256xf32> to vector<8x256xf32>
      %15 = arith.addf %12, %14 : vector<8x256xf32>
      %16 = arith.truncf %15 : vector<8x256xf32> to vector<8x256xbf16>
      %c0_14 = arith.constant 0 : index
      %c0_15 = arith.constant 0 : index
      %17 = vector.load %arg6[%c0_14, %c0_15] : memref<8x256xbf16, #tpu.memory_space<vmem>>, vector<8x256xbf16>
      tpu.vector_store %arg6[%c0_14, %c0_15], %16 {strides = array<i32>} : memref<8x256xbf16, #tpu.memory_space<vmem>>, vector<8x256xbf16>,
    } else {
    }
    return
  }
  func.func @transform_0(%arg0: i32, %arg1: i32, %arg2: i32) -> (i32, i32) {
    %c0_i32 = arith.constant 0 : i32
    return %arg0, %arg2 : i32, i32
  }
  func.func @transform_1(%arg0: i32, %arg1: i32, %arg2: i32) -> (i32, i32) {
    %c0_i32 = arith.constant 0 : i32
    return %arg2, %arg1 : i32, i32
  }
  func.func @transform_2(%arg0: i32, %arg1: i32, %arg2: i32) -> (i32, i32) {
    %c0_i32 = arith.constant 0 : i32
    %c0_i32_0 = arith.constant 0 : i32
    return %c0_i32, %arg1 : i32, i32
  }
  func.func @transform_3(%arg0: i32, %arg1: i32, %arg2: i32) -> (i32, i32) {
    %c0_i32 = arith.constant 0 : i32
    return %arg0, %arg1 : i32, i32
  }
}

module attributes {stable_mosaic.version = 11 : i64} {
  func.func @_mm_kernel(%arg0: i32, %arg1: i32, %arg2: i32, %arg3: memref<8x512xbf16, #tpu.memory_space<vmem>>, %arg4: memref<512x256xbf16, #tpu.memory_space<vmem>>, %arg5: memref<1x256xf32, #tpu.memory_space<vmem>>, %arg6: memref<8x256xbf16, #tpu.memory_space<vmem>>, %arg7: memref<8x256xbf16, #tpu.memory_space<vmem>>, %arg8: memref<8x256xf32, #tpu.memory_space<vmem>>) attributes {dimension_semantics = [#tpu.dimension_semantics<parallel>, #tpu.dimension_semantics<parallel>, #tpu.dimension_semantics<arbitrary>], iteration_bounds = array<i64: 1, 2, 9>, scalar_prefetch = 0 : i64, scratch_operands = 1 : i64, tpu.core_type = #tpu.core_type<tc>, window_params = [{transform_indices = @transform_0, window_bounds = array<i64: 8, 512>}, {transform_indices = @transform_1, window_bounds = array<i64: 512, 256>}, {transform_indices = @transform_2, window_bounds = array<i64: 1, 256>}, {transform_indices = @transform_3, window_bounds = array<i64: 8, 256>}, {transform_indices = @transform_4, window_bounds = array<i64: 8, 256>}]} {
    %c0_i32 = arith.constant 0 : i32
    %0 = arith.cmpi eq, %arg2, %c0_i32 : i32
    %1 = arith.extui %0 : i1 to i32
    %c0_i32_0 = arith.constant 0 : i32
    %2 = arith.cmpi ne, %1, %c0_i32_0 : i32
    scf.if %2 {
      %cst_9 = arith.constant 0.000000e+00 : f32
      %12 = vector.broadcast %cst_9 : f32 to vector<8x256xf32>
      %c0_10 = arith.constant 0 : index
      %c0_11 = arith.constant 0 : index
      %13 = vector.load %arg8[%c0_10, %c0_11] : memref<8x256xf32, #tpu.memory_space<vmem>>, vector<8x256xf32>
      tpu.vector_store %arg8[%c0_10, %c0_11], %12 {strides = array<i32>} : memref<8x256xf32, #tpu.memory_space<vmem>>, vector<8x256xf32>,
    } else {
    }
    %c0 = arith.constant 0 : index
    %c0_1 = arith.constant 0 : index
    %3 = vector.load %arg8[%c0, %c0_1] : memref<8x256xf32, #tpu.memory_space<vmem>>, vector<8x256xf32>
    %c0_2 = arith.constant 0 : index
    %c0_3 = arith.constant 0 : index
    %4 = vector.load %arg3[%c0_2, %c0_3] : memref<8x512xbf16, #tpu.memory_space<vmem>>, vector<8x512xbf16>
    %c0_4 = arith.constant 0 : index
    %c0_5 = arith.constant 0 : index
    %5 = vector.load %arg4[%c0_4, %c0_5] : memref<512x256xbf16, #tpu.memory_space<vmem>>, vector<512x256xbf16>
    %cst = arith.constant dense<0.000000e+00> : vector<8x256xf32>
    %6 = tpu.matmul %4, %5, %cst {dimension_numbers = #tpu.dot_dimension_numbers<[1], [0], [0], [1], [0, 0, 1, 1], [], []>} : vector<8x512xbf16>, vector<512x256xbf16>, vector<8x256xf32> -> vector<8x256xf32>
    %7 = arith.addf %3, %6 : vector<8x256xf32>
    %c0_6 = arith.constant 0 : index
    %c0_7 = arith.constant 0 : index
    %8 = vector.load %arg8[%c0_6, %c0_7] : memref<8x256xf32, #tpu.memory_space<vmem>>, vector<8x256xf32>
    tpu.vector_store %arg8[%c0_6, %c0_7], %7 {strides = array<i32>} : memref<8x256xf32, #tpu.memory_space<vmem>>, vector<8x256xf32>,
    %c8_i32 = arith.constant 8 : i32
    %9 = arith.cmpi eq, %arg2, %c8_i32 : i32
    %10 = arith.extui %9 : i1 to i32
    %c0_i32_8 = arith.constant 0 : i32
    %11 = arith.cmpi ne, %10, %c0_i32_8 : i32
    scf.if %11 {
      %c0_9 = arith.constant 0 : index
      %c0_10 = arith.constant 0 : index
      %12 = vector.load %arg8[%c0_9, %c0_10] : memref<8x256xf32, #tpu.memory_space<vmem>>, vector<8x256xf32>
      %c0_11 = arith.constant 0 : index
      %c0_12 = arith.constant 0 : index
      %13 = vector.load %arg5[%c0_11, %c0_12] : memref<1x256xf32, #tpu.memory_space<vmem>>, vector<1x256xf32>
      %14 = vector.broadcast %13 : vector<1x256xf32> to vector<8x256xf32>
      %15 = arith.addf %12, %14 : vector<8x256xf32>
      %cst_13 = arith.constant 0.000000e+00 : f32
      %16 = vector.broadcast %cst_13 : f32 to vector<8x256xf32>
      %17 = arith.maximumf %15, %16 : vector<8x256xf32>
      %c0_14 = arith.constant 0 : index
      %c0_15 = arith.constant 0 : index
      %18 = vector.load %arg6[%c0_14, %c0_15] : memref<8x256xbf16, #tpu.memory_space<vmem>>, vector<8x256xbf16>
      %19 = arith.extf %18 : vector<8x256xbf16> to vector<8x256xf32>
      %20 = arith.addf %17, %19 : vector<8x256xf32>
      %21 = arith.truncf %20 : vector<8x256xf32> to vector<8x256xbf16>
      %c0_16 = arith.constant 0 : index
      %c0_17 = arith.constant 0 : index
      %22 = vector.load %arg7[%c0_16, %c0_17] : memref<8x256xbf16, #tpu.memory_space<vmem>>, vector<8x256xbf16>
      tpu.vector_store %arg7[%c0_16, %c0_17], %21 {strides = array<i32>} : memref<8x256xbf16, #tpu.memory_space<vmem>>, vector<8x256xbf16>,
    } else {
    }
    return
  }
  func.func @transform_0(%arg0: i32, %arg1: i32, %arg2: i32) -> (i32, i32) {
    %c0_i32 = arith.constant 0 : i32
    return %arg0, %arg2 : i32, i32
  }
  func.func @transform_1(%arg0: i32, %arg1: i32, %arg2: i32) -> (i32, i32) {
    %c0_i32 = arith.constant 0 : i32
    return %arg2, %arg1 : i32, i32
  }
  func.func @transform_2(%arg0: i32, %arg1: i32, %arg2: i32) -> (i32, i32) {
    %c0_i32 = arith.constant 0 : i32
    %c0_i32_0 = arith.constant 0 : i32
    return %c0_i32, %arg1 : i32, i32
  }
  func.func @transform_3(%arg0: i32, %arg1: i32, %arg2: i32) -> (i32, i32) {
    %c0_i32 = arith.constant 0 : i32
    return %arg0, %arg1 : i32, i32
  }
  func.func @transform_4(%arg0: i32, %arg1: i32, %arg2: i32) -> (i32, i32) {
    %c0_i32 = arith.constant 0 : i32
    return %arg0, %arg1 : i32, i32
  }
}

module attributes {stable_mosaic.version = 11 : i64} {
  func.func @_mm_kernel(%arg0: i32, %arg1: i32, %arg2: i32, %arg3: memref<8x512xbf16, #tpu.memory_space<vmem>>, %arg4: memref<512x256xbf16, #tpu.memory_space<vmem>>, %arg5: memref<1x256xf32, #tpu.memory_space<vmem>>, %arg6: memref<8x256xbf16, #tpu.memory_space<vmem>>, %arg7: memref<8x256xf32, #tpu.memory_space<vmem>>) attributes {dimension_semantics = [#tpu.dimension_semantics<parallel>, #tpu.dimension_semantics<parallel>, #tpu.dimension_semantics<arbitrary>], iteration_bounds = array<i64: 1, 2, 9>, scalar_prefetch = 0 : i64, scratch_operands = 1 : i64, tpu.core_type = #tpu.core_type<tc>, window_params = [{transform_indices = @transform_0, window_bounds = array<i64: 8, 512>}, {transform_indices = @transform_1, window_bounds = array<i64: 512, 256>}, {transform_indices = @transform_2, window_bounds = array<i64: 1, 256>}, {transform_indices = @transform_3, window_bounds = array<i64: 8, 256>}]} {
    %c0_i32 = arith.constant 0 : i32
    %0 = arith.cmpi eq, %arg2, %c0_i32 : i32
    %1 = arith.extui %0 : i1 to i32
    %c0_i32_0 = arith.constant 0 : i32
    %2 = arith.cmpi ne, %1, %c0_i32_0 : i32
    scf.if %2 {
      %cst_9 = arith.constant 0.000000e+00 : f32
      %12 = vector.broadcast %cst_9 : f32 to vector<8x256xf32>
      %c0_10 = arith.constant 0 : index
      %c0_11 = arith.constant 0 : index
      %13 = vector.load %arg7[%c0_10, %c0_11] : memref<8x256xf32, #tpu.memory_space<vmem>>, vector<8x256xf32>
      tpu.vector_store %arg7[%c0_10, %c0_11], %12 {strides = array<i32>} : memref<8x256xf32, #tpu.memory_space<vmem>>, vector<8x256xf32>,
    } else {
    }
    %c0 = arith.constant 0 : index
    %c0_1 = arith.constant 0 : index
    %3 = vector.load %arg7[%c0, %c0_1] : memref<8x256xf32, #tpu.memory_space<vmem>>, vector<8x256xf32>
    %c0_2 = arith.constant 0 : index
    %c0_3 = arith.constant 0 : index
    %4 = vector.load %arg3[%c0_2, %c0_3] : memref<8x512xbf16, #tpu.memory_space<vmem>>, vector<8x512xbf16>
    %c0_4 = arith.constant 0 : index
    %c0_5 = arith.constant 0 : index
    %5 = vector.load %arg4[%c0_4, %c0_5] : memref<512x256xbf16, #tpu.memory_space<vmem>>, vector<512x256xbf16>
    %cst = arith.constant dense<0.000000e+00> : vector<8x256xf32>
    %6 = tpu.matmul %4, %5, %cst {dimension_numbers = #tpu.dot_dimension_numbers<[1], [0], [0], [1], [0, 0, 1, 1], [], []>} : vector<8x512xbf16>, vector<512x256xbf16>, vector<8x256xf32> -> vector<8x256xf32>
    %7 = arith.addf %3, %6 : vector<8x256xf32>
    %c0_6 = arith.constant 0 : index
    %c0_7 = arith.constant 0 : index
    %8 = vector.load %arg7[%c0_6, %c0_7] : memref<8x256xf32, #tpu.memory_space<vmem>>, vector<8x256xf32>
    tpu.vector_store %arg7[%c0_6, %c0_7], %7 {strides = array<i32>} : memref<8x256xf32, #tpu.memory_space<vmem>>, vector<8x256xf32>,
    %c8_i32 = arith.constant 8 : i32
    %9 = arith.cmpi eq, %arg2, %c8_i32 : i32
    %10 = arith.extui %9 : i1 to i32
    %c0_i32_8 = arith.constant 0 : i32
    %11 = arith.cmpi ne, %10, %c0_i32_8 : i32
    scf.if %11 {
      %c0_9 = arith.constant 0 : index
      %c0_10 = arith.constant 0 : index
      %12 = vector.load %arg7[%c0_9, %c0_10] : memref<8x256xf32, #tpu.memory_space<vmem>>, vector<8x256xf32>
      %c0_11 = arith.constant 0 : index
      %c0_12 = arith.constant 0 : index
      %13 = vector.load %arg5[%c0_11, %c0_12] : memref<1x256xf32, #tpu.memory_space<vmem>>, vector<1x256xf32>
      %14 = vector.broadcast %13 : vector<1x256xf32> to vector<8x256xf32>
      %15 = arith.addf %12, %14 : vector<8x256xf32>
      %cst_13 = arith.constant 0.000000e+00 : f32
      %16 = vector.broadcast %cst_13 : f32 to vector<8x256xf32>
      %17 = arith.maximumf %15, %16 : vector<8x256xf32>
      %18 = arith.truncf %17 : vector<8x256xf32> to vector<8x256xbf16>
      %c0_14 = arith.constant 0 : index
      %c0_15 = arith.constant 0 : index
      %19 = vector.load %arg6[%c0_14, %c0_15] : memref<8x256xbf16, #tpu.memory_space<vmem>>, vector<8x256xbf16>
      tpu.vector_store %arg6[%c0_14, %c0_15], %18 {strides = array<i32>} : memref<8x256xbf16, #tpu.memory_space<vmem>>, vector<8x256xbf16>,
    } else {
    }
    return
  }
  func.func @transform_0(%arg0: i32, %arg1: i32, %arg2: i32) -> (i32, i32) {
    %c0_i32 = arith.constant 0 : i32
    return %arg0, %arg2 : i32, i32
  }
  func.func @transform_1(%arg0: i32, %arg1: i32, %arg2: i32) -> (i32, i32) {
    %c0_i32 = arith.constant 0 : i32
    return %arg2, %arg1 : i32, i32
  }
  func.func @transform_2(%arg0: i32, %arg1: i32, %arg2: i32) -> (i32, i32) {
    %c0_i32 = arith.constant 0 : i32
    %c0_i32_0 = arith.constant 0 : i32
    return %c0_i32, %arg1 : i32, i32
  }
  func.func @transform_3(%arg0: i32, %arg1: i32, %arg2: i32) -> (i32, i32) {
    %c0_i32 = arith.constant 0 : i32
    return %arg0, %arg1 : i32, i32
  }
}

module attributes {stable_mosaic.version = 11 : i64} {
  func.func @_mm_kernel(%arg0: i32, %arg1: i32, %arg2: i32, %arg3: memref<8x512xbf16, #tpu.memory_space<vmem>>, %arg4: memref<512x256xbf16, #tpu.memory_space<vmem>>, %arg5: memref<1x256xf32, #tpu.memory_space<vmem>>, %arg6: memref<8x256xbf16, #tpu.memory_space<vmem>>, %arg7: memref<8x256xf32, #tpu.memory_space<vmem>>) attributes {dimension_semantics = [#tpu.dimension_semantics<parallel>, #tpu.dimension_semantics<parallel>, #tpu.dimension_semantics<arbitrary>], iteration_bounds = array<i64: 1, 4, 1>, scalar_prefetch = 0 : i64, scratch_operands = 1 : i64, tpu.core_type = #tpu.core_type<tc>, window_params = [{transform_indices = @transform_0, window_bounds = array<i64: 8, 512>}, {transform_indices = @transform_1, window_bounds = array<i64: 512, 256>}, {transform_indices = @transform_2, window_bounds = array<i64: 1, 256>}, {transform_indices = @transform_3, window_bounds = array<i64: 8, 256>}]} {
    %c0_i32 = arith.constant 0 : i32
    %0 = arith.cmpi eq, %arg2, %c0_i32 : i32
    %1 = arith.extui %0 : i1 to i32
    %c0_i32_0 = arith.constant 0 : i32
    %2 = arith.cmpi ne, %1, %c0_i32_0 : i32
    scf.if %2 {
      %cst_10 = arith.constant 0.000000e+00 : f32
      %12 = vector.broadcast %cst_10 : f32 to vector<8x256xf32>
      %c0_11 = arith.constant 0 : index
      %c0_12 = arith.constant 0 : index
      %13 = vector.load %arg7[%c0_11, %c0_12] : memref<8x256xf32, #tpu.memory_space<vmem>>, vector<8x256xf32>
      tpu.vector_store %arg7[%c0_11, %c0_12], %12 {strides = array<i32>} : memref<8x256xf32, #tpu.memory_space<vmem>>, vector<8x256xf32>,
    } else {
    }
    %c0 = arith.constant 0 : index
    %c0_1 = arith.constant 0 : index
    %3 = vector.load %arg7[%c0, %c0_1] : memref<8x256xf32, #tpu.memory_space<vmem>>, vector<8x256xf32>
    %c0_2 = arith.constant 0 : index
    %c0_3 = arith.constant 0 : index
    %4 = vector.load %arg3[%c0_2, %c0_3] : memref<8x512xbf16, #tpu.memory_space<vmem>>, vector<8x512xbf16>
    %c0_4 = arith.constant 0 : index
    %c0_5 = arith.constant 0 : index
    %5 = vector.load %arg4[%c0_4, %c0_5] : memref<512x256xbf16, #tpu.memory_space<vmem>>, vector<512x256xbf16>
    %cst = arith.constant dense<0.000000e+00> : vector<8x256xf32>
    %6 = tpu.matmul %4, %5, %cst {dimension_numbers = #tpu.dot_dimension_numbers<[1], [0], [0], [1], [0, 0, 1, 1], [], []>} : vector<8x512xbf16>, vector<512x256xbf16>, vector<8x256xf32> -> vector<8x256xf32>
    %7 = arith.addf %3, %6 : vector<8x256xf32>
    %c0_6 = arith.constant 0 : index
    %c0_7 = arith.constant 0 : index
    %8 = vector.load %arg7[%c0_6, %c0_7] : memref<8x256xf32, #tpu.memory_space<vmem>>, vector<8x256xf32>
    tpu.vector_store %arg7[%c0_6, %c0_7], %7 {strides = array<i32>} : memref<8x256xf32, #tpu.memory_space<vmem>>, vector<8x256xf32>,
    %c0_i32_8 = arith.constant 0 : i32
    %9 = arith.cmpi eq, %arg2, %c0_i32_8 : i32
    %10 = arith.extui %9 : i1 to i32
    %c0_i32_9 = arith.constant 0 : i32
    %11 = arith.cmpi ne, %10, %c0_i32_9 : i32
    scf.if %11 {
      %c0_10 = arith.constant 0 : index
      %c0_11 = arith.constant 0 : index
      %12 = vector.load %arg7[%c0_10, %c0_11] : memref<8x256xf32, #tpu.memory_space<vmem>>, vector<8x256xf32>
      %c0_12 = arith.constant 0 : index
      %c0_13 = arith.constant 0 : index
      %13 = vector.load %arg5[%c0_12, %c0_13] : memref<1x256xf32, #tpu.memory_space<vmem>>, vector<1x256xf32>
      %14 = vector.broadcast %13 : vector<1x256xf32> to vector<8x256xf32>
      %15 = arith.addf %12, %14 : vector<8x256xf32>
      %cst_14 = arith.constant 0.000000e+00 : f32
      %16 = vector.broadcast %cst_14 : f32 to vector<8x256xf32>
      %17 = arith.maximumf %15, %16 : vector<8x256xf32>
      %18 = arith.truncf %17 : vector<8x256xf32> to vector<8x256xbf16>
      %c0_15 = arith.constant 0 : index
      %c0_16 = arith.constant 0 : index
      %19 = vector.load %arg6[%c0_15, %c0_16] : memref<8x256xbf16, #tpu.memory_space<vmem>>, vector<8x256xbf16>
      tpu.vector_store %arg6[%c0_15, %c0_16], %18 {strides = array<i32>} : memref<8x256xbf16, #tpu.memory_space<vmem>>, vector<8x256xbf16>,
    } else {
    }
    return
  }
  func.func @transform_0(%arg0: i32, %arg1: i32, %arg2: i32) -> (i32, i32) {
    %c0_i32 = arith.constant 0 : i32
    return %arg0, %arg2 : i32, i32
  }
  func.func @transform_1(%arg0: i32, %arg1: i32, %arg2: i32) -> (i32, i32) {
    %c0_i32 = arith.constant 0 : i32
    return %arg2, %arg1 : i32, i32
  }
  func.func @transform_2(%arg0: i32, %arg1: i32, %arg2: i32) -> (i32, i32) {
    %c0_i32 = arith.constant 0 : i32
    %c0_i32_0 = arith.constant 0 : i32
    return %c0_i32, %arg1 : i32, i32
  }
  func.func @transform_3(%arg0: i32, %arg1: i32, %arg2: i32) -> (i32, i32) {
    %c0_i32 = arith.constant 0 : i32
    return %arg0, %arg1 : i32, i32
  }
}

module attributes {stable_mosaic.version = 11 : i64} {
  func.func @_mm_kernel(%arg0: i32, %arg1: i32, %arg2: i32, %arg3: memref<8x512xbf16, #tpu.memory_space<vmem>>, %arg4: memref<512x256xbf16, #tpu.memory_space<vmem>>, %arg5: memref<1x256xf32, #tpu.memory_space<vmem>>, %arg6: memref<8x256xbf16, #tpu.memory_space<vmem>>, %arg7: memref<8x256xf32, #tpu.memory_space<vmem>>) attributes {dimension_semantics = [#tpu.dimension_semantics<parallel>, #tpu.dimension_semantics<parallel>, #tpu.dimension_semantics<arbitrary>], iteration_bounds = array<i64: 1, 4, 2>, scalar_prefetch = 0 : i64, scratch_operands = 1 : i64, tpu.core_type = #tpu.core_type<tc>, window_params = [{transform_indices = @transform_0, window_bounds = array<i64: 8, 512>}, {transform_indices = @transform_1, window_bounds = array<i64: 512, 256>}, {transform_indices = @transform_2, window_bounds = array<i64: 1, 256>}, {transform_indices = @transform_3, window_bounds = array<i64: 8, 256>}]} {
    %c0_i32 = arith.constant 0 : i32
    %0 = arith.cmpi eq, %arg2, %c0_i32 : i32
    %1 = arith.extui %0 : i1 to i32
    %c0_i32_0 = arith.constant 0 : i32
    %2 = arith.cmpi ne, %1, %c0_i32_0 : i32
    scf.if %2 {
      %cst_9 = arith.constant 0.000000e+00 : f32
      %12 = vector.broadcast %cst_9 : f32 to vector<8x256xf32>
      %c0_10 = arith.constant 0 : index
      %c0_11 = arith.constant 0 : index
      %13 = vector.load %arg7[%c0_10, %c0_11] : memref<8x256xf32, #tpu.memory_space<vmem>>, vector<8x256xf32>
      tpu.vector_store %arg7[%c0_10, %c0_11], %12 {strides = array<i32>} : memref<8x256xf32, #tpu.memory_space<vmem>>, vector<8x256xf32>,
    } else {
    }
    %c0 = arith.constant 0 : index
    %c0_1 = arith.constant 0 : index
    %3 = vector.load %arg7[%c0, %c0_1] : memref<8x256xf32, #tpu.memory_space<vmem>>, vector<8x256xf32>
    %c0_2 = arith.constant 0 : index
    %c0_3 = arith.constant 0 : index
    %4 = vector.load %arg3[%c0_2, %c0_3] : memref<8x512xbf16, #tpu.memory_space<vmem>>, vector<8x512xbf16>
    %c0_4 = arith.constant 0 : index
    %c0_5 = arith.constant 0 : index
    %5 = vector.load %arg4[%c0_4, %c0_5] : memref<512x256xbf16, #tpu.memory_space<vmem>>, vector<512x256xbf16>
    %cst = arith.constant dense<0.000000e+00> : vector<8x256xf32>
    %6 = tpu.matmul %4, %5, %cst {dimension_numbers = #tpu.dot_dimension_numbers<[1], [0], [0], [1], [0, 0, 1, 1], [], []>} : vector<8x512xbf16>, vector<512x256xbf16>, vector<8x256xf32> -> vector<8x256xf32>
    %7 = arith.addf %3, %6 : vector<8x256xf32>
    %c0_6 = arith.constant 0 : index
    %c0_7 = arith.constant 0 : index
    %8 = vector.load %arg7[%c0_6, %c0_7] : memref<8x256xf32, #tpu.memory_space<vmem>>, vector<8x256xf32>
    tpu.vector_store %arg7[%c0_6, %c0_7], %7 {strides = array<i32>} : memref<8x256xf32, #tpu.memory_space<vmem>>, vector<8x256xf32>,
    %c1_i32 = arith.constant 1 : i32
    %9 = arith.cmpi eq, %arg2, %c1_i32 : i32
    %10 = arith.extui %9 : i1 to i32
    %c0_i32_8 = arith.constant 0 : i32
    %11 = arith.cmpi ne, %10, %c0_i32_8 : i32
    scf.if %11 {
      %c0_9 = arith.constant 0 : index
      %c0_10 = arith.constant 0 : index
      %12 = vector.load %arg7[%c0_9, %c0_10] : memref<8x256xf32, #tpu.memory_space<vmem>>, vector<8x256xf32>
      %c0_11 = arith.constant 0 : index
      %c0_12 = arith.constant 0 : index
      %13 = vector.load %arg5[%c0_11, %c0_12] : memref<1x256xf32, #tpu.memory_space<vmem>>, vector<1x256xf32>
      %14 = vector.broadcast %13 : vector<1x256xf32> to vector<8x256xf32>
      %15 = arith.addf %12, %14 : vector<8x256xf32>
      %cst_13 = arith.constant 0.000000e+00 : f32
      %16 = vector.broadcast %cst_13 : f32 to vector<8x256xf32>
      %17 = arith.maximumf %15, %16 : vector<8x256xf32>
      %18 = arith.truncf %17 : vector<8x256xf32> to vector<8x256xbf16>
      %c0_14 = arith.constant 0 : index
      %c0_15 = arith.constant 0 : index
      %19 = vector.load %arg6[%c0_14, %c0_15] : memref<8x256xbf16, #tpu.memory_space<vmem>>, vector<8x256xbf16>
      tpu.vector_store %arg6[%c0_14, %c0_15], %18 {strides = array<i32>} : memref<8x256xbf16, #tpu.memory_space<vmem>>, vector<8x256xbf16>,
    } else {
    }
    return
  }
  func.func @transform_0(%arg0: i32, %arg1: i32, %arg2: i32) -> (i32, i32) {
    %c0_i32 = arith.constant 0 : i32
    return %arg0, %arg2 : i32, i32
  }
  func.func @transform_1(%arg0: i32, %arg1: i32, %arg2: i32) -> (i32, i32) {
    %c0_i32 = arith.constant 0 : i32
    return %arg2, %arg1 : i32, i32
  }
  func.func @transform_2(%arg0: i32, %arg1: i32, %arg2: i32) -> (i32, i32) {
    %c0_i32 = arith.constant 0 : i32
    %c0_i32_0 = arith.constant 0 : i32
    return %c0_i32, %arg1 : i32, i32
  }
  func.func @transform_3(%arg0: i32, %arg1: i32, %arg2: i32) -> (i32, i32) {
    %c0_i32 = arith.constant 0 : i32
    return %arg0, %arg1 : i32, i32
  }
}

module attributes {stable_mosaic.version = 11 : i64} {
  func.func @_mm_kernel(%arg0: i32, %arg1: i32, %arg2: i32, %arg3: memref<8x512xbf16, #tpu.memory_space<vmem>>, %arg4: memref<512x128xbf16, #tpu.memory_space<vmem>>, %arg5: memref<1x128xf32, #tpu.memory_space<vmem>>, %arg6: memref<8x128xf32, #tpu.memory_space<vmem>>, %arg7: memref<8x128xf32, #tpu.memory_space<vmem>>) attributes {dimension_semantics = [#tpu.dimension_semantics<parallel>, #tpu.dimension_semantics<parallel>, #tpu.dimension_semantics<arbitrary>], iteration_bounds = array<i64: 1, 1, 2>, scalar_prefetch = 0 : i64, scratch_operands = 1 : i64, tpu.core_type = #tpu.core_type<tc>, window_params = [{transform_indices = @transform_0, window_bounds = array<i64: 8, 512>}, {transform_indices = @transform_1, window_bounds = array<i64: 512, 128>}, {transform_indices = @transform_2, window_bounds = array<i64: 1, 128>}, {transform_indices = @transform_3, window_bounds = array<i64: 8, 128>}]} {
    %c0_i32 = arith.constant 0 : i32
    %0 = arith.cmpi eq, %arg2, %c0_i32 : i32
    %1 = arith.extui %0 : i1 to i32
    %c0_i32_0 = arith.constant 0 : i32
    %2 = arith.cmpi ne, %1, %c0_i32_0 : i32
    scf.if %2 {
      %cst_9 = arith.constant 0.000000e+00 : f32
      %12 = vector.broadcast %cst_9 : f32 to vector<8x128xf32>
      %c0_10 = arith.constant 0 : index
      %c0_11 = arith.constant 0 : index
      %13 = vector.load %arg7[%c0_10, %c0_11] : memref<8x128xf32, #tpu.memory_space<vmem>>, vector<8x128xf32>
      tpu.vector_store %arg7[%c0_10, %c0_11], %12 {strides = array<i32>} : memref<8x128xf32, #tpu.memory_space<vmem>>, vector<8x128xf32>,
    } else {
    }
    %c0 = arith.constant 0 : index
    %c0_1 = arith.constant 0 : index
    %3 = vector.load %arg7[%c0, %c0_1] : memref<8x128xf32, #tpu.memory_space<vmem>>, vector<8x128xf32>
    %c0_2 = arith.constant 0 : index
    %c0_3 = arith.constant 0 : index
    %4 = vector.load %arg3[%c0_2, %c0_3] : memref<8x512xbf16, #tpu.memory_space<vmem>>, vector<8x512xbf16>
    %c0_4 = arith.constant 0 : index
    %c0_5 = arith.constant 0 : index
    %5 = vector.load %arg4[%c0_4, %c0_5] : memref<512x128xbf16, #tpu.memory_space<vmem>>, vector<512x128xbf16>
    %cst = arith.constant dense<0.000000e+00> : vector<8x128xf32>
    %6 = tpu.matmul %4, %5, %cst {dimension_numbers = #tpu.dot_dimension_numbers<[1], [0], [0], [1], [0, 0, 1, 1], [], []>} : vector<8x512xbf16>, vector<512x128xbf16>, vector<8x128xf32> -> vector<8x128xf32>
    %7 = arith.addf %3, %6 : vector<8x128xf32>
    %c0_6 = arith.constant 0 : index
    %c0_7 = arith.constant 0 : index
    %8 = vector.load %arg7[%c0_6, %c0_7] : memref<8x128xf32, #tpu.memory_space<vmem>>, vector<8x128xf32>
    tpu.vector_store %arg7[%c0_6, %c0_7], %7 {strides = array<i32>} : memref<8x128xf32, #tpu.memory_space<vmem>>, vector<8x128xf32>,
    %c1_i32 = arith.constant 1 : i32
    %9 = arith.cmpi eq, %arg2, %c1_i32 : i32
    %10 = arith.extui %9 : i1 to i32
    %c0_i32_8 = arith.constant 0 : i32
    %11 = arith.cmpi ne, %10, %c0_i32_8 : i32
    scf.if %11 {
      %c0_9 = arith.constant 0 : index
      %c0_10 = arith.constant 0 : index
      %12 = vector.load %arg7[%c0_9, %c0_10] : memref<8x128xf32, #tpu.memory_space<vmem>>, vector<8x128xf32>
      %c0_11 = arith.constant 0 : index
      %c0_12 = arith.constant 0 : index
      %13 = vector.load %arg5[%c0_11, %c0_12] : memref<1x128xf32, #tpu.memory_space<vmem>>, vector<1x128xf32>
      %14 = vector.broadcast %13 : vector<1x128xf32> to vector<8x128xf32>
      %15 = arith.addf %12, %14 : vector<8x128xf32>
      %c0_13 = arith.constant 0 : index
      %c0_14 = arith.constant 0 : index
      %16 = vector.load %arg6[%c0_13, %c0_14] : memref<8x128xf32, #tpu.memory_space<vmem>>, vector<8x128xf32>
      tpu.vector_store %arg6[%c0_13, %c0_14], %15 {strides = array<i32>} : memref<8x128xf32, #tpu.memory_space<vmem>>, vector<8x128xf32>,
    } else {
    }
    return
  }
  func.func @transform_0(%arg0: i32, %arg1: i32, %arg2: i32) -> (i32, i32) {
    %c0_i32 = arith.constant 0 : i32
    return %arg0, %arg2 : i32, i32
  }
  func.func @transform_1(%arg0: i32, %arg1: i32, %arg2: i32) -> (i32, i32) {
    %c0_i32 = arith.constant 0 : i32
    return %arg2, %arg1 : i32, i32
  }
  func.func @transform_2(%arg0: i32, %arg1: i32, %arg2: i32) -> (i32, i32) {
    %c0_i32 = arith.constant 0 : i32
    %c0_i32_0 = arith.constant 0 : i32
    return %c0_i32, %arg1 : i32, i32
  }
  func.func @transform_3(%arg0: i32, %arg1: i32, %arg2: i32) -> (i32, i32) {
    %c0_i32 = arith.constant 0 : i32
    return %arg0, %arg1 : i32, i32
  }
}

</mosaic_0001>

<bundles_post_ra>
// kernel: esac_scnet_forward.17
= control target key start
LH: loop header
LB: loop body
LE: loop exit
PB: predicated region body
PF: predicated region fallthrough
CT: control target
= control target key end

     0   :  { %s1499_s12 = smov 0   ;;  %s1501_s13 = smov 0   ;;  %s1636_s0 = inlined_call_operand.vmem [shape: bf16[512,128], index: 0, kind: input, shape index: {}]   ;;  %s1637_s1 = inlined_call_operand.vmem [shape: bf16[128,128], index: 1, kind: input, shape index: {}]   ;;  %s1638_s2 = inlined_call_operand.vmem [shape: f32[1,128], index: 2, kind: input, shape index: {}]   ;;  %s1639_s3 = inlined_call_operand.vmem [shape: bf16[512,128], index: 3, kind: output, shape index: {}]  }
   0x1   :  { %s1503_s14 = smov 0  }
   0x2 LB: > { %s32_s15 = sadd.s32 1, %s1473_s13  ;;  %p1128_p0 = scmp.ge.s32.totalorder %s1477_s14, 1  ;;  %s1477_s14 = sphi %s1503_s14, %s13_s14   ;;  %s1473_s13 = sphi %s1501_s13, %s1641_s13   ;;  %s1469_s12 = sphi %s1499_s12, %s1640_s12  }
   0x3   : > { %p34_p1 = scmp.ge.s32.totalorder %s32_s15, 2  ;;  %p188_p2 = scmp.lt.s32.totalorder %s1477_s14, 3 }
   0x5   : > { %s1643_s15 = smov (%p34_p1, %s32_s15), 0  ;;  %p189_p3 = pnand %p1128_p0, %p188_p2 }
   0x6   : > { %v1431_v0 = vld [vmem:[%s1637_s1] sm:$0xff] (!%p189_p3)   ;;  %s1129_s18 = sshll.u32 (!%p189_p3), %s1469_s12, 5  ;;  %v1432_v1 = vld [vmem:[%s1637_s1 + $0x8] sm:$0xff] (!%p189_p3)   ;;  %v1433_v2 = vld [vmem:[%s1637_s1 + $0x10] sm:$0xff] (!%p189_p3)  }
   0x7   : > { %192 = sbr.rel (%p189_p3) target bundleno = 285 (0x11d), region = 32  ;;  %p230_p4 = scmp.lt.s32.totalorder (!%p189_p3), %s1129_s18, 63  ;;  %1343 = vmatprep.subr.bf16.mxu0 (!%p189_p3), %v1431_v0  ;;  %1391 = vmatprep.subr.bf16.mxu1 (!%p189_p3), %v1431_v0  ;;  %v1434_v3 = vld [vmem:[%s1637_s1 + $0x18] sm:$0xff] (!%p189_p3)   ;;  %v1435_v6 = vld [vmem:[%s1637_s1 + $0x20] sm:$0xff] (!%p189_p3)   ;;  %v1436_v7 = vld [vmem:[%s1637_s1 + $0x28] sm:$0xff] (!%p189_p3)  }
   0x8   : > { %1344 = vmatpush3.bf16.msra.mxu0 (!%p189_p3), %v1431_v0  ;;  %1399 = vmatpush3.bf16.msra.mxu1 (!%p189_p3), %v1431_v0  ;;  %v1437_v8 = vld [vmem:[%s1637_s1 + $0x30] sm:$0xff] (!%p189_p3)   ;;  %v1438_v9 = vld [vmem:[%s1637_s1 + $0x38] sm:$0xff] (!%p189_p3)   ;;  %v1570_v24 = vld [vmem:[%s1638_s2] ss:$0 sm:$0xff] (!%p189_p3) }
   0x9   : > { %1345 = vmatprep.subr.bf16.mxu0 (!%p189_p3), %v1432_v1  ;;  %1392 = vmatprep.subr.bf16.mxu1 (!%p189_p3), %v1432_v1 }
   0xc   : > { %1346 = vmatpush3.bf16.msra.mxu0 (!%p189_p3), %v1432_v1  ;;  %1400 = vmatpush3.bf16.msra.mxu1 (!%p189_p3), %v1432_v1 }
   0xd   : > { %1347 = vmatprep.subr.bf16.mxu0 (!%p189_p3), %v1433_v2  ;;  %1393 = vmatprep.subr.bf16.mxu1 (!%p189_p3), %v1433_v2 }
   0xe   : > { %s1645_s18 = smov (!%p230_p4, %s1129_s18), 63 }
   0xf   : > { %s1130_s23 = sshll.u32 %s1645_s18, 2 }
  0x10   : > { %s1534_s26 = scalar_lea.vmem %s1636_s0, %s1130_s23  ;;  %1348 = vmatpush3.bf16.msra.mxu0 %v1433_v2  ;;  %1401 = vmatpush3.bf16.msra.mxu1 %v1433_v2  ;;  %s1585_s17 = scalar_lea.vmem %s1639_s3, %s1130_s23 }
  0x11   : > { %v1439_v4 = vld [vmem:[%s1534_s26] sm:$0xff]   ;;  %1349 = vmatprep.subr.bf16.mxu0 %v1434_v3  ;;  %1394 = vmatprep.subr.bf16.mxu1 %v1434_v3  ;;  %v1441_v10 = vld [vmem:[%s1534_s26 + $0x8] sm:$0xff]   ;;  %v1443_v12 = vld [vmem:[%s1534_s26 + $0x10] sm:$0xff]  }
  0x12   : > { %v1440_v5 = vld [vmem:[%s1534_s26 + $0x40] sm:$0xff]   ;;  %1359 = vmatprep.mubr.bf16.mxu0 %v1439_v4  ;;  %v1442_v11 = vld [vmem:[%s1534_s26 + $0x48] sm:$0xff]   ;;  %v1444_v13 = vld [vmem:[%s1534_s26 + $0x50] sm:$0xff]  }
  0x13   : > { %1375 = vmatprep.mubr.bf16.mxu1 %v1440_v5  ;;  %v1445_v14 = vld [vmem:[%s1534_s26 + $0x18] sm:$0xff]   ;;  %v1447_v16 = vld [vmem:[%s1534_s26 + $0x20] sm:$0xff]   ;;  %v1449_v18 = vld [vmem:[%s1534_s26 + $0x28] sm:$0xff]  }
  0x14   : > { %1350 = vmatpush3.bf16.msra.mxu0 %v1434_v3  ;;  %1402 = vmatpush3.bf16.msra.mxu1 %v1434_v3  ;;  %v1446_v15 = vld [vmem:[%s1534_s26 + $0x58] sm:$0xff]   ;;  %v1448_v17 = vld [vmem:[%s1534_s26 + $0x60] sm:$0xff]   ;;  %v1450_v19 = vld [vmem:[%s1534_s26 + $0x68] sm:$0xff]  }
  0x15   : > { %1351 = vmatprep.subr.bf16.mxu0 %v1435_v6  ;;  %1395 = vmatprep.subr.bf16.mxu1 %v1435_v6  ;;  %v1451_v20 = vld [vmem:[%s1534_s26 + $0x30] sm:$0xff]   ;;  %v1453_v22 = vld [vmem:[%s1534_s26 + $0x38] sm:$0xff]  }
  0x16   : > { %v1452_v21 = vld [vmem:[%s1534_s26 + $0x70] sm:$0xff]   ;;  %v1454_v23 = vld [vmem:[%s1534_s26 + $0x78] sm:$0xff]  }
  0x18   : > { %1352 = vmatpush3.bf16.msra.mxu0 %v1435_v6  ;;  %1403 = vmatpush3.bf16.msra.mxu1 %v1435_v6 }
  0x19   : > { %1353 = vmatprep.subr.bf16.mxu0 %v1436_v7  ;;  %1396 = vmatprep.subr.bf16.mxu1 %v1436_v7 }
  0x1c   : > { %1354 = vmatpush3.bf16.msra.mxu0 %v1436_v7  ;;  %1404 = vmatpush3.bf16.msra.mxu1 %v1436_v7 }
  0x1d   : > { %1355 = vmatprep.subr.bf16.mxu0 %v1437_v8  ;;  %1397 = vmatprep.subr.bf16.mxu1 %v1437_v8 }
  0x20   : > { %1356 = vmatpush3.bf16.msra.mxu0 %v1437_v8  ;;  %1405 = vmatpush3.bf16.msra.mxu1 %v1437_v8 }
  0x21   : > { %1357 = vmatprep.subr.bf16.mxu0 %v1438_v9  ;;  %1398 = vmatprep.subr.bf16.mxu1 %v1438_v9 }
  0x24   : > { %1358 = vmatpush3.bf16.msra.mxu0 %v1438_v9  ;;  %1406 = vmatpush3.bf16.msra.mxu1 %v1438_v9 }
  0x27   : > { %1360 = vmatmul.mubr.bf16.vlgmr.msra.gmra.mrb[0].mxu0 %v1441_v10  ;;  %1376 = vmatmul.mubr.bf16.vlgmr.msra.gmra.mrb[0].mxu1 %v1442_v11 }
  0x28   : > { %1363 = vmatprep.mubr.bf16.mxu0 %v1443_v12  ;;  %1379 = vmatprep.mubr.bf16.mxu1 %v1444_v13 }
  0x2f   : > { %1364 = vmatmul.mubr.bf16.gmra.mrb[4].mxu0 %v1445_v14  ;;  %1380 = vmatmul.mubr.bf16.gmra.mrb[4].mxu1 %v1446_v15 }
  0x30   : > { %1367 = vmatprep.mubr.bf16.mxu0 %v1447_v16  ;;  %1383 = vmatprep.mubr.bf16.mxu1 %v1448_v17 }
  0x37   : > { %1368 = vmatmul.mubr.bf16.gmra.mrb[8].mxu0 %v1449_v18  ;;  %1384 = vmatmul.mubr.bf16.gmra.mrb[8].mxu1 %v1450_v19 }
  0x38   : > { %1371 = vmatprep.mubr.bf16.mxu0 %v1451_v20  ;;  %1387 = vmatprep.mubr.bf16.mxu1 %v1452_v21 }
  0x3f   : > { %1372 = vmatmul.mubr.bf16.gmra.mrb[12].mxu0 %v1453_v22  ;;  %1388 = vmatmul.mubr.bf16.gmra.mrb[12].mxu1 %v1454_v23 }
  0xfa   : > { %v1361_v25 = vpop.f32.mrb[0].mxu0  ;;  %v1377_v26 = vpop.f32.mrb[0].mxu1 }
  0xfb   : > { %v789_v27 = vadd.f32 %v1361_v25, %v1570_v24  ;;  %v805_v28 = vadd.f32 %v1377_v26, %v1570_v24  ;;  %v554_v29 = vpop.f32.mrb[1].mxu0  ;;  %v618_v30 = vpop.f32.mrb[1].mxu1 }
  0xfc   : > { %v787_v31 = vadd.f32 %v1570_v24, %v554_v29  ;;  %v803_v32 = vadd.f32 %v1570_v24, %v618_v30  ;;  %v1362_v33 = vpop.f32.mrb[2].mxu0  ;;  %v1378_v34 = vpop.f32.mrb[2].mxu1 }
  0xfd   : > { %v790_v35 = vadd.f32 %v1362_v33, %v1570_v24  ;;  %v806_v36 = vadd.f32 %v1378_v34, %v1570_v24  ;;  %v557_v37 = vpop.f32.mrb[3].mxu0  ;;  %v621_v38 = vpop.f32.mrb[3].mxu1  ;;  %v821_v41 = vmax.f32 %v789_v27, 0.0  ;;  %v837_v42 = vmax.f32 %v805_v28, 0.0 }
  0xfe   : > { %v788_v39 = vadd.f32 %v1570_v24, %v557_v37  ;;  %v804_v40 = vadd.f32 %v1570_v24, %v621_v38  ;;  %v819_v45 = vmax.f32 %v787_v31, 0.0  ;;  %v835_v46 = vmax.f32 %v803_v32, 0.0 }
  0xff   : > { %v822_v43 = vmax.f32 %v790_v35, 0.0  ;;  %v838_v44 = vmax.f32 %v806_v36, 0.0 }
 0x100   : > { %v820_v47 = vmax.f32 %v788_v39, 0.0  ;;  %v836_v48 = vmax.f32 %v804_v40, 0.0 }
 0x101   : > { %v1232_v49 = vpack.c.bf16 %v822_v43, %v821_v41  ;;  %v1272_v50 = vpack.c.bf16 %v838_v44, %v837_v42 }
 0x102   : > { %v1227_v51 = vpack.c.bf16 %v820_v47, %v819_v45  ;;  %v1267_v52 = vpack.c.bf16 %v836_v48, %v835_v46  ;;  %v1365_v53 = vpop.f32.mrb[4].mxu0  ;;  %v1381_v54 = vpop.f32.mrb[4].mxu1 }
 0x103   : > { %1304 = vst [vmem:[%s1585_s17 + $0x8] sm:$0xff] %v1232_v49   ;;  %1312 = vst [vmem:[%s1585_s17 + $0x48] sm:$0xff] %v1272_v50   ;;  %v793_v55 = vadd.f32 %v1365_v53, %v1570_v24  ;;  %v809_v56 = vadd.f32 %v1381_v54, %v1570_v24  ;;  %v570_v57 = vpop.f32.mrb[5].mxu0  ;;  %v634_v58 = vpop.f32.mrb[5].mxu1 }
 0x104   : > { %1228 = vst [vmem:[%s1585_s17] sm:$0xff] %v1227_v51   ;;  %1311 = vst [vmem:[%s1585_s17 + $0x40] sm:$0xff] %v1267_v52   ;;  %v791_v59 = vadd.f32 %v1570_v24, %v570_v57  ;;  %v807_v60 = vadd.f32 %v1570_v24, %v634_v58  ;;  %v1366_v61 = vpop.f32.mrb[6].mxu0  ;;  %v1382_v62 = vpop.f32.mrb[6].mxu1 }
 0x105   : > { %v794_v63 = vadd.f32 %v1366_v61, %v1570_v24  ;;  %v810_v0 = vadd.f32 %v1382_v62, %v1570_v24  ;;  %v573_v1 = vpop.f32.mrb[7].mxu0  ;;  %v637_v2 = vpop.f32.mrb[7].mxu1  ;;  %v825_v5 = vmax.f32 %v793_v55, 0.0  ;;  %v841_v6 = vmax.f32 %v809_v56, 0.0 }
 0x106   : > { %v792_v3 = vadd.f32 %v1570_v24, %v573_v1  ;;  %v808_v4 = vadd.f32 %v1570_v24, %v637_v2  ;;  %v823_v9 = vmax.f32 %v791_v59, 0.0  ;;  %v839_v10 = vmax.f32 %v807_v60, 0.0 }
 0x107   : > { %v826_v7 = vmax.f32 %v794_v63, 0.0  ;;  %v842_v8 = vmax.f32 %v810_v0, 0.0 }
 0x108   : > { %v824_v11 = vmax.f32 %v792_v3, 0.0  ;;  %v840_v12 = vmax.f32 %v808_v4, 0.0 }
 0x109   : > { %v1242_v13 = vpack.c.bf16 %v826_v7, %v825_v5  ;;  %v1282_v14 = vpack.c.bf16 %v842_v8, %v841_v6 }
 0x10a   : > { %v1237_v15 = vpack.c.bf16 %v824_v11, %v823_v9  ;;  %v1277_v16 = vpack.c.bf16 %v840_v12, %v839_v10  ;;  %v1369_v17 = vpop.f32.mrb[8].mxu0  ;;  %v1385_v18 = vpop.f32.mrb[8].mxu1 }
 0x10b   : > { %1306 = vst [vmem:[%s1585_s17 + $0x18] sm:$0xff] %v1242_v13   ;;  %1314 = vst [vmem:[%s1585_s17 + $0x58] sm:$0xff] %v1282_v14   ;;  %v797_v19 = vadd.f32 %v1369_v17, %v1570_v24  ;;  %v813_v20 = vadd.f32 %v1385_v18, %v1570_v24  ;;  %v586_v21 = vpop.f32.mrb[9].mxu0  ;;  %v650_v22 = vpop.f32.mrb[9].mxu1 }
 0x10c   : > { %1305 = vst [vmem:[%s1585_s17 + $0x10] sm:$0xff] %v1237_v15   ;;  %1313 = vst [vmem:[%s1585_s17 + $0x50] sm:$0xff] %v1277_v16   ;;  %v795_v23 = vadd.f32 %v1570_v24, %v586_v21  ;;  %v811_v25 = vadd.f32 %v1570_v24, %v650_v22  ;;  %v1370_v26 = vpop.f32.mrb[10].mxu0  ;;  %v1386_v27 = vpop.f32.mrb[10].mxu1 }
 0x10d   : > { %v798_v28 = vadd.f32 %v1370_v26, %v1570_v24  ;;  %v814_v29 = vadd.f32 %v1386_v27, %v1570_v24  ;;  %v589_v30 = vpop.f32.mrb[11].mxu0  ;;  %v653_v31 = vpop.f32.mrb[11].mxu1  ;;  %v829_v34 = vmax.f32 %v797_v19, 0.0  ;;  %v845_v35 = vmax.f32 %v813_v20, 0.0 }
 0x10e   : > { %v796_v32 = vadd.f32 %v1570_v24, %v589_v30  ;;  %v812_v33 = vadd.f32 %v1570_v24, %v653_v31  ;;  %v827_v38 = vmax.f32 %v795_v23, 0.0  ;;  %v843_v39 = vmax.f32 %v811_v25, 0.0 }
 0x10f   : > { %v830_v36 = vmax.f32 %v798_v28, 0.0  ;;  %v846_v37 = vmax.f32 %v814_v29, 0.0 }
 0x110   : > { %v828_v40 = vmax.f32 %v796_v32, 0.0  ;;  %v844_v41 = vmax.f32 %v812_v33, 0.0 }
 0x111   : > { %v1252_v42 = vpack.c.bf16 %v830_v36, %v829_v34  ;;  %v1292_v43 = vpack.c.bf16 %v846_v37, %v845_v35 }
 0x112   : > { %v1247_v44 = vpack.c.bf16 %v828_v40, %v827_v38  ;;  %v1287_v45 = vpack.c.bf16 %v844_v41, %v843_v39  ;;  %v1373_v46 = vpop.f32.mrb[12].mxu0  ;;  %v1389_v47 = vpop.f32.mrb[12].mxu1 }
 0x113   : > { %1308 = vst [vmem:[%s1585_s17 + $0x28] sm:$0xff] %v1252_v42   ;;  %1316 = vst [vmem:[%s1585_s17 + $0x68] sm:$0xff] %v1292_v43   ;;  %v801_v48 = vadd.f32 %v1373_v46, %v1570_v24  ;;  %v817_v49 = vadd.f32 %v1389_v47, %v1570_v24  ;;  %v602_v50 = vpop.f32.mrb[13].mxu0  ;;  %v666_v51 = vpop.f32.mrb[13].mxu1 }
 0x114   : > { %1307 = vst [vmem:[%s1585_s17 + $0x20] sm:$0xff] %v1247_v44   ;;  %1315 = vst [vmem:[%s1585_s17 + $0x60] sm:$0xff] %v1287_v45   ;;  %v799_v52 = vadd.f32 %v1570_v24, %v602_v50  ;;  %v815_v53 = vadd.f32 %v1570_v24, %v666_v51  ;;  %v1374_v54 = vpop.f32.mrb[14].mxu0  ;;  %v1390_v55 = vpop.f32.mrb[14].mxu1 }
 0x115   : > { %v802_v56 = vadd.f32 %v1374_v54, %v1570_v24  ;;  %v818_v57 = vadd.f32 %v1390_v55, %v1570_v24  ;;  %v605_v58 = vpop.f32.mrb[15].mxu0  ;;  %v669_v59 = vpop.f32.mrb[15].mxu1  ;;  %v833_v62 = vmax.f32 %v801_v48, 0.0  ;;  %v849_v63 = vmax.f32 %v817_v49, 0.0 }
 0x116   : > { %v800_v60 = vadd.f32 %v1570_v24, %v605_v58  ;;  %v816_v61 = vadd.f32 %v1570_v24, %v669_v59  ;;  %v831_v2 = vmax.f32 %v799_v52, 0.0  ;;  %v847_v3 = vmax.f32 %v815_v53, 0.0 }
 0x117   : > { %v834_v0 = vmax.f32 %v802_v56, 0.0  ;;  %v850_v1 = vmax.f32 %v818_v57, 0.0 }
 0x118   : > { %v832_v4 = vmax.f32 %v800_v60, 0.0  ;;  %v848_v5 = vmax.f32 %v816_v61, 0.0 }
 0x119   : > { %v1262_v6 = vpack.c.bf16 %v834_v0, %v833_v62  ;;  %v1302_v7 = vpack.c.bf16 %v850_v1, %v849_v63 }
 0x11a   : > { %v1257_v8 = vpack.c.bf16 %v832_v4, %v831_v2  ;;  %v1297_v9 = vpack.c.bf16 %v848_v5, %v847_v3 }
 0x11b   : > { %1310 = vst [vmem:[%s1585_s17 + $0x38] sm:$0xff] %v1262_v6   ;;  %1318 = vst [vmem:[%s1585_s17 + $0x78] sm:$0xff] %v1302_v7  }
 0x11c   : > { %1309 = vst [vmem:[%s1585_s17 + $0x30] sm:$0xff] %v1257_v8   ;;  %1317 = vst [vmem:[%s1585_s17 + $0x70] sm:$0xff] %v1297_v9  }
 0x11d PF: > { %s13_s14 = sadd.s32 1, %s1477_s14   ;;  %s1640_s12 = smov %s1473_s13 }
 0x11e   : > { %p10_p5 = scmp.ge.s32.totalorder %s13_s14, 4   ;;  %s1641_s13 = smov %s1643_s15 }
 0x120   :  { %12 = sbr.rel (!%p10_p5) target bundleno = 2 (0x2), region = 76 }

// kernel: esac_scnet_forward.18
= control target key start
LH: loop header
LB: loop body
LE: loop exit
PB: predicated region body
PF: predicated region fallthrough
CT: control target
= control target key end

     0   :  { %s1276_s1 = inlined_call_operand.vmem [shape: bf16[384,128], index: 1, kind: input, shape index: {}]   ;;  %s1277_s0 = inlined_call_operand.vmem [shape: bf16[128,384], index: 0, kind: input, shape index: {}]   ;;  %s1278_s2 = inlined_call_operand.vmem [shape: f32[1,128], index: 2, kind: input, shape index: {}]   ;;  %s1279_s3 = inlined_call_operand.vmem [shape: bf16[128,128], index: 3, kind: output, shape index: {}]  }
   0x1   :  { %v1011_v0 = vld [vmem:[%s1276_s1 + $0x40] sm:$0xff]   ;;  %v1014_v3 = vld [vmem:[%s1276_s1 + $0x48] sm:$0xff]   ;;  %v1017_v6 = vld [vmem:[%s1276_s1 + $0x50] sm:$0xff]  }
   0x2   :  { %v1012_v1 = vld [vmem:[%s1276_s1] sm:$0xff]   ;;  %899 = vmatprep.subr.bf16.mxu0 %v1011_v0  ;;  %v1015_v4 = vld [vmem:[%s1276_s1 + $0x8] sm:$0xff]   ;;  %v1018_v7 = vld [vmem:[%s1276_s1 + $0x10] sm:$0xff]  }
   0x3   :  { %v1013_v2 = vld [vmem:[%s1276_s1 + $0x80] sm:$0xff]   ;;  %900 = vmatpush3.bf16.msra.mxu0 %v1012_v1  ;;  %v1016_v5 = vld [vmem:[%s1276_s1 + $0x88] sm:$0xff]   ;;  %v1019_v8 = vld [vmem:[%s1276_s1 + $0x90] sm:$0xff]  }
   0x4   :  { %979 = vmatprep.subr.bf16.mxu1 %v1013_v2  ;;  %901 = vmatprep.subr.bf16.mxu0 %v1014_v3  ;;  %v1020_v9 = vld [vmem:[%s1276_s1 + $0x58] sm:$0xff]   ;;  %v1023_v12 = vld [vmem:[%s1276_s1 + $0x60] sm:$0xff]   ;;  %v1026_v15 = vld [vmem:[%s1276_s1 + $0x68] sm:$0xff]  }
   0x5   :  { %980 = vmatpush3.bf16.msra.mxu1 %v1013_v2  ;;  %v1021_v10 = vld [vmem:[%s1276_s1 + $0x18] sm:$0xff]   ;;  %v1025_v13 = vld [vmem:[%s1276_s1 + $0xa0] sm:$0xff]   ;;  %v1028_v16 = vld [vmem:[%s1276_s1 + $0xa8] sm:$0xff]  }
   0x6   :  { %981 = vmatprep.subr.bf16.mxu1 %v1016_v5  ;;  %v1022_v11 = vld [vmem:[%s1276_s1 + $0x98] sm:$0xff]   ;;  %v1024_v14 = vld [vmem:[%s1276_s1 + $0x20] sm:$0xff]   ;;  %v1027_v17 = vld [vmem:[%s1276_s1 + $0x28] sm:$0xff]  }
   0x7   :  { %902 = vmatpush3.bf16.msra.mxu0 %v1015_v4  ;;  %v1029_v18 = vld [vmem:[%s1276_s1 + $0x70] sm:$0xff]   ;;  %v1032_v21 = vld [vmem:[%s1276_s1 + $0x78] sm:$0xff]   ;;  %v1035_v26 = vld [vmem:[%s1277_s0] ss:$12 sps:$4 sm:$0xff]  }
   0x8   :  { %903 = vmatprep.subr.bf16.mxu0 %v1017_v6  ;;  %v1030_v19 = vld [vmem:[%s1276_s1 + $0x30] sm:$0xff]   ;;  %v1034_v22 = vld [vmem:[%s1276_s1 + $0xb8] sm:$0xff]   ;;  %v1039_v28 = vld [vmem:[%s1277_s0 + $0x20] ss:$12 sps:$4 sm:$0xff]  }
   0x9   :  { %982 = vmatpush3.bf16.msra.mxu1 %v1016_v5  ;;  %v1031_v20 = vld [vmem:[%s1276_s1 + $0xb0] sm:$0xff]   ;;  %v1033_v25 = vld [vmem:[%s1276_s1 + $0x38] sm:$0xff]   ;;  %v1055_v36 = vld [vmem:[%s1277_s0 + $0x80] ss:$12 sps:$4 sm:$0xff]  }
   0xa   :  { %983 = vmatprep.subr.bf16.mxu1 %v1019_v8  ;;  %v1037_v23 = vld [vmem:[%s1277_s0 + $0x4] ss:$12 sps:$4 sm:$0xff]   ;;  %v1038_v24 = vld [vmem:[%s1277_s0 + $0x8] ss:$12 sps:$4 sm:$0xff]   ;;  %v1048_v35 = vld [vmem:[%s1277_s0 + $0x4c] ss:$12 sps:$4 sm:$0xff]  }
   0xb   :  { %904 = vmatpush3.bf16.msra.mxu0 %v1018_v7  ;;  %435 = vmatprep.mubr.bf16.mxu0 %v1037_v23  ;;  %v1040_v27 = vld [vmem:[%s1277_s0 + $0x1c] ss:$12 sps:$4 sm:$0xff]   ;;  %v1046_v29 = vld [vmem:[%s1277_s0 + $0x38] ss:$12 sps:$4 sm:$0xff]   ;;  %v1043_v31 = vld [vmem:[%s1277_s0 + $0x34] ss:$12 sps:$4 sm:$0xff]  }
   0xc   :  { %905 = vmatprep.subr.bf16.mxu0 %v1020_v9  ;;  %995 = vmatprep.mubr.bf16.mxu1 %v1038_v24  ;;  %v1042_v30 = vld [vmem:[%s1277_s0 + $0x18] ss:$12 sps:$4 sm:$0xff]   ;;  %v1047_v32 = vld [vmem:[%s1277_s0 + $0x50] ss:$12 sps:$4 sm:$0xff]   ;;  %v1054_v33 = vld [vmem:[%s1277_s0 + $0x68] ss:$12 sps:$4 sm:$0xff]  }
   0xd   :  { %984 = vmatpush3.bf16.msra.mxu1 %v1019_v8  ;;  %v1045_v34 = vld [vmem:[%s1277_s0 + $0x30] ss:$12 sps:$4 sm:$0xff]   ;;  %v1062_v37 = vld [vmem:[%s1277_s0 + $0x98] ss:$12 sps:$4 sm:$0xff]   ;;  %v1050_v38 = vld [vmem:[%s1277_s0 + $0x48] ss:$12 sps:$4 sm:$0xff]  }
   0xe   :  { %985 = vmatprep.subr.bf16.mxu1 %v1022_v11  ;;  %v1051_v39 = vld [vmem:[%s1277_s0 + $0x64] ss:$12 sps:$4 sm:$0xff]   ;;  %v1053_v41 = vld [vmem:[%s1277_s0 + $0x60] ss:$12 sps:$4 sm:$0xff]   ;;  %v1056_v42 = vld [vmem:[%s1277_s0 + $0x7c] ss:$12 sps:$4 sm:$0xff]  }
   0xf   :  { %906 = vmatpush3.bf16.msra.mxu0 %v1021_v10  ;;  %v1063_v40 = vld [vmem:[%s1277_s0 + $0xb0] ss:$12 sps:$4 sm:$0xff]   ;;  %v1058_v43 = vld [vmem:[%s1277_s0 + $0x78] ss:$12 sps:$4 sm:$0xff]   ;;  %v1059_v44 = vld [vmem:[%s1277_s0 + $0x94] ss:$12 sps:$4 sm:$0xff]  }
  0x10   :  { %907 = vmatprep.subr.bf16.mxu0 %v1023_v12  ;;  %v1061_v45 = vld [vmem:[%s1277_s0 + $0x90] ss:$12 sps:$4 sm:$0xff]   ;;  %v1064_v46 = vld [vmem:[%s1277_s0 + $0xac] ss:$12 sps:$4 sm:$0xff]   ;;  %v1066_v47 = vld [vmem:[%s1277_s0 + $0xa8] ss:$12 sps:$4 sm:$0xff]  }
  0x11   :  { %986 = vmatpush3.bf16.msra.mxu1 %v1022_v11  ;;  %v1234_v55 = vld [vmem:[%s1278_s2] ss:$0 sm:$0xff] }
  0x12   :  { %987 = vmatprep.subr.bf16.mxu1 %v1025_v13 }
  0x13   :  { %908 = vmatpush3.bf16.msra.mxu0 %v1024_v14 }
  0x14   :  { %909 = vmatprep.subr.bf16.mxu0 %v1026_v15 }
  0x15   :  { %988 = vmatpush3.bf16.msra.mxu1 %v1025_v13 }
  0x16   :  { %989 = vmatprep.subr.bf16.mxu1 %v1028_v16 }
  0x17   :  { %910 = vmatpush3.bf16.msra.mxu0 %v1027_v17 }
  0x18   :  { %911 = vmatprep.subr.bf16.mxu0 %v1029_v18 }
  0x19   :  { %990 = vmatpush3.bf16.msra.mxu1 %v1028_v16 }
  0x1a   :  { %991 = vmatprep.subr.bf16.mxu1 %v1031_v20 }
  0x1b   :  { %912 = vmatpush3.bf16.msra.mxu0 %v1030_v19 }
  0x1c   :  { %913 = vmatprep.subr.bf16.mxu0 %v1032_v21 }
  0x1d   :  { %992 = vmatpush3.bf16.msra.mxu1 %v1031_v20 }
  0x1e   :  { %993 = vmatprep.subr.bf16.mxu1 %v1034_v22 }
  0x1f   :  { %914 = vmatpush3.bf16.msra.mxu0 %v1033_v25 }
  0x21   :  { %994 = vmatpush3.bf16.msra.mxu1 %v1034_v22 }
  0x22   :  { %436 = vmatmul.mubr.bf16.vlgmr.msra.gmra.mrb[0].mxu0 %v1035_v26 }
  0x23   :  { %443 = vmatprep.mubr.bf16.mxu0 %v1040_v27 }
  0x24   :  { %996 = vmatmul.mubr.bf16.vlgmr.msra.gmra.mrb[0].mxu1 %v1039_v28 }
  0x25   :  { %999 = vmatprep.mubr.bf16.mxu1 %v1046_v29 }
  0x2a   :  { %444 = vmatmul.mubr.bf16.gmra.mrb[4].mxu0 %v1042_v30 }
  0x2b   :  { %451 = vmatprep.mubr.bf16.mxu0 %v1043_v31 }
  0x2c   :  { %1000 = vmatmul.mubr.bf16.gmra.mrb[4].mxu1 %v1047_v32 }
  0x2d   :  { %1003 = vmatprep.mubr.bf16.mxu1 %v1054_v33 }
  0x32   :  { %452 = vmatmul.mubr.bf16.gmra.mrb[8].mxu0 %v1045_v34 }
  0x33   :  { %459 = vmatprep.mubr.bf16.mxu0 %v1048_v35 }
  0x34   :  { %1004 = vmatmul.mubr.bf16.gmra.mrb[8].mxu1 %v1055_v36 }
  0x35   :  { %1007 = vmatprep.mubr.bf16.mxu1 %v1062_v37 }
  0x3a   :  { %460 = vmatmul.mubr.bf16.gmra.mrb[12].mxu0 %v1050_v38 }
  0x3b   :  { %467 = vmatprep.mubr.bf16.mxu0 %v1051_v39 }
  0x3c   :  { %1008 = vmatmul.mubr.bf16.gmra.mrb[12].mxu1 %v1063_v40 }
  0x42   :  { %468 = vmatmul.mubr.bf16.gmra.mrb[16].mxu0 %v1053_v41 }
  0x43   :  { %475 = vmatprep.mubr.bf16.mxu0 %v1056_v42 }
  0x4a   :  { %476 = vmatmul.mubr.bf16.gmra.mrb[20].mxu0 %v1058_v43 }
  0x4b   :  { %483 = vmatprep.mubr.bf16.mxu0 %v1059_v44 }
  0x52   :  { %484 = vmatmul.mubr.bf16.gmra.mrb[24].mxu0 %v1061_v45 }
  0x53   :  { %491 = vmatprep.mubr.bf16.mxu0 %v1064_v46 }
  0x5a   :  { %492 = vmatmul.mubr.bf16.gmra.mrb[28].mxu0 %v1066_v47 }
  0xf5   :  { %v915_v48 = vpop.f32.mrb[0].mxu0 }
  0xf6   :  { %v916_v49 = vpop.f32.mrb[1].mxu0 }
  0xf7   :  { %v917_v50 = vadd.f32 %v916_v49, %v915_v48  ;;  %v918_v51 = vpop.f32.mrb[2].mxu0  ;;  %v997_v52 = vpop.f32.mrb[0].mxu1 }
  0xf8   :  { %v919_v53 = vpop.f32.mrb[3].mxu0  ;;  %v534_v54 = vpop.f32.mrb[1].mxu1 }
  0xf9   :  { %v920_v56 = vadd.f32 %v919_v53, %v918_v51  ;;  %v535_v57 = vadd.f32 %v917_v50, %v534_v54  ;;  %v998_v58 = vpop.f32.mrb[2].mxu1 }
  0xfa   :  { %v537_v59 = vpop.f32.mrb[3].mxu1 }
  0xfb   :  { %v655_v60 = vadd.f32 %v1234_v55, %v535_v57  ;;  %v538_v61 = vadd.f32 %v920_v56, %v537_v59 }
  0xfd   :  { %v656_v62 = vadd.f32 %v1234_v55, %v538_v61  ;;  %v921_v63 = vpop.f32.mrb[4].mxu0  ;;  %v671_v1 = vmax.f32 %v655_v60, 0.0 }
  0xfe   :  { %v922_v0 = vpop.f32.mrb[5].mxu0 }
  0xff   :  { %v672_v2 = vmax.f32 %v656_v62, 0.0  ;;  %v923_v3 = vadd.f32 %v922_v0, %v921_v63  ;;  %v924_v4 = vpop.f32.mrb[6].mxu0  ;;  %v1001_v5 = vpop.f32.mrb[4].mxu1 }
 0x100   :  { %v925_v6 = vpop.f32.mrb[7].mxu0  ;;  %v550_v7 = vpop.f32.mrb[5].mxu1 }
 0x101   :  { %v855_v8 = vpack.c.bf16 %v672_v2, %v671_v1  ;;  %v543_v9 = vadd.f32 %v997_v52, %v923_v3  ;;  %v926_v10 = vadd.f32 %v925_v6, %v924_v4  ;;  %v1002_v11 = vpop.f32.mrb[6].mxu1 }
 0x102   :  { %v553_v12 = vpop.f32.mrb[7].mxu1 }
 0x103   :  { %856 = vst [vmem:[%s1279_s3] sm:$0xff] %v855_v8   ;;  %v657_v13 = vadd.f32 %v1234_v55, %v543_v9  ;;  %v546_v14 = vadd.f32 %v998_v58, %v926_v10 }
 0x105   :  { %v658_v15 = vadd.f32 %v1234_v55, %v546_v14  ;;  %v927_v16 = vpop.f32.mrb[8].mxu0  ;;  %v673_v18 = vmax.f32 %v657_v13, 0.0 }
 0x106   :  { %v928_v17 = vpop.f32.mrb[9].mxu0 }
 0x107   :  { %v674_v19 = vmax.f32 %v658_v15, 0.0  ;;  %v929_v20 = vadd.f32 %v928_v17, %v927_v16  ;;  %v930_v21 = vpop.f32.mrb[10].mxu0  ;;  %v1005_v22 = vpop.f32.mrb[8].mxu1 }
 0x108   :  { %v931_v23 = vpop.f32.mrb[11].mxu0  ;;  %v566_v24 = vpop.f32.mrb[9].mxu1 }
 0x109   :  { %v860_v25 = vpack.c.bf16 %v674_v19, %v673_v18  ;;  %v932_v26 = vadd.f32 %v931_v23, %v930_v21  ;;  %v551_v27 = vadd.f32 %v929_v20, %v550_v7  ;;  %v1006_v28 = vpop.f32.mrb[10].mxu1 }
 0x10a   :  { %v569_v29 = vpop.f32.mrb[11].mxu1 }
 0x10b   :  { %892 = vst [vmem:[%s1279_s3 + $0x8] sm:$0xff] %v860_v25   ;;  %v659_v30 = vadd.f32 %v1234_v55, %v551_v27  ;;  %v554_v31 = vadd.f32 %v932_v26, %v553_v12 }
 0x10d   :  { %v660_v32 = vadd.f32 %v1234_v55, %v554_v31  ;;  %v933_v33 = vpop.f32.mrb[12].mxu0  ;;  %v675_v35 = vmax.f32 %v659_v30, 0.0 }
 0x10e   :  { %v934_v34 = vpop.f32.mrb[13].mxu0 }
 0x10f   :  { %v676_v36 = vmax.f32 %v660_v32, 0.0  ;;  %v935_v37 = vadd.f32 %v934_v34, %v933_v33  ;;  %v936_v38 = vpop.f32.mrb[14].mxu0  ;;  %v1009_v39 = vpop.f32.mrb[12].mxu1 }
 0x110   :  { %v937_v40 = vpop.f32.mrb[15].mxu0  ;;  %v582_v41 = vpop.f32.mrb[13].mxu1 }
 0x111   :  { %v865_v42 = vpack.c.bf16 %v676_v36, %v675_v35  ;;  %v559_v43 = vadd.f32 %v1001_v5, %v935_v37  ;;  %v938_v44 = vadd.f32 %v937_v40, %v936_v38  ;;  %v1010_v45 = vpop.f32.mrb[14].mxu1 }
 0x112   :  { %v585_v46 = vpop.f32.mrb[15].mxu1 }
 0x113   :  { %893 = vst [vmem:[%s1279_s3 + $0x10] sm:$0xff] %v865_v42   ;;  %v661_v47 = vadd.f32 %v1234_v55, %v559_v43  ;;  %v562_v48 = vadd.f32 %v1002_v11, %v938_v44 }
 0x115   :  { %v662_v49 = vadd.f32 %v1234_v55, %v562_v48  ;;  %v939_v50 = vpop.f32.mrb[16].mxu0  ;;  %v677_v52 = vmax.f32 %v661_v47, 0.0 }
 0x116   :  { %v940_v51 = vpop.f32.mrb[17].mxu0 }
 0x117   :  { %v678_v53 = vmax.f32 %v662_v49, 0.0  ;;  %v941_v54 = vadd.f32 %v940_v51, %v939_v50  ;;  %v942_v56 = vpop.f32.mrb[18].mxu0 }
 0x118   :  { %v943_v57 = vpop.f32.mrb[19].mxu0 }
 0x119   :  { %v870_v58 = vpack.c.bf16 %v678_v53, %v677_v52  ;;  %v944_v59 = vadd.f32 %v943_v57, %v942_v56  ;;  %v567_v60 = vadd.f32 %v941_v54, %v566_v24 }
 0x11b   :  { %894 = vst [vmem:[%s1279_s3 + $0x18] sm:$0xff] %v870_v58   ;;  %v663_v61 = vadd.f32 %v1234_v55, %v567_v60  ;;  %v570_v62 = vadd.f32 %v944_v59, %v569_v29 }
 0x11d   :  { %v664_v63 = vadd.f32 %v1234_v55, %v570_v62  ;;  %v945_v0 = vpop.f32.mrb[20].mxu0  ;;  %v679_v2 = vmax.f32 %v663_v61, 0.0 }
 0x11e   :  { %v946_v1 = vpop.f32.mrb[21].mxu0 }
 0x11f   :  { %v680_v3 = vmax.f32 %v664_v63, 0.0  ;;  %v947_v4 = vadd.f32 %v946_v1, %v945_v0  ;;  %v948_v5 = vpop.f32.mrb[22].mxu0 }
 0x120   :  { %v949_v6 = vpop.f32.mrb[23].mxu0 }
 0x121   :  { %v875_v7 = vpack.c.bf16 %v680_v3, %v679_v2  ;;  %v575_v8 = vadd.f32 %v1005_v22, %v947_v4  ;;  %v950_v9 = vadd.f32 %v949_v6, %v948_v5 }
 0x123   :  { %895 = vst [vmem:[%s1279_s3 + $0x20] sm:$0xff] %v875_v7   ;;  %v665_v10 = vadd.f32 %v1234_v55, %v575_v8  ;;  %v578_v11 = vadd.f32 %v1006_v28, %v950_v9 }
 0x125   :  { %v666_v12 = vadd.f32 %v1234_v55, %v578_v11  ;;  %v951_v13 = vpop.f32.mrb[24].mxu0  ;;  %v681_v15 = vmax.f32 %v665_v10, 0.0 }
 0x126   :  { %v952_v14 = vpop.f32.mrb[25].mxu0 }
 0x127   :  { %v682_v16 = vmax.f32 %v666_v12, 0.0  ;;  %v953_v17 = vadd.f32 %v952_v14, %v951_v13  ;;  %v954_v18 = vpop.f32.mrb[26].mxu0 }
 0x128   :  { %v955_v19 = vpop.f32.mrb[27].mxu0 }
 0x129   :  { %v880_v20 = vpack.c.bf16 %v682_v16, %v681_v15  ;;  %v956_v21 = vadd.f32 %v955_v19, %v954_v18  ;;  %v583_v22 = vadd.f32 %v953_v17, %v582_v41 }
 0x12b   :  { %896 = vst [vmem:[%s1279_s3 + $0x28] sm:$0xff] %v880_v20   ;;  %v667_v23 = vadd.f32 %v1234_v55, %v583_v22  ;;  %v586_v24 = vadd.f32 %v956_v21, %v585_v46 }
 0x12d   :  { %v668_v25 = vadd.f32 %v1234_v55, %v586_v24  ;;  %v957_v26 = vpop.f32.mrb[28].mxu0  ;;  %v683_v28 = vmax.f32 %v667_v23, 0.0 }
 0x12e   :  { %v958_v27 = vpop.f32.mrb[29].mxu0 }
 0x12f   :  { %v684_v29 = vmax.f32 %v668_v25, 0.0  ;;  %v959_v30 = vadd.f32 %v958_v27, %v957_v26  ;;  %v960_v31 = vpop.f32.mrb[30].mxu0 }
 0x130   :  { %v961_v32 = vpop.f32.mrb[31].mxu0 }
 0x131   :  { %v885_v33 = vpack.c.bf16 %v684_v29, %v683_v28  ;;  %v591_v34 = vadd.f32 %v1009_v39, %v959_v30  ;;  %v962_v35 = vadd.f32 %v961_v32, %v960_v31 }
 0x133   :  { %897 = vst [vmem:[%s1279_s3 + $0x30] sm:$0xff] %v885_v33   ;;  %v669_v36 = vadd.f32 %v1234_v55, %v591_v34  ;;  %v594_v37 = vadd.f32 %v1010_v45, %v962_v35 }
 0x135   :  { %v670_v38 = vadd.f32 %v1234_v55, %v594_v37  ;;  %v685_v40 = vmax.f32 %v669_v36, 0.0 }
 0x137   :  { %v686_v41 = vmax.f32 %v670_v38, 0.0 }
 0x139   :  { %v890_v42 = vpack.c.bf16 %v686_v41, %v685_v40 }
 0x13b   :  { %898 = vst [vmem:[%s1279_s3 + $0x38] sm:$0xff] %v890_v42  }

// kernel: esac_scnet_forward.19
= control target key start
LH: loop header
LB: loop body
LE: loop exit
PB: predicated region body
PF: predicated region fallthrough
CT: control target
= control target key end

     0   :  { %s796_s12 = smov 0   ;;  %s798_s13 = smov 0   ;;  %s889_s0 = inlined_call_operand.vmem [shape: bf16[32,640], index: 0, kind: input, shape index: {}]   ;;  %s890_s1 = inlined_call_operand.vmem [shape: bf16[640,128], index: 1, kind: input, shape index: {}]   ;;  %s891_s2 = inlined_call_operand.vmem [shape: f32[1,128], index: 2, kind: input, shape index: {}]   ;;  %s892_s3 = inlined_call_operand.vmem [shape: bf16[32,128], index: 3, kind: output, shape index: {}]  }
   0x1   :  { %s800_s14 = smov 0   ;;  %s802_s15 = smov 0  }
   0x2   :  { %s804_s16 = smov 0  }
   0x3 LB: > { %s25_s17 = sadd.s32 1, %s769_s15  ;;  %p48_p1 = scmp.ne.s32.totalorder %s761_s13, %s757_s12  ;;  %s773_s16 = sphi %s804_s16, %s13_s16   ;;  %s769_s15 = sphi %s802_s15, %s896_s15   ;;  %s765_s14 = sphi %s800_s14, %s895_s14   ;;  %s761_s13 = sphi %s798_s13, %s894_s13   ;;  %s757_s12 = sphi %s796_s12, %s893_s12  }
   0x4   : > { %p26_p0 = scmp.ge.s32.totalorder %s25_s17, 5  ;;  %p49_p2 = scmp.eq.s32.totalorder %s773_s16, 0 }
   0x5   : > { %s41_s19 = sadd.s32 1, %s761_s13  ;;  %p611_p5 = scmp.ge.s32.totalorder %s773_s16, 5 }
   0x6   : > { %s898_s17 = smov (%p26_p0, %s25_s17), 0  ;;  %p50_p3 = por %p49_p2, %p48_p1 }
   0x7   : > { %s37_s18 = ssub.s32 %s769_s15, %s898_s17  ;;  %162 = sbr.rel (%p611_p5) target bundleno = 21 (0x15), region = 20 }
   0x8   : > { %p39_p4 = scmp.eq.s32.totalorder %s37_s18, 0 }
   0xa   : > { %s831_s20 = scalar_select %p39_p4, %s761_s13, %s41_s19  }
   0xe   : > { %165 = sbr.rel (!%p50_p3) target bundleno = 21 (0x15), region = 24  ;;  %s167_s21 = sand.u32 (%p50_p3), 1, %s761_s13  }
   0xf   : > { %s613_s22 = sshll.u32 (%p50_p3), %s769_s15, 2  ;;  %s612_s23 = sshll.u32 (%p50_p3), %s167_s21, 4 }
  0x10   : > { %s174_s26 = scalar_lea.vmem (%p50_p3), %s889_s0, %s613_s22  ;;  %s169_s27 = scalar_lea.vmem (%p50_p3), [#allocation3], %s612_s23 }
  0x11   : > { %v190_v0 = vld [vmem:[%s174_s26] sm:$0xf] (%p50_p3)  ;;  %v192_v1 = vld [vmem:[%s174_s26 + $0x14] sm:$0xf] (%p50_p3)  ;;  %v194_v2 = vld [vmem:[%s174_s26 + $0x28] sm:$0xf] (%p50_p3) }
  0x12   : > { %191 = vst [vmem:[%s169_s27] sm:$0xf] (%p50_p3), %v190_v0  ;;  %193 = vst [vmem:[%s169_s27 + $0x4] sm:$0xf] (%p50_p3), %v192_v1  ;;  %v196_v3 = vld [vmem:[%s174_s26 + $0x3c] sm:$0xf] (%p50_p3) }
  0x13   : > { %195 = vst [vmem:[%s169_s27 + $0x8] sm:$0xf] (%p50_p3), %v194_v2  ;;  %197 = vst [vmem:[%s169_s27 + $0xc] sm:$0xf] (%p50_p3), %v196_v3 }
  0x15 PF: > { %p614_p6 = scmp.ge.s32.totalorder %s773_s16, 1  ;;  %p239_p7 = scmp.lt.s32.totalorder %s773_s16, 6 }
  0x17   : > { %p240_p8 = pnand %p614_p6, %p239_p7 }
  0x18   : > { %s246_s28 = sand.u32 (!%p240_p8), 1, %s757_s12   ;;  %s616_s29 = sshll.u32 (!%p240_p8), %s765_s14, 4 }
  0x19   : > { %243 = sbr.rel (%p240_p8) target bundleno = 304 (0x130), region = 69  ;;  %s843_s30 = sshll.u32 (!%p240_p8), %s246_s28, 4 }
  0x1a   : > { %p285_p9 = scmp.lt.s32.totalorder (!%p240_p8), %s616_s29, 79  ;;  %s248_s8 = scalar_lea.vmem (!%p240_p8), [#allocation3], %s843_s30 }
  0x1b   : > { %p618_p10 = scmp.ne.s32.totalorder (!%p240_p8), %s765_s14, 0 }
  0x20   : > { %s900_s29 = smov (!%p285_p9, %s616_s29), 79  ;;  %309 = sbr.rel (%p618_p10) target bundleno = 39 (0x27), region = 77 }
  0x21   : > { %s617_s4 = sshll.u32 %s900_s29, 2  ;;  %v775_v4 = vmov (!%p618_p10), 0.0  }
  0x22   : > { %s848_s7 = scalar_lea.vmem %s890_s1, %s617_s4  ;;  %310 = vst [vmem:[#allocation2] sm:$0xff] (!%p618_p10), %v775_v4  ;;  %311 = vst [vmem:[#allocation2 + $0x8] sm:$0xff] (!%p618_p10), %v775_v4 }
  0x23   : > { %312 = vst [vmem:[#allocation2 + $0x10] sm:$0xff] (!%p618_p10), %v775_v4  ;;  %313 = vst [vmem:[#allocation2 + $0x18] sm:$0xff] (!%p618_p10), %v775_v4 }
  0x27 PF: > { %v725_v5 = vld [vmem:[%s848_s7] sm:$0xff]   ;;  %v726_v6 = vld [vmem:[%s848_s7 + $0x8] sm:$0xff]   ;;  %v727_v7 = vld [vmem:[%s848_s7 + $0x10] sm:$0xff]   ;;  %p629_p11 = scmp.ne.s32.totalorder %s765_s14, 4 }
  0x28   : > { %664 = vmatprep.subr.bf16.mxu0 %v725_v5  ;;  %v728_v8 = vld [vmem:[%s848_s7 + $0x18] sm:$0xff]   ;;  %v733_v9 = vld [vmem:[%s248_s8] sm:$0xff]   ;;  %v730_v11 = vld [vmem:[%s848_s7 + $0x28] sm:$0xff]  }
  0x29   : > { %665 = vmatpush3.bf16.msra.mxu0 %v725_v5  ;;  %680 = vmatprep.mubr.bf16.mxu0 %v733_v9  ;;  %v729_v10 = vld [vmem:[%s848_s7 + $0x20] sm:$0xff]   ;;  %v731_v12 = vld [vmem:[%s848_s7 + $0x30] sm:$0xff]   ;;  %v732_v13 = vld [vmem:[%s848_s7 + $0x38] sm:$0xff]  }
  0x2a   : > { %666 = vmatprep.subr.bf16.mxu0 %v726_v6  ;;  %v734_v14 = vld [vmem:[%s248_s8 + $0x8] sm:$0xff]   ;;  %v316_v15 = vld [vmem:[#allocation2 + $0x10] sm:$0xff]  ;;  %v314_v16 = vld [vmem:[#allocation2] sm:$0xff] }
  0x2b   : > { %v317_v18 = vld [vmem:[#allocation2 + $0x18] sm:$0xff]  ;;  %v315_v21 = vld [vmem:[#allocation2 + $0x8] sm:$0xff]  ;;  %v630_v29 = vld [vmem:[%s891_s2] ss:$0 sm:$0xff] (!%p629_p11) }
  0x2d   : > { %667 = vmatpush3.bf16.msra.mxu0 %v726_v6 }
  0x2e   : > { %668 = vmatprep.subr.bf16.mxu0 %v727_v7 }
  0x31   : > { %669 = vmatpush3.bf16.msra.mxu0 %v727_v7 }
  0x32   : > { %670 = vmatprep.subr.bf16.mxu0 %v728_v8 }
  0x35   : > { %671 = vmatpush3.bf16.msra.mxu0 %v728_v8 }
  0x36   : > { %672 = vmatprep.subr.bf16.mxu0 %v729_v10 }
  0x39   : > { %673 = vmatpush3.bf16.msra.mxu0 %v729_v10 }
  0x3a   : > { %674 = vmatprep.subr.bf16.mxu0 %v730_v11 }
  0x3d   : > { %675 = vmatpush3.bf16.msra.mxu0 %v730_v11 }
  0x3e   : > { %676 = vmatprep.subr.bf16.mxu0 %v731_v12 }
  0x41   : > { %677 = vmatpush3.bf16.msra.mxu0 %v731_v12 }
  0x42   : > { %678 = vmatprep.subr.bf16.mxu0 %v732_v13 }
  0x45   : > { %679 = vmatpush3.bf16.msra.mxu0 %v732_v13 }
  0x48   : > { %681 = vmatmul.mubr.bf16.vlgmr.msra.gmra.mrb[0].mxu0 %v734_v14 }
 0x11b   : > { %v682_v17 = vpop.f32.mrb[0].mxu0  ;;  %458 = sbr.rel (%p629_p11) target bundleno = 304 (0x130), region = 81 }
 0x11c   : > { %v449_v19 = vadd.f32 %v682_v17, %v316_v15  ;;  %v432_v20 = vpop.f32.mrb[1].mxu0 }
 0x11d   : > { %v447_v22 = vadd.f32 %v432_v20, %v314_v16  ;;  %v683_v23 = vpop.f32.mrb[2].mxu0 }
 0x11e   : > { %453 = vst [vmem:[#allocation2 + $0x10] sm:$0xff] %v449_v19  ;;  %v450_v24 = vadd.f32 %v683_v23, %v317_v18  ;;  %v435_v25 = vpop.f32.mrb[3].mxu0 }
 0x11f   : > { %451 = vst [vmem:[#allocation2] sm:$0xff] %v447_v22  ;;  %v448_v26 = vadd.f32 %v435_v25, %v315_v21 }
 0x120   : > { %454 = vst [vmem:[#allocation2 + $0x18] sm:$0xff] %v450_v24 }
 0x121   : > { %452 = vst [vmem:[#allocation2 + $0x8] sm:$0xff] %v448_v26 }
 0x125   : > { %v461_v32 = vld [vmem:[#allocation2 + $0x10] sm:$0xff] }
 0x126   : > { %v459_v27 = vld [vmem:[#allocation2] sm:$0xff]  ;;  %v472_v34 = vadd.f32 %v630_v29, %v461_v32 }
 0x127   : > { %v470_v30 = vadd.f32 %v630_v29, %v459_v27  ;;  %v462_v33 = vld [vmem:[#allocation2 + $0x18] sm:$0xff] }
 0x128   : > { %v460_v28 = vld [vmem:[#allocation2 + $0x8] sm:$0xff]  ;;  %v473_v35 = vadd.f32 %v630_v29, %v462_v33  ;;  %v476_v38 = vmax.f32 %v472_v34, 0.0 }
 0x129   : > { %v471_v31 = vadd.f32 %v630_v29, %v460_v28  ;;  %v474_v36 = vmax.f32 %v470_v30, 0.0 }
 0x12a   : > { %v477_v39 = vmax.f32 %v473_v35, 0.0 }
 0x12b   : > { %v475_v37 = vmax.f32 %v471_v31, 0.0 }
 0x12c   : > { %v651_v41 = vpack.c.bf16 %v477_v39, %v476_v38 }
 0x12d   : > { %v646_v40 = vpack.c.bf16 %v475_v37, %v474_v36 }
 0x12e   : > { %653 = vst [vmem:[%s892_s3 + $0x8] sm:$0xff] %v651_v41  }
 0x12f   : > { %647 = vst [vmem:[%s892_s3] sm:$0xff] %v646_v40  }
 0x130 PF: > { %s13_s16 = sadd.s32 1, %s773_s16   ;;  %s893_s12 = smov %s761_s13 }
 0x131   : > { %p10_p12 = scmp.ge.s32.totalorder %s13_s16, 7   ;;  %s894_s13 = smov %s831_s20 }
 0x132   : > { %s895_s14 = smov %s769_s15  ;;  %s896_s15 = smov %s898_s17 }
 0x133   :  { %12 = sbr.rel (!%p10_p12) target bundleno = 3 (0x3), region = 122 }

// kernel: esac_scnet_forward.20
= control target key start
LH: loop header
LB: loop body
LE: loop exit
PB: predicated region body
PF: predicated region fallthrough
CT: control target
= control target key end

     0   :  { %s1036_s12 = smov 0   ;;  %s1038_s13 = smov 0   ;;  %s1135_s0 = inlined_call_operand.vmem [shape: bf16[8,1152], index: 0, kind: input, shape index: {}]   ;;  %s1136_s1 = inlined_call_operand.vmem [shape: bf16[1152,256], index: 1, kind: input, shape index: {}]   ;;  %s1137_s2 = inlined_call_operand.vmem [shape: f32[1,256], index: 2, kind: input, shape index: {}]   ;;  %s1138_s3 = inlined_call_operand.vmem [shape: bf16[8,256], index: 3, kind: output, shape index: {}]  }
   0x1   :  { %s1040_s14 = smov 0  }
   0x2 LB: > { %s25_s15 = sadd.s32 1, %s1008_s13  ;;  %p825_p0 = scmp.ge.s32.totalorder %s1012_s14, 1  ;;  %s1012_s14 = sphi %s1040_s14, %s13_s14   ;;  %s1008_s13 = sphi %s1038_s13, %s1140_s13   ;;  %s1004_s12 = sphi %s1036_s12, %s1139_s12  }
   0x3   : > { %p26_p1 = scmp.ge.s32.totalorder %s25_s15, 3  ;;  %p194_p2 = scmp.lt.s32.totalorder %s1012_s14, 4 }
   0x5   : > { %s1142_s15 = smov (%p26_p1, %s25_s15), 0  ;;  %p195_p3 = pnand %p825_p0, %p194_p2 }
   0x6   : > { %s240_s16 = smul.u32 (!%p195_p3), 3, %s1004_s12  ;;  %p829_p6 = scmp.ne.s32.totalorder (!%p195_p3), %s1004_s12, 0 }
   0x7   : > { %198 = sbr.rel (%p195_p3) target bundleno = 321 (0x141), region = 32 }
   0x8   : > { %s250_s17 = smul.u32 (!%p195_p3), 48, %s1004_s12  ;;  %p243_p4 = scmp.lt.s32.totalorder (!%p195_p3), %s240_s16, 8 }
   0xa   : > { %p252_p5 = scmp.lt.s32.totalorder (!%p195_p3), %s250_s17, 143 }
   0xe   : > { %s1144_s16 = smov (!%p243_p4, %s240_s16), 8  ;;  %s1146_s17 = smov (!%p252_p5, %s250_s17), 143 }
   0xf   : > { %s826_s18 = sshll.u32 %s1144_s16, 2  ;;  %s887_s22 = sshll.u32 %s1146_s17, 3  ;;  %v1014_v0 = vmov (!%p829_p6), 0.0  }
  0x10   : > { %s1061_s21 = scalar_lea.vmem %s1135_s0, %s826_s18  ;;  %s1066_s25 = scalar_lea.vmem %s1136_s1, %s887_s22  ;;  %282 = vst [vmem:[#allocation2] sm:$0xff] (!%p829_p6), %v1014_v0  ;;  %283 = vst [vmem:[#allocation2 + $0x8] sm:$0xff] (!%p829_p6), %v1014_v0 }
  0x11   : > { %281 = sbr.rel (%p829_p6) target bundleno = 24 (0x18), region = 36 }
  0x18 PF: > { %v915_v1 = vld [vmem:[%s1066_s25 + $0x4] ss:$8 sps:$4 sm:$0xff]   ;;  %v917_v2 = vld [vmem:[%s1066_s25] ss:$8 sps:$4 sm:$0xff]   ;;  %v1015_v3 = vmov 0   ;;  %p881_p7 = scmp.ne.s32.totalorder %s1004_s12, 2 }
  0x19   : > { %660 = vmatprep.mubr.bf16.mxu1 %v1015_v3  ;;  %587 = vmatprep.subr.bf16.mxu0 %v915_v1  ;;  %v918_v4 = vld [vmem:[%s1066_s25 + $0x14] ss:$8 sps:$4 sm:$0xff]   ;;  %v920_v5 = vld [vmem:[%s1066_s25 + $0x10] ss:$8 sps:$4 sm:$0xff]   ;;  %v921_v6 = vld [vmem:[%s1066_s25 + $0x24] ss:$8 sps:$4 sm:$0xff]  }
  0x1a   : > { %588 = vmatpush1.bf16.msra.mxu0 %v917_v2  ;;  %v923_v7 = vld [vmem:[%s1066_s25 + $0x20] ss:$8 sps:$4 sm:$0xff]   ;;  %v924_v8 = vld [vmem:[%s1066_s25 + $0x34] ss:$8 sps:$4 sm:$0xff]   ;;  %v926_v9 = vld [vmem:[%s1066_s25 + $0x30] ss:$8 sps:$4 sm:$0xff]  }
  0x1b   : > { %589 = vmatprep.subr.bf16.mxu0 %v918_v4  ;;  %v939_v10 = vld [vmem:[%s1066_s25 + $0x104] ss:$8 sps:$4 sm:$0xff]   ;;  %v941_v11 = vld [vmem:[%s1066_s25 + $0x100] ss:$8 sps:$4 sm:$0xff]   ;;  %v945_v13 = vld [vmem:[%s1066_s25 + $0x114] ss:$8 sps:$4 sm:$0xff]   ;;  %v681_v4 = vlaneseq (!%p881_p7) }
  0x1c   : > { %v927_v12 = vld [vmem:[%s1066_s25 + $0x44] ss:$8 sps:$4 sm:$0xff]   ;;  %628 = vmatprep.subr.bf16.mxu1 %v939_v10  ;;  %v947_v14 = vld [vmem:[%s1066_s25 + $0x110] ss:$8 sps:$4 sm:$0xff]   ;;  %v929_v15 = vld [vmem:[%s1066_s25 + $0x40] ss:$8 sps:$4 sm:$0xff]  }
  0x1d   : > { %629 = vmatpush1.bf16.msra.mxu1 %v941_v11  ;;  %v930_v16 = vld [vmem:[%s1066_s25 + $0x54] ss:$8 sps:$4 sm:$0xff]   ;;  %v951_v17 = vld [vmem:[%s1066_s25 + $0x124] ss:$8 sps:$4 sm:$0xff]   ;;  %v953_v18 = vld [vmem:[%s1066_s25 + $0x120] ss:$8 sps:$4 sm:$0xff]  }
  0x1e   : > { %590 = vmatpush1.bf16.msra.mxu0 %v920_v5  ;;  %630 = vmatprep.subr.bf16.mxu1 %v945_v13  ;;  %v932_v19 = vld [vmem:[%s1066_s25 + $0x50] ss:$8 sps:$4 sm:$0xff]   ;;  %v957_v20 = vld [vmem:[%s1066_s25 + $0x134] ss:$8 sps:$4 sm:$0xff]   ;;  %v933_v21 = vld [vmem:[%s1066_s25 + $0x64] ss:$8 sps:$4 sm:$0xff]  }
  0x1f   : > { %591 = vmatprep.subr.bf16.mxu0 %v921_v6  ;;  %v959_v22 = vld [vmem:[%s1066_s25 + $0x130] ss:$8 sps:$4 sm:$0xff]   ;;  %v935_v23 = vld [vmem:[%s1066_s25 + $0x60] ss:$8 sps:$4 sm:$0xff]   ;;  %v963_v24 = vld [vmem:[%s1066_s25 + $0x144] ss:$8 sps:$4 sm:$0xff]  }
  0x20   : > { %v936_v25 = vld [vmem:[%s1066_s25 + $0x74] ss:$8 sps:$4 sm:$0xff]   ;;  %v965_v26 = vld [vmem:[%s1066_s25 + $0x140] ss:$8 sps:$4 sm:$0xff]   ;;  %v938_v27 = vld [vmem:[%s1066_s25 + $0x70] ss:$8 sps:$4 sm:$0xff]  }
  0x21   : > { %631 = vmatpush1.bf16.msra.mxu1 %v947_v14  ;;  %v969_v28 = vld [vmem:[%s1066_s25 + $0x154] ss:$8 sps:$4 sm:$0xff]   ;;  %v942_v29 = vld [vmem:[%s1066_s25 + $0x84] ss:$8 sps:$4 sm:$0xff]   ;;  %v971_v30 = vld [vmem:[%s1066_s25 + $0x150] ss:$8 sps:$4 sm:$0xff]  }
  0x22   : > { %592 = vmatpush1.bf16.msra.mxu0 %v923_v7  ;;  %632 = vmatprep.subr.bf16.mxu1 %v951_v17  ;;  %v944_v31 = vld [vmem:[%s1066_s25 + $0x80] ss:$8 sps:$4 sm:$0xff]   ;;  %v975_v32 = vld [vmem:[%s1066_s25 + $0x164] ss:$8 sps:$4 sm:$0xff]   ;;  %v948_v33 = vld [vmem:[%s1066_s25 + $0x94] ss:$8 sps:$4 sm:$0xff]  }
  0x23   : > { %593 = vmatprep.subr.bf16.mxu0 %v924_v8  ;;  %v286_v34 = vld [vmem:[%s1061_s21] sm:$0xff]  ;;  %v950_v37 = vld [vmem:[%s1066_s25 + $0x90] ss:$8 sps:$4 sm:$0xff]   ;;  %v981_v38 = vld [vmem:[%s1066_s25 + $0x174] ss:$8 sps:$4 sm:$0xff]   ;;  %v682_v5 = vshrl.u32 (!%p881_p7), %v681_v4, 7 }
  0x24   : > { %v831_v35 = vcombine.high %v286_v34, %v286_v34  ;;  %v977_v36 = vld [vmem:[%s1066_s25 + $0x160] ss:$8 sps:$4 sm:$0xff]   ;;  %v954_v39 = vld [vmem:[%s1066_s25 + $0xa4] ss:$8 sps:$4 sm:$0xff]   ;;  %v983_v40 = vld [vmem:[%s1066_s25 + $0x170] ss:$8 sps:$4 sm:$0xff]   ;;  %v830_v53 = vcombine.low %v286_v34, %v286_v34 }
  0x25   : > { %633 = vmatpush1.bf16.msra.mxu1 %v953_v18  ;;  %v956_v41 = vld [vmem:[%s1066_s25 + $0xa0] ss:$8 sps:$4 sm:$0xff]   ;;  %v960_v42 = vld [vmem:[%s1066_s25 + $0xb4] ss:$8 sps:$4 sm:$0xff]   ;;  %v962_v44 = vld [vmem:[%s1066_s25 + $0xb0] ss:$8 sps:$4 sm:$0xff]  }
  0x26   : > { %594 = vmatpush1.bf16.msra.mxu0 %v926_v9  ;;  %634 = vmatprep.subr.bf16.mxu1 %v957_v20  ;;  %v987_v43 = vld [vmem:[%s1061_s21 + $0x8] ss:$0 sps:$4 sm:$0xff]   ;;  %v966_v45 = vld [vmem:[%s1066_s25 + $0xc4] ss:$8 sps:$4 sm:$0xff]   ;;  %v972_v47 = vld [vmem:[%s1066_s25 + $0xd4] ss:$8 sps:$4 sm:$0xff]  }
  0x27   : > { %595 = vmatprep.subr.bf16.mxu0 %v927_v12  ;;  %619 = vmatprep.mubr.bf16.mxu0 %v831_v35  ;;  %v968_v46 = vld [vmem:[%s1066_s25 + $0xc0] ss:$8 sps:$4 sm:$0xff]   ;;  %v974_v48 = vld [vmem:[%s1066_s25 + $0xd0] ss:$8 sps:$4 sm:$0xff]   ;;  %v978_v49 = vld [vmem:[%s1066_s25 + $0xe4] ss:$8 sps:$4 sm:$0xff]  }
  0x28   : > { %v980_v50 = vld [vmem:[%s1066_s25 + $0xe0] ss:$8 sps:$4 sm:$0xff]   ;;  %v984_v51 = vld [vmem:[%s1066_s25 + $0xf4] ss:$8 sps:$4 sm:$0xff]   ;;  %v986_v52 = vld [vmem:[%s1066_s25 + $0xf0] ss:$8 sps:$4 sm:$0xff]  }
  0x29   : > { %635 = vmatpush1.bf16.msra.mxu1 %v959_v22  ;;  %v284_v58 = vld [vmem:[#allocation2] sm:$0xff]  ;;  %v285_v61 = vld [vmem:[#allocation2 + $0x8] sm:$0xff]  ;;  %v683_v7 = vsub.s32 (!%p881_p7), 0, %v682_v5  ;;  %v687_v8 = vsub.s32 (!%p881_p7), 1, %v682_v5 }
  0x2a   : > { %596 = vmatpush1.bf16.msra.mxu0 %v929_v15  ;;  %636 = vmatprep.subr.bf16.mxu1 %v963_v24  ;;  %v679_v6 = vld [vmem:[%s1137_s2] sm:$0x3] (!%p881_p7) }
  0x2b   : > { %597 = vmatprep.subr.bf16.mxu0 %v930_v16  ;;  %v684_v11 = vrot.slane (!%p881_p7), %v679_v6, %v683_v7  ;;  %v688_v12 = vrot.slane (!%p881_p7), %v679_v6, %v687_v8 }
  0x2d   : > { %637 = vmatpush1.bf16.msra.mxu1 %v965_v26 }
  0x2e   : > { %598 = vmatpush1.bf16.msra.mxu0 %v932_v19  ;;  %638 = vmatprep.subr.bf16.mxu1 %v969_v28 }
  0x2f   : > { %599 = vmatprep.subr.bf16.mxu0 %v933_v21 }
  0x31   : > { %639 = vmatpush1.bf16.msra.mxu1 %v971_v30 }
  0x32   : > { %600 = vmatpush1.bf16.msra.mxu0 %v935_v23  ;;  %640 = vmatprep.subr.bf16.mxu1 %v975_v32 }
  0x33   : > { %601 = vmatprep.subr.bf16.mxu0 %v936_v25 }
  0x35   : > { %641 = vmatpush1.bf16.msra.mxu1 %v977_v36 }
  0x36   : > { %602 = vmatpush1.bf16.msra.mxu0 %v938_v27  ;;  %642 = vmatprep.subr.bf16.mxu1 %v981_v38 }
  0x37   : > { %603 = vmatprep.subr.bf16.mxu0 %v942_v29 }
  0x39   : > { %643 = vmatpush1.bf16.msra.mxu1 %v983_v40 }
  0x3a   : > { %604 = vmatpush1.bf16.msra.mxu0 %v944_v31 }
  0x3b   : > { %605 = vmatprep.subr.bf16.mxu0 %v948_v33 }
  0x3c   : > { %661 = vmatmul.mubr.bf16.vlgmr.msra.gmra.mrb[0].mxu1 %v987_v43 }
  0x3e   : > { %606 = vmatpush1.bf16.msra.mxu0 %v950_v37 }
  0x3f   : > { %607 = vmatprep.subr.bf16.mxu0 %v954_v39 }
  0x42   : > { %608 = vmatpush1.bf16.msra.mxu0 %v956_v41 }
  0x43   : > { %609 = vmatprep.subr.bf16.mxu0 %v960_v42 }
  0x46   : > { %610 = vmatpush1.bf16.msra.mxu0 %v962_v44 }
  0x47   : > { %611 = vmatprep.subr.bf16.mxu0 %v966_v45 }
  0x4a   : > { %612 = vmatpush1.bf16.msra.mxu0 %v968_v46 }
  0x4b   : > { %613 = vmatprep.subr.bf16.mxu0 %v972_v47 }
  0x4e   : > { %614 = vmatpush1.bf16.msra.mxu0 %v974_v48 }
  0x4f   : > { %615 = vmatprep.subr.bf16.mxu0 %v978_v49 }
  0x52   : > { %616 = vmatpush1.bf16.msra.mxu0 %v980_v50 }
  0x53   : > { %617 = vmatprep.subr.bf16.mxu0 %v984_v51 }
  0x56   : > { %618 = vmatpush1.bf16.msra.mxu0 %v986_v52 }
  0x59   : > { %620 = vmatmul.mubr.bf16.vlgmr.msra.gmra.mrb[0].mxu0 %v830_v53 }
 0x10f   : > { %v662_v54 = vpop.f32.mrb[0].mxu1 }
 0x110   : > { %v664_v55 = vpop.f32.mrb[1].mxu1 }
 0x111   : > { %v666_v56 = vpop.f32.mrb[2].mxu1 }
 0x112   : > { %v667_v57 = vpop.f32.mrb[3].mxu1 }
 0x12c   : > { %v621_v59 = vpop.f32.mrb[0].mxu0  ;;  %676 = sbr.rel (%p881_p7) target bundleno = 321 (0x141), region = 40 }
 0x12d   : > { %v663_v60 = vadd.f32 %v662_v54, %v621_v59  ;;  %v623_v62 = vpop.f32.mrb[1].mxu0 }
 0x12e   : > { %v665_v63 = vadd.f32 %v664_v55, %v623_v62  ;;  %v625_v0 = vpop.f32.mrb[2].mxu0 }
 0x12f   : > { %v669_v1 = vadd.f32 %v663_v60, %v284_v58  ;;  %v626_v2 = vpop.f32.mrb[3].mxu0 }
 0x130   : > { %v670_v3 = vadd.f32 %v665_v63, %v285_v61 }
 0x131   : > { %671 = vst [vmem:[#allocation2] sm:$0xff] %v669_v1 }
 0x132   : > { %672 = vst [vmem:[#allocation2 + $0x8] sm:$0xff] %v670_v3 }
 0x138   : > { %v677_v9 = vld [vmem:[#allocation2] sm:$0xff] }
 0x139   : > { %v678_v10 = vld [vmem:[#allocation2 + $0x8] sm:$0xff]  ;;  %v691_v13 = vadd.f32 %v684_v11, %v677_v9 }
 0x13a   : > { %v692_v14 = vadd.f32 %v688_v12, %v678_v10 }
 0x13b   : > { %v693_v15 = vmax.f32 %v691_v13, 0.0 }
 0x13c   : > { %v694_v16 = vmax.f32 %v692_v14, 0.0 }
 0x13e   : > { %v888_v17 = vpack.c.bf16 %v694_v16, %v693_v15 }
 0x140   : > { %703 = vst [vmem:[%s1138_s3] sm:$0xff] %v888_v17 }
 0x141 PF: > { %s13_s14 = sadd.s32 1, %s1012_s14   ;;  %s1139_s12 = smov %s1008_s13 }
 0x142   : > { %p10_p8 = scmp.ge.s32.totalorder %s13_s14, 5   ;;  %s1140_s13 = smov %s1142_s15 }
 0x144   :  { %12 = sbr.rel (!%p10_p8) target bundleno = 2 (0x2), region = 76 }

// kernel: esac_scnet_forward.21
= control target key start
LH: loop header
LB: loop body
LE: loop exit
PB: predicated region body
PF: predicated region fallthrough
CT: control target
= control target key end

     0   :  { %s1036_s12 = smov 0   ;;  %s1038_s13 = smov 0   ;;  %s1135_s0 = inlined_call_operand.vmem [shape: bf16[8,2304], index: 0, kind: input, shape index: {}]   ;;  %s1136_s1 = inlined_call_operand.vmem [shape: bf16[2304,256], index: 1, kind: input, shape index: {}]   ;;  %s1137_s2 = inlined_call_operand.vmem [shape: f32[1,256], index: 2, kind: input, shape index: {}]   ;;  %s1138_s3 = inlined_call_operand.vmem [shape: bf16[8,256], index: 3, kind: output, shape index: {}]  }
   0x1   :  { %s1040_s14 = smov 0  }
   0x2 LB: > { %s25_s15 = sadd.s32 1, %s1008_s13  ;;  %p825_p0 = scmp.ge.s32.totalorder %s1012_s14, 1  ;;  %s1012_s14 = sphi %s1040_s14, %s13_s14   ;;  %s1008_s13 = sphi %s1038_s13, %s1140_s13   ;;  %s1004_s12 = sphi %s1036_s12, %s1139_s12  }
   0x3   : > { %p26_p1 = scmp.ge.s32.totalorder %s25_s15, 6  ;;  %p194_p2 = scmp.lt.s32.totalorder %s1012_s14, 7 }
   0x5   : > { %s1142_s15 = smov (%p26_p1, %s25_s15), 0  ;;  %p195_p3 = pnand %p825_p0, %p194_p2 }
   0x6   : > { %s240_s16 = smul.u32 (!%p195_p3), 3, %s1004_s12  ;;  %p829_p6 = scmp.ne.s32.totalorder (!%p195_p3), %s1004_s12, 0 }
   0x7   : > { %198 = sbr.rel (%p195_p3) target bundleno = 321 (0x141), region = 32 }
   0x8   : > { %s250_s17 = smul.u32 (!%p195_p3), 48, %s1004_s12  ;;  %p243_p4 = scmp.lt.s32.totalorder (!%p195_p3), %s240_s16, 17 }
   0xa   : > { %p252_p5 = scmp.lt.s32.totalorder (!%p195_p3), %s250_s17, 287 }
   0xe   : > { %s1144_s16 = smov (!%p243_p4, %s240_s16), 17  ;;  %s1146_s17 = smov (!%p252_p5, %s250_s17), 287 }
   0xf   : > { %s826_s18 = sshll.u32 %s1144_s16, 2  ;;  %s887_s22 = sshll.u32 %s1146_s17, 3  ;;  %v1014_v0 = vmov (!%p829_p6), 0.0  }
  0x10   : > { %s1061_s21 = scalar_lea.vmem %s1135_s0, %s826_s18  ;;  %s1066_s25 = scalar_lea.vmem %s1136_s1, %s887_s22  ;;  %282 = vst [vmem:[#allocation2] sm:$0xff] (!%p829_p6), %v1014_v0  ;;  %283 = vst [vmem:[#allocation2 + $0x8] sm:$0xff] (!%p829_p6), %v1014_v0 }
  0x11   : > { %281 = sbr.rel (%p829_p6) target bundleno = 24 (0x18), region = 36 }
  0x18 PF: > { %v915_v1 = vld [vmem:[%s1066_s25 + $0x4] ss:$8 sps:$4 sm:$0xff]   ;;  %v917_v2 = vld [vmem:[%s1066_s25] ss:$8 sps:$4 sm:$0xff]   ;;  %v1015_v3 = vmov 0   ;;  %p881_p7 = scmp.ne.s32.totalorder %s1004_s12, 5 }
  0x19   : > { %660 = vmatprep.mubr.bf16.mxu1 %v1015_v3  ;;  %587 = vmatprep.subr.bf16.mxu0 %v915_v1  ;;  %v918_v4 = vld [vmem:[%s1066_s25 + $0x14] ss:$8 sps:$4 sm:$0xff]   ;;  %v920_v5 = vld [vmem:[%s1066_s25 + $0x10] ss:$8 sps:$4 sm:$0xff]   ;;  %v921_v6 = vld [vmem:[%s1066_s25 + $0x24] ss:$8 sps:$4 sm:$0xff]  }
  0x1a   : > { %588 = vmatpush1.bf16.msra.mxu0 %v917_v2  ;;  %v923_v7 = vld [vmem:[%s1066_s25 + $0x20] ss:$8 sps:$4 sm:$0xff]   ;;  %v924_v8 = vld [vmem:[%s1066_s25 + $0x34] ss:$8 sps:$4 sm:$0xff]   ;;  %v926_v9 = vld [vmem:[%s1066_s25 + $0x30] ss:$8 sps:$4 sm:$0xff]  }
  0x1b   : > { %589 = vmatprep.subr.bf16.mxu0 %v918_v4  ;;  %v939_v10 = vld [vmem:[%s1066_s25 + $0x104] ss:$8 sps:$4 sm:$0xff]   ;;  %v941_v11 = vld [vmem:[%s1066_s25 + $0x100] ss:$8 sps:$4 sm:$0xff]   ;;  %v945_v13 = vld [vmem:[%s1066_s25 + $0x114] ss:$8 sps:$4 sm:$0xff]   ;;  %v681_v4 = vlaneseq (!%p881_p7) }
  0x1c   : > { %v927_v12 = vld [vmem:[%s1066_s25 + $0x44] ss:$8 sps:$4 sm:$0xff]   ;;  %628 = vmatprep.subr.bf16.mxu1 %v939_v10  ;;  %v947_v14 = vld [vmem:[%s1066_s25 + $0x110] ss:$8 sps:$4 sm:$0xff]   ;;  %v929_v15 = vld [vmem:[%s1066_s25 + $0x40] ss:$8 sps:$4 sm:$0xff]  }
  0x1d   : > { %629 = vmatpush1.bf16.msra.mxu1 %v941_v11  ;;  %v930_v16 = vld [vmem:[%s1066_s25 + $0x54] ss:$8 sps:$4 sm:$0xff]   ;;  %v951_v17 = vld [vmem:[%s1066_s25 + $0x124] ss:$8 sps:$4 sm:$0xff]   ;;  %v953_v18 = vld [vmem:[%s1066_s25 + $0x120] ss:$8 sps:$4 sm:$0xff]  }
  0x1e   : > { %590 = vmatpush1.bf16.msra.mxu0 %v920_v5  ;;  %630 = vmatprep.subr.bf16.mxu1 %v945_v13  ;;  %v932_v19 = vld [vmem:[%s1066_s25 + $0x50] ss:$8 sps:$4 sm:$0xff]   ;;  %v957_v20 = vld [vmem:[%s1066_s25 + $0x134] ss:$8 sps:$4 sm:$0xff]   ;;  %v933_v21 = vld [vmem:[%s1066_s25 + $0x64] ss:$8 sps:$4 sm:$0xff]  }
  0x1f   : > { %591 = vmatprep.subr.bf16.mxu0 %v921_v6  ;;  %v959_v22 = vld [vmem:[%s1066_s25 + $0x130] ss:$8 sps:$4 sm:$0xff]   ;;  %v935_v23 = vld [vmem:[%s1066_s25 + $0x60] ss:$8 sps:$4 sm:$0xff]   ;;  %v963_v24 = vld [vmem:[%s1066_s25 + $0x144] ss:$8 sps:$4 sm:$0xff]  }
  0x20   : > { %v936_v25 = vld [vmem:[%s1066_s25 + $0x74] ss:$8 sps:$4 sm:$0xff]   ;;  %v965_v26 = vld [vmem:[%s1066_s25 + $0x140] ss:$8 sps:$4 sm:$0xff]   ;;  %v938_v27 = vld [vmem:[%s1066_s25 + $0x70] ss:$8 sps:$4 sm:$0xff]  }
  0x21   : > { %631 = vmatpush1.bf16.msra.mxu1 %v947_v14  ;;  %v969_v28 = vld [vmem:[%s1066_s25 + $0x154] ss:$8 sps:$4 sm:$0xff]   ;;  %v942_v29 = vld [vmem:[%s1066_s25 + $0x84] ss:$8 sps:$4 sm:$0xff]   ;;  %v971_v30 = vld [vmem:[%s1066_s25 + $0x150] ss:$8 sps:$4 sm:$0xff]  }
  0x22   : > { %592 = vmatpush1.bf16.msra.mxu0 %v923_v7  ;;  %632 = vmatprep.subr.bf16.mxu1 %v951_v17  ;;  %v944_v31 = vld [vmem:[%s1066_s25 + $0x80] ss:$8 sps:$4 sm:$0xff]   ;;  %v975_v32 = vld [vmem:[%s1066_s25 + $0x164] ss:$8 sps:$4 sm:$0xff]   ;;  %v948_v33 = vld [vmem:[%s1066_s25 + $0x94] ss:$8 sps:$4 sm:$0xff]  }
  0x23   : > { %593 = vmatprep.subr.bf16.mxu0 %v924_v8  ;;  %v286_v34 = vld [vmem:[%s1061_s21] sm:$0xff]  ;;  %v950_v37 = vld [vmem:[%s1066_s25 + $0x90] ss:$8 sps:$4 sm:$0xff]   ;;  %v981_v38 = vld [vmem:[%s1066_s25 + $0x174] ss:$8 sps:$4 sm:$0xff]   ;;  %v682_v5 = vshrl.u32 (!%p881_p7), %v681_v4, 7 }
  0x24   : > { %v831_v35 = vcombine.high %v286_v34, %v286_v34  ;;  %v977_v36 = vld [vmem:[%s1066_s25 + $0x160] ss:$8 sps:$4 sm:$0xff]   ;;  %v954_v39 = vld [vmem:[%s1066_s25 + $0xa4] ss:$8 sps:$4 sm:$0xff]   ;;  %v983_v40 = vld [vmem:[%s1066_s25 + $0x170] ss:$8 sps:$4 sm:$0xff]   ;;  %v830_v53 = vcombine.low %v286_v34, %v286_v34 }
  0x25   : > { %633 = vmatpush1.bf16.msra.mxu1 %v953_v18  ;;  %v956_v41 = vld [vmem:[%s1066_s25 + $0xa0] ss:$8 sps:$4 sm:$0xff]   ;;  %v960_v42 = vld [vmem:[%s1066_s25 + $0xb4] ss:$8 sps:$4 sm:$0xff]   ;;  %v962_v44 = vld [vmem:[%s1066_s25 + $0xb0] ss:$8 sps:$4 sm:$0xff]  }
  0x26   : > { %594 = vmatpush1.bf16.msra.mxu0 %v926_v9  ;;  %634 = vmatprep.subr.bf16.mxu1 %v957_v20  ;;  %v987_v43 = vld [vmem:[%s1061_s21 + $0x8] ss:$0 sps:$4 sm:$0xff]   ;;  %v966_v45 = vld [vmem:[%s1066_s25 + $0xc4] ss:$8 sps:$4 sm:$0xff]   ;;  %v972_v47 = vld [vmem:[%s1066_s25 + $0xd4] ss:$8 sps:$4 sm:$0xff]  }
  0x27   : > { %595 = vmatprep.subr.bf16.mxu0 %v927_v12  ;;  %619 = vmatprep.mubr.bf16.mxu0 %v831_v35  ;;  %v968_v46 = vld [vmem:[%s1066_s25 + $0xc0] ss:$8 sps:$4 sm:$0xff]   ;;  %v974_v48 = vld [vmem:[%s1066_s25 + $0xd0] ss:$8 sps:$4 sm:$0xff]   ;;  %v978_v49 = vld [vmem:[%s1066_s25 + $0xe4] ss:$8 sps:$4 sm:$0xff]  }
  0x28   : > { %v980_v50 = vld [vmem:[%s1066_s25 + $0xe0] ss:$8 sps:$4 sm:$0xff]   ;;  %v984_v51 = vld [vmem:[%s1066_s25 + $0xf4] ss:$8 sps:$4 sm:$0xff]   ;;  %v986_v52 = vld [vmem:[%s1066_s25 + $0xf0] ss:$8 sps:$4 sm:$0xff]  }
  0x29   : > { %635 = vmatpush1.bf16.msra.mxu1 %v959_v22  ;;  %v284_v58 = vld [vmem:[#allocation2] sm:$0xff]  ;;  %v285_v61 = vld [vmem:[#allocation2 + $0x8] sm:$0xff]  ;;  %v683_v7 = vsub.s32 (!%p881_p7), 0, %v682_v5  ;;  %v687_v8 = vsub.s32 (!%p881_p7), 1, %v682_v5 }
  0x2a   : > { %596 = vmatpush1.bf16.msra.mxu0 %v929_v15  ;;  %636 = vmatprep.subr.bf16.mxu1 %v963_v24  ;;  %v679_v6 = vld [vmem:[%s1137_s2] sm:$0x3] (!%p881_p7) }
  0x2b   : > { %597 = vmatprep.subr.bf16.mxu0 %v930_v16  ;;  %v684_v11 = vrot.slane (!%p881_p7), %v679_v6, %v683_v7  ;;  %v688_v12 = vrot.slane (!%p881_p7), %v679_v6, %v687_v8 }
  0x2d   : > { %637 = vmatpush1.bf16.msra.mxu1 %v965_v26 }
  0x2e   : > { %598 = vmatpush1.bf16.msra.mxu0 %v932_v19  ;;  %638 = vmatprep.subr.bf16.mxu1 %v969_v28 }
  0x2f   : > { %599 = vmatprep.subr.bf16.mxu0 %v933_v21 }
  0x31   : > { %639 = vmatpush1.bf16.msra.mxu1 %v971_v30 }
  0x32   : > { %600 = vmatpush1.bf16.msra.mxu0 %v935_v23  ;;  %640 = vmatprep.subr.bf16.mxu1 %v975_v32 }
  0x33   : > { %601 = vmatprep.subr.bf16.mxu0 %v936_v25 }
  0x35   : > { %641 = vmatpush1.bf16.msra.mxu1 %v977_v36 }
  0x36   : > { %602 = vmatpush1.bf16.msra.mxu0 %v938_v27  ;;  %642 = vmatprep.subr.bf16.mxu1 %v981_v38 }
  0x37   : > { %603 = vmatprep.subr.bf16.mxu0 %v942_v29 }
  0x39   : > { %643 = vmatpush1.bf16.msra.mxu1 %v983_v40 }
  0x3a   : > { %604 = vmatpush1.bf16.msra.mxu0 %v944_v31 }
  0x3b   : > { %605 = vmatprep.subr.bf16.mxu0 %v948_v33 }
  0x3c   : > { %661 = vmatmul.mubr.bf16.vlgmr.msra.gmra.mrb[0].mxu1 %v987_v43 }
  0x3e   : > { %606 = vmatpush1.bf16.msra.mxu0 %v950_v37 }
  0x3f   : > { %607 = vmatprep.subr.bf16.mxu0 %v954_v39 }
  0x42   : > { %608 = vmatpush1.bf16.msra.mxu0 %v956_v41 }
  0x43   : > { %609 = vmatprep.subr.bf16.mxu0 %v960_v42 }
  0x46   : > { %610 = vmatpush1.bf16.msra.mxu0 %v962_v44 }
  0x47   : > { %611 = vmatprep.subr.bf16.mxu0 %v966_v45 }
  0x4a   : > { %612 = vmatpush1.bf16.msra.mxu0 %v968_v46 }
  0x4b   : > { %613 = vmatprep.subr.bf16.mxu0 %v972_v47 }
  0x4e   : > { %614 = vmatpush1.bf16.msra.mxu0 %v974_v48 }
  0x4f   : > { %615 = vmatprep.subr.bf16.mxu0 %v978_v49 }
  0x52   : > { %616 = vmatpush1.bf16.msra.mxu0 %v980_v50 }
  0x53   : > { %617 = vmatprep.subr.bf16.mxu0 %v984_v51 }
  0x56   : > { %618 = vmatpush1.bf16.msra.mxu0 %v986_v52 }
  0x59   : > { %620 = vmatmul.mubr.bf16.vlgmr.msra.gmra.mrb[0].mxu0 %v830_v53 }
 0x10f   : > { %v662_v54 = vpop.f32.mrb[0].mxu1 }
 0x110   : > { %v664_v55 = vpop.f32.mrb[1].mxu1 }
 0x111   : > { %v666_v56 = vpop.f32.mrb[2].mxu1 }
 0x112   : > { %v667_v57 = vpop.f32.mrb[3].mxu1 }
 0x12c   : > { %v621_v59 = vpop.f32.mrb[0].mxu0  ;;  %676 = sbr.rel (%p881_p7) target bundleno = 321 (0x141), region = 40 }
 0x12d   : > { %v663_v60 = vadd.f32 %v662_v54, %v621_v59  ;;  %v623_v62 = vpop.f32.mrb[1].mxu0 }
 0x12e   : > { %v665_v63 = vadd.f32 %v664_v55, %v623_v62  ;;  %v625_v0 = vpop.f32.mrb[2].mxu0 }
 0x12f   : > { %v669_v1 = vadd.f32 %v663_v60, %v284_v58  ;;  %v626_v2 = vpop.f32.mrb[3].mxu0 }
 0x130   : > { %v670_v3 = vadd.f32 %v665_v63, %v285_v61 }
 0x131   : > { %671 = vst [vmem:[#allocation2] sm:$0xff] %v669_v1 }
 0x132   : > { %672 = vst [vmem:[#allocation2 + $0x8] sm:$0xff] %v670_v3 }
 0x138   : > { %v677_v9 = vld [vmem:[#allocation2] sm:$0xff] }
 0x139   : > { %v678_v10 = vld [vmem:[#allocation2 + $0x8] sm:$0xff]  ;;  %v691_v13 = vadd.f32 %v684_v11, %v677_v9 }
 0x13a   : > { %v692_v14 = vadd.f32 %v688_v12, %v678_v10 }
 0x13b   : > { %v693_v15 = vmax.f32 %v691_v13, 0.0 }
 0x13c   : > { %v694_v16 = vmax.f32 %v692_v14, 0.0 }
 0x13e   : > { %v888_v17 = vpack.c.bf16 %v694_v16, %v693_v15 }
 0x140   : > { %703 = vst [vmem:[%s1138_s3] sm:$0xff] %v888_v17 }
 0x141 PF: > { %s13_s14 = sadd.s32 1, %s1012_s14   ;;  %s1139_s12 = smov %s1008_s13 }
 0x142   : > { %p10_p8 = scmp.ge.s32.totalorder %s13_s14, 8   ;;  %s1140_s13 = smov %s1142_s15 }
 0x144   :  { %12 = sbr.rel (!%p10_p8) target bundleno = 2 (0x2), region = 76 }

// kernel: esac_scnet_forward.22
= control target key start
LH: loop header
LB: loop body
LE: loop exit
PB: predicated region body
PF: predicated region fallthrough
CT: control target
= control target key end

     0   :  { %v274_v35 = vlaneseq  ;;  %s512_s1 = inlined_call_operand.vmem [shape: bf16[256,256], index: 1, kind: input, shape index: {}]   ;;  %s513_s0 = inlined_call_operand.vmem [shape: bf16[8,256], index: 0, kind: input, shape index: {}]   ;;  %s514_s2 = inlined_call_operand.vmem [shape: f32[1,256], index: 2, kind: input, shape index: {}]   ;;  %s515_s3 = inlined_call_operand.vmem [shape: bf16[8,256], index: 3, kind: output, shape index: {}]  }
   0x1   :  { %v337_v0 = vld [vmem:[%s512_s1 + $0x4] ss:$8 sps:$4 sm:$0xff]   ;;  %v339_v1 = vld [vmem:[%s512_s1] ss:$8 sps:$4 sm:$0xff]   ;;  %v340_v2 = vld [vmem:[%s512_s1 + $0x14] ss:$8 sps:$4 sm:$0xff]  }
   0x2   :  { %222 = vmatprep.subr.bf16.mxu0 %v337_v0  ;;  %v342_v3 = vld [vmem:[%s512_s1 + $0x10] ss:$8 sps:$4 sm:$0xff]   ;;  %v343_v4 = vld [vmem:[%s512_s1 + $0x24] ss:$8 sps:$4 sm:$0xff]   ;;  %v345_v5 = vld [vmem:[%s512_s1 + $0x20] ss:$8 sps:$4 sm:$0xff]  }
   0x3   :  { %223 = vmatpush1.bf16.msra.mxu0 %v339_v1  ;;  %v346_v6 = vld [vmem:[%s512_s1 + $0x34] ss:$8 sps:$4 sm:$0xff]   ;;  %v348_v7 = vld [vmem:[%s512_s1 + $0x30] ss:$8 sps:$4 sm:$0xff]   ;;  %v349_v8 = vld [vmem:[%s512_s1 + $0x44] ss:$8 sps:$4 sm:$0xff]  }
   0x4   :  { %224 = vmatprep.subr.bf16.mxu0 %v340_v2  ;;  %v351_v9 = vld [vmem:[%s512_s1 + $0x40] ss:$8 sps:$4 sm:$0xff]   ;;  %v352_v10 = vld [vmem:[%s512_s1 + $0x54] ss:$8 sps:$4 sm:$0xff]   ;;  %v354_v11 = vld [vmem:[%s512_s1 + $0x50] ss:$8 sps:$4 sm:$0xff]  }
   0x5   :  { %v355_v12 = vld [vmem:[%s512_s1 + $0x64] ss:$8 sps:$4 sm:$0xff]   ;;  %v357_v15 = vld [vmem:[%s512_s1 + $0x60] ss:$8 sps:$4 sm:$0xff]   ;;  %v358_v16 = vld [vmem:[%s512_s1 + $0x74] ss:$8 sps:$4 sm:$0xff]  }
   0x6   :  { %v22_v13 = vld [vmem:[%s513_s0] sm:$0xff]  ;;  %v360_v17 = vld [vmem:[%s512_s1 + $0x70] ss:$8 sps:$4 sm:$0xff]   ;;  %v364_v20 = vld [vmem:[%s512_s1 + $0x94] ss:$8 sps:$4 sm:$0xff]   ;;  %v275_v36 = vshrl.u32 %v274_v35, 7 }
   0x7   :  { %225 = vmatpush1.bf16.msra.mxu0 %v342_v3  ;;  %v302_v14 = vcombine.high %v22_v13, %v22_v13  ;;  %v361_v18 = vld [vmem:[%s512_s1 + $0x84] ss:$8 sps:$4 sm:$0xff]   ;;  %v363_v19 = vld [vmem:[%s512_s1 + $0x80] ss:$8 sps:$4 sm:$0xff]   ;;  %v366_v21 = vld [vmem:[%s512_s1 + $0x90] ss:$8 sps:$4 sm:$0xff]   ;;  %v301_v34 = vcombine.low %v22_v13, %v22_v13 }
   0x8   :  { %226 = vmatprep.subr.bf16.mxu0 %v343_v4  ;;  %v367_v22 = vld [vmem:[%s512_s1 + $0xa4] ss:$8 sps:$4 sm:$0xff]   ;;  %v369_v23 = vld [vmem:[%s512_s1 + $0xa0] ss:$8 sps:$4 sm:$0xff]   ;;  %v370_v24 = vld [vmem:[%s512_s1 + $0xb4] ss:$8 sps:$4 sm:$0xff]  }
   0x9   :  { %254 = vmatprep.mubr.bf16.mxu0 %v302_v14  ;;  %v372_v25 = vld [vmem:[%s512_s1 + $0xb0] ss:$8 sps:$4 sm:$0xff]   ;;  %v373_v26 = vld [vmem:[%s512_s1 + $0xc4] ss:$8 sps:$4 sm:$0xff]   ;;  %v375_v27 = vld [vmem:[%s512_s1 + $0xc0] ss:$8 sps:$4 sm:$0xff]  }
   0xa   :  { %v376_v28 = vld [vmem:[%s512_s1 + $0xd4] ss:$8 sps:$4 sm:$0xff]   ;;  %v378_v29 = vld [vmem:[%s512_s1 + $0xd0] ss:$8 sps:$4 sm:$0xff]   ;;  %v379_v30 = vld [vmem:[%s512_s1 + $0xe4] ss:$8 sps:$4 sm:$0xff]  }
   0xb   :  { %227 = vmatpush1.bf16.msra.mxu0 %v345_v5  ;;  %v381_v31 = vld [vmem:[%s512_s1 + $0xe0] ss:$8 sps:$4 sm:$0xff]   ;;  %v382_v32 = vld [vmem:[%s512_s1 + $0xf4] ss:$8 sps:$4 sm:$0xff]   ;;  %v384_v33 = vld [vmem:[%s512_s1 + $0xf0] ss:$8 sps:$4 sm:$0xff]  }
   0xc   :  { %228 = vmatprep.subr.bf16.mxu0 %v346_v6  ;;  %v276_v37 = vsub.s32 0, %v275_v36  ;;  %v272_v38 = vld [vmem:[%s514_s2] sm:$0x3]  ;;  %v280_v39 = vsub.s32 1, %v275_v36 }
   0xe   :  { %v277_v40 = vrot.slane %v272_v38, %v276_v37  ;;  %v281_v41 = vrot.slane %v272_v38, %v280_v39 }
   0xf   :  { %229 = vmatpush1.bf16.msra.mxu0 %v348_v7 }
  0x10   :  { %230 = vmatprep.subr.bf16.mxu0 %v349_v8 }
  0x13   :  { %231 = vmatpush1.bf16.msra.mxu0 %v351_v9 }
  0x14   :  { %232 = vmatprep.subr.bf16.mxu0 %v352_v10 }
  0x17   :  { %233 = vmatpush1.bf16.msra.mxu0 %v354_v11 }
  0x18   :  { %234 = vmatprep.subr.bf16.mxu0 %v355_v12 }
  0x1b   :  { %235 = vmatpush1.bf16.msra.mxu0 %v357_v15 }
  0x1c   :  { %236 = vmatprep.subr.bf16.mxu0 %v358_v16 }
  0x1f   :  { %237 = vmatpush1.bf16.msra.mxu0 %v360_v17 }
  0x20   :  { %238 = vmatprep.subr.bf16.mxu0 %v361_v18 }
  0x23   :  { %239 = vmatpush1.bf16.msra.mxu0 %v363_v19 }
  0x24   :  { %240 = vmatprep.subr.bf16.mxu0 %v364_v20 }
  0x27   :  { %241 = vmatpush1.bf16.msra.mxu0 %v366_v21 }
  0x28   :  { %242 = vmatprep.subr.bf16.mxu0 %v367_v22 }
  0x2b   :  { %243 = vmatpush1.bf16.msra.mxu0 %v369_v23 }
  0x2c   :  { %244 = vmatprep.subr.bf16.mxu0 %v370_v24 }
  0x2f   :  { %245 = vmatpush1.bf16.msra.mxu0 %v372_v25 }
  0x30   :  { %246 = vmatprep.subr.bf16.mxu0 %v373_v26 }
  0x33   :  { %247 = vmatpush1.bf16.msra.mxu0 %v375_v27 }
  0x34   :  { %248 = vmatprep.subr.bf16.mxu0 %v376_v28 }
  0x37   :  { %249 = vmatpush1.bf16.msra.mxu0 %v378_v29 }
  0x38   :  { %250 = vmatprep.subr.bf16.mxu0 %v379_v30 }
  0x3b   :  { %251 = vmatpush1.bf16.msra.mxu0 %v381_v31 }
  0x3c   :  { %252 = vmatprep.subr.bf16.mxu0 %v382_v32 }
  0x3f   :  { %253 = vmatpush1.bf16.msra.mxu0 %v384_v33 }
  0x42   :  { %255 = vmatmul.mubr.bf16.vlgmr.msra.gmra.mrb[0].mxu0 %v301_v34 }
 0x115   :  { %v256_v42 = vpop.f32.mrb[0].mxu0 }
 0x116   :  { %v284_v43 = vadd.f32 %v277_v40, %v256_v42  ;;  %v258_v44 = vpop.f32.mrb[1].mxu0 }
 0x117   :  { %v285_v45 = vadd.f32 %v281_v41, %v258_v44  ;;  %v260_v46 = vpop.f32.mrb[2].mxu0 }
 0x118   :  { %v286_v47 = vmax.f32 %v284_v43, 0.0  ;;  %v261_v48 = vpop.f32.mrb[3].mxu0 }
 0x119   :  { %v287_v49 = vmax.f32 %v285_v45, 0.0 }
 0x11b   :  { %v336_v50 = vpack.c.bf16 %v287_v49, %v286_v47 }
 0x11d   :  { %296 = vst [vmem:[%s515_s3] sm:$0xff] %v336_v50 }

// kernel: esac_scnet_forward.23
= control target key start
LH: loop header
LB: loop body
LE: loop exit
PB: predicated region body
PF: predicated region fallthrough
CT: control target
= control target key end

     0   :  { %s1131_s15 = smov 0   ;;  %s1133_s16 = smov 0   ;;  %s1233_s0 = inlined_call_operand.vmem [shape: bf16[8,2304], index: 0, kind: input, shape index: {}]   ;;  %s1234_s1 = inlined_call_operand.vmem [shape: bf16[2304,256], index: 1, kind: input, shape index: {}]   ;;  %s1235_s2 = inlined_call_operand.vmem [shape: f32[1,256], index: 2, kind: input, shape index: {}]   ;;  %s1236_s3 = inlined_call_operand.vmem [shape: bf16[8,256], index: 3, kind: input, shape index: {}]   ;;  %s1237_s4 = inlined_call_operand.vmem [shape: bf16[8,256], index: 4, kind: output, shape index: {}]  }
   0x1   :  { %s1135_s17 = smov 0  }
   0x2 LB: > { %s26_s18 = sadd.s32 1, %s1098_s16  ;;  %p915_p0 = scmp.ge.s32.totalorder %s1102_s17, 1  ;;  %s1102_s17 = sphi %s1135_s17, %s14_s17   ;;  %s1098_s16 = sphi %s1133_s16, %s1239_s16   ;;  %s1094_s15 = sphi %s1131_s15, %s1238_s15  }
   0x3   : > { %p27_p1 = scmp.ge.s32.totalorder %s26_s18, 6  ;;  %p236_p2 = scmp.lt.s32.totalorder %s1102_s17, 7 }
   0x5   : > { %s1241_s18 = smov (%p27_p1, %s26_s18), 0  ;;  %p237_p3 = pnand %p915_p0, %p236_p2 }
   0x6   : > { %s293_s19 = smul.u32 (!%p237_p3), 3, %s1094_s15  ;;  %p919_p6 = scmp.ne.s32.totalorder (!%p237_p3), %s1094_s15, 0 }
   0x7   : > { %240 = sbr.rel (%p237_p3) target bundleno = 323 (0x143), region = 36 }
   0x8   : > { %s303_s20 = smul.u32 (!%p237_p3), 48, %s1094_s15  ;;  %p296_p4 = scmp.lt.s32.totalorder (!%p237_p3), %s293_s19, 17 }
   0xa   : > { %p305_p5 = scmp.lt.s32.totalorder (!%p237_p3), %s303_s20, 287 }
   0xe   : > { %s1243_s19 = smov (!%p296_p4, %s293_s19), 17  ;;  %s1245_s20 = smov (!%p305_p5, %s303_s20), 287 }
   0xf   : > { %s916_s21 = sshll.u32 %s1243_s19, 2  ;;  %s977_s25 = sshll.u32 %s1245_s20, 3  ;;  %v1104_v0 = vmov (!%p919_p6), 0.0  }
  0x10   : > { %s1156_s24 = scalar_lea.vmem %s1233_s0, %s916_s21  ;;  %s1161_s28 = scalar_lea.vmem %s1234_s1, %s977_s25  ;;  %345 = vst [vmem:[#allocation2] sm:$0xff] (!%p919_p6), %v1104_v0  ;;  %346 = vst [vmem:[#allocation2 + $0x8] sm:$0xff] (!%p919_p6), %v1104_v0 }
  0x11   : > { %344 = sbr.rel (%p919_p6) target bundleno = 24 (0x18), region = 40 }
  0x18 PF: > { %v1005_v1 = vld [vmem:[%s1161_s28 + $0x4] ss:$8 sps:$4 sm:$0xff]   ;;  %v1007_v2 = vld [vmem:[%s1161_s28] ss:$8 sps:$4 sm:$0xff]   ;;  %v1105_v3 = vmov 0   ;;  %p971_p7 = scmp.ne.s32.totalorder %s1094_s15, 5 }
  0x19   : > { %723 = vmatprep.mubr.bf16.mxu1 %v1105_v3  ;;  %650 = vmatprep.subr.bf16.mxu0 %v1005_v1  ;;  %v1008_v4 = vld [vmem:[%s1161_s28 + $0x14] ss:$8 sps:$4 sm:$0xff]   ;;  %v1010_v5 = vld [vmem:[%s1161_s28 + $0x10] ss:$8 sps:$4 sm:$0xff]   ;;  %v1011_v6 = vld [vmem:[%s1161_s28 + $0x24] ss:$8 sps:$4 sm:$0xff]  }
  0x1a   : > { %651 = vmatpush1.bf16.msra.mxu0 %v1007_v2  ;;  %v1013_v7 = vld [vmem:[%s1161_s28 + $0x20] ss:$8 sps:$4 sm:$0xff]   ;;  %v1014_v8 = vld [vmem:[%s1161_s28 + $0x34] ss:$8 sps:$4 sm:$0xff]   ;;  %v1016_v9 = vld [vmem:[%s1161_s28 + $0x30] ss:$8 sps:$4 sm:$0xff]  }
  0x1b   : > { %652 = vmatprep.subr.bf16.mxu0 %v1008_v4  ;;  %v1029_v10 = vld [vmem:[%s1161_s28 + $0x104] ss:$8 sps:$4 sm:$0xff]   ;;  %v1031_v11 = vld [vmem:[%s1161_s28 + $0x100] ss:$8 sps:$4 sm:$0xff]   ;;  %v1035_v13 = vld [vmem:[%s1161_s28 + $0x114] ss:$8 sps:$4 sm:$0xff]   ;;  %v744_v4 = vlaneseq (!%p971_p7) }
  0x1c   : > { %v1017_v12 = vld [vmem:[%s1161_s28 + $0x44] ss:$8 sps:$4 sm:$0xff]   ;;  %691 = vmatprep.subr.bf16.mxu1 %v1029_v10  ;;  %v1037_v14 = vld [vmem:[%s1161_s28 + $0x110] ss:$8 sps:$4 sm:$0xff]   ;;  %v1019_v15 = vld [vmem:[%s1161_s28 + $0x40] ss:$8 sps:$4 sm:$0xff]  }
  0x1d   : > { %692 = vmatpush1.bf16.msra.mxu1 %v1031_v11  ;;  %v1020_v16 = vld [vmem:[%s1161_s28 + $0x54] ss:$8 sps:$4 sm:$0xff]   ;;  %v1041_v17 = vld [vmem:[%s1161_s28 + $0x124] ss:$8 sps:$4 sm:$0xff]   ;;  %v1043_v18 = vld [vmem:[%s1161_s28 + $0x120] ss:$8 sps:$4 sm:$0xff]  }
  0x1e   : > { %653 = vmatpush1.bf16.msra.mxu0 %v1010_v5  ;;  %693 = vmatprep.subr.bf16.mxu1 %v1035_v13  ;;  %v1022_v19 = vld [vmem:[%s1161_s28 + $0x50] ss:$8 sps:$4 sm:$0xff]   ;;  %v1047_v20 = vld [vmem:[%s1161_s28 + $0x134] ss:$8 sps:$4 sm:$0xff]   ;;  %v1023_v21 = vld [vmem:[%s1161_s28 + $0x64] ss:$8 sps:$4 sm:$0xff]  }
  0x1f   : > { %654 = vmatprep.subr.bf16.mxu0 %v1011_v6  ;;  %v1049_v22 = vld [vmem:[%s1161_s28 + $0x130] ss:$8 sps:$4 sm:$0xff]   ;;  %v1025_v23 = vld [vmem:[%s1161_s28 + $0x60] ss:$8 sps:$4 sm:$0xff]   ;;  %v1053_v24 = vld [vmem:[%s1161_s28 + $0x144] ss:$8 sps:$4 sm:$0xff]  }
  0x20   : > { %v1026_v25 = vld [vmem:[%s1161_s28 + $0x74] ss:$8 sps:$4 sm:$0xff]   ;;  %v1055_v26 = vld [vmem:[%s1161_s28 + $0x140] ss:$8 sps:$4 sm:$0xff]   ;;  %v1028_v27 = vld [vmem:[%s1161_s28 + $0x70] ss:$8 sps:$4 sm:$0xff]  }
  0x21   : > { %694 = vmatpush1.bf16.msra.mxu1 %v1037_v14  ;;  %v1059_v28 = vld [vmem:[%s1161_s28 + $0x154] ss:$8 sps:$4 sm:$0xff]   ;;  %v1032_v29 = vld [vmem:[%s1161_s28 + $0x84] ss:$8 sps:$4 sm:$0xff]   ;;  %v1061_v30 = vld [vmem:[%s1161_s28 + $0x150] ss:$8 sps:$4 sm:$0xff]  }
  0x22   : > { %655 = vmatpush1.bf16.msra.mxu0 %v1013_v7  ;;  %695 = vmatprep.subr.bf16.mxu1 %v1041_v17  ;;  %v1034_v31 = vld [vmem:[%s1161_s28 + $0x80] ss:$8 sps:$4 sm:$0xff]   ;;  %v1065_v32 = vld [vmem:[%s1161_s28 + $0x164] ss:$8 sps:$4 sm:$0xff]   ;;  %v1038_v33 = vld [vmem:[%s1161_s28 + $0x94] ss:$8 sps:$4 sm:$0xff]  }
  0x23   : > { %656 = vmatprep.subr.bf16.mxu0 %v1014_v8  ;;  %v349_v34 = vld [vmem:[%s1156_s24] sm:$0xff]  ;;  %v1040_v37 = vld [vmem:[%s1161_s28 + $0x90] ss:$8 sps:$4 sm:$0xff]   ;;  %v1071_v38 = vld [vmem:[%s1161_s28 + $0x174] ss:$8 sps:$4 sm:$0xff]   ;;  %v745_v5 = vshrl.u32 (!%p971_p7), %v744_v4, 7 }
  0x24   : > { %v921_v35 = vcombine.high %v349_v34, %v349_v34  ;;  %v1067_v36 = vld [vmem:[%s1161_s28 + $0x160] ss:$8 sps:$4 sm:$0xff]   ;;  %v1044_v39 = vld [vmem:[%s1161_s28 + $0xa4] ss:$8 sps:$4 sm:$0xff]   ;;  %v1073_v40 = vld [vmem:[%s1161_s28 + $0x170] ss:$8 sps:$4 sm:$0xff]   ;;  %v920_v53 = vcombine.low %v349_v34, %v349_v34 }
  0x25   : > { %696 = vmatpush1.bf16.msra.mxu1 %v1043_v18  ;;  %v1046_v41 = vld [vmem:[%s1161_s28 + $0xa0] ss:$8 sps:$4 sm:$0xff]   ;;  %v1050_v42 = vld [vmem:[%s1161_s28 + $0xb4] ss:$8 sps:$4 sm:$0xff]   ;;  %v1052_v44 = vld [vmem:[%s1161_s28 + $0xb0] ss:$8 sps:$4 sm:$0xff]  }
  0x26   : > { %657 = vmatpush1.bf16.msra.mxu0 %v1016_v9  ;;  %697 = vmatprep.subr.bf16.mxu1 %v1047_v20  ;;  %v1077_v43 = vld [vmem:[%s1156_s24 + $0x8] ss:$0 sps:$4 sm:$0xff]   ;;  %v1056_v45 = vld [vmem:[%s1161_s28 + $0xc4] ss:$8 sps:$4 sm:$0xff]   ;;  %v1062_v47 = vld [vmem:[%s1161_s28 + $0xd4] ss:$8 sps:$4 sm:$0xff]  }
  0x27   : > { %658 = vmatprep.subr.bf16.mxu0 %v1017_v12  ;;  %682 = vmatprep.mubr.bf16.mxu0 %v921_v35  ;;  %v1058_v46 = vld [vmem:[%s1161_s28 + $0xc0] ss:$8 sps:$4 sm:$0xff]   ;;  %v1064_v48 = vld [vmem:[%s1161_s28 + $0xd0] ss:$8 sps:$4 sm:$0xff]   ;;  %v1068_v49 = vld [vmem:[%s1161_s28 + $0xe4] ss:$8 sps:$4 sm:$0xff]  }
  0x28   : > { %v1070_v50 = vld [vmem:[%s1161_s28 + $0xe0] ss:$8 sps:$4 sm:$0xff]   ;;  %v1074_v51 = vld [vmem:[%s1161_s28 + $0xf4] ss:$8 sps:$4 sm:$0xff]   ;;  %v1076_v52 = vld [vmem:[%s1161_s28 + $0xf0] ss:$8 sps:$4 sm:$0xff]  }
  0x29   : > { %698 = vmatpush1.bf16.msra.mxu1 %v1049_v22  ;;  %v347_v58 = vld [vmem:[#allocation2] sm:$0xff]  ;;  %v348_v61 = vld [vmem:[#allocation2 + $0x8] sm:$0xff]  ;;  %v746_v7 = vsub.s32 (!%p971_p7), 0, %v745_v5  ;;  %v750_v8 = vsub.s32 (!%p971_p7), 1, %v745_v5 }
  0x2a   : > { %659 = vmatpush1.bf16.msra.mxu0 %v1019_v15  ;;  %699 = vmatprep.subr.bf16.mxu1 %v1053_v24  ;;  %v742_v6 = vld [vmem:[%s1235_s2] sm:$0x3] (!%p971_p7) }
  0x2b   : > { %660 = vmatprep.subr.bf16.mxu0 %v1020_v16  ;;  %v758_v11 = vld [vmem:[%s1236_s3] sm:$0xff] (!%p971_p7)  ;;  %v747_v12 = vrot.slane (!%p971_p7), %v742_v6, %v746_v7  ;;  %v751_v13 = vrot.slane (!%p971_p7), %v742_v6, %v750_v8 }
  0x2c   : > { %v759_v16 = vunpack.c.l.bf16 (!%p971_p7), %v758_v11  ;;  %v760_v17 = vunpack.c.h.bf16 (!%p971_p7), %v758_v11 }
  0x2d   : > { %700 = vmatpush1.bf16.msra.mxu1 %v1055_v26 }
  0x2e   : > { %661 = vmatpush1.bf16.msra.mxu0 %v1022_v19  ;;  %701 = vmatprep.subr.bf16.mxu1 %v1059_v28 }
  0x2f   : > { %662 = vmatprep.subr.bf16.mxu0 %v1023_v21 }
  0x31   : > { %702 = vmatpush1.bf16.msra.mxu1 %v1061_v30 }
  0x32   : > { %663 = vmatpush1.bf16.msra.mxu0 %v1025_v23  ;;  %703 = vmatprep.subr.bf16.mxu1 %v1065_v32 }
  0x33   : > { %664 = vmatprep.subr.bf16.mxu0 %v1026_v25 }
  0x35   : > { %704 = vmatpush1.bf16.msra.mxu1 %v1067_v36 }
  0x36   : > { %665 = vmatpush1.bf16.msra.mxu0 %v1028_v27  ;;  %705 = vmatprep.subr.bf16.mxu1 %v1071_v38 }
  0x37   : > { %666 = vmatprep.subr.bf16.mxu0 %v1032_v29 }
  0x39   : > { %706 = vmatpush1.bf16.msra.mxu1 %v1073_v40 }
  0x3a   : > { %667 = vmatpush1.bf16.msra.mxu0 %v1034_v31 }
  0x3b   : > { %668 = vmatprep.subr.bf16.mxu0 %v1038_v33 }
  0x3c   : > { %724 = vmatmul.mubr.bf16.vlgmr.msra.gmra.mrb[0].mxu1 %v1077_v43 }
  0x3e   : > { %669 = vmatpush1.bf16.msra.mxu0 %v1040_v37 }
  0x3f   : > { %670 = vmatprep.subr.bf16.mxu0 %v1044_v39 }
  0x42   : > { %671 = vmatpush1.bf16.msra.mxu0 %v1046_v41 }
  0x43   : > { %672 = vmatprep.subr.bf16.mxu0 %v1050_v42 }
  0x46   : > { %673 = vmatpush1.bf16.msra.mxu0 %v1052_v44 }
  0x47   : > { %674 = vmatprep.subr.bf16.mxu0 %v1056_v45 }
  0x4a   : > { %675 = vmatpush1.bf16.msra.mxu0 %v1058_v46 }
  0x4b   : > { %676 = vmatprep.subr.bf16.mxu0 %v1062_v47 }
  0x4e   : > { %677 = vmatpush1.bf16.msra.mxu0 %v1064_v48 }
  0x4f   : > { %678 = vmatprep.subr.bf16.mxu0 %v1068_v49 }
  0x52   : > { %679 = vmatpush1.bf16.msra.mxu0 %v1070_v50 }
  0x53   : > { %680 = vmatprep.subr.bf16.mxu0 %v1074_v51 }
  0x56   : > { %681 = vmatpush1.bf16.msra.mxu0 %v1076_v52 }
  0x59   : > { %683 = vmatmul.mubr.bf16.vlgmr.msra.gmra.mrb[0].mxu0 %v920_v53 }
 0x10f   : > { %v725_v54 = vpop.f32.mrb[0].mxu1 }
 0x110   : > { %v727_v55 = vpop.f32.mrb[1].mxu1 }
 0x111   : > { %v729_v56 = vpop.f32.mrb[2].mxu1 }
 0x112   : > { %v730_v57 = vpop.f32.mrb[3].mxu1 }
 0x12c   : > { %v684_v59 = vpop.f32.mrb[0].mxu0  ;;  %739 = sbr.rel (%p971_p7) target bundleno = 323 (0x143), region = 44 }
 0x12d   : > { %v726_v60 = vadd.f32 %v725_v54, %v684_v59  ;;  %v686_v62 = vpop.f32.mrb[1].mxu0 }
 0x12e   : > { %v728_v63 = vadd.f32 %v727_v55, %v686_v62  ;;  %v688_v0 = vpop.f32.mrb[2].mxu0 }
 0x12f   : > { %v732_v1 = vadd.f32 %v726_v60, %v347_v58  ;;  %v689_v2 = vpop.f32.mrb[3].mxu0 }
 0x130   : > { %v733_v3 = vadd.f32 %v728_v63, %v348_v61 }
 0x131   : > { %734 = vst [vmem:[#allocation2] sm:$0xff] %v732_v1 }
 0x132   : > { %735 = vst [vmem:[#allocation2 + $0x8] sm:$0xff] %v733_v3 }
 0x138   : > { %v740_v9 = vld [vmem:[#allocation2] sm:$0xff] }
 0x139   : > { %v741_v10 = vld [vmem:[#allocation2 + $0x8] sm:$0xff]  ;;  %v754_v14 = vadd.f32 %v747_v12, %v740_v9 }
 0x13a   : > { %v755_v15 = vadd.f32 %v751_v13, %v741_v10 }
 0x13b   : > { %v756_v18 = vmax.f32 %v754_v14, 0.0 }
 0x13c   : > { %v757_v19 = vmax.f32 %v755_v15, 0.0 }
 0x13d   : > { %v761_v20 = vadd.f32 %v759_v16, %v756_v18 }
 0x13e   : > { %v762_v21 = vadd.f32 %v760_v17, %v757_v19 }
 0x140   : > { %v978_v22 = vpack.c.bf16 %v762_v21, %v761_v20 }
 0x142   : > { %771 = vst [vmem:[%s1237_s4] sm:$0xff] %v978_v22 }
 0x143 PF: > { %s14_s17 = sadd.s32 1, %s1102_s17   ;;  %s1238_s15 = smov %s1098_s16 }
 0x144   : > { %p11_p8 = scmp.ge.s32.totalorder %s14_s17, 8   ;;  %s1239_s16 = smov %s1241_s18 }
 0x146   :  { %13 = sbr.rel (!%p11_p8) target bundleno = 2 (0x2), region = 83 }

// kernel: esac_scnet_forward.24
= control target key start
LH: loop header
LB: loop body
LE: loop exit
PB: predicated region body
PF: predicated region fallthrough
CT: control target
= control target key end

     0   :  { %s1319_s12 = smov 0   ;;  %s1321_s13 = smov 0   ;;  %s1582_s0 = inlined_call_operand.vmem [shape: bf16[8,2304], index: 0, kind: input, shape index: {}]   ;;  %s1583_s1 = inlined_call_operand.vmem [shape: bf16[2304,512], index: 1, kind: input, shape index: {}]   ;;  %s1584_s2 = inlined_call_operand.vmem [shape: f32[1,512], index: 2, kind: input, shape index: {}]   ;;  %s1585_s3 = inlined_call_operand.vmem [shape: bf16[8,512], index: 3, kind: output, shape index: {}]  }
   0x1   :  { %s1323_s14 = smov 0   ;;  %s1325_s15 = smov 0  }
   0x2   :  { %s1327_s16 = smov 0   ;;  %s1329_s17 = smov 0  }
   0x3   :  { %s1331_s18 = smov 0  }
   0x4 LB: > { %s25_s19 = sadd.s32 1, %s1287_s16  ;;  %s28_s20 = sadd.s32 1, %s1291_s17  ;;  %s1295_s18 = sphi %s1331_s18, %s13_s18   ;;  %s1291_s17 = sphi %s1329_s17, %s1591_s17   ;;  %s1287_s16 = sphi %s1327_s16, %s1590_s16   ;;  %s1283_s15 = sphi %s1325_s15, %s1589_s15   ;;  %s1279_s14 = sphi %s1323_s14, %s1588_s14   ;;  %s1275_s13 = sphi %s1321_s13, %s1587_s13   ;;  %s1271_s12 = sphi %s1319_s12, %s1586_s12  }
   0x5   : > { %p26_p0 = scmp.ge.s32.totalorder %s25_s19, 6  ;;  %p76_p1 = scmp.ne.s32.totalorder %s1275_s13, %s1271_s12 }
   0x6   : > { %p77_p2 = scmp.eq.s32.totalorder %s1295_s18, 0  ;;  %s69_s24 = sadd.s32 1, %s1275_s13 }
   0x7   : > { %s1593_s19 = smov (%p26_p0, %s25_s19), 0  ;;  %s1595_s20 = smov (!%p26_p0, %s28_s20), %s1291_s17 }
   0x8   : > { %p78_p3 = por %p77_p2, %p76_p1  ;;  %p30_p4 = scmp.ge.s32.totalorder %s1595_s20, 2 }
   0x9   : > { %s64_s21 = ssub.s32 %s1287_s16, %s1593_s19  ;;  %p1039_p6 = scmp.ge.s32.totalorder %s1295_s18, 12 }
   0xa   : > { %s1597_s20 = smov (%p30_p4, %s1595_s20), 0 }
   0xb   : > { %s65_s22 = ssub.s32 %s1291_s17, %s1597_s20  ;;  %156 = sbr.rel (%p1039_p6) target bundleno = 50 (0x32), region = 16 }
   0xc   : > { %s66_s23 = sor.u32 %s65_s22, %s64_s21 }
   0xd   : > { %p67_p5 = scmp.eq.s32.totalorder %s66_s23, 0 }
   0xf   : > { %s1370_s25 = scalar_select %p67_p5, %s1275_s13, %s69_s24  }
  0x12   : > { %172 = sbr.rel (!%p78_p3) target bundleno = 50 (0x32), region = 24  ;;  %s174_s26 = sand.u32 (%p78_p3), 1, %s1275_s13  }
  0x13   : > { %s1106_s27 = smul.u32 (%p78_p3), 384, %s174_s26  ;;  %s1040_s28 = sshll.u32 (%p78_p3), %s1291_s17, 1 }
  0x14   : > { %s1104_s29 = smul.u32 (%p78_p3), 192, %s1287_s16 }
  0x15   : > { %s1384_s8 = scalar_lea.vmem (%p78_p3), [#allocation3], %s1106_s27 }
  0x16   : > { %s180_s30 = sadd.s32 (%p78_p3), %s1104_s29, %s1040_s28 }
  0x17   : > { %s1042_s4 = sshll.u32 (%p78_p3), %s180_s30, 2 }
  0x18   : > { %s1379_s7 = scalar_lea.vmem (%p78_p3), %s1583_s1, %s1042_s4 }
  0x19   : > { %v304_v0 = vld [vmem:[%s1379_s7] sm:$0xff]  ;;  %v306_v1 = vld [vmem:[%s1379_s7 + $0x10] sm:$0xff] }
  0x1a   : > { %v308_v2 = vld [vmem:[%s1379_s7 + $0x20] sm:$0xff]  ;;  %305 = vst [vmem:[%s1384_s8] sm:$0xff] %v304_v0  ;;  %307 = vst [vmem:[%s1384_s8 + $0x8] sm:$0xff] %v306_v1  ;;  %v310_v3 = vld [vmem:[%s1379_s7 + $0x30] sm:$0xff] }
  0x1b   : > { %309 = vst [vmem:[%s1384_s8 + $0x10] sm:$0xff] %v308_v2  ;;  %v312_v4 = vld [vmem:[%s1379_s7 + $0x40] sm:$0xff]  ;;  %v314_v5 = vld [vmem:[%s1379_s7 + $0x50] sm:$0xff]  ;;  %311 = vst [vmem:[%s1384_s8 + $0x18] sm:$0xff] %v310_v3 }
  0x1c   : > { %313 = vst [vmem:[%s1384_s8 + $0x20] sm:$0xff] %v312_v4  ;;  %315 = vst [vmem:[%s1384_s8 + $0x28] sm:$0xff] %v314_v5  ;;  %v316_v6 = vld [vmem:[%s1379_s7 + $0x60] sm:$0xff]  ;;  %v318_v7 = vld [vmem:[%s1379_s7 + $0x70] sm:$0xff] }
  0x1d   : > { %v320_v8 = vld [vmem:[%s1379_s7 + $0x80] sm:$0xff]  ;;  %317 = vst [vmem:[%s1384_s8 + $0x30] sm:$0xff] %v316_v6  ;;  %319 = vst [vmem:[%s1384_s8 + $0x38] sm:$0xff] %v318_v7  ;;  %v322_v9 = vld [vmem:[%s1379_s7 + $0x90] sm:$0xff] }
  0x1e   : > { %321 = vst [vmem:[%s1384_s8 + $0x40] sm:$0xff] %v320_v8  ;;  %v324_v10 = vld [vmem:[%s1379_s7 + $0xa0] sm:$0xff]  ;;  %v326_v11 = vld [vmem:[%s1379_s7 + $0xb0] sm:$0xff]  ;;  %323 = vst [vmem:[%s1384_s8 + $0x48] sm:$0xff] %v322_v9 }
  0x1f   : > { %325 = vst [vmem:[%s1384_s8 + $0x50] sm:$0xff] %v324_v10  ;;  %327 = vst [vmem:[%s1384_s8 + $0x58] sm:$0xff] %v326_v11  ;;  %v328_v12 = vld [vmem:[%s1379_s7 + $0xc0] sm:$0xff]  ;;  %v330_v13 = vld [vmem:[%s1379_s7 + $0xd0] sm:$0xff] }
  0x20   : > { %v332_v14 = vld [vmem:[%s1379_s7 + $0xe0] sm:$0xff]  ;;  %329 = vst [vmem:[%s1384_s8 + $0x60] sm:$0xff] %v328_v12  ;;  %331 = vst [vmem:[%s1384_s8 + $0x68] sm:$0xff] %v330_v13  ;;  %v334_v15 = vld [vmem:[%s1379_s7 + $0xf0] sm:$0xff] }
  0x21   : > { %333 = vst [vmem:[%s1384_s8 + $0x70] sm:$0xff] %v332_v14  ;;  %v336_v16 = vld [vmem:[%s1379_s7 + $0x100] sm:$0xff]  ;;  %v338_v17 = vld [vmem:[%s1379_s7 + $0x110] sm:$0xff]  ;;  %335 = vst [vmem:[%s1384_s8 + $0x78] sm:$0xff] %v334_v15 }
  0x22   : > { %337 = vst [vmem:[%s1384_s8 + $0x80] sm:$0xff] %v336_v16  ;;  %339 = vst [vmem:[%s1384_s8 + $0x88] sm:$0xff] %v338_v17  ;;  %v340_v18 = vld [vmem:[%s1379_s7 + $0x120] sm:$0xff]  ;;  %v342_v19 = vld [vmem:[%s1379_s7 + $0x130] sm:$0xff] }
  0x23   : > { %v344_v20 = vld [vmem:[%s1379_s7 + $0x140] sm:$0xff]  ;;  %341 = vst [vmem:[%s1384_s8 + $0x90] sm:$0xff] %v340_v18  ;;  %343 = vst [vmem:[%s1384_s8 + $0x98] sm:$0xff] %v342_v19  ;;  %v346_v21 = vld [vmem:[%s1379_s7 + $0x150] sm:$0xff] }
  0x24   : > { %345 = vst [vmem:[%s1384_s8 + $0xa0] sm:$0xff] %v344_v20  ;;  %v348_v22 = vld [vmem:[%s1379_s7 + $0x160] sm:$0xff]  ;;  %v350_v23 = vld [vmem:[%s1379_s7 + $0x170] sm:$0xff]  ;;  %347 = vst [vmem:[%s1384_s8 + $0xa8] sm:$0xff] %v346_v21 }
  0x25   : > { %349 = vst [vmem:[%s1384_s8 + $0xb0] sm:$0xff] %v348_v22  ;;  %351 = vst [vmem:[%s1384_s8 + $0xb8] sm:$0xff] %v350_v23  ;;  %v352_v24 = vld [vmem:[%s1379_s7 + $0x180] sm:$0xff]  ;;  %v354_v25 = vld [vmem:[%s1379_s7 + $0x190] sm:$0xff] }
  0x26   : > { %v356_v26 = vld [vmem:[%s1379_s7 + $0x1a0] sm:$0xff]  ;;  %353 = vst [vmem:[%s1384_s8 + $0xc0] sm:$0xff] %v352_v24  ;;  %355 = vst [vmem:[%s1384_s8 + $0xc8] sm:$0xff] %v354_v25  ;;  %v358_v27 = vld [vmem:[%s1379_s7 + $0x1b0] sm:$0xff] }
  0x27   : > { %357 = vst [vmem:[%s1384_s8 + $0xd0] sm:$0xff] %v356_v26  ;;  %v360_v28 = vld [vmem:[%s1379_s7 + $0x1c0] sm:$0xff]  ;;  %v362_v29 = vld [vmem:[%s1379_s7 + $0x1d0] sm:$0xff]  ;;  %359 = vst [vmem:[%s1384_s8 + $0xd8] sm:$0xff] %v358_v27 }
  0x28   : > { %361 = vst [vmem:[%s1384_s8 + $0xe0] sm:$0xff] %v360_v28  ;;  %363 = vst [vmem:[%s1384_s8 + $0xe8] sm:$0xff] %v362_v29  ;;  %v364_v30 = vld [vmem:[%s1379_s7 + $0x1e0] sm:$0xff]  ;;  %v366_v31 = vld [vmem:[%s1379_s7 + $0x1f0] sm:$0xff] }
  0x29   : > { %v368_v32 = vld [vmem:[%s1379_s7 + $0x200] sm:$0xff]  ;;  %365 = vst [vmem:[%s1384_s8 + $0xf0] sm:$0xff] %v364_v30  ;;  %367 = vst [vmem:[%s1384_s8 + $0xf8] sm:$0xff] %v366_v31  ;;  %v370_v33 = vld [vmem:[%s1379_s7 + $0x210] sm:$0xff] }
  0x2a   : > { %369 = vst [vmem:[%s1384_s8 + $0x100] sm:$0xff] %v368_v32  ;;  %v372_v34 = vld [vmem:[%s1379_s7 + $0x220] sm:$0xff]  ;;  %v374_v35 = vld [vmem:[%s1379_s7 + $0x230] sm:$0xff]  ;;  %371 = vst [vmem:[%s1384_s8 + $0x108] sm:$0xff] %v370_v33 }
  0x2b   : > { %373 = vst [vmem:[%s1384_s8 + $0x110] sm:$0xff] %v372_v34  ;;  %375 = vst [vmem:[%s1384_s8 + $0x118] sm:$0xff] %v374_v35  ;;  %v376_v36 = vld [vmem:[%s1379_s7 + $0x240] sm:$0xff]  ;;  %v378_v37 = vld [vmem:[%s1379_s7 + $0x250] sm:$0xff] }
  0x2c   : > { %v380_v38 = vld [vmem:[%s1379_s7 + $0x260] sm:$0xff]  ;;  %377 = vst [vmem:[%s1384_s8 + $0x120] sm:$0xff] %v376_v36  ;;  %379 = vst [vmem:[%s1384_s8 + $0x128] sm:$0xff] %v378_v37  ;;  %v382_v39 = vld [vmem:[%s1379_s7 + $0x270] sm:$0xff] }
  0x2d   : > { %381 = vst [vmem:[%s1384_s8 + $0x130] sm:$0xff] %v380_v38  ;;  %v384_v40 = vld [vmem:[%s1379_s7 + $0x280] sm:$0xff]  ;;  %v386_v41 = vld [vmem:[%s1379_s7 + $0x290] sm:$0xff]  ;;  %383 = vst [vmem:[%s1384_s8 + $0x138] sm:$0xff] %v382_v39 }
  0x2e   : > { %385 = vst [vmem:[%s1384_s8 + $0x140] sm:$0xff] %v384_v40  ;;  %387 = vst [vmem:[%s1384_s8 + $0x148] sm:$0xff] %v386_v41  ;;  %v388_v42 = vld [vmem:[%s1379_s7 + $0x2a0] sm:$0xff]  ;;  %v390_v43 = vld [vmem:[%s1379_s7 + $0x2b0] sm:$0xff] }
  0x2f   : > { %v392_v44 = vld [vmem:[%s1379_s7 + $0x2c0] sm:$0xff]  ;;  %389 = vst [vmem:[%s1384_s8 + $0x150] sm:$0xff] %v388_v42  ;;  %391 = vst [vmem:[%s1384_s8 + $0x158] sm:$0xff] %v390_v43  ;;  %v394_v45 = vld [vmem:[%s1379_s7 + $0x2d0] sm:$0xff] }
  0x30   : > { %393 = vst [vmem:[%s1384_s8 + $0x160] sm:$0xff] %v392_v44  ;;  %v396_v46 = vld [vmem:[%s1379_s7 + $0x2e0] sm:$0xff]  ;;  %v398_v47 = vld [vmem:[%s1379_s7 + $0x2f0] sm:$0xff]  ;;  %395 = vst [vmem:[%s1384_s8 + $0x168] sm:$0xff] %v394_v45 }
  0x31   : > { %397 = vst [vmem:[%s1384_s8 + $0x170] sm:$0xff] %v396_v46  ;;  %399 = vst [vmem:[%s1384_s8 + $0x178] sm:$0xff] %v398_v47 }
  0x32 PF: > { %p1043_p7 = scmp.ge.s32.totalorder %s1295_s18, 1  ;;  %p412_p8 = scmp.lt.s32.totalorder %s1295_s18, 13 }
  0x34   : > { %p413_p9 = pnand %p1043_p7, %p412_p8 }
  0x35   : > { %s419_s9 = sand.u32 (!%p413_p9), 1, %s1271_s12   ;;  %s459_s10 = smul.u32 (!%p413_p9), 3, %s1279_s14 }
  0x36   : > { %416 = sbr.rel (%p413_p9) target bundleno = 368 (0x170), region = 66  ;;  %s1045_s21 = sshll.u32 (!%p413_p9), %s1283_s15, 1 }
  0x37   : > { %s1107_s11 = smul.u32 (!%p413_p9), 384, %s419_s9  ;;  %p462_p10 = scmp.lt.s32.totalorder (!%p413_p9), %s459_s10, 17 }
  0x38   : > { %p472_p11 = scmp.lt.s32.totalorder (!%p413_p9), %s1045_s21, 3  ;;  %p1048_p12 = scmp.ne.s32.totalorder (!%p413_p9), %s1279_s14, 0 }
  0x39   : > { %s1501_s5 = scalar_lea.vmem (!%p413_p9), [#allocation3], %s1107_s11 }
  0x3d   : > { %s1599_s10 = smov (!%p462_p10, %s459_s10), 17  ;;  %s1601_s21 = smov (!%p472_p11, %s1045_s21), 3 }
  0x3e   : > { %s1044_s22 = sshll.u32 %s1599_s10, 2  ;;  %s474_s12 = scalar_lea.vmem %s1584_s2, %s1601_s21  ;;  %v1297_v48 = vmov (!%p1048_p12), 0.0  }
  0x3f   : > { %s1489_s26 = scalar_lea.vmem %s1582_s0, %s1044_s22  ;;  %s1047_s29 = sshll.u32 %s1601_s21, 2  ;;  %491 = vst [vmem:[#allocation2] sm:$0xff] (!%p1048_p12), %v1297_v48  ;;  %492 = vst [vmem:[#allocation2 + $0x8] sm:$0xff] (!%p1048_p12), %v1297_v48 }
  0x40   : > { %s1499_s4 = scalar_lea.vmem %s1585_s3, %s1047_s29  ;;  %490 = sbr.rel (%p1048_p12) target bundleno = 71 (0x47), region = 74 }
  0x47 PF: > { %v1166_v49 = vld [vmem:[%s1501_s5 + $0x4] ss:$8 sps:$4 sm:$0xff]   ;;  %v1168_v50 = vld [vmem:[%s1501_s5] ss:$8 sps:$4 sm:$0xff]   ;;  %v1298_v51 = vmov 0   ;;  %v495_v18 = vld [vmem:[%s1489_s26] sm:$0xff] }
  0x48   : > { %869 = vmatprep.mubr.bf16.mxu1 %v1298_v51  ;;  %796 = vmatprep.subr.bf16.mxu0 %v1166_v49  ;;  %v1169_v52 = vld [vmem:[%s1501_s5 + $0x14] ss:$8 sps:$4 sm:$0xff]   ;;  %v1171_v53 = vld [vmem:[%s1501_s5 + $0x10] ss:$8 sps:$4 sm:$0xff]   ;;  %v1172_v54 = vld [vmem:[%s1501_s5 + $0x24] ss:$8 sps:$4 sm:$0xff]   ;;  %v1050_v19 = vcombine.high %v495_v18, %v495_v18  ;;  %v1049_v37 = vcombine.low %v495_v18, %v495_v18 }
  0x49   : > { %797 = vmatpush1.bf16.msra.mxu0 %v1168_v50  ;;  %v1174_v55 = vld [vmem:[%s1501_s5 + $0x20] ss:$8 sps:$4 sm:$0xff]   ;;  %v1175_v56 = vld [vmem:[%s1501_s5 + $0x34] ss:$8 sps:$4 sm:$0xff]   ;;  %v1177_v57 = vld [vmem:[%s1501_s5 + $0x30] ss:$8 sps:$4 sm:$0xff]  }
  0x4a   : > { %798 = vmatprep.subr.bf16.mxu0 %v1169_v52  ;;  %v1190_v58 = vld [vmem:[%s1501_s5 + $0x104] ss:$8 sps:$4 sm:$0xff]   ;;  %v1192_v59 = vld [vmem:[%s1501_s5 + $0x100] ss:$8 sps:$4 sm:$0xff]   ;;  %v1196_v61 = vld [vmem:[%s1501_s5 + $0x114] ss:$8 sps:$4 sm:$0xff]   ;;  %828 = vmatprep.mubr.bf16.mxu0 %v1050_v19 }
  0x4b   : > { %v1178_v60 = vld [vmem:[%s1501_s5 + $0x44] ss:$8 sps:$4 sm:$0xff]   ;;  %837 = vmatprep.subr.bf16.mxu1 %v1190_v58  ;;  %v1198_v62 = vld [vmem:[%s1501_s5 + $0x110] ss:$8 sps:$4 sm:$0xff]   ;;  %v1180_v63 = vld [vmem:[%s1501_s5 + $0x40] ss:$8 sps:$4 sm:$0xff]  }
  0x4c   : > { %838 = vmatpush1.bf16.msra.mxu1 %v1192_v59  ;;  %v1181_v0 = vld [vmem:[%s1501_s5 + $0x54] ss:$8 sps:$4 sm:$0xff]   ;;  %v1202_v1 = vld [vmem:[%s1501_s5 + $0x124] ss:$8 sps:$4 sm:$0xff]   ;;  %v1204_v2 = vld [vmem:[%s1501_s5 + $0x120] ss:$8 sps:$4 sm:$0xff]  }
  0x4d   : > { %799 = vmatpush1.bf16.msra.mxu0 %v1171_v53  ;;  %839 = vmatprep.subr.bf16.mxu1 %v1196_v61  ;;  %v1183_v3 = vld [vmem:[%s1501_s5 + $0x50] ss:$8 sps:$4 sm:$0xff]   ;;  %v1208_v4 = vld [vmem:[%s1501_s5 + $0x134] ss:$8 sps:$4 sm:$0xff]   ;;  %v1184_v5 = vld [vmem:[%s1501_s5 + $0x64] ss:$8 sps:$4 sm:$0xff]  }
  0x4e   : > { %800 = vmatprep.subr.bf16.mxu0 %v1172_v54  ;;  %v1210_v6 = vld [vmem:[%s1501_s5 + $0x130] ss:$8 sps:$4 sm:$0xff]   ;;  %v1186_v7 = vld [vmem:[%s1501_s5 + $0x60] ss:$8 sps:$4 sm:$0xff]   ;;  %v1214_v8 = vld [vmem:[%s1501_s5 + $0x144] ss:$8 sps:$4 sm:$0xff]  }
  0x4f   : > { %v1187_v9 = vld [vmem:[%s1501_s5 + $0x74] ss:$8 sps:$4 sm:$0xff]   ;;  %v1216_v10 = vld [vmem:[%s1501_s5 + $0x140] ss:$8 sps:$4 sm:$0xff]   ;;  %v1189_v11 = vld [vmem:[%s1501_s5 + $0x70] ss:$8 sps:$4 sm:$0xff]  }
  0x50   : > { %840 = vmatpush1.bf16.msra.mxu1 %v1198_v62  ;;  %v1220_v12 = vld [vmem:[%s1501_s5 + $0x154] ss:$8 sps:$4 sm:$0xff]   ;;  %v1193_v13 = vld [vmem:[%s1501_s5 + $0x84] ss:$8 sps:$4 sm:$0xff]   ;;  %v1222_v14 = vld [vmem:[%s1501_s5 + $0x150] ss:$8 sps:$4 sm:$0xff]  }
  0x51   : > { %801 = vmatpush1.bf16.msra.mxu0 %v1174_v55  ;;  %841 = vmatprep.subr.bf16.mxu1 %v1202_v1  ;;  %v1195_v15 = vld [vmem:[%s1501_s5 + $0x80] ss:$8 sps:$4 sm:$0xff]   ;;  %v1226_v16 = vld [vmem:[%s1501_s5 + $0x164] ss:$8 sps:$4 sm:$0xff]   ;;  %v1199_v17 = vld [vmem:[%s1501_s5 + $0x94] ss:$8 sps:$4 sm:$0xff]  }
  0x52   : > { %802 = vmatprep.subr.bf16.mxu0 %v1175_v56  ;;  %v1228_v20 = vld [vmem:[%s1501_s5 + $0x160] ss:$8 sps:$4 sm:$0xff]   ;;  %v1201_v21 = vld [vmem:[%s1501_s5 + $0x90] ss:$8 sps:$4 sm:$0xff]   ;;  %v1232_v22 = vld [vmem:[%s1501_s5 + $0x174] ss:$8 sps:$4 sm:$0xff]  }
  0x53   : > { %v1205_v23 = vld [vmem:[%s1501_s5 + $0xa4] ss:$8 sps:$4 sm:$0xff]   ;;  %v1234_v24 = vld [vmem:[%s1501_s5 + $0x170] ss:$8 sps:$4 sm:$0xff]   ;;  %v1207_v25 = vld [vmem:[%s1501_s5 + $0xa0] ss:$8 sps:$4 sm:$0xff]  }
  0x54   : > { %842 = vmatpush1.bf16.msra.mxu1 %v1204_v2  ;;  %v1211_v26 = vld [vmem:[%s1501_s5 + $0xb4] ss:$8 sps:$4 sm:$0xff]   ;;  %v1238_v27 = vld [vmem:[%s1489_s26 + $0x8] ss:$0 sps:$4 sm:$0xff]   ;;  %v1217_v29 = vld [vmem:[%s1501_s5 + $0xc4] ss:$8 sps:$4 sm:$0xff]  }
  0x55   : > { %803 = vmatpush1.bf16.msra.mxu0 %v1177_v57  ;;  %843 = vmatprep.subr.bf16.mxu1 %v1208_v4  ;;  %v1213_v28 = vld [vmem:[%s1501_s5 + $0xb0] ss:$8 sps:$4 sm:$0xff]   ;;  %v1219_v30 = vld [vmem:[%s1501_s5 + $0xc0] ss:$8 sps:$4 sm:$0xff]   ;;  %v1223_v31 = vld [vmem:[%s1501_s5 + $0xd4] ss:$8 sps:$4 sm:$0xff]  }
  0x56   : > { %804 = vmatprep.subr.bf16.mxu0 %v1178_v60  ;;  %v1225_v32 = vld [vmem:[%s1501_s5 + $0xd0] ss:$8 sps:$4 sm:$0xff]   ;;  %v1229_v33 = vld [vmem:[%s1501_s5 + $0xe4] ss:$8 sps:$4 sm:$0xff]   ;;  %v1231_v34 = vld [vmem:[%s1501_s5 + $0xe0] ss:$8 sps:$4 sm:$0xff]  }
  0x57   : > { %v1235_v35 = vld [vmem:[%s1501_s5 + $0xf4] ss:$8 sps:$4 sm:$0xff]   ;;  %v1237_v36 = vld [vmem:[%s1501_s5 + $0xf0] ss:$8 sps:$4 sm:$0xff]   ;;  %p1100_p13 = scmp.ne.s32.totalorder %s1279_s14, 5 }
  0x58   : > { %844 = vmatpush1.bf16.msra.mxu1 %v1210_v6  ;;  %v493_v42 = vld [vmem:[#allocation2] sm:$0xff]  ;;  %v494_v45 = vld [vmem:[#allocation2 + $0x8] sm:$0xff]  ;;  %v890_v52 = vlaneseq (!%p1100_p13) }
  0x59   : > { %805 = vmatpush1.bf16.msra.mxu0 %v1180_v63  ;;  %845 = vmatprep.subr.bf16.mxu1 %v1214_v8  ;;  %v888_v54 = vld [vmem:[%s474_s12] sm:$0x3] (!%p1100_p13) }
  0x5a   : > { %806 = vmatprep.subr.bf16.mxu0 %v1181_v0  ;;  %v891_v53 = vshrl.u32 (!%p1100_p13), %v890_v52, 7 }
  0x5c   : > { %846 = vmatpush1.bf16.msra.mxu1 %v1216_v10  ;;  %v892_v55 = vsub.s32 (!%p1100_p13), 0, %v891_v53  ;;  %v896_v56 = vsub.s32 (!%p1100_p13), 1, %v891_v53 }
  0x5d   : > { %807 = vmatpush1.bf16.msra.mxu0 %v1183_v3  ;;  %847 = vmatprep.subr.bf16.mxu1 %v1220_v12 }
  0x5e   : > { %808 = vmatprep.subr.bf16.mxu0 %v1184_v5  ;;  %v893_v59 = vrot.slane (!%p1100_p13), %v888_v54, %v892_v55  ;;  %v897_v60 = vrot.slane (!%p1100_p13), %v888_v54, %v896_v56 }
  0x60   : > { %848 = vmatpush1.bf16.msra.mxu1 %v1222_v14 }
  0x61   : > { %809 = vmatpush1.bf16.msra.mxu0 %v1186_v7  ;;  %849 = vmatprep.subr.bf16.mxu1 %v1226_v16 }
  0x62   : > { %810 = vmatprep.subr.bf16.mxu0 %v1187_v9 }
  0x64   : > { %850 = vmatpush1.bf16.msra.mxu1 %v1228_v20 }
  0x65   : > { %811 = vmatpush1.bf16.msra.mxu0 %v1189_v11  ;;  %851 = vmatprep.subr.bf16.mxu1 %v1232_v22 }
  0x66   : > { %812 = vmatprep.subr.bf16.mxu0 %v1193_v13 }
  0x68   : > { %852 = vmatpush1.bf16.msra.mxu1 %v1234_v24 }
  0x69   : > { %813 = vmatpush1.bf16.msra.mxu0 %v1195_v15 }
  0x6a   : > { %814 = vmatprep.subr.bf16.mxu0 %v1199_v17 }
  0x6b   : > { %870 = vmatmul.mubr.bf16.vlgmr.msra.gmra.mrb[0].mxu1 %v1238_v27 }
  0x6d   : > { %815 = vmatpush1.bf16.msra.mxu0 %v1201_v21 }
  0x6e   : > { %816 = vmatprep.subr.bf16.mxu0 %v1205_v23 }
  0x71   : > { %817 = vmatpush1.bf16.msra.mxu0 %v1207_v25 }
  0x72   : > { %818 = vmatprep.subr.bf16.mxu0 %v1211_v26 }
  0x75   : > { %819 = vmatpush1.bf16.msra.mxu0 %v1213_v28 }
  0x76   : > { %820 = vmatprep.subr.bf16.mxu0 %v1217_v29 }
  0x79   : > { %821 = vmatpush1.bf16.msra.mxu0 %v1219_v30 }
  0x7a   : > { %822 = vmatprep.subr.bf16.mxu0 %v1223_v31 }
  0x7d   : > { %823 = vmatpush1.bf16.msra.mxu0 %v1225_v32 }
  0x7e   : > { %824 = vmatprep.subr.bf16.mxu0 %v1229_v33 }
  0x81   : > { %825 = vmatpush1.bf16.msra.mxu0 %v1231_v34 }
  0x82   : > { %826 = vmatprep.subr.bf16.mxu0 %v1235_v35 }
  0x85   : > { %827 = vmatpush1.bf16.msra.mxu0 %v1237_v36 }
  0x88   : > { %829 = vmatmul.mubr.bf16.vlgmr.msra.gmra.mrb[0].mxu0 %v1049_v37 }
 0x13e   : > { %v871_v38 = vpop.f32.mrb[0].mxu1 }
 0x13f   : > { %v873_v39 = vpop.f32.mrb[1].mxu1 }
 0x140   : > { %v875_v40 = vpop.f32.mrb[2].mxu1 }
 0x141   : > { %v876_v41 = vpop.f32.mrb[3].mxu1 }
 0x15b   : > { %v830_v43 = vpop.f32.mrb[0].mxu0  ;;  %885 = sbr.rel (%p1100_p13) target bundleno = 368 (0x170), region = 78 }
 0x15c   : > { %v872_v44 = vadd.f32 %v871_v38, %v830_v43  ;;  %v832_v46 = vpop.f32.mrb[1].mxu0 }
 0x15d   : > { %v874_v47 = vadd.f32 %v873_v39, %v832_v46  ;;  %v834_v48 = vpop.f32.mrb[2].mxu0 }
 0x15e   : > { %v878_v49 = vadd.f32 %v872_v44, %v493_v42  ;;  %v835_v50 = vpop.f32.mrb[3].mxu0 }
 0x15f   : > { %v879_v51 = vadd.f32 %v874_v47, %v494_v45 }
 0x160   : > { %880 = vst [vmem:[#allocation2] sm:$0xff] %v878_v49 }
 0x161   : > { %881 = vst [vmem:[#allocation2 + $0x8] sm:$0xff] %v879_v51 }
 0x167   : > { %v886_v57 = vld [vmem:[#allocation2] sm:$0xff] }
 0x168   : > { %v887_v58 = vld [vmem:[#allocation2 + $0x8] sm:$0xff]  ;;  %v900_v61 = vadd.f32 %v893_v59, %v886_v57 }
 0x169   : > { %v901_v62 = vadd.f32 %v897_v60, %v887_v58 }
 0x16a   : > { %v902_v63 = vmax.f32 %v900_v61, 0.0 }
 0x16b   : > { %v903_v0 = vmax.f32 %v901_v62, 0.0 }
 0x16d   : > { %v1105_v1 = vpack.c.bf16 %v903_v0, %v902_v63 }
 0x16f   : > { %912 = vst [vmem:[%s1499_s4] sm:$0xff] %v1105_v1 }
 0x170 PF: > { %s13_s18 = sadd.s32 1, %s1295_s18   ;;  %s1586_s12 = smov %s1275_s13 }
 0x171   : > { %p10_p0 = scmp.ge.s32.totalorder %s13_s18, 14   ;;  %s1587_s13 = smov %s1370_s25 }
 0x172   : > { %s1588_s14 = smov %s1287_s16  ;;  %s1589_s15 = smov %s1291_s17 }
 0x173   : > { %s1590_s16 = smov %s1593_s19  ;;  %s1591_s17 = smov %s1597_s20 }
 0x174   :  { %12 = sbr.rel (!%p10_p0) target bundleno = 4 (0x4), region = 119 }

// kernel: esac_scnet_forward.25
= control target key start
LH: loop header
LB: loop body
LE: loop exit
PB: predicated region body
PF: predicated region fallthrough
CT: control target
= control target key end

     0   :  { %s1483_s12 = smov 0   ;;  %s1485_s13 = smov 0   ;;  %s1767_s0 = inlined_call_operand.vmem [shape: bf16[8,512], index: 0, kind: input, shape index: {}]   ;;  %s1768_s1 = inlined_call_operand.vmem [shape: bf16[512,512], index: 1, kind: input, shape index: {}]   ;;  %s1769_s2 = inlined_call_operand.vmem [shape: f32[1,512], index: 2, kind: input, shape index: {}]   ;;  %s1770_s3 = inlined_call_operand.vmem [shape: bf16[8,512], index: 3, kind: output, shape index: {}]  }
   0x1   :  { %s1487_s14 = smov 0   ;;  %s1489_s15 = smov 0  }
   0x2   :  { %s1491_s16 = smov 0  }
   0x3 LB: > { %s28_s17 = sadd.s32 1, %s1457_s15  ;;  %p76_p1 = scmp.ne.s32.totalorder %s1449_s13, %s1445_s12  ;;  %s1461_s16 = sphi %s1491_s16, %s13_s16   ;;  %s1457_s15 = sphi %s1489_s15, %s1774_s15   ;;  %s1453_s14 = sphi %s1487_s14, %s1773_s14   ;;  %s1449_s13 = sphi %s1485_s13, %s1772_s13   ;;  %s1445_s12 = sphi %s1483_s12, %s1771_s12  }
   0x4   : > { %p30_p0 = scmp.ge.s32.totalorder %s28_s17, 2  ;;  %p77_p2 = scmp.eq.s32.totalorder %s1461_s16, 0 }
   0x5   : > { %s69_s19 = sadd.s32 1, %s1449_s13  ;;  %p1201_p5 = scmp.ge.s32.totalorder %s1461_s16, 2 }
   0x6   : > { %s1776_s17 = smov (%p30_p0, %s28_s17), 0  ;;  %p78_p3 = por %p77_p2, %p76_p1 }
   0x7   : > { %s65_s18 = ssub.s32 %s1457_s15, %s1776_s17  ;;  %169 = sbr.rel (%p1201_p5) target bundleno = 50 (0x32), region = 20 }
   0x8   : > { %p67_p4 = scmp.eq.s32.totalorder %s65_s18, 0 }
   0xa   : > { %s1518_s20 = scalar_select %p67_p4, %s1449_s13, %s69_s19  }
   0xe   : > { %172 = sbr.rel (!%p78_p3) target bundleno = 50 (0x32), region = 24  ;;  %s174_s21 = sand.u32 (%p78_p3), 1, %s1449_s13  }
   0xf   : > { %s1281_s22 = sshll.u32 (%p78_p3), %s1457_s15, 3  ;;  %s1202_s23 = sshll.u32 (%p78_p3), %s174_s21, 9 }
  0x10   : > { %s1526_s26 = scalar_lea.vmem (%p78_p3), %s1768_s1, %s1281_s22  ;;  %s1531_s27 = scalar_lea.vmem (%p78_p3), [#allocation3], %s1202_s23 }
  0x11   : > { %v336_v0 = vld [vmem:[%s1526_s26] sm:$0xff] (%p78_p3)  ;;  %v338_v1 = vld [vmem:[%s1526_s26 + $0x10] sm:$0xff] (%p78_p3) }
  0x12   : > { %v340_v2 = vld [vmem:[%s1526_s26 + $0x20] sm:$0xff] (%p78_p3)  ;;  %337 = vst [vmem:[%s1531_s27] sm:$0xff] (%p78_p3), %v336_v0  ;;  %339 = vst [vmem:[%s1531_s27 + $0x8] sm:$0xff] (%p78_p3), %v338_v1  ;;  %v342_v3 = vld [vmem:[%s1526_s26 + $0x30] sm:$0xff] (%p78_p3) }
  0x13   : > { %341 = vst [vmem:[%s1531_s27 + $0x10] sm:$0xff] (%p78_p3), %v340_v2  ;;  %v344_v4 = vld [vmem:[%s1526_s26 + $0x40] sm:$0xff] (%p78_p3)  ;;  %v346_v5 = vld [vmem:[%s1526_s26 + $0x50] sm:$0xff] (%p78_p3)  ;;  %343 = vst [vmem:[%s1531_s27 + $0x18] sm:$0xff] (%p78_p3), %v342_v3 }
  0x14   : > { %345 = vst [vmem:[%s1531_s27 + $0x20] sm:$0xff] (%p78_p3), %v344_v4  ;;  %347 = vst [vmem:[%s1531_s27 + $0x28] sm:$0xff] (%p78_p3), %v346_v5  ;;  %v348_v6 = vld [vmem:[%s1526_s26 + $0x60] sm:$0xff] (%p78_p3)  ;;  %v350_v7 = vld [vmem:[%s1526_s26 + $0x70] sm:$0xff] (%p78_p3) }
  0x15   : > { %v352_v8 = vld [vmem:[%s1526_s26 + $0x80] sm:$0xff]  ;;  %349 = vst [vmem:[%s1531_s27 + $0x30] sm:$0xff] %v348_v6  ;;  %351 = vst [vmem:[%s1531_s27 + $0x38] sm:$0xff] %v350_v7  ;;  %v354_v9 = vld [vmem:[%s1526_s26 + $0x90] sm:$0xff] }
  0x16   : > { %353 = vst [vmem:[%s1531_s27 + $0x40] sm:$0xff] %v352_v8  ;;  %v356_v10 = vld [vmem:[%s1526_s26 + $0xa0] sm:$0xff]  ;;  %v358_v11 = vld [vmem:[%s1526_s26 + $0xb0] sm:$0xff]  ;;  %355 = vst [vmem:[%s1531_s27 + $0x48] sm:$0xff] %v354_v9 }
  0x17   : > { %357 = vst [vmem:[%s1531_s27 + $0x50] sm:$0xff] %v356_v10  ;;  %359 = vst [vmem:[%s1531_s27 + $0x58] sm:$0xff] %v358_v11  ;;  %v360_v12 = vld [vmem:[%s1526_s26 + $0xc0] sm:$0xff]  ;;  %v362_v13 = vld [vmem:[%s1526_s26 + $0xd0] sm:$0xff] }
  0x18   : > { %v364_v14 = vld [vmem:[%s1526_s26 + $0xe0] sm:$0xff]  ;;  %361 = vst [vmem:[%s1531_s27 + $0x60] sm:$0xff] %v360_v12  ;;  %363 = vst [vmem:[%s1531_s27 + $0x68] sm:$0xff] %v362_v13  ;;  %v366_v15 = vld [vmem:[%s1526_s26 + $0xf0] sm:$0xff] }
  0x19   : > { %365 = vst [vmem:[%s1531_s27 + $0x70] sm:$0xff] %v364_v14  ;;  %v368_v16 = vld [vmem:[%s1526_s26 + $0x100] sm:$0xff]  ;;  %v370_v17 = vld [vmem:[%s1526_s26 + $0x110] sm:$0xff]  ;;  %367 = vst [vmem:[%s1531_s27 + $0x78] sm:$0xff] %v366_v15 }
  0x1a   : > { %369 = vst [vmem:[%s1531_s27 + $0x80] sm:$0xff] %v368_v16  ;;  %371 = vst [vmem:[%s1531_s27 + $0x88] sm:$0xff] %v370_v17  ;;  %v372_v18 = vld [vmem:[%s1526_s26 + $0x120] sm:$0xff]  ;;  %v374_v19 = vld [vmem:[%s1526_s26 + $0x130] sm:$0xff] }
  0x1b   : > { %v376_v20 = vld [vmem:[%s1526_s26 + $0x140] sm:$0xff]  ;;  %373 = vst [vmem:[%s1531_s27 + $0x90] sm:$0xff] %v372_v18  ;;  %375 = vst [vmem:[%s1531_s27 + $0x98] sm:$0xff] %v374_v19  ;;  %v378_v21 = vld [vmem:[%s1526_s26 + $0x150] sm:$0xff] }
  0x1c   : > { %377 = vst [vmem:[%s1531_s27 + $0xa0] sm:$0xff] %v376_v20  ;;  %v380_v22 = vld [vmem:[%s1526_s26 + $0x160] sm:$0xff]  ;;  %v382_v23 = vld [vmem:[%s1526_s26 + $0x170] sm:$0xff]  ;;  %379 = vst [vmem:[%s1531_s27 + $0xa8] sm:$0xff] %v378_v21 }
  0x1d   : > { %381 = vst [vmem:[%s1531_s27 + $0xb0] sm:$0xff] %v380_v22  ;;  %383 = vst [vmem:[%s1531_s27 + $0xb8] sm:$0xff] %v382_v23  ;;  %v384_v24 = vld [vmem:[%s1526_s26 + $0x180] sm:$0xff]  ;;  %v386_v25 = vld [vmem:[%s1526_s26 + $0x190] sm:$0xff] }
  0x1e   : > { %v388_v26 = vld [vmem:[%s1526_s26 + $0x1a0] sm:$0xff]  ;;  %385 = vst [vmem:[%s1531_s27 + $0xc0] sm:$0xff] %v384_v24  ;;  %387 = vst [vmem:[%s1531_s27 + $0xc8] sm:$0xff] %v386_v25  ;;  %v390_v27 = vld [vmem:[%s1526_s26 + $0x1b0] sm:$0xff] }
  0x1f   : > { %389 = vst [vmem:[%s1531_s27 + $0xd0] sm:$0xff] %v388_v26  ;;  %v392_v28 = vld [vmem:[%s1526_s26 + $0x1c0] sm:$0xff]  ;;  %v394_v29 = vld [vmem:[%s1526_s26 + $0x1d0] sm:$0xff]  ;;  %391 = vst [vmem:[%s1531_s27 + $0xd8] sm:$0xff] %v390_v27 }
  0x20   : > { %393 = vst [vmem:[%s1531_s27 + $0xe0] sm:$0xff] %v392_v28  ;;  %395 = vst [vmem:[%s1531_s27 + $0xe8] sm:$0xff] %v394_v29  ;;  %v396_v30 = vld [vmem:[%s1526_s26 + $0x1e0] sm:$0xff]  ;;  %v398_v31 = vld [vmem:[%s1526_s26 + $0x1f0] sm:$0xff] }
  0x21   : > { %v400_v32 = vld [vmem:[%s1526_s26 + $0x200] sm:$0xff]  ;;  %397 = vst [vmem:[%s1531_s27 + $0xf0] sm:$0xff] %v396_v30  ;;  %399 = vst [vmem:[%s1531_s27 + $0xf8] sm:$0xff] %v398_v31  ;;  %v402_v33 = vld [vmem:[%s1526_s26 + $0x210] sm:$0xff] }
  0x22   : > { %401 = vst [vmem:[%s1531_s27 + $0x100] sm:$0xff] %v400_v32  ;;  %v404_v34 = vld [vmem:[%s1526_s26 + $0x220] sm:$0xff]  ;;  %v406_v35 = vld [vmem:[%s1526_s26 + $0x230] sm:$0xff]  ;;  %403 = vst [vmem:[%s1531_s27 + $0x108] sm:$0xff] %v402_v33 }
  0x23   : > { %405 = vst [vmem:[%s1531_s27 + $0x110] sm:$0xff] %v404_v34  ;;  %407 = vst [vmem:[%s1531_s27 + $0x118] sm:$0xff] %v406_v35  ;;  %v408_v36 = vld [vmem:[%s1526_s26 + $0x240] sm:$0xff]  ;;  %v410_v37 = vld [vmem:[%s1526_s26 + $0x250] sm:$0xff] }
  0x24   : > { %v412_v38 = vld [vmem:[%s1526_s26 + $0x260] sm:$0xff]  ;;  %409 = vst [vmem:[%s1531_s27 + $0x120] sm:$0xff] %v408_v36  ;;  %411 = vst [vmem:[%s1531_s27 + $0x128] sm:$0xff] %v410_v37  ;;  %v414_v39 = vld [vmem:[%s1526_s26 + $0x270] sm:$0xff] }
  0x25   : > { %413 = vst [vmem:[%s1531_s27 + $0x130] sm:$0xff] %v412_v38  ;;  %v416_v40 = vld [vmem:[%s1526_s26 + $0x280] sm:$0xff]  ;;  %v418_v41 = vld [vmem:[%s1526_s26 + $0x290] sm:$0xff]  ;;  %415 = vst [vmem:[%s1531_s27 + $0x138] sm:$0xff] %v414_v39 }
  0x26   : > { %417 = vst [vmem:[%s1531_s27 + $0x140] sm:$0xff] %v416_v40  ;;  %419 = vst [vmem:[%s1531_s27 + $0x148] sm:$0xff] %v418_v41  ;;  %v420_v42 = vld [vmem:[%s1526_s26 + $0x2a0] sm:$0xff]  ;;  %v422_v43 = vld [vmem:[%s1526_s26 + $0x2b0] sm:$0xff] }
  0x27   : > { %v424_v44 = vld [vmem:[%s1526_s26 + $0x2c0] sm:$0xff]  ;;  %421 = vst [vmem:[%s1531_s27 + $0x150] sm:$0xff] %v420_v42  ;;  %423 = vst [vmem:[%s1531_s27 + $0x158] sm:$0xff] %v422_v43  ;;  %v426_v45 = vld [vmem:[%s1526_s26 + $0x2d0] sm:$0xff] }
  0x28   : > { %425 = vst [vmem:[%s1531_s27 + $0x160] sm:$0xff] %v424_v44  ;;  %v428_v46 = vld [vmem:[%s1526_s26 + $0x2e0] sm:$0xff]  ;;  %v430_v47 = vld [vmem:[%s1526_s26 + $0x2f0] sm:$0xff]  ;;  %427 = vst [vmem:[%s1531_s27 + $0x168] sm:$0xff] %v426_v45 }
  0x29   : > { %429 = vst [vmem:[%s1531_s27 + $0x170] sm:$0xff] %v428_v46  ;;  %431 = vst [vmem:[%s1531_s27 + $0x178] sm:$0xff] %v430_v47  ;;  %v432_v48 = vld [vmem:[%s1526_s26 + $0x300] sm:$0xff]  ;;  %v434_v49 = vld [vmem:[%s1526_s26 + $0x310] sm:$0xff] }
  0x2a   : > { %v436_v50 = vld [vmem:[%s1526_s26 + $0x320] sm:$0xff]  ;;  %433 = vst [vmem:[%s1531_s27 + $0x180] sm:$0xff] %v432_v48  ;;  %435 = vst [vmem:[%s1531_s27 + $0x188] sm:$0xff] %v434_v49  ;;  %v438_v51 = vld [vmem:[%s1526_s26 + $0x330] sm:$0xff] }
  0x2b   : > { %437 = vst [vmem:[%s1531_s27 + $0x190] sm:$0xff] %v436_v50  ;;  %v440_v52 = vld [vmem:[%s1526_s26 + $0x340] sm:$0xff]  ;;  %v442_v53 = vld [vmem:[%s1526_s26 + $0x350] sm:$0xff]  ;;  %439 = vst [vmem:[%s1531_s27 + $0x198] sm:$0xff] %v438_v51 }
  0x2c   : > { %441 = vst [vmem:[%s1531_s27 + $0x1a0] sm:$0xff] %v440_v52  ;;  %443 = vst [vmem:[%s1531_s27 + $0x1a8] sm:$0xff] %v442_v53  ;;  %v444_v54 = vld [vmem:[%s1526_s26 + $0x360] sm:$0xff]  ;;  %v446_v55 = vld [vmem:[%s1526_s26 + $0x370] sm:$0xff] }
  0x2d   : > { %v448_v56 = vld [vmem:[%s1526_s26 + $0x380] sm:$0xff]  ;;  %445 = vst [vmem:[%s1531_s27 + $0x1b0] sm:$0xff] %v444_v54  ;;  %447 = vst [vmem:[%s1531_s27 + $0x1b8] sm:$0xff] %v446_v55  ;;  %v450_v57 = vld [vmem:[%s1526_s26 + $0x390] sm:$0xff] }
  0x2e   : > { %449 = vst [vmem:[%s1531_s27 + $0x1c0] sm:$0xff] %v448_v56  ;;  %v452_v58 = vld [vmem:[%s1526_s26 + $0x3a0] sm:$0xff]  ;;  %v454_v59 = vld [vmem:[%s1526_s26 + $0x3b0] sm:$0xff]  ;;  %451 = vst [vmem:[%s1531_s27 + $0x1c8] sm:$0xff] %v450_v57 }
  0x2f   : > { %453 = vst [vmem:[%s1531_s27 + $0x1d0] sm:$0xff] %v452_v58  ;;  %455 = vst [vmem:[%s1531_s27 + $0x1d8] sm:$0xff] %v454_v59  ;;  %v456_v60 = vld [vmem:[%s1526_s26 + $0x3c0] sm:$0xff]  ;;  %v458_v61 = vld [vmem:[%s1526_s26 + $0x3d0] sm:$0xff] }
  0x30   : > { %v460_v62 = vld [vmem:[%s1526_s26 + $0x3e0] sm:$0xff]  ;;  %457 = vst [vmem:[%s1531_s27 + $0x1e0] sm:$0xff] %v456_v60  ;;  %459 = vst [vmem:[%s1531_s27 + $0x1e8] sm:$0xff] %v458_v61  ;;  %v462_v63 = vld [vmem:[%s1526_s26 + $0x3f0] sm:$0xff] }
  0x31   : > { %461 = vst [vmem:[%s1531_s27 + $0x1f0] sm:$0xff] %v460_v62  ;;  %463 = vst [vmem:[%s1531_s27 + $0x1f8] sm:$0xff] %v462_v63 }
  0x32 PF: > { %p1205_p6 = scmp.ge.s32.totalorder %s1461_s16, 1  ;;  %p476_p7 = scmp.lt.s32.totalorder %s1461_s16, 3 }
  0x34   : > { %p477_p8 = pnand %p1205_p6, %p476_p7 }
  0x35   : > { %s483_s28 = sand.u32 (!%p477_p8), 1, %s1445_s12   ;;  %v1664_v0 = vld [vmem:[%s1767_s0] sm:$0xff] (!%p477_p8)  ;;  %v1669_v1 = vld [vmem:[%s1767_s0 + $0x8] sm:$0xff] (!%p477_p8)  ;;  %s1207_s8 = sshll.u32 (!%p477_p8), %s1453_s14, 1 }
  0x36   : > { %480 = sbr.rel (%p477_p8) target bundleno = 344 (0x158), region = 66  ;;  %s1206_s6 = sshll.u32 (!%p477_p8), %s483_s28, 9  ;;  %v1211_v2 = vcombine.high (!%p477_p8), %v1664_v0, %v1664_v0  ;;  %v1213_v3 = vcombine.high (!%p477_p8), %v1669_v1, %v1669_v1 }
  0x37   : > { %s1675_s7 = scalar_lea.vmem (!%p477_p8), [#allocation3], %s1206_s6  ;;  %p536_p9 = scmp.lt.s32.totalorder (!%p477_p8), %s1207_s8, 3 }
  0x38   : > { %v1323_v4 = vld [vmem:[%s1675_s7 + $0x4] ss:$8 sps:$4 sm:$0xff] (!%p477_p8)   ;;  %990 = vmatprep.mubr.bf16.mxu0 (!%p477_p8), %v1211_v2  ;;  %1031 = vmatprep.mubr.bf16.mxu1 (!%p477_p8), %v1213_v3  ;;  %v1327_v6 = vld [vmem:[%s1675_s7] ss:$8 sps:$4 sm:$0xff] (!%p477_p8)   ;;  %v1329_v8 = vld [vmem:[%s1675_s7 + $0x14] ss:$8 sps:$4 sm:$0xff] (!%p477_p8)  }
  0x39   : > { %v1325_v5 = vld [vmem:[%s1675_s7 + $0x104] ss:$8 sps:$4 sm:$0xff] (!%p477_p8)   ;;  %958 = vmatprep.subr.bf16.mxu0 (!%p477_p8), %v1323_v4  ;;  %v1328_v7 = vld [vmem:[%s1675_s7 + $0x100] ss:$8 sps:$4 sm:$0xff] (!%p477_p8)   ;;  %v1331_v9 = vld [vmem:[%s1675_s7 + $0x114] ss:$8 sps:$4 sm:$0xff] (!%p477_p8)  }
  0x3a   : > { %999 = vmatprep.subr.bf16.mxu1 (!%p477_p8), %v1325_v5  ;;  %959 = vmatpush1.bf16.msra.mxu0 (!%p477_p8), %v1327_v6  ;;  %v1333_v10 = vld [vmem:[%s1675_s7 + $0x10] ss:$8 sps:$4 sm:$0xff] (!%p477_p8)   ;;  %v1335_v12 = vld [vmem:[%s1675_s7 + $0x24] ss:$8 sps:$4 sm:$0xff] (!%p477_p8)   ;;  %v1339_v14 = vld [vmem:[%s1675_s7 + $0x20] ss:$8 sps:$4 sm:$0xff] (!%p477_p8)   ;;  %v1210_v6 = vcombine.low (!%p477_p8), %v1664_v0, %v1664_v0 }
  0x3b   : > { %1000 = vmatpush1.bf16.msra.mxu1 (!%p477_p8), %v1328_v7  ;;  %960 = vmatprep.subr.bf16.mxu0 (!%p477_p8), %v1329_v8  ;;  %v1334_v11 = vld [vmem:[%s1675_s7 + $0x110] ss:$8 sps:$4 sm:$0xff] (!%p477_p8)   ;;  %v1337_v13 = vld [vmem:[%s1675_s7 + $0x124] ss:$8 sps:$4 sm:$0xff] (!%p477_p8)   ;;  %v1340_v15 = vld [vmem:[%s1675_s7 + $0x120] ss:$8 sps:$4 sm:$0xff] (!%p477_p8)   ;;  %v1212_v7 = vcombine.low (!%p477_p8), %v1669_v1, %v1669_v1  ;;  %v1051_v8 = vlaneseq (!%p477_p8) }
  0x3c   : > { %1001 = vmatprep.subr.bf16.mxu1 (!%p477_p8), %v1331_v9  ;;  %v1341_v16 = vld [vmem:[%s1675_s7 + $0x34] ss:$8 sps:$4 sm:$0xff] (!%p477_p8)   ;;  %v1345_v18 = vld [vmem:[%s1675_s7 + $0x30] ss:$8 sps:$4 sm:$0xff] (!%p477_p8)   ;;  %v1347_v20 = vld [vmem:[%s1675_s7 + $0x44] ss:$8 sps:$4 sm:$0xff] (!%p477_p8)  }
  0x3d   : > { %v1343_v17 = vld [vmem:[%s1675_s7 + $0x134] ss:$8 sps:$4 sm:$0xff]   ;;  %v1346_v19 = vld [vmem:[%s1675_s7 + $0x130] ss:$8 sps:$4 sm:$0xff]   ;;  %v1349_v21 = vld [vmem:[%s1675_s7 + $0x144] ss:$8 sps:$4 sm:$0xff]  }
  0x3e   : > { %961 = vmatpush1.bf16.msra.mxu0 %v1333_v10  ;;  %v1351_v22 = vld [vmem:[%s1675_s7 + $0x40] ss:$8 sps:$4 sm:$0xff]   ;;  %v1353_v24 = vld [vmem:[%s1675_s7 + $0x54] ss:$8 sps:$4 sm:$0xff]   ;;  %v1357_v26 = vld [vmem:[%s1675_s7 + $0x50] ss:$8 sps:$4 sm:$0xff]  }
  0x3f   : > { %1002 = vmatpush1.bf16.msra.mxu1 %v1334_v11  ;;  %962 = vmatprep.subr.bf16.mxu0 %v1335_v12  ;;  %v1352_v23 = vld [vmem:[%s1675_s7 + $0x140] ss:$8 sps:$4 sm:$0xff]   ;;  %v1355_v25 = vld [vmem:[%s1675_s7 + $0x154] ss:$8 sps:$4 sm:$0xff]   ;;  %v1358_v27 = vld [vmem:[%s1675_s7 + $0x150] ss:$8 sps:$4 sm:$0xff]  }
  0x40   : > { %1003 = vmatprep.subr.bf16.mxu1 %v1337_v13  ;;  %v1359_v28 = vld [vmem:[%s1675_s7 + $0x64] ss:$8 sps:$4 sm:$0xff]   ;;  %v1363_v30 = vld [vmem:[%s1675_s7 + $0x60] ss:$8 sps:$4 sm:$0xff]   ;;  %v1365_v32 = vld [vmem:[%s1675_s7 + $0x74] ss:$8 sps:$4 sm:$0xff]  }
  0x41   : > { %v1361_v29 = vld [vmem:[%s1675_s7 + $0x164] ss:$8 sps:$4 sm:$0xff]   ;;  %v1364_v31 = vld [vmem:[%s1675_s7 + $0x160] ss:$8 sps:$4 sm:$0xff]   ;;  %v1367_v33 = vld [vmem:[%s1675_s7 + $0x174] ss:$8 sps:$4 sm:$0xff]  }
  0x42   : > { %963 = vmatpush1.bf16.msra.mxu0 %v1339_v14  ;;  %v1369_v34 = vld [vmem:[%s1675_s7 + $0x70] ss:$8 sps:$4 sm:$0xff]   ;;  %v1371_v36 = vld [vmem:[%s1675_s7 + $0x84] ss:$8 sps:$4 sm:$0xff]   ;;  %v1375_v38 = vld [vmem:[%s1675_s7 + $0x80] ss:$8 sps:$4 sm:$0xff]  }
  0x43   : > { %1004 = vmatpush1.bf16.msra.mxu1 %v1340_v15  ;;  %964 = vmatprep.subr.bf16.mxu0 %v1341_v16  ;;  %v1370_v35 = vld [vmem:[%s1675_s7 + $0x170] ss:$8 sps:$4 sm:$0xff]   ;;  %v1373_v37 = vld [vmem:[%s1675_s7 + $0x184] ss:$8 sps:$4 sm:$0xff]   ;;  %v1376_v39 = vld [vmem:[%s1675_s7 + $0x180] ss:$8 sps:$4 sm:$0xff]  }
  0x44   : > { %1005 = vmatprep.subr.bf16.mxu1 %v1343_v17  ;;  %v1377_v40 = vld [vmem:[%s1675_s7 + $0x94] ss:$8 sps:$4 sm:$0xff]   ;;  %v1381_v42 = vld [vmem:[%s1675_s7 + $0x90] ss:$8 sps:$4 sm:$0xff]   ;;  %v1383_v44 = vld [vmem:[%s1675_s7 + $0xa4] ss:$8 sps:$4 sm:$0xff]  }
  0x45   : > { %v1379_v41 = vld [vmem:[%s1675_s7 + $0x194] ss:$8 sps:$4 sm:$0xff]   ;;  %v1382_v43 = vld [vmem:[%s1675_s7 + $0x190] ss:$8 sps:$4 sm:$0xff]   ;;  %v1385_v45 = vld [vmem:[%s1675_s7 + $0x1a4] ss:$8 sps:$4 sm:$0xff]  }
  0x46   : > { %965 = vmatpush1.bf16.msra.mxu0 %v1345_v18  ;;  %v1387_v46 = vld [vmem:[%s1675_s7 + $0xa0] ss:$8 sps:$4 sm:$0xff]   ;;  %v1389_v48 = vld [vmem:[%s1675_s7 + $0xb4] ss:$8 sps:$4 sm:$0xff]   ;;  %v1393_v50 = vld [vmem:[%s1675_s7 + $0xb0] ss:$8 sps:$4 sm:$0xff]  }
  0x47   : > { %1006 = vmatpush1.bf16.msra.mxu1 %v1346_v19  ;;  %966 = vmatprep.subr.bf16.mxu0 %v1347_v20  ;;  %v1388_v47 = vld [vmem:[%s1675_s7 + $0x1a0] ss:$8 sps:$4 sm:$0xff]   ;;  %v1391_v49 = vld [vmem:[%s1675_s7 + $0x1b4] ss:$8 sps:$4 sm:$0xff]   ;;  %v1394_v51 = vld [vmem:[%s1675_s7 + $0x1b0] ss:$8 sps:$4 sm:$0xff]  }
  0x48   : > { %1007 = vmatprep.subr.bf16.mxu1 %v1349_v21  ;;  %v1395_v52 = vld [vmem:[%s1675_s7 + $0xc4] ss:$8 sps:$4 sm:$0xff]   ;;  %v1399_v54 = vld [vmem:[%s1675_s7 + $0xc0] ss:$8 sps:$4 sm:$0xff]   ;;  %v1401_v56 = vld [vmem:[%s1675_s7 + $0xd4] ss:$8 sps:$4 sm:$0xff]  }
  0x49   : > { %v1397_v53 = vld [vmem:[%s1675_s7 + $0x1c4] ss:$8 sps:$4 sm:$0xff]   ;;  %v1400_v55 = vld [vmem:[%s1675_s7 + $0x1c0] ss:$8 sps:$4 sm:$0xff]   ;;  %v1403_v57 = vld [vmem:[%s1675_s7 + $0x1d4] ss:$8 sps:$4 sm:$0xff]  }
  0x4a   : > { %967 = vmatpush1.bf16.msra.mxu0 %v1351_v22  ;;  %v1405_v58 = vld [vmem:[%s1675_s7 + $0xd0] ss:$8 sps:$4 sm:$0xff]   ;;  %v1407_v60 = vld [vmem:[%s1675_s7 + $0xe4] ss:$8 sps:$4 sm:$0xff]   ;;  %v1411_v62 = vld [vmem:[%s1675_s7 + $0xe0] ss:$8 sps:$4 sm:$0xff]  }
  0x4b   : > { %1008 = vmatpush1.bf16.msra.mxu1 %v1352_v23  ;;  %968 = vmatprep.subr.bf16.mxu0 %v1353_v24  ;;  %v1406_v59 = vld [vmem:[%s1675_s7 + $0x1d0] ss:$8 sps:$4 sm:$0xff]   ;;  %v1409_v61 = vld [vmem:[%s1675_s7 + $0x1e4] ss:$8 sps:$4 sm:$0xff]   ;;  %v1412_v63 = vld [vmem:[%s1675_s7 + $0x1e0] ss:$8 sps:$4 sm:$0xff]  }
  0x4c   : > { %1009 = vmatprep.subr.bf16.mxu1 %v1355_v25  ;;  %v1413_v2 = vld [vmem:[%s1675_s7 + $0xf4] ss:$8 sps:$4 sm:$0xff]   ;;  %v1417_v4 = vld [vmem:[%s1675_s7 + $0xf0] ss:$8 sps:$4 sm:$0xff]   ;;  %s1778_s8 = smov (!%p536_p9, %s1207_s8), 3  ;;  %v1052_v9 = vshrl.u32 %v1051_v8, 7 }
  0x4d   : > { %v1415_v3 = vld [vmem:[%s1675_s7 + $0x1f4] ss:$8 sps:$4 sm:$0xff]   ;;  %v1418_v5 = vld [vmem:[%s1675_s7 + $0x1f0] ss:$8 sps:$4 sm:$0xff]   ;;  %s538_s11 = scalar_lea.vmem %s1769_s2, %s1778_s8  ;;  %s1209_s12 = sshll.u32 %s1778_s8, 2 }
  0x4e   : > { %969 = vmatpush1.bf16.msra.mxu0 %v1357_v26  ;;  %v1053_v10 = vsub.s32 0, %v1052_v9  ;;  %v1049_v11 = vld [vmem:[%s538_s11] sm:$0x3]  ;;  %v1057_v12 = vsub.s32 1, %v1052_v9  ;;  %s548_s19 = scalar_lea.vmem %s1770_s3, %s1209_s12 }
  0x4f   : > { %1010 = vmatpush1.bf16.msra.mxu1 %v1358_v27  ;;  %970 = vmatprep.subr.bf16.mxu0 %v1359_v28 }
  0x50   : > { %1011 = vmatprep.subr.bf16.mxu1 %v1361_v29  ;;  %v1054_v0 = vrot.slane %v1049_v11, %v1053_v10  ;;  %v1058_v1 = vrot.slane %v1049_v11, %v1057_v12 }
  0x52   : > { %971 = vmatpush1.bf16.msra.mxu0 %v1363_v30 }
  0x53   : > { %1012 = vmatpush1.bf16.msra.mxu1 %v1364_v31  ;;  %972 = vmatprep.subr.bf16.mxu0 %v1365_v32 }
  0x54   : > { %1013 = vmatprep.subr.bf16.mxu1 %v1367_v33 }
  0x56   : > { %973 = vmatpush1.bf16.msra.mxu0 %v1369_v34 }
  0x57   : > { %1014 = vmatpush1.bf16.msra.mxu1 %v1370_v35  ;;  %974 = vmatprep.subr.bf16.mxu0 %v1371_v36 }
  0x58   : > { %1015 = vmatprep.subr.bf16.mxu1 %v1373_v37 }
  0x5a   : > { %975 = vmatpush1.bf16.msra.mxu0 %v1375_v38 }
  0x5b   : > { %1016 = vmatpush1.bf16.msra.mxu1 %v1376_v39  ;;  %976 = vmatprep.subr.bf16.mxu0 %v1377_v40 }
  0x5c   : > { %1017 = vmatprep.subr.bf16.mxu1 %v1379_v41 }
  0x5e   : > { %977 = vmatpush1.bf16.msra.mxu0 %v1381_v42 }
  0x5f   : > { %1018 = vmatpush1.bf16.msra.mxu1 %v1382_v43  ;;  %978 = vmatprep.subr.bf16.mxu0 %v1383_v44 }
  0x60   : > { %1019 = vmatprep.subr.bf16.mxu1 %v1385_v45 }
  0x62   : > { %979 = vmatpush1.bf16.msra.mxu0 %v1387_v46 }
  0x63   : > { %1020 = vmatpush1.bf16.msra.mxu1 %v1388_v47  ;;  %980 = vmatprep.subr.bf16.mxu0 %v1389_v48 }
  0x64   : > { %1021 = vmatprep.subr.bf16.mxu1 %v1391_v49 }
  0x66   : > { %981 = vmatpush1.bf16.msra.mxu0 %v1393_v50 }
  0x67   : > { %1022 = vmatpush1.bf16.msra.mxu1 %v1394_v51  ;;  %982 = vmatprep.subr.bf16.mxu0 %v1395_v52 }
  0x68   : > { %1023 = vmatprep.subr.bf16.mxu1 %v1397_v53 }
  0x6a   : > { %983 = vmatpush1.bf16.msra.mxu0 %v1399_v54 }
  0x6b   : > { %1024 = vmatpush1.bf16.msra.mxu1 %v1400_v55  ;;  %984 = vmatprep.subr.bf16.mxu0 %v1401_v56 }
  0x6c   : > { %1025 = vmatprep.subr.bf16.mxu1 %v1403_v57 }
  0x6e   : > { %985 = vmatpush1.bf16.msra.mxu0 %v1405_v58 }
  0x6f   : > { %1026 = vmatpush1.bf16.msra.mxu1 %v1406_v59  ;;  %986 = vmatprep.subr.bf16.mxu0 %v1407_v60 }
  0x70   : > { %1027 = vmatprep.subr.bf16.mxu1 %v1409_v61 }
  0x72   : > { %987 = vmatpush1.bf16.msra.mxu0 %v1411_v62 }
  0x73   : > { %1028 = vmatpush1.bf16.msra.mxu1 %v1412_v63  ;;  %988 = vmatprep.subr.bf16.mxu0 %v1413_v2 }
  0x74   : > { %1029 = vmatprep.subr.bf16.mxu1 %v1415_v3 }
  0x76   : > { %989 = vmatpush1.bf16.msra.mxu0 %v1417_v4 }
  0x77   : > { %1030 = vmatpush1.bf16.msra.mxu1 %v1418_v5 }
  0x79   : > { %991 = vmatmul.mubr.bf16.vlgmr.msra.gmra.mrb[0].mxu0 %v1210_v6 }
  0x7a   : > { %1032 = vmatmul.mubr.bf16.vlgmr.msra.gmra.mrb[0].mxu1 %v1212_v7 }
 0x14c   : > { %v992_v13 = vpop.f32.mrb[0].mxu0 }
 0x14d   : > { %v1033_v14 = vpop.f32.mrb[0].mxu1  ;;  %v994_v16 = vpop.f32.mrb[1].mxu0 }
 0x14e   : > { %v1034_v15 = vadd.f32 %v1033_v14, %v992_v13  ;;  %v1035_v17 = vpop.f32.mrb[1].mxu1  ;;  %v996_v19 = vpop.f32.mrb[2].mxu0 }
 0x14f   : > { %v1036_v18 = vadd.f32 %v1035_v17, %v994_v16  ;;  %v1037_v20 = vpop.f32.mrb[2].mxu1  ;;  %v997_v22 = vpop.f32.mrb[3].mxu0 }
 0x150   : > { %v1061_v21 = vadd.f32 %v1054_v0, %v1034_v15  ;;  %v1038_v23 = vpop.f32.mrb[3].mxu1 }
 0x151   : > { %v1062_v24 = vadd.f32 %v1058_v1, %v1036_v18 }
 0x152   : > { %v1063_v25 = vmax.f32 %v1061_v21, 0.0 }
 0x153   : > { %v1064_v26 = vmax.f32 %v1062_v24, 0.0 }
 0x155   : > { %v1282_v27 = vpack.c.bf16 %v1064_v26, %v1063_v25 }
 0x157   : > { %1073 = vst [vmem:[%s548_s19] sm:$0xff] %v1282_v27 }
 0x158 PF: > { %s13_s16 = sadd.s32 1, %s1461_s16   ;;  %s1771_s12 = smov %s1449_s13 }
 0x159   : > { %p10_p10 = scmp.ge.s32.totalorder %s13_s16, 4   ;;  %s1772_s13 = smov %s1518_s20 }
 0x15a   : > { %s1773_s14 = smov %s1457_s15  ;;  %s1774_s15 = smov %s1776_s17 }
 0x15b   :  { %12 = sbr.rel (!%p10_p10) target bundleno = 3 (0x3), region = 119 }

// kernel: esac_scnet_forward.26
= control target key start
LH: loop header
LB: loop body
LE: loop exit
PB: predicated region body
PF: predicated region fallthrough
CT: control target
= control target key end

     0   :  { %s1028_s12 = smov 0   ;;  %s1030_s13 = smov 0   ;;  %s1207_s0 = inlined_call_operand.vmem [shape: bf16[8,256], index: 0, kind: input, shape index: {}]   ;;  %s1208_s1 = inlined_call_operand.vmem [shape: bf16[256,512], index: 1, kind: input, shape index: {}]   ;;  %s1209_s2 = inlined_call_operand.vmem [shape: f32[1,512], index: 2, kind: input, shape index: {}]   ;;  %s1210_s3 = inlined_call_operand.vmem [shape: bf16[8,512], index: 3, kind: output, shape index: {}]  }
   0x1   :  { %s1032_s14 = smov 0   ;;  %s1034_s15 = smov 0  }
   0x2   :  { %s1036_s16 = smov 0  }
   0x3 LB: > { %s28_s17 = sadd.s32 1, %s1002_s15  ;;  %p76_p1 = scmp.ne.s32.totalorder %s994_s13, %s990_s12  ;;  %s1006_s16 = sphi %s1036_s16, %s13_s16   ;;  %s1002_s15 = sphi %s1034_s15, %s1214_s15   ;;  %s998_s14 = sphi %s1032_s14, %s1213_s14   ;;  %s994_s13 = sphi %s1030_s13, %s1212_s13   ;;  %s990_s12 = sphi %s1028_s12, %s1211_s12  }
   0x4   : > { %p30_p0 = scmp.ge.s32.totalorder %s28_s17, 2  ;;  %p77_p2 = scmp.eq.s32.totalorder %s1006_s16, 0 }
   0x5   : > { %s69_s19 = sadd.s32 1, %s994_s13  ;;  %p830_p5 = scmp.ge.s32.totalorder %s1006_s16, 2 }
   0x6   : > { %s1216_s17 = smov (%p30_p0, %s28_s17), 0  ;;  %p78_p3 = por %p77_p2, %p76_p1 }
   0x7   : > { %s65_s18 = ssub.s32 %s1002_s15, %s1216_s17  ;;  %169 = sbr.rel (%p830_p5) target bundleno = 34 (0x22), region = 20 }
   0x8   : > { %p67_p4 = scmp.eq.s32.totalorder %s65_s18, 0 }
   0xa   : > { %s1063_s20 = scalar_select %p67_p4, %s994_s13, %s69_s19  }
   0xe   : > { %172 = sbr.rel (!%p78_p3) target bundleno = 34 (0x22), region = 24  ;;  %s174_s21 = sand.u32 (%p78_p3), 1, %s994_s13  }
   0xf   : > { %s876_s22 = sshll.u32 (%p78_p3), %s1002_s15, 3  ;;  %s831_s23 = sshll.u32 (%p78_p3), %s174_s21, 8 }
  0x10   : > { %s1071_s26 = scalar_lea.vmem (%p78_p3), %s1208_s1, %s876_s22  ;;  %s1076_s27 = scalar_lea.vmem (%p78_p3), [#allocation3], %s831_s23 }
  0x11   : > { %v272_v0 = vld [vmem:[%s1071_s26] sm:$0xff] (%p78_p3)  ;;  %v274_v1 = vld [vmem:[%s1071_s26 + $0x10] sm:$0xff] (%p78_p3) }
  0x12   : > { %v276_v2 = vld [vmem:[%s1071_s26 + $0x20] sm:$0xff] (%p78_p3)  ;;  %273 = vst [vmem:[%s1076_s27] sm:$0xff] (%p78_p3), %v272_v0  ;;  %275 = vst [vmem:[%s1076_s27 + $0x8] sm:$0xff] (%p78_p3), %v274_v1  ;;  %v278_v3 = vld [vmem:[%s1071_s26 + $0x30] sm:$0xff] (%p78_p3) }
  0x13   : > { %277 = vst [vmem:[%s1076_s27 + $0x10] sm:$0xff] (%p78_p3), %v276_v2  ;;  %v280_v4 = vld [vmem:[%s1071_s26 + $0x40] sm:$0xff] (%p78_p3)  ;;  %v282_v5 = vld [vmem:[%s1071_s26 + $0x50] sm:$0xff] (%p78_p3)  ;;  %279 = vst [vmem:[%s1076_s27 + $0x18] sm:$0xff] (%p78_p3), %v278_v3 }
  0x14   : > { %281 = vst [vmem:[%s1076_s27 + $0x20] sm:$0xff] (%p78_p3), %v280_v4  ;;  %283 = vst [vmem:[%s1076_s27 + $0x28] sm:$0xff] (%p78_p3), %v282_v5  ;;  %v284_v6 = vld [vmem:[%s1071_s26 + $0x60] sm:$0xff] (%p78_p3)  ;;  %v286_v7 = vld [vmem:[%s1071_s26 + $0x70] sm:$0xff] (%p78_p3) }
  0x15   : > { %v288_v8 = vld [vmem:[%s1071_s26 + $0x80] sm:$0xff]  ;;  %285 = vst [vmem:[%s1076_s27 + $0x30] sm:$0xff] %v284_v6  ;;  %287 = vst [vmem:[%s1076_s27 + $0x38] sm:$0xff] %v286_v7  ;;  %v290_v9 = vld [vmem:[%s1071_s26 + $0x90] sm:$0xff] }
  0x16   : > { %289 = vst [vmem:[%s1076_s27 + $0x40] sm:$0xff] %v288_v8  ;;  %v292_v10 = vld [vmem:[%s1071_s26 + $0xa0] sm:$0xff]  ;;  %v294_v11 = vld [vmem:[%s1071_s26 + $0xb0] sm:$0xff]  ;;  %291 = vst [vmem:[%s1076_s27 + $0x48] sm:$0xff] %v290_v9 }
  0x17   : > { %293 = vst [vmem:[%s1076_s27 + $0x50] sm:$0xff] %v292_v10  ;;  %295 = vst [vmem:[%s1076_s27 + $0x58] sm:$0xff] %v294_v11  ;;  %v296_v12 = vld [vmem:[%s1071_s26 + $0xc0] sm:$0xff]  ;;  %v298_v13 = vld [vmem:[%s1071_s26 + $0xd0] sm:$0xff] }
  0x18   : > { %v300_v14 = vld [vmem:[%s1071_s26 + $0xe0] sm:$0xff]  ;;  %297 = vst [vmem:[%s1076_s27 + $0x60] sm:$0xff] %v296_v12  ;;  %299 = vst [vmem:[%s1076_s27 + $0x68] sm:$0xff] %v298_v13  ;;  %v302_v15 = vld [vmem:[%s1071_s26 + $0xf0] sm:$0xff] }
  0x19   : > { %301 = vst [vmem:[%s1076_s27 + $0x70] sm:$0xff] %v300_v14  ;;  %v304_v16 = vld [vmem:[%s1071_s26 + $0x100] sm:$0xff]  ;;  %v306_v17 = vld [vmem:[%s1071_s26 + $0x110] sm:$0xff]  ;;  %303 = vst [vmem:[%s1076_s27 + $0x78] sm:$0xff] %v302_v15 }
  0x1a   : > { %305 = vst [vmem:[%s1076_s27 + $0x80] sm:$0xff] %v304_v16  ;;  %307 = vst [vmem:[%s1076_s27 + $0x88] sm:$0xff] %v306_v17  ;;  %v308_v18 = vld [vmem:[%s1071_s26 + $0x120] sm:$0xff]  ;;  %v310_v19 = vld [vmem:[%s1071_s26 + $0x130] sm:$0xff] }
  0x1b   : > { %v312_v20 = vld [vmem:[%s1071_s26 + $0x140] sm:$0xff]  ;;  %309 = vst [vmem:[%s1076_s27 + $0x90] sm:$0xff] %v308_v18  ;;  %311 = vst [vmem:[%s1076_s27 + $0x98] sm:$0xff] %v310_v19  ;;  %v314_v21 = vld [vmem:[%s1071_s26 + $0x150] sm:$0xff] }
  0x1c   : > { %313 = vst [vmem:[%s1076_s27 + $0xa0] sm:$0xff] %v312_v20  ;;  %v316_v22 = vld [vmem:[%s1071_s26 + $0x160] sm:$0xff]  ;;  %v318_v23 = vld [vmem:[%s1071_s26 + $0x170] sm:$0xff]  ;;  %315 = vst [vmem:[%s1076_s27 + $0xa8] sm:$0xff] %v314_v21 }
  0x1d   : > { %317 = vst [vmem:[%s1076_s27 + $0xb0] sm:$0xff] %v316_v22  ;;  %319 = vst [vmem:[%s1076_s27 + $0xb8] sm:$0xff] %v318_v23  ;;  %v320_v24 = vld [vmem:[%s1071_s26 + $0x180] sm:$0xff]  ;;  %v322_v25 = vld [vmem:[%s1071_s26 + $0x190] sm:$0xff] }
  0x1e   : > { %v324_v26 = vld [vmem:[%s1071_s26 + $0x1a0] sm:$0xff]  ;;  %321 = vst [vmem:[%s1076_s27 + $0xc0] sm:$0xff] %v320_v24  ;;  %323 = vst [vmem:[%s1076_s27 + $0xc8] sm:$0xff] %v322_v25  ;;  %v326_v27 = vld [vmem:[%s1071_s26 + $0x1b0] sm:$0xff] }
  0x1f   : > { %325 = vst [vmem:[%s1076_s27 + $0xd0] sm:$0xff] %v324_v26  ;;  %v328_v28 = vld [vmem:[%s1071_s26 + $0x1c0] sm:$0xff]  ;;  %v330_v29 = vld [vmem:[%s1071_s26 + $0x1d0] sm:$0xff]  ;;  %327 = vst [vmem:[%s1076_s27 + $0xd8] sm:$0xff] %v326_v27 }
  0x20   : > { %329 = vst [vmem:[%s1076_s27 + $0xe0] sm:$0xff] %v328_v28  ;;  %331 = vst [vmem:[%s1076_s27 + $0xe8] sm:$0xff] %v330_v29  ;;  %v332_v30 = vld [vmem:[%s1071_s26 + $0x1e0] sm:$0xff]  ;;  %v334_v31 = vld [vmem:[%s1071_s26 + $0x1f0] sm:$0xff] }
  0x21   : > { %333 = vst [vmem:[%s1076_s27 + $0xf0] sm:$0xff] %v332_v30  ;;  %335 = vst [vmem:[%s1076_s27 + $0xf8] sm:$0xff] %v334_v31 }
  0x22 PF: > { %p834_p6 = scmp.ge.s32.totalorder %s1006_s16, 1  ;;  %p348_p7 = scmp.lt.s32.totalorder %s1006_s16, 3 }
  0x24   : > { %p349_p8 = pnand %p834_p6, %p348_p7 }
  0x25   : > { %s355_s28 = sand.u32 (!%p349_p8), 1, %s990_s12   ;;  %v1145_v32 = vld [vmem:[%s1207_s0] sm:$0xff] (!%p349_p8)  ;;  %s836_s6 = sshll.u32 (!%p349_p8), %s998_s14, 1  ;;  %v682_v3 = vlaneseq (!%p349_p8) }
  0x26   : > { %352 = sbr.rel (%p349_p8) target bundleno = 323 (0x143), region = 66  ;;  %s835_s4 = sshll.u32 (!%p349_p8), %s355_s28, 8  ;;  %v840_v33 = vcombine.high (!%p349_p8), %v1145_v32, %v1145_v32  ;;  %v839_v2 = vcombine.low (!%p349_p8), %v1145_v32, %v1145_v32 }
  0x27   : > { %s1149_s5 = scalar_lea.vmem (!%p349_p8), [#allocation3], %s835_s4  ;;  %p408_p9 = scmp.lt.s32.totalorder (!%p349_p8), %s836_s6, 3  ;;  %v683_v4 = vshrl.u32 (!%p349_p8), %v682_v3, 7 }
  0x28   : > { %v918_v34 = vld [vmem:[%s1149_s5 + $0x4] ss:$8 sps:$4 sm:$0xff] (!%p349_p8)   ;;  %662 = vmatprep.mubr.bf16.mxu0 (!%p349_p8), %v840_v33  ;;  %v920_v35 = vld [vmem:[%s1149_s5] ss:$8 sps:$4 sm:$0xff] (!%p349_p8)   ;;  %v921_v36 = vld [vmem:[%s1149_s5 + $0x14] ss:$8 sps:$4 sm:$0xff] (!%p349_p8)  }
  0x29   : > { %630 = vmatprep.subr.bf16.mxu0 (!%p349_p8), %v918_v34  ;;  %v923_v37 = vld [vmem:[%s1149_s5 + $0x10] ss:$8 sps:$4 sm:$0xff] (!%p349_p8)   ;;  %v924_v38 = vld [vmem:[%s1149_s5 + $0x24] ss:$8 sps:$4 sm:$0xff] (!%p349_p8)   ;;  %v926_v39 = vld [vmem:[%s1149_s5 + $0x20] ss:$8 sps:$4 sm:$0xff] (!%p349_p8)  }
  0x2a   : > { %631 = vmatpush1.bf16.msra.mxu0 (!%p349_p8), %v920_v35  ;;  %v927_v40 = vld [vmem:[%s1149_s5 + $0x34] ss:$8 sps:$4 sm:$0xff] (!%p349_p8)   ;;  %v929_v41 = vld [vmem:[%s1149_s5 + $0x30] ss:$8 sps:$4 sm:$0xff] (!%p349_p8)   ;;  %v930_v42 = vld [vmem:[%s1149_s5 + $0x44] ss:$8 sps:$4 sm:$0xff] (!%p349_p8)  }
  0x2b   : > { %632 = vmatprep.subr.bf16.mxu0 (!%p349_p8), %v921_v36  ;;  %v932_v43 = vld [vmem:[%s1149_s5 + $0x40] ss:$8 sps:$4 sm:$0xff] (!%p349_p8)   ;;  %v933_v44 = vld [vmem:[%s1149_s5 + $0x54] ss:$8 sps:$4 sm:$0xff] (!%p349_p8)   ;;  %v935_v45 = vld [vmem:[%s1149_s5 + $0x50] ss:$8 sps:$4 sm:$0xff] (!%p349_p8)  }
  0x2c   : > { %v936_v46 = vld [vmem:[%s1149_s5 + $0x64] ss:$8 sps:$4 sm:$0xff] (!%p349_p8)   ;;  %v938_v47 = vld [vmem:[%s1149_s5 + $0x60] ss:$8 sps:$4 sm:$0xff] (!%p349_p8)   ;;  %v939_v48 = vld [vmem:[%s1149_s5 + $0x74] ss:$8 sps:$4 sm:$0xff] (!%p349_p8)  }
  0x2d   : > { %v941_v49 = vld [vmem:[%s1149_s5 + $0x70] ss:$8 sps:$4 sm:$0xff]   ;;  %v942_v50 = vld [vmem:[%s1149_s5 + $0x84] ss:$8 sps:$4 sm:$0xff]   ;;  %v944_v51 = vld [vmem:[%s1149_s5 + $0x80] ss:$8 sps:$4 sm:$0xff]  }
  0x2e   : > { %633 = vmatpush1.bf16.msra.mxu0 %v923_v37  ;;  %v945_v52 = vld [vmem:[%s1149_s5 + $0x94] ss:$8 sps:$4 sm:$0xff]   ;;  %v947_v53 = vld [vmem:[%s1149_s5 + $0x90] ss:$8 sps:$4 sm:$0xff]   ;;  %v948_v54 = vld [vmem:[%s1149_s5 + $0xa4] ss:$8 sps:$4 sm:$0xff]  }
  0x2f   : > { %634 = vmatprep.subr.bf16.mxu0 %v924_v38  ;;  %v950_v55 = vld [vmem:[%s1149_s5 + $0xa0] ss:$8 sps:$4 sm:$0xff]   ;;  %v951_v56 = vld [vmem:[%s1149_s5 + $0xb4] ss:$8 sps:$4 sm:$0xff]   ;;  %v953_v57 = vld [vmem:[%s1149_s5 + $0xb0] ss:$8 sps:$4 sm:$0xff]  }
  0x30   : > { %v954_v58 = vld [vmem:[%s1149_s5 + $0xc4] ss:$8 sps:$4 sm:$0xff]   ;;  %v956_v59 = vld [vmem:[%s1149_s5 + $0xc0] ss:$8 sps:$4 sm:$0xff]   ;;  %v957_v60 = vld [vmem:[%s1149_s5 + $0xd4] ss:$8 sps:$4 sm:$0xff]  }
  0x31   : > { %v959_v61 = vld [vmem:[%s1149_s5 + $0xd0] ss:$8 sps:$4 sm:$0xff]   ;;  %v960_v62 = vld [vmem:[%s1149_s5 + $0xe4] ss:$8 sps:$4 sm:$0xff]   ;;  %v962_v63 = vld [vmem:[%s1149_s5 + $0xe0] ss:$8 sps:$4 sm:$0xff]  }
  0x32   : > { %635 = vmatpush1.bf16.msra.mxu0 %v926_v39  ;;  %v963_v0 = vld [vmem:[%s1149_s5 + $0xf4] ss:$8 sps:$4 sm:$0xff]   ;;  %v965_v1 = vld [vmem:[%s1149_s5 + $0xf0] ss:$8 sps:$4 sm:$0xff]   ;;  %s1218_s6 = smov (!%p408_p9, %s836_s6), 3  ;;  %v684_v5 = vsub.s32 0, %v683_v4 }
  0x33   : > { %636 = vmatprep.subr.bf16.mxu0 %v927_v40  ;;  %s410_s9 = scalar_lea.vmem %s1209_s2, %s1218_s6  ;;  %v688_v7 = vsub.s32 1, %v683_v4  ;;  %s838_s10 = sshll.u32 %s1218_s6, 2 }
  0x34   : > { %v680_v6 = vld [vmem:[%s410_s9] sm:$0x3]  ;;  %s420_s14 = scalar_lea.vmem %s1210_s3, %s838_s10 }
  0x35   : > { %v685_v8 = vrot.slane %v680_v6, %v684_v5  ;;  %v689_v9 = vrot.slane %v680_v6, %v688_v7 }
  0x36   : > { %637 = vmatpush1.bf16.msra.mxu0 %v929_v41 }
  0x37   : > { %638 = vmatprep.subr.bf16.mxu0 %v930_v42 }
  0x3a   : > { %639 = vmatpush1.bf16.msra.mxu0 %v932_v43 }
  0x3b   : > { %640 = vmatprep.subr.bf16.mxu0 %v933_v44 }
  0x3e   : > { %641 = vmatpush1.bf16.msra.mxu0 %v935_v45 }
  0x3f   : > { %642 = vmatprep.subr.bf16.mxu0 %v936_v46 }
  0x42   : > { %643 = vmatpush1.bf16.msra.mxu0 %v938_v47 }
  0x43   : > { %644 = vmatprep.subr.bf16.mxu0 %v939_v48 }
  0x46   : > { %645 = vmatpush1.bf16.msra.mxu0 %v941_v49 }
  0x47   : > { %646 = vmatprep.subr.bf16.mxu0 %v942_v50 }
  0x4a   : > { %647 = vmatpush1.bf16.msra.mxu0 %v944_v51 }
  0x4b   : > { %648 = vmatprep.subr.bf16.mxu0 %v945_v52 }
  0x4e   : > { %649 = vmatpush1.bf16.msra.mxu0 %v947_v53 }
  0x4f   : > { %650 = vmatprep.subr.bf16.mxu0 %v948_v54 }
  0x52   : > { %651 = vmatpush1.bf16.msra.mxu0 %v950_v55 }
  0x53   : > { %652 = vmatprep.subr.bf16.mxu0 %v951_v56 }
  0x56   : > { %653 = vmatpush1.bf16.msra.mxu0 %v953_v57 }
  0x57   : > { %654 = vmatprep.subr.bf16.mxu0 %v954_v58 }
  0x5a   : > { %655 = vmatpush1.bf16.msra.mxu0 %v956_v59 }
  0x5b   : > { %656 = vmatprep.subr.bf16.mxu0 %v957_v60 }
  0x5e   : > { %657 = vmatpush1.bf16.msra.mxu0 %v959_v61 }
  0x5f   : > { %658 = vmatprep.subr.bf16.mxu0 %v960_v62 }
  0x62   : > { %659 = vmatpush1.bf16.msra.mxu0 %v962_v63 }
  0x63   : > { %660 = vmatprep.subr.bf16.mxu0 %v963_v0 }
  0x66   : > { %661 = vmatpush1.bf16.msra.mxu0 %v965_v1 }
  0x69   : > { %663 = vmatmul.mubr.bf16.vlgmr.msra.gmra.mrb[0].mxu0 %v839_v2 }
 0x13c   : > { %v664_v10 = vpop.f32.mrb[0].mxu0 }
 0x13d   : > { %v692_v11 = vadd.f32 %v685_v8, %v664_v10  ;;  %v666_v12 = vpop.f32.mrb[1].mxu0 }
 0x13e   : > { %v693_v13 = vadd.f32 %v689_v9, %v666_v12  ;;  %v668_v14 = vpop.f32.mrb[2].mxu0 }
 0x13f   : > { %v669_v15 = vpop.f32.mrb[3].mxu0 }
 0x140   : > { %v877_v16 = vpack.c.bf16 %v693_v13, %v692_v11 }
 0x142   : > { %702 = vst [vmem:[%s420_s14] sm:$0xff] %v877_v16 }
 0x143 PF: > { %s13_s16 = sadd.s32 1, %s1006_s16   ;;  %s1211_s12 = smov %s994_s13 }
 0x144   : > { %p10_p10 = scmp.ge.s32.totalorder %s13_s16, 4   ;;  %s1212_s13 = smov %s1063_s20 }
 0x145   : > { %s1213_s14 = smov %s1002_s15  ;;  %s1214_s15 = smov %s1216_s17 }
 0x146   :  { %12 = sbr.rel (!%p10_p10) target bundleno = 3 (0x3), region = 119 }

// kernel: esac_scnet_forward.27
= control target key start
LH: loop header
LB: loop body
LE: loop exit
PB: predicated region body
PF: predicated region fallthrough
CT: control target
= control target key end

     0   :  { %s1616_s15 = smov 0   ;;  %s1618_s16 = smov 0   ;;  %s1933_s0 = inlined_call_operand.vmem [shape: bf16[8,4608], index: 0, kind: input, shape index: {}]   ;;  %s1934_s1 = inlined_call_operand.vmem [shape: bf16[4608,512], index: 1, kind: input, shape index: {}]   ;;  %s1935_s2 = inlined_call_operand.vmem [shape: f32[1,512], index: 2, kind: input, shape index: {}]   ;;  %s1936_s3 = inlined_call_operand.vmem [shape: bf16[8,512], index: 3, kind: input, shape index: {}]   ;;  %s1937_s4 = inlined_call_operand.vmem [shape: bf16[8,512], index: 4, kind: output, shape index: {}]  }
   0x1   :  { %s1620_s17 = smov 0   ;;  %s1622_s18 = smov 0  }
   0x2   :  { %s1624_s19 = smov 0   ;;  %s1626_s20 = smov 0  }
   0x3   :  { %s1628_s21 = smov 0  }
   0x4 LB: > { %s26_s22 = sadd.s32 1, %s1580_s19  ;;  %s29_s23 = sadd.s32 1, %s1584_s20  ;;  %s1588_s21 = sphi %s1628_s21, %s14_s21   ;;  %s1584_s20 = sphi %s1626_s20, %s1943_s20   ;;  %s1580_s19 = sphi %s1624_s19, %s1942_s19   ;;  %s1576_s18 = sphi %s1622_s18, %s1941_s18   ;;  %s1572_s17 = sphi %s1620_s17, %s1940_s17   ;;  %s1568_s16 = sphi %s1618_s16, %s1939_s16   ;;  %s1564_s15 = sphi %s1616_s15, %s1938_s15  }
   0x5   : > { %p27_p0 = scmp.ge.s32.totalorder %s26_s22, 9  ;;  %p77_p1 = scmp.ne.s32.totalorder %s1568_s16, %s1564_s15 }
   0x6   : > { %p78_p2 = scmp.eq.s32.totalorder %s1588_s21, 0  ;;  %s70_s27 = sadd.s32 1, %s1568_s16 }
   0x7   : > { %s1945_s22 = smov (%p27_p0, %s26_s22), 0  ;;  %s1947_s23 = smov (!%p27_p0, %s29_s23), %s1584_s20 }
   0x8   : > { %p79_p3 = por %p78_p2, %p77_p1  ;;  %p31_p4 = scmp.ge.s32.totalorder %s1947_s23, 2 }
   0x9   : > { %s65_s24 = ssub.s32 %s1580_s19, %s1945_s22  ;;  %p1287_p6 = scmp.ge.s32.totalorder %s1588_s21, 18 }
   0xa   : > { %s1949_s23 = smov (%p31_p4, %s1947_s23), 0 }
   0xb   : > { %s66_s25 = ssub.s32 %s1584_s20, %s1949_s23  ;;  %185 = sbr.rel (%p1287_p6) target bundleno = 57 (0x39), region = 16 }
   0xc   : > { %s67_s26 = sor.u32 %s66_s25, %s65_s24 }
   0xd   : > { %p68_p5 = scmp.eq.s32.totalorder %s67_s26, 0 }
   0xf   : > { %s1667_s28 = scalar_select %p68_p5, %s1568_s16, %s70_s27  }
  0x12   : > { %201 = sbr.rel (!%p79_p3) target bundleno = 57 (0x39), region = 24  ;;  %s203_s29 = sand.u32 (%p79_p3), 1, %s1568_s16  }
  0x13   : > { %s1290_s30 = sshll.u32 (%p79_p3), %s1584_s20, 1  ;;  %s1288_s5 = sshll.u32 (%p79_p3), %s203_s29, 9 }
  0x14   : > { %s1375_s6 = sshll.u32 (%p79_p3), %s1580_s19, 8  ;;  %s1681_s12 = scalar_lea.vmem (%p79_p3), [#allocation3], %s1288_s5 }
  0x15   : > { %s209_s7 = sadd.s32 (%p79_p3), %s1375_s6, %s1290_s30 }
  0x16   : > { %s1292_s8 = sshll.u32 (%p79_p3), %s209_s7, 2 }
  0x17   : > { %s1676_s11 = scalar_lea.vmem (%p79_p3), %s1934_s1, %s1292_s8 }
  0x18   : > { %v365_v0 = vld [vmem:[%s1676_s11] sm:$0xff] (%p79_p3)  ;;  %v367_v1 = vld [vmem:[%s1676_s11 + $0x10] sm:$0xff] (%p79_p3) }
  0x19   : > { %v369_v2 = vld [vmem:[%s1676_s11 + $0x20] sm:$0xff]  ;;  %366 = vst [vmem:[%s1681_s12] sm:$0xff] %v365_v0  ;;  %368 = vst [vmem:[%s1681_s12 + $0x8] sm:$0xff] %v367_v1  ;;  %v371_v3 = vld [vmem:[%s1676_s11 + $0x30] sm:$0xff] }
  0x1a   : > { %370 = vst [vmem:[%s1681_s12 + $0x10] sm:$0xff] %v369_v2  ;;  %v373_v4 = vld [vmem:[%s1676_s11 + $0x40] sm:$0xff]  ;;  %v375_v5 = vld [vmem:[%s1676_s11 + $0x50] sm:$0xff]  ;;  %372 = vst [vmem:[%s1681_s12 + $0x18] sm:$0xff] %v371_v3 }
  0x1b   : > { %374 = vst [vmem:[%s1681_s12 + $0x20] sm:$0xff] %v373_v4  ;;  %376 = vst [vmem:[%s1681_s12 + $0x28] sm:$0xff] %v375_v5  ;;  %v377_v6 = vld [vmem:[%s1676_s11 + $0x60] sm:$0xff]  ;;  %v379_v7 = vld [vmem:[%s1676_s11 + $0x70] sm:$0xff] }
  0x1c   : > { %v381_v8 = vld [vmem:[%s1676_s11 + $0x80] sm:$0xff]  ;;  %378 = vst [vmem:[%s1681_s12 + $0x30] sm:$0xff] %v377_v6  ;;  %380 = vst [vmem:[%s1681_s12 + $0x38] sm:$0xff] %v379_v7  ;;  %v383_v9 = vld [vmem:[%s1676_s11 + $0x90] sm:$0xff] }
  0x1d   : > { %382 = vst [vmem:[%s1681_s12 + $0x40] sm:$0xff] %v381_v8  ;;  %v385_v10 = vld [vmem:[%s1676_s11 + $0xa0] sm:$0xff]  ;;  %v387_v11 = vld [vmem:[%s1676_s11 + $0xb0] sm:$0xff]  ;;  %384 = vst [vmem:[%s1681_s12 + $0x48] sm:$0xff] %v383_v9 }
  0x1e   : > { %386 = vst [vmem:[%s1681_s12 + $0x50] sm:$0xff] %v385_v10  ;;  %388 = vst [vmem:[%s1681_s12 + $0x58] sm:$0xff] %v387_v11  ;;  %v389_v12 = vld [vmem:[%s1676_s11 + $0xc0] sm:$0xff]  ;;  %v391_v13 = vld [vmem:[%s1676_s11 + $0xd0] sm:$0xff] }
  0x1f   : > { %v393_v14 = vld [vmem:[%s1676_s11 + $0xe0] sm:$0xff]  ;;  %390 = vst [vmem:[%s1681_s12 + $0x60] sm:$0xff] %v389_v12  ;;  %392 = vst [vmem:[%s1681_s12 + $0x68] sm:$0xff] %v391_v13  ;;  %v395_v15 = vld [vmem:[%s1676_s11 + $0xf0] sm:$0xff] }
  0x20   : > { %394 = vst [vmem:[%s1681_s12 + $0x70] sm:$0xff] %v393_v14  ;;  %v397_v16 = vld [vmem:[%s1676_s11 + $0x100] sm:$0xff]  ;;  %v399_v17 = vld [vmem:[%s1676_s11 + $0x110] sm:$0xff]  ;;  %396 = vst [vmem:[%s1681_s12 + $0x78] sm:$0xff] %v395_v15 }
  0x21   : > { %398 = vst [vmem:[%s1681_s12 + $0x80] sm:$0xff] %v397_v16  ;;  %400 = vst [vmem:[%s1681_s12 + $0x88] sm:$0xff] %v399_v17  ;;  %v401_v18 = vld [vmem:[%s1676_s11 + $0x120] sm:$0xff]  ;;  %v403_v19 = vld [vmem:[%s1676_s11 + $0x130] sm:$0xff] }
  0x22   : > { %v405_v20 = vld [vmem:[%s1676_s11 + $0x140] sm:$0xff]  ;;  %402 = vst [vmem:[%s1681_s12 + $0x90] sm:$0xff] %v401_v18  ;;  %404 = vst [vmem:[%s1681_s12 + $0x98] sm:$0xff] %v403_v19  ;;  %v407_v21 = vld [vmem:[%s1676_s11 + $0x150] sm:$0xff] }
  0x23   : > { %406 = vst [vmem:[%s1681_s12 + $0xa0] sm:$0xff] %v405_v20  ;;  %v409_v22 = vld [vmem:[%s1676_s11 + $0x160] sm:$0xff]  ;;  %v411_v23 = vld [vmem:[%s1676_s11 + $0x170] sm:$0xff]  ;;  %408 = vst [vmem:[%s1681_s12 + $0xa8] sm:$0xff] %v407_v21 }
  0x24   : > { %410 = vst [vmem:[%s1681_s12 + $0xb0] sm:$0xff] %v409_v22  ;;  %412 = vst [vmem:[%s1681_s12 + $0xb8] sm:$0xff] %v411_v23  ;;  %v413_v24 = vld [vmem:[%s1676_s11 + $0x180] sm:$0xff]  ;;  %v415_v25 = vld [vmem:[%s1676_s11 + $0x190] sm:$0xff] }
  0x25   : > { %v417_v26 = vld [vmem:[%s1676_s11 + $0x1a0] sm:$0xff]  ;;  %414 = vst [vmem:[%s1681_s12 + $0xc0] sm:$0xff] %v413_v24  ;;  %416 = vst [vmem:[%s1681_s12 + $0xc8] sm:$0xff] %v415_v25  ;;  %v419_v27 = vld [vmem:[%s1676_s11 + $0x1b0] sm:$0xff] }
  0x26   : > { %418 = vst [vmem:[%s1681_s12 + $0xd0] sm:$0xff] %v417_v26  ;;  %v421_v28 = vld [vmem:[%s1676_s11 + $0x1c0] sm:$0xff]  ;;  %v423_v29 = vld [vmem:[%s1676_s11 + $0x1d0] sm:$0xff]  ;;  %420 = vst [vmem:[%s1681_s12 + $0xd8] sm:$0xff] %v419_v27 }
  0x27   : > { %422 = vst [vmem:[%s1681_s12 + $0xe0] sm:$0xff] %v421_v28  ;;  %424 = vst [vmem:[%s1681_s12 + $0xe8] sm:$0xff] %v423_v29  ;;  %v425_v30 = vld [vmem:[%s1676_s11 + $0x1e0] sm:$0xff]  ;;  %v427_v31 = vld [vmem:[%s1676_s11 + $0x1f0] sm:$0xff] }
  0x28   : > { %v429_v32 = vld [vmem:[%s1676_s11 + $0x200] sm:$0xff]  ;;  %426 = vst [vmem:[%s1681_s12 + $0xf0] sm:$0xff] %v425_v30  ;;  %428 = vst [vmem:[%s1681_s12 + $0xf8] sm:$0xff] %v427_v31  ;;  %v431_v33 = vld [vmem:[%s1676_s11 + $0x210] sm:$0xff] }
  0x29   : > { %430 = vst [vmem:[%s1681_s12 + $0x100] sm:$0xff] %v429_v32  ;;  %v433_v34 = vld [vmem:[%s1676_s11 + $0x220] sm:$0xff]  ;;  %v435_v35 = vld [vmem:[%s1676_s11 + $0x230] sm:$0xff]  ;;  %432 = vst [vmem:[%s1681_s12 + $0x108] sm:$0xff] %v431_v33 }
  0x2a   : > { %434 = vst [vmem:[%s1681_s12 + $0x110] sm:$0xff] %v433_v34  ;;  %436 = vst [vmem:[%s1681_s12 + $0x118] sm:$0xff] %v435_v35  ;;  %v437_v36 = vld [vmem:[%s1676_s11 + $0x240] sm:$0xff]  ;;  %v439_v37 = vld [vmem:[%s1676_s11 + $0x250] sm:$0xff] }
  0x2b   : > { %v441_v38 = vld [vmem:[%s1676_s11 + $0x260] sm:$0xff]  ;;  %438 = vst [vmem:[%s1681_s12 + $0x120] sm:$0xff] %v437_v36  ;;  %440 = vst [vmem:[%s1681_s12 + $0x128] sm:$0xff] %v439_v37  ;;  %v443_v39 = vld [vmem:[%s1676_s11 + $0x270] sm:$0xff] }
  0x2c   : > { %442 = vst [vmem:[%s1681_s12 + $0x130] sm:$0xff] %v441_v38  ;;  %v445_v40 = vld [vmem:[%s1676_s11 + $0x280] sm:$0xff]  ;;  %v447_v41 = vld [vmem:[%s1676_s11 + $0x290] sm:$0xff]  ;;  %444 = vst [vmem:[%s1681_s12 + $0x138] sm:$0xff] %v443_v39 }
  0x2d   : > { %446 = vst [vmem:[%s1681_s12 + $0x140] sm:$0xff] %v445_v40  ;;  %448 = vst [vmem:[%s1681_s12 + $0x148] sm:$0xff] %v447_v41  ;;  %v449_v42 = vld [vmem:[%s1676_s11 + $0x2a0] sm:$0xff]  ;;  %v451_v43 = vld [vmem:[%s1676_s11 + $0x2b0] sm:$0xff] }
  0x2e   : > { %v453_v44 = vld [vmem:[%s1676_s11 + $0x2c0] sm:$0xff]  ;;  %450 = vst [vmem:[%s1681_s12 + $0x150] sm:$0xff] %v449_v42  ;;  %452 = vst [vmem:[%s1681_s12 + $0x158] sm:$0xff] %v451_v43  ;;  %v455_v45 = vld [vmem:[%s1676_s11 + $0x2d0] sm:$0xff] }
  0x2f   : > { %454 = vst [vmem:[%s1681_s12 + $0x160] sm:$0xff] %v453_v44  ;;  %v457_v46 = vld [vmem:[%s1676_s11 + $0x2e0] sm:$0xff]  ;;  %v459_v47 = vld [vmem:[%s1676_s11 + $0x2f0] sm:$0xff]  ;;  %456 = vst [vmem:[%s1681_s12 + $0x168] sm:$0xff] %v455_v45 }
  0x30   : > { %458 = vst [vmem:[%s1681_s12 + $0x170] sm:$0xff] %v457_v46  ;;  %460 = vst [vmem:[%s1681_s12 + $0x178] sm:$0xff] %v459_v47  ;;  %v461_v48 = vld [vmem:[%s1676_s11 + $0x300] sm:$0xff]  ;;  %v463_v49 = vld [vmem:[%s1676_s11 + $0x310] sm:$0xff] }
  0x31   : > { %v465_v50 = vld [vmem:[%s1676_s11 + $0x320] sm:$0xff]  ;;  %462 = vst [vmem:[%s1681_s12 + $0x180] sm:$0xff] %v461_v48  ;;  %464 = vst [vmem:[%s1681_s12 + $0x188] sm:$0xff] %v463_v49  ;;  %v467_v51 = vld [vmem:[%s1676_s11 + $0x330] sm:$0xff] }
  0x32   : > { %466 = vst [vmem:[%s1681_s12 + $0x190] sm:$0xff] %v465_v50  ;;  %v469_v52 = vld [vmem:[%s1676_s11 + $0x340] sm:$0xff]  ;;  %v471_v53 = vld [vmem:[%s1676_s11 + $0x350] sm:$0xff]  ;;  %468 = vst [vmem:[%s1681_s12 + $0x198] sm:$0xff] %v467_v51 }
  0x33   : > { %470 = vst [vmem:[%s1681_s12 + $0x1a0] sm:$0xff] %v469_v52  ;;  %472 = vst [vmem:[%s1681_s12 + $0x1a8] sm:$0xff] %v471_v53  ;;  %v473_v54 = vld [vmem:[%s1676_s11 + $0x360] sm:$0xff]  ;;  %v475_v55 = vld [vmem:[%s1676_s11 + $0x370] sm:$0xff] }
  0x34   : > { %v477_v56 = vld [vmem:[%s1676_s11 + $0x380] sm:$0xff]  ;;  %474 = vst [vmem:[%s1681_s12 + $0x1b0] sm:$0xff] %v473_v54  ;;  %476 = vst [vmem:[%s1681_s12 + $0x1b8] sm:$0xff] %v475_v55  ;;  %v479_v57 = vld [vmem:[%s1676_s11 + $0x390] sm:$0xff] }
  0x35   : > { %478 = vst [vmem:[%s1681_s12 + $0x1c0] sm:$0xff] %v477_v56  ;;  %v481_v58 = vld [vmem:[%s1676_s11 + $0x3a0] sm:$0xff]  ;;  %v483_v59 = vld [vmem:[%s1676_s11 + $0x3b0] sm:$0xff]  ;;  %480 = vst [vmem:[%s1681_s12 + $0x1c8] sm:$0xff] %v479_v57 }
  0x36   : > { %482 = vst [vmem:[%s1681_s12 + $0x1d0] sm:$0xff] %v481_v58  ;;  %484 = vst [vmem:[%s1681_s12 + $0x1d8] sm:$0xff] %v483_v59  ;;  %v485_v60 = vld [vmem:[%s1676_s11 + $0x3c0] sm:$0xff]  ;;  %v487_v61 = vld [vmem:[%s1676_s11 + $0x3d0] sm:$0xff] }
  0x37   : > { %v489_v62 = vld [vmem:[%s1676_s11 + $0x3e0] sm:$0xff]  ;;  %486 = vst [vmem:[%s1681_s12 + $0x1e0] sm:$0xff] %v485_v60  ;;  %488 = vst [vmem:[%s1681_s12 + $0x1e8] sm:$0xff] %v487_v61  ;;  %v491_v63 = vld [vmem:[%s1676_s11 + $0x3f0] sm:$0xff] }
  0x38   : > { %490 = vst [vmem:[%s1681_s12 + $0x1f0] sm:$0xff] %v489_v62  ;;  %492 = vst [vmem:[%s1681_s12 + $0x1f8] sm:$0xff] %v491_v63 }
  0x39 PF: > { %p1293_p7 = scmp.ge.s32.totalorder %s1588_s21, 1  ;;  %p518_p8 = scmp.lt.s32.totalorder %s1588_s21, 19 }
  0x3b   : > { %p519_p9 = pnand %p1293_p7, %p518_p8 }
  0x3c   : > { %s525_s13 = sand.u32 (!%p519_p9), 1, %s1564_s15   ;;  %s1295_s14 = sshll.u32 (!%p519_p9), %s1572_s17, 2 }
  0x3d   : > { %522 = sbr.rel (%p519_p9) target bundleno = 379 (0x17b), region = 70  ;;  %s1294_s24 = sshll.u32 (!%p519_p9), %s525_s13, 9 }
  0x3e   : > { %p579_p10 = scmp.lt.s32.totalorder (!%p519_p9), %s1295_s14, 35  ;;  %s1297_s25 = sshll.u32 (!%p519_p9), %s1576_s18, 1 }
  0x3f   : > { %p589_p11 = scmp.lt.s32.totalorder (!%p519_p9), %s1297_s25, 3  ;;  %s1835_s13 = scalar_lea.vmem (!%p519_p9), [#allocation3], %s1294_s24 }
  0x40   : > { %p1302_p12 = scmp.ne.s32.totalorder (!%p519_p9), %s1572_s17, 0 }
  0x44   : > { %s1951_s14 = smov (!%p579_p10, %s1295_s14), 35  ;;  %s1953_s25 = smov (!%p589_p11, %s1297_s25), 3 }
  0x45   : > { %s1296_s26 = sshll.u32 %s1951_s14, 2  ;;  %s591_s15 = scalar_lea.vmem %s1935_s2, %s1953_s25  ;;  %v1590_v0 = vmov (!%p1302_p12), 0.0  }
  0x46   : > { %s1816_s30 = scalar_lea.vmem %s1933_s0, %s1296_s26  ;;  %s1299_s7 = sshll.u32 %s1953_s25, 2  ;;  %617 = vst [vmem:[#allocation2] sm:$0xff] (!%p1302_p12), %v1590_v0  ;;  %618 = vst [vmem:[#allocation2 + $0x8] sm:$0xff] (!%p1302_p12), %v1590_v0 }
  0x47   : > { %s1828_s18 = scalar_lea.vmem %s1936_s3, %s1299_s7  ;;  %s1833_s12 = scalar_lea.vmem %s1937_s4, %s1299_s7 }
  0x48   : > { %616 = sbr.rel (%p1302_p12) target bundleno = 79 (0x4f), region = 78 }
  0x4f PF: > { %v1434_v1 = vld [vmem:[%s1835_s13 + $0x4] ss:$8 sps:$4 sm:$0xff]   ;;  %v1438_v3 = vld [vmem:[%s1835_s13] ss:$8 sps:$4 sm:$0xff]   ;;  %v1440_v5 = vld [vmem:[%s1835_s13 + $0x14] ss:$8 sps:$4 sm:$0xff]  }
  0x50   : > { %v1436_v2 = vld [vmem:[%s1835_s13 + $0x104] ss:$8 sps:$4 sm:$0xff]   ;;  %1021 = vmatprep.subr.bf16.mxu0 %v1434_v1  ;;  %v1439_v4 = vld [vmem:[%s1835_s13 + $0x100] ss:$8 sps:$4 sm:$0xff]   ;;  %v1442_v6 = vld [vmem:[%s1835_s13 + $0x114] ss:$8 sps:$4 sm:$0xff]  }
  0x51   : > { %1062 = vmatprep.subr.bf16.mxu1 %v1436_v2  ;;  %1022 = vmatpush1.bf16.msra.mxu0 %v1438_v3  ;;  %v1444_v7 = vld [vmem:[%s1835_s13 + $0x10] ss:$8 sps:$4 sm:$0xff]   ;;  %v1446_v9 = vld [vmem:[%s1835_s13 + $0x24] ss:$8 sps:$4 sm:$0xff]   ;;  %v1450_v11 = vld [vmem:[%s1835_s13 + $0x20] ss:$8 sps:$4 sm:$0xff]  }
  0x52   : > { %1063 = vmatpush1.bf16.msra.mxu1 %v1439_v4  ;;  %1023 = vmatprep.subr.bf16.mxu0 %v1440_v5  ;;  %v1445_v8 = vld [vmem:[%s1835_s13 + $0x110] ss:$8 sps:$4 sm:$0xff]   ;;  %v1448_v10 = vld [vmem:[%s1835_s13 + $0x124] ss:$8 sps:$4 sm:$0xff]   ;;  %v1451_v12 = vld [vmem:[%s1835_s13 + $0x120] ss:$8 sps:$4 sm:$0xff]  }
  0x53   : > { %1064 = vmatprep.subr.bf16.mxu1 %v1442_v6  ;;  %v1452_v13 = vld [vmem:[%s1835_s13 + $0x34] ss:$8 sps:$4 sm:$0xff]   ;;  %v1456_v15 = vld [vmem:[%s1835_s13 + $0x30] ss:$8 sps:$4 sm:$0xff]   ;;  %v1458_v17 = vld [vmem:[%s1835_s13 + $0x44] ss:$8 sps:$4 sm:$0xff]  }
  0x54   : > { %v1454_v14 = vld [vmem:[%s1835_s13 + $0x134] ss:$8 sps:$4 sm:$0xff]   ;;  %v1457_v16 = vld [vmem:[%s1835_s13 + $0x130] ss:$8 sps:$4 sm:$0xff]   ;;  %v1460_v18 = vld [vmem:[%s1835_s13 + $0x144] ss:$8 sps:$4 sm:$0xff]  }
  0x55   : > { %1024 = vmatpush1.bf16.msra.mxu0 %v1444_v7  ;;  %v1462_v19 = vld [vmem:[%s1835_s13 + $0x40] ss:$8 sps:$4 sm:$0xff]   ;;  %v1464_v21 = vld [vmem:[%s1835_s13 + $0x54] ss:$8 sps:$4 sm:$0xff]   ;;  %v1468_v23 = vld [vmem:[%s1835_s13 + $0x50] ss:$8 sps:$4 sm:$0xff]  }
  0x56   : > { %1065 = vmatpush1.bf16.msra.mxu1 %v1445_v8  ;;  %1025 = vmatprep.subr.bf16.mxu0 %v1446_v9  ;;  %v1463_v20 = vld [vmem:[%s1835_s13 + $0x140] ss:$8 sps:$4 sm:$0xff]   ;;  %v1466_v22 = vld [vmem:[%s1835_s13 + $0x154] ss:$8 sps:$4 sm:$0xff]   ;;  %v1469_v24 = vld [vmem:[%s1835_s13 + $0x150] ss:$8 sps:$4 sm:$0xff]  }
  0x57   : > { %1066 = vmatprep.subr.bf16.mxu1 %v1448_v10  ;;  %v1470_v25 = vld [vmem:[%s1835_s13 + $0x64] ss:$8 sps:$4 sm:$0xff]   ;;  %v1474_v27 = vld [vmem:[%s1835_s13 + $0x60] ss:$8 sps:$4 sm:$0xff]   ;;  %v1476_v29 = vld [vmem:[%s1835_s13 + $0x74] ss:$8 sps:$4 sm:$0xff]  }
  0x58   : > { %v1472_v26 = vld [vmem:[%s1835_s13 + $0x164] ss:$8 sps:$4 sm:$0xff]   ;;  %v1475_v28 = vld [vmem:[%s1835_s13 + $0x160] ss:$8 sps:$4 sm:$0xff]   ;;  %v1478_v30 = vld [vmem:[%s1835_s13 + $0x174] ss:$8 sps:$4 sm:$0xff]  }
  0x59   : > { %1026 = vmatpush1.bf16.msra.mxu0 %v1450_v11  ;;  %v1480_v31 = vld [vmem:[%s1835_s13 + $0x70] ss:$8 sps:$4 sm:$0xff]   ;;  %v1482_v33 = vld [vmem:[%s1835_s13 + $0x84] ss:$8 sps:$4 sm:$0xff]   ;;  %v1486_v35 = vld [vmem:[%s1835_s13 + $0x80] ss:$8 sps:$4 sm:$0xff]  }
  0x5a   : > { %1067 = vmatpush1.bf16.msra.mxu1 %v1451_v12  ;;  %1027 = vmatprep.subr.bf16.mxu0 %v1452_v13  ;;  %v1481_v32 = vld [vmem:[%s1835_s13 + $0x170] ss:$8 sps:$4 sm:$0xff]   ;;  %v1484_v34 = vld [vmem:[%s1835_s13 + $0x184] ss:$8 sps:$4 sm:$0xff]   ;;  %v1487_v36 = vld [vmem:[%s1835_s13 + $0x180] ss:$8 sps:$4 sm:$0xff]  }
  0x5b   : > { %1068 = vmatprep.subr.bf16.mxu1 %v1454_v14  ;;  %v1488_v37 = vld [vmem:[%s1835_s13 + $0x94] ss:$8 sps:$4 sm:$0xff]   ;;  %v1492_v39 = vld [vmem:[%s1835_s13 + $0x90] ss:$8 sps:$4 sm:$0xff]   ;;  %v1494_v41 = vld [vmem:[%s1835_s13 + $0xa4] ss:$8 sps:$4 sm:$0xff]  }
  0x5c   : > { %v1490_v38 = vld [vmem:[%s1835_s13 + $0x194] ss:$8 sps:$4 sm:$0xff]   ;;  %v1493_v40 = vld [vmem:[%s1835_s13 + $0x190] ss:$8 sps:$4 sm:$0xff]   ;;  %v1496_v42 = vld [vmem:[%s1835_s13 + $0x1a4] ss:$8 sps:$4 sm:$0xff]  }
  0x5d   : > { %1028 = vmatpush1.bf16.msra.mxu0 %v1456_v15  ;;  %v1498_v43 = vld [vmem:[%s1835_s13 + $0xa0] ss:$8 sps:$4 sm:$0xff]   ;;  %v1500_v45 = vld [vmem:[%s1835_s13 + $0xb4] ss:$8 sps:$4 sm:$0xff]   ;;  %v1504_v50 = vld [vmem:[%s1835_s13 + $0xb0] ss:$8 sps:$4 sm:$0xff]  }
  0x5e   : > { %1069 = vmatpush1.bf16.msra.mxu1 %v1457_v16  ;;  %1029 = vmatprep.subr.bf16.mxu0 %v1458_v17  ;;  %v1499_v44 = vld [vmem:[%s1835_s13 + $0x1a0] ss:$8 sps:$4 sm:$0xff]   ;;  %v1502_v46 = vld [vmem:[%s1835_s13 + $0x1b4] ss:$8 sps:$4 sm:$0xff]   ;;  %v1505_v51 = vld [vmem:[%s1835_s13 + $0x1b0] ss:$8 sps:$4 sm:$0xff]  }
  0x5f   : > { %1070 = vmatprep.subr.bf16.mxu1 %v1460_v18  ;;  %v621_v47 = vld [vmem:[%s1816_s30] sm:$0xff]  ;;  %v622_v49 = vld [vmem:[%s1816_s30 + $0x8] sm:$0xff]  ;;  %v1506_v53 = vld [vmem:[%s1835_s13 + $0xc4] ss:$8 sps:$4 sm:$0xff]   ;;  %p1371_p13 = scmp.ne.s32.totalorder %s1572_s17, 8 }
  0x60   : > { %v1304_v48 = vcombine.high %v621_v47, %v621_v47  ;;  %v1306_v52 = vcombine.high %v622_v49, %v622_v49  ;;  %v1508_v54 = vld [vmem:[%s1835_s13 + $0x1c4] ss:$8 sps:$4 sm:$0xff]   ;;  %v1510_v55 = vld [vmem:[%s1835_s13 + $0xc0] ss:$8 sps:$4 sm:$0xff]   ;;  %v1512_v57 = vld [vmem:[%s1835_s13 + $0xd4] ss:$8 sps:$4 sm:$0xff]   ;;  %v1303_v5 = vcombine.low %v621_v47, %v621_v47  ;;  %v1305_v6 = vcombine.low %v622_v49, %v622_v49 }
  0x61   : > { %1030 = vmatpush1.bf16.msra.mxu0 %v1462_v19  ;;  %v1511_v56 = vld [vmem:[%s1835_s13 + $0x1c0] ss:$8 sps:$4 sm:$0xff]   ;;  %v1514_v58 = vld [vmem:[%s1835_s13 + $0x1d4] ss:$8 sps:$4 sm:$0xff]   ;;  %v1516_v59 = vld [vmem:[%s1835_s13 + $0xd0] ss:$8 sps:$4 sm:$0xff]  }
  0x62   : > { %1071 = vmatpush1.bf16.msra.mxu1 %v1463_v20  ;;  %1031 = vmatprep.subr.bf16.mxu0 %v1464_v21  ;;  %v1517_v60 = vld [vmem:[%s1835_s13 + $0x1d0] ss:$8 sps:$4 sm:$0xff]   ;;  %v1518_v61 = vld [vmem:[%s1835_s13 + $0xe4] ss:$8 sps:$4 sm:$0xff]   ;;  %v1522_v63 = vld [vmem:[%s1835_s13 + $0xe0] ss:$8 sps:$4 sm:$0xff]   ;;  %v1115_v21 = vlaneseq (!%p1371_p13) }
  0x63   : > { %1072 = vmatprep.subr.bf16.mxu1 %v1466_v22  ;;  %1053 = vmatprep.mubr.bf16.mxu0 %v1304_v48  ;;  %v1520_v62 = vld [vmem:[%s1835_s13 + $0x1e4] ss:$8 sps:$4 sm:$0xff]   ;;  %v1523_v0 = vld [vmem:[%s1835_s13 + $0x1e0] ss:$8 sps:$4 sm:$0xff]   ;;  %v1524_v1 = vld [vmem:[%s1835_s13 + $0xf4] ss:$8 sps:$4 sm:$0xff]  }
  0x64   : > { %1094 = vmatprep.mubr.bf16.mxu1 %v1306_v52  ;;  %v1526_v2 = vld [vmem:[%s1835_s13 + $0x1f4] ss:$8 sps:$4 sm:$0xff]   ;;  %v1528_v3 = vld [vmem:[%s1835_s13 + $0xf0] ss:$8 sps:$4 sm:$0xff]   ;;  %v1116_v22 = vshrl.u32 (!%p1371_p13), %v1115_v21, 7 }
  0x65   : > { %1032 = vmatpush1.bf16.msra.mxu0 %v1468_v23  ;;  %v1529_v4 = vld [vmem:[%s1835_s13 + $0x1f0] ss:$8 sps:$4 sm:$0xff]  }
  0x66   : > { %1073 = vmatpush1.bf16.msra.mxu1 %v1469_v24  ;;  %1033 = vmatprep.subr.bf16.mxu0 %v1470_v25  ;;  %v619_v8 = vld [vmem:[#allocation2] sm:$0xff]  ;;  %v620_v12 = vld [vmem:[#allocation2 + $0x8] sm:$0xff]  ;;  %v1117_v24 = vsub.s32 (!%p1371_p13), 0, %v1116_v22  ;;  %v1121_v25 = vsub.s32 (!%p1371_p13), 1, %v1116_v22 }
  0x67   : > { %1074 = vmatprep.subr.bf16.mxu1 %v1472_v26  ;;  %v1113_v23 = vld [vmem:[%s591_s15] sm:$0x3] (!%p1371_p13) }
  0x69   : > { %1034 = vmatpush1.bf16.msra.mxu0 %v1474_v27 }
  0x6a   : > { %1075 = vmatpush1.bf16.msra.mxu1 %v1475_v28  ;;  %1035 = vmatprep.subr.bf16.mxu0 %v1476_v29  ;;  %v1129_v28 = vld [vmem:[%s1828_s18] sm:$0xff] (!%p1371_p13)  ;;  %v1118_v29 = vrot.slane (!%p1371_p13), %v1113_v23, %v1117_v24 }
  0x6b   : > { %1076 = vmatprep.subr.bf16.mxu1 %v1478_v30  ;;  %v1122_v30 = vrot.slane (!%p1371_p13), %v1113_v23, %v1121_v25 }
  0x6d   : > { %1036 = vmatpush1.bf16.msra.mxu0 %v1480_v31 }
  0x6e   : > { %1077 = vmatpush1.bf16.msra.mxu1 %v1481_v32  ;;  %1037 = vmatprep.subr.bf16.mxu0 %v1482_v33  ;;  %v1130_v33 = vunpack.c.l.bf16 (!%p1371_p13), %v1129_v28 }
  0x6f   : > { %1078 = vmatprep.subr.bf16.mxu1 %v1484_v34  ;;  %v1131_v34 = vunpack.c.h.bf16 (!%p1371_p13), %v1129_v28 }
  0x71   : > { %1038 = vmatpush1.bf16.msra.mxu0 %v1486_v35 }
  0x72   : > { %1079 = vmatpush1.bf16.msra.mxu1 %v1487_v36  ;;  %1039 = vmatprep.subr.bf16.mxu0 %v1488_v37 }
  0x73   : > { %1080 = vmatprep.subr.bf16.mxu1 %v1490_v38 }
  0x75   : > { %1040 = vmatpush1.bf16.msra.mxu0 %v1492_v39 }
  0x76   : > { %1081 = vmatpush1.bf16.msra.mxu1 %v1493_v40  ;;  %1041 = vmatprep.subr.bf16.mxu0 %v1494_v41 }
  0x77   : > { %1082 = vmatprep.subr.bf16.mxu1 %v1496_v42 }
  0x79   : > { %1042 = vmatpush1.bf16.msra.mxu0 %v1498_v43 }
  0x7a   : > { %1083 = vmatpush1.bf16.msra.mxu1 %v1499_v44  ;;  %1043 = vmatprep.subr.bf16.mxu0 %v1500_v45 }
  0x7b   : > { %1084 = vmatprep.subr.bf16.mxu1 %v1502_v46 }
  0x7d   : > { %1044 = vmatpush1.bf16.msra.mxu0 %v1504_v50 }
  0x7e   : > { %1085 = vmatpush1.bf16.msra.mxu1 %v1505_v51  ;;  %1045 = vmatprep.subr.bf16.mxu0 %v1506_v53 }
  0x7f   : > { %1086 = vmatprep.subr.bf16.mxu1 %v1508_v54 }
  0x81   : > { %1046 = vmatpush1.bf16.msra.mxu0 %v1510_v55 }
  0x82   : > { %1087 = vmatpush1.bf16.msra.mxu1 %v1511_v56  ;;  %1047 = vmatprep.subr.bf16.mxu0 %v1512_v57 }
  0x83   : > { %1088 = vmatprep.subr.bf16.mxu1 %v1514_v58 }
  0x85   : > { %1048 = vmatpush1.bf16.msra.mxu0 %v1516_v59 }
  0x86   : > { %1089 = vmatpush1.bf16.msra.mxu1 %v1517_v60  ;;  %1049 = vmatprep.subr.bf16.mxu0 %v1518_v61 }
  0x87   : > { %1090 = vmatprep.subr.bf16.mxu1 %v1520_v62 }
  0x89   : > { %1050 = vmatpush1.bf16.msra.mxu0 %v1522_v63 }
  0x8a   : > { %1091 = vmatpush1.bf16.msra.mxu1 %v1523_v0  ;;  %1051 = vmatprep.subr.bf16.mxu0 %v1524_v1 }
  0x8b   : > { %1092 = vmatprep.subr.bf16.mxu1 %v1526_v2 }
  0x8d   : > { %1052 = vmatpush1.bf16.msra.mxu0 %v1528_v3 }
  0x8e   : > { %1093 = vmatpush1.bf16.msra.mxu1 %v1529_v4 }
  0x90   : > { %1054 = vmatmul.mubr.bf16.vlgmr.msra.gmra.mrb[0].mxu0 %v1303_v5 }
  0x91   : > { %1095 = vmatmul.mubr.bf16.vlgmr.msra.gmra.mrb[0].mxu1 %v1305_v6 }
 0x163   : > { %v1055_v7 = vpop.f32.mrb[0].mxu0 }
 0x164   : > { %v1096_v9 = vpop.f32.mrb[0].mxu1  ;;  %v1057_v11 = vpop.f32.mrb[1].mxu0  ;;  %1110 = sbr.rel (%p1371_p13) target bundleno = 379 (0x17b), region = 82 }
 0x165   : > { %v1097_v10 = vadd.f32 %v1096_v9, %v1055_v7  ;;  %v1098_v13 = vpop.f32.mrb[1].mxu1  ;;  %v1059_v15 = vpop.f32.mrb[2].mxu0 }
 0x166   : > { %v1099_v14 = vadd.f32 %v1098_v13, %v1057_v11  ;;  %v1100_v16 = vpop.f32.mrb[2].mxu1  ;;  %v1060_v18 = vpop.f32.mrb[3].mxu0 }
 0x167   : > { %v1103_v17 = vadd.f32 %v1097_v10, %v619_v8  ;;  %v1101_v19 = vpop.f32.mrb[3].mxu1 }
 0x168   : > { %v1104_v20 = vadd.f32 %v1099_v14, %v620_v12 }
 0x169   : > { %1105 = vst [vmem:[#allocation2] sm:$0xff] %v1103_v17 }
 0x16a   : > { %1106 = vst [vmem:[#allocation2 + $0x8] sm:$0xff] %v1104_v20 }
 0x170   : > { %v1111_v26 = vld [vmem:[#allocation2] sm:$0xff] }
 0x171   : > { %v1112_v27 = vld [vmem:[#allocation2 + $0x8] sm:$0xff]  ;;  %v1125_v31 = vadd.f32 %v1118_v29, %v1111_v26 }
 0x172   : > { %v1126_v32 = vadd.f32 %v1122_v30, %v1112_v27 }
 0x173   : > { %v1127_v35 = vmax.f32 %v1125_v31, 0.0 }
 0x174   : > { %v1128_v36 = vmax.f32 %v1126_v32, 0.0 }
 0x175   : > { %v1132_v37 = vadd.f32 %v1130_v33, %v1127_v35 }
 0x176   : > { %v1133_v38 = vadd.f32 %v1131_v34, %v1128_v36 }
 0x178   : > { %v1376_v39 = vpack.c.bf16 %v1133_v38, %v1132_v37 }
 0x17a   : > { %1142 = vst [vmem:[%s1833_s12] sm:$0xff] %v1376_v39 }
 0x17b PF: > { %s14_s21 = sadd.s32 1, %s1588_s21   ;;  %s1938_s15 = smov %s1568_s16 }
 0x17c   : > { %p11_p0 = scmp.ge.s32.totalorder %s14_s21, 20   ;;  %s1939_s16 = smov %s1667_s28 }
 0x17d   : > { %s1940_s17 = smov %s1580_s19  ;;  %s1941_s18 = smov %s1584_s20 }
 0x17e   : > { %s1942_s19 = smov %s1945_s22  ;;  %s1943_s20 = smov %s1949_s23 }
 0x17f   :  { %13 = sbr.rel (!%p11_p0) target bundleno = 4 (0x4), region = 126 }

// kernel: esac_scnet_forward.28
= control target key start
LH: loop header
LB: loop body
LE: loop exit
PB: predicated region body
PF: predicated region fallthrough
CT: control target
= control target key end

     0   :  { %s1523_s12 = smov 0   ;;  %s1525_s13 = smov 0   ;;  %s1834_s0 = inlined_call_operand.vmem [shape: bf16[8,4608], index: 0, kind: input, shape index: {}]   ;;  %s1835_s1 = inlined_call_operand.vmem [shape: bf16[4608,512], index: 1, kind: input, shape index: {}]   ;;  %s1836_s2 = inlined_call_operand.vmem [shape: f32[1,512], index: 2, kind: input, shape index: {}]   ;;  %s1837_s3 = inlined_call_operand.vmem [shape: bf16[8,512], index: 3, kind: output, shape index: {}]  }
   0x1   :  { %s1527_s14 = smov 0   ;;  %s1529_s15 = smov 0  }
   0x2   :  { %s1531_s16 = smov 0   ;;  %s1533_s17 = smov 0  }
   0x3   :  { %s1535_s18 = smov 0  }
   0x4 LB: > { %s25_s19 = sadd.s32 1, %s1492_s16  ;;  %s28_s20 = sadd.s32 1, %s1496_s17  ;;  %s1500_s18 = sphi %s1535_s18, %s13_s18   ;;  %s1496_s17 = sphi %s1533_s17, %s1843_s17   ;;  %s1492_s16 = sphi %s1531_s16, %s1842_s16   ;;  %s1488_s15 = sphi %s1529_s15, %s1841_s15   ;;  %s1484_s14 = sphi %s1527_s14, %s1840_s14   ;;  %s1480_s13 = sphi %s1525_s13, %s1839_s13   ;;  %s1476_s12 = sphi %s1523_s12, %s1838_s12  }
   0x5   : > { %p26_p0 = scmp.ge.s32.totalorder %s25_s19, 9  ;;  %p76_p1 = scmp.ne.s32.totalorder %s1480_s13, %s1476_s12 }
   0x6   : > { %p77_p2 = scmp.eq.s32.totalorder %s1500_s18, 0  ;;  %s69_s24 = sadd.s32 1, %s1480_s13 }
   0x7   : > { %s1845_s19 = smov (%p26_p0, %s25_s19), 0  ;;  %s1847_s20 = smov (!%p26_p0, %s28_s20), %s1496_s17 }
   0x8   : > { %p78_p3 = por %p77_p2, %p76_p1  ;;  %p30_p4 = scmp.ge.s32.totalorder %s1847_s20, 2 }
   0x9   : > { %s64_s21 = ssub.s32 %s1492_s16, %s1845_s19  ;;  %p1201_p6 = scmp.ge.s32.totalorder %s1500_s18, 18 }
   0xa   : > { %s1849_s20 = smov (%p30_p4, %s1847_s20), 0 }
   0xb   : > { %s65_s22 = ssub.s32 %s1496_s17, %s1849_s20  ;;  %156 = sbr.rel (%p1201_p6) target bundleno = 57 (0x39), region = 16 }
   0xc   : > { %s66_s23 = sor.u32 %s65_s22, %s64_s21 }
   0xd   : > { %p67_p5 = scmp.eq.s32.totalorder %s66_s23, 0 }
   0xf   : > { %s1574_s25 = scalar_select %p67_p5, %s1480_s13, %s69_s24  }
  0x12   : > { %172 = sbr.rel (!%p78_p3) target bundleno = 57 (0x39), region = 24  ;;  %s174_s26 = sand.u32 (%p78_p3), 1, %s1480_s13  }
  0x13   : > { %s1204_s27 = sshll.u32 (%p78_p3), %s1496_s17, 1  ;;  %s1202_s28 = sshll.u32 (%p78_p3), %s174_s26, 9 }
  0x14   : > { %s1287_s29 = sshll.u32 (%p78_p3), %s1492_s16, 8  ;;  %s1588_s8 = scalar_lea.vmem (%p78_p3), [#allocation3], %s1202_s28 }
  0x15   : > { %s180_s30 = sadd.s32 (%p78_p3), %s1287_s29, %s1204_s27 }
  0x16   : > { %s1206_s4 = sshll.u32 (%p78_p3), %s180_s30, 2 }
  0x17   : > { %s1583_s7 = scalar_lea.vmem (%p78_p3), %s1835_s1, %s1206_s4 }
  0x18   : > { %v336_v0 = vld [vmem:[%s1583_s7] sm:$0xff] (%p78_p3)  ;;  %v338_v1 = vld [vmem:[%s1583_s7 + $0x10] sm:$0xff] (%p78_p3) }
  0x19   : > { %v340_v2 = vld [vmem:[%s1583_s7 + $0x20] sm:$0xff]  ;;  %337 = vst [vmem:[%s1588_s8] sm:$0xff] %v336_v0  ;;  %339 = vst [vmem:[%s1588_s8 + $0x8] sm:$0xff] %v338_v1  ;;  %v342_v3 = vld [vmem:[%s1583_s7 + $0x30] sm:$0xff] }
  0x1a   : > { %341 = vst [vmem:[%s1588_s8 + $0x10] sm:$0xff] %v340_v2  ;;  %v344_v4 = vld [vmem:[%s1583_s7 + $0x40] sm:$0xff]  ;;  %v346_v5 = vld [vmem:[%s1583_s7 + $0x50] sm:$0xff]  ;;  %343 = vst [vmem:[%s1588_s8 + $0x18] sm:$0xff] %v342_v3 }
  0x1b   : > { %345 = vst [vmem:[%s1588_s8 + $0x20] sm:$0xff] %v344_v4  ;;  %347 = vst [vmem:[%s1588_s8 + $0x28] sm:$0xff] %v346_v5  ;;  %v348_v6 = vld [vmem:[%s1583_s7 + $0x60] sm:$0xff]  ;;  %v350_v7 = vld [vmem:[%s1583_s7 + $0x70] sm:$0xff] }
  0x1c   : > { %v352_v8 = vld [vmem:[%s1583_s7 + $0x80] sm:$0xff]  ;;  %349 = vst [vmem:[%s1588_s8 + $0x30] sm:$0xff] %v348_v6  ;;  %351 = vst [vmem:[%s1588_s8 + $0x38] sm:$0xff] %v350_v7  ;;  %v354_v9 = vld [vmem:[%s1583_s7 + $0x90] sm:$0xff] }
  0x1d   : > { %353 = vst [vmem:[%s1588_s8 + $0x40] sm:$0xff] %v352_v8  ;;  %v356_v10 = vld [vmem:[%s1583_s7 + $0xa0] sm:$0xff]  ;;  %v358_v11 = vld [vmem:[%s1583_s7 + $0xb0] sm:$0xff]  ;;  %355 = vst [vmem:[%s1588_s8 + $0x48] sm:$0xff] %v354_v9 }
  0x1e   : > { %357 = vst [vmem:[%s1588_s8 + $0x50] sm:$0xff] %v356_v10  ;;  %359 = vst [vmem:[%s1588_s8 + $0x58] sm:$0xff] %v358_v11  ;;  %v360_v12 = vld [vmem:[%s1583_s7 + $0xc0] sm:$0xff]  ;;  %v362_v13 = vld [vmem:[%s1583_s7 + $0xd0] sm:$0xff] }
  0x1f   : > { %v364_v14 = vld [vmem:[%s1583_s7 + $0xe0] sm:$0xff]  ;;  %361 = vst [vmem:[%s1588_s8 + $0x60] sm:$0xff] %v360_v12  ;;  %363 = vst [vmem:[%s1588_s8 + $0x68] sm:$0xff] %v362_v13  ;;  %v366_v15 = vld [vmem:[%s1583_s7 + $0xf0] sm:$0xff] }
  0x20   : > { %365 = vst [vmem:[%s1588_s8 + $0x70] sm:$0xff] %v364_v14  ;;  %v368_v16 = vld [vmem:[%s1583_s7 + $0x100] sm:$0xff]  ;;  %v370_v17 = vld [vmem:[%s1583_s7 + $0x110] sm:$0xff]  ;;  %367 = vst [vmem:[%s1588_s8 + $0x78] sm:$0xff] %v366_v15 }
  0x21   : > { %369 = vst [vmem:[%s1588_s8 + $0x80] sm:$0xff] %v368_v16  ;;  %371 = vst [vmem:[%s1588_s8 + $0x88] sm:$0xff] %v370_v17  ;;  %v372_v18 = vld [vmem:[%s1583_s7 + $0x120] sm:$0xff]  ;;  %v374_v19 = vld [vmem:[%s1583_s7 + $0x130] sm:$0xff] }
  0x22   : > { %v376_v20 = vld [vmem:[%s1583_s7 + $0x140] sm:$0xff]  ;;  %373 = vst [vmem:[%s1588_s8 + $0x90] sm:$0xff] %v372_v18  ;;  %375 = vst [vmem:[%s1588_s8 + $0x98] sm:$0xff] %v374_v19  ;;  %v378_v21 = vld [vmem:[%s1583_s7 + $0x150] sm:$0xff] }
  0x23   : > { %377 = vst [vmem:[%s1588_s8 + $0xa0] sm:$0xff] %v376_v20  ;;  %v380_v22 = vld [vmem:[%s1583_s7 + $0x160] sm:$0xff]  ;;  %v382_v23 = vld [vmem:[%s1583_s7 + $0x170] sm:$0xff]  ;;  %379 = vst [vmem:[%s1588_s8 + $0xa8] sm:$0xff] %v378_v21 }
  0x24   : > { %381 = vst [vmem:[%s1588_s8 + $0xb0] sm:$0xff] %v380_v22  ;;  %383 = vst [vmem:[%s1588_s8 + $0xb8] sm:$0xff] %v382_v23  ;;  %v384_v24 = vld [vmem:[%s1583_s7 + $0x180] sm:$0xff]  ;;  %v386_v25 = vld [vmem:[%s1583_s7 + $0x190] sm:$0xff] }
  0x25   : > { %v388_v26 = vld [vmem:[%s1583_s7 + $0x1a0] sm:$0xff]  ;;  %385 = vst [vmem:[%s1588_s8 + $0xc0] sm:$0xff] %v384_v24  ;;  %387 = vst [vmem:[%s1588_s8 + $0xc8] sm:$0xff] %v386_v25  ;;  %v390_v27 = vld [vmem:[%s1583_s7 + $0x1b0] sm:$0xff] }
  0x26   : > { %389 = vst [vmem:[%s1588_s8 + $0xd0] sm:$0xff] %v388_v26  ;;  %v392_v28 = vld [vmem:[%s1583_s7 + $0x1c0] sm:$0xff]  ;;  %v394_v29 = vld [vmem:[%s1583_s7 + $0x1d0] sm:$0xff]  ;;  %391 = vst [vmem:[%s1588_s8 + $0xd8] sm:$0xff] %v390_v27 }
  0x27   : > { %393 = vst [vmem:[%s1588_s8 + $0xe0] sm:$0xff] %v392_v28  ;;  %395 = vst [vmem:[%s1588_s8 + $0xe8] sm:$0xff] %v394_v29  ;;  %v396_v30 = vld [vmem:[%s1583_s7 + $0x1e0] sm:$0xff]  ;;  %v398_v31 = vld [vmem:[%s1583_s7 + $0x1f0] sm:$0xff] }
  0x28   : > { %v400_v32 = vld [vmem:[%s1583_s7 + $0x200] sm:$0xff]  ;;  %397 = vst [vmem:[%s1588_s8 + $0xf0] sm:$0xff] %v396_v30  ;;  %399 = vst [vmem:[%s1588_s8 + $0xf8] sm:$0xff] %v398_v31  ;;  %v402_v33 = vld [vmem:[%s1583_s7 + $0x210] sm:$0xff] }
  0x29   : > { %401 = vst [vmem:[%s1588_s8 + $0x100] sm:$0xff] %v400_v32  ;;  %v404_v34 = vld [vmem:[%s1583_s7 + $0x220] sm:$0xff]  ;;  %v406_v35 = vld [vmem:[%s1583_s7 + $0x230] sm:$0xff]  ;;  %403 = vst [vmem:[%s1588_s8 + $0x108] sm:$0xff] %v402_v33 }
  0x2a   : > { %405 = vst [vmem:[%s1588_s8 + $0x110] sm:$0xff] %v404_v34  ;;  %407 = vst [vmem:[%s1588_s8 + $0x118] sm:$0xff] %v406_v35  ;;  %v408_v36 = vld [vmem:[%s1583_s7 + $0x240] sm:$0xff]  ;;  %v410_v37 = vld [vmem:[%s1583_s7 + $0x250] sm:$0xff] }
  0x2b   : > { %v412_v38 = vld [vmem:[%s1583_s7 + $0x260] sm:$0xff]  ;;  %409 = vst [vmem:[%s1588_s8 + $0x120] sm:$0xff] %v408_v36  ;;  %411 = vst [vmem:[%s1588_s8 + $0x128] sm:$0xff] %v410_v37  ;;  %v414_v39 = vld [vmem:[%s1583_s7 + $0x270] sm:$0xff] }
  0x2c   : > { %413 = vst [vmem:[%s1588_s8 + $0x130] sm:$0xff] %v412_v38  ;;  %v416_v40 = vld [vmem:[%s1583_s7 + $0x280] sm:$0xff]  ;;  %v418_v41 = vld [vmem:[%s1583_s7 + $0x290] sm:$0xff]  ;;  %415 = vst [vmem:[%s1588_s8 + $0x138] sm:$0xff] %v414_v39 }
  0x2d   : > { %417 = vst [vmem:[%s1588_s8 + $0x140] sm:$0xff] %v416_v40  ;;  %419 = vst [vmem:[%s1588_s8 + $0x148] sm:$0xff] %v418_v41  ;;  %v420_v42 = vld [vmem:[%s1583_s7 + $0x2a0] sm:$0xff]  ;;  %v422_v43 = vld [vmem:[%s1583_s7 + $0x2b0] sm:$0xff] }
  0x2e   : > { %v424_v44 = vld [vmem:[%s1583_s7 + $0x2c0] sm:$0xff]  ;;  %421 = vst [vmem:[%s1588_s8 + $0x150] sm:$0xff] %v420_v42  ;;  %423 = vst [vmem:[%s1588_s8 + $0x158] sm:$0xff] %v422_v43  ;;  %v426_v45 = vld [vmem:[%s1583_s7 + $0x2d0] sm:$0xff] }
  0x2f   : > { %425 = vst [vmem:[%s1588_s8 + $0x160] sm:$0xff] %v424_v44  ;;  %v428_v46 = vld [vmem:[%s1583_s7 + $0x2e0] sm:$0xff]  ;;  %v430_v47 = vld [vmem:[%s1583_s7 + $0x2f0] sm:$0xff]  ;;  %427 = vst [vmem:[%s1588_s8 + $0x168] sm:$0xff] %v426_v45 }
  0x30   : > { %429 = vst [vmem:[%s1588_s8 + $0x170] sm:$0xff] %v428_v46  ;;  %431 = vst [vmem:[%s1588_s8 + $0x178] sm:$0xff] %v430_v47  ;;  %v432_v48 = vld [vmem:[%s1583_s7 + $0x300] sm:$0xff]  ;;  %v434_v49 = vld [vmem:[%s1583_s7 + $0x310] sm:$0xff] }
  0x31   : > { %v436_v50 = vld [vmem:[%s1583_s7 + $0x320] sm:$0xff]  ;;  %433 = vst [vmem:[%s1588_s8 + $0x180] sm:$0xff] %v432_v48  ;;  %435 = vst [vmem:[%s1588_s8 + $0x188] sm:$0xff] %v434_v49  ;;  %v438_v51 = vld [vmem:[%s1583_s7 + $0x330] sm:$0xff] }
  0x32   : > { %437 = vst [vmem:[%s1588_s8 + $0x190] sm:$0xff] %v436_v50  ;;  %v440_v52 = vld [vmem:[%s1583_s7 + $0x340] sm:$0xff]  ;;  %v442_v53 = vld [vmem:[%s1583_s7 + $0x350] sm:$0xff]  ;;  %439 = vst [vmem:[%s1588_s8 + $0x198] sm:$0xff] %v438_v51 }
  0x33   : > { %441 = vst [vmem:[%s1588_s8 + $0x1a0] sm:$0xff] %v440_v52  ;;  %443 = vst [vmem:[%s1588_s8 + $0x1a8] sm:$0xff] %v442_v53  ;;  %v444_v54 = vld [vmem:[%s1583_s7 + $0x360] sm:$0xff]  ;;  %v446_v55 = vld [vmem:[%s1583_s7 + $0x370] sm:$0xff] }
  0x34   : > { %v448_v56 = vld [vmem:[%s1583_s7 + $0x380] sm:$0xff]  ;;  %445 = vst [vmem:[%s1588_s8 + $0x1b0] sm:$0xff] %v444_v54  ;;  %447 = vst [vmem:[%s1588_s8 + $0x1b8] sm:$0xff] %v446_v55  ;;  %v450_v57 = vld [vmem:[%s1583_s7 + $0x390] sm:$0xff] }
  0x35   : > { %449 = vst [vmem:[%s1588_s8 + $0x1c0] sm:$0xff] %v448_v56  ;;  %v452_v58 = vld [vmem:[%s1583_s7 + $0x3a0] sm:$0xff]  ;;  %v454_v59 = vld [vmem:[%s1583_s7 + $0x3b0] sm:$0xff]  ;;  %451 = vst [vmem:[%s1588_s8 + $0x1c8] sm:$0xff] %v450_v57 }
  0x36   : > { %453 = vst [vmem:[%s1588_s8 + $0x1d0] sm:$0xff] %v452_v58  ;;  %455 = vst [vmem:[%s1588_s8 + $0x1d8] sm:$0xff] %v454_v59  ;;  %v456_v60 = vld [vmem:[%s1583_s7 + $0x3c0] sm:$0xff]  ;;  %v458_v61 = vld [vmem:[%s1583_s7 + $0x3d0] sm:$0xff] }
  0x37   : > { %v460_v62 = vld [vmem:[%s1583_s7 + $0x3e0] sm:$0xff]  ;;  %457 = vst [vmem:[%s1588_s8 + $0x1e0] sm:$0xff] %v456_v60  ;;  %459 = vst [vmem:[%s1588_s8 + $0x1e8] sm:$0xff] %v458_v61  ;;  %v462_v63 = vld [vmem:[%s1583_s7 + $0x3f0] sm:$0xff] }
  0x38   : > { %461 = vst [vmem:[%s1588_s8 + $0x1f0] sm:$0xff] %v460_v62  ;;  %463 = vst [vmem:[%s1588_s8 + $0x1f8] sm:$0xff] %v462_v63 }
  0x39 PF: > { %p1207_p7 = scmp.ge.s32.totalorder %s1500_s18, 1  ;;  %p476_p8 = scmp.lt.s32.totalorder %s1500_s18, 19 }
  0x3b   : > { %p477_p9 = pnand %p1207_p7, %p476_p8 }
  0x3c   : > { %s483_s9 = sand.u32 (!%p477_p9), 1, %s1476_s12   ;;  %s1209_s10 = sshll.u32 (!%p477_p9), %s1484_s14, 2 }
  0x3d   : > { %480 = sbr.rel (%p477_p9) target bundleno = 376 (0x178), region = 66  ;;  %s1208_s11 = sshll.u32 (!%p477_p9), %s483_s9, 9 }
  0x3e   : > { %p526_p10 = scmp.lt.s32.totalorder (!%p477_p9), %s1209_s10, 35  ;;  %s1211_s21 = sshll.u32 (!%p477_p9), %s1488_s15, 1 }
  0x3f   : > { %p536_p11 = scmp.lt.s32.totalorder (!%p477_p9), %s1211_s21, 3  ;;  %s1737_s5 = scalar_lea.vmem (!%p477_p9), [#allocation3], %s1208_s11 }
  0x40   : > { %p1214_p12 = scmp.ne.s32.totalorder (!%p477_p9), %s1484_s14, 0 }
  0x44   : > { %s1851_s10 = smov (!%p526_p10, %s1209_s10), 35  ;;  %s1853_s21 = smov (!%p536_p11, %s1211_s21), 3 }
  0x45   : > { %s1210_s22 = sshll.u32 %s1851_s10, 2  ;;  %s538_s12 = scalar_lea.vmem %s1836_s2, %s1853_s21  ;;  %v1502_v0 = vmov (!%p1214_p12), 0.0  }
  0x46   : > { %s1723_s26 = scalar_lea.vmem %s1834_s0, %s1210_s22  ;;  %s1213_s29 = sshll.u32 %s1853_s21, 2  ;;  %554 = vst [vmem:[#allocation2] sm:$0xff] (!%p1214_p12), %v1502_v0  ;;  %555 = vst [vmem:[#allocation2 + $0x8] sm:$0xff] (!%p1214_p12), %v1502_v0 }
  0x47   : > { %s1735_s15 = scalar_lea.vmem %s1837_s3, %s1213_s29  ;;  %553 = sbr.rel (%p1214_p12) target bundleno = 78 (0x4e), region = 74 }
  0x4e PF: > { %v1346_v1 = vld [vmem:[%s1737_s5 + $0x4] ss:$8 sps:$4 sm:$0xff]   ;;  %v1350_v3 = vld [vmem:[%s1737_s5] ss:$8 sps:$4 sm:$0xff]   ;;  %v1352_v5 = vld [vmem:[%s1737_s5 + $0x14] ss:$8 sps:$4 sm:$0xff]  }
  0x4f   : > { %v1348_v2 = vld [vmem:[%s1737_s5 + $0x104] ss:$8 sps:$4 sm:$0xff]   ;;  %958 = vmatprep.subr.bf16.mxu0 %v1346_v1  ;;  %v1351_v4 = vld [vmem:[%s1737_s5 + $0x100] ss:$8 sps:$4 sm:$0xff]   ;;  %v1354_v6 = vld [vmem:[%s1737_s5 + $0x114] ss:$8 sps:$4 sm:$0xff]  }
  0x50   : > { %999 = vmatprep.subr.bf16.mxu1 %v1348_v2  ;;  %959 = vmatpush1.bf16.msra.mxu0 %v1350_v3  ;;  %v1356_v7 = vld [vmem:[%s1737_s5 + $0x10] ss:$8 sps:$4 sm:$0xff]   ;;  %v1358_v9 = vld [vmem:[%s1737_s5 + $0x24] ss:$8 sps:$4 sm:$0xff]   ;;  %v1362_v11 = vld [vmem:[%s1737_s5 + $0x20] ss:$8 sps:$4 sm:$0xff]  }
  0x51   : > { %1000 = vmatpush1.bf16.msra.mxu1 %v1351_v4  ;;  %960 = vmatprep.subr.bf16.mxu0 %v1352_v5  ;;  %v1357_v8 = vld [vmem:[%s1737_s5 + $0x110] ss:$8 sps:$4 sm:$0xff]   ;;  %v1360_v10 = vld [vmem:[%s1737_s5 + $0x124] ss:$8 sps:$4 sm:$0xff]   ;;  %v1363_v12 = vld [vmem:[%s1737_s5 + $0x120] ss:$8 sps:$4 sm:$0xff]  }
  0x52   : > { %1001 = vmatprep.subr.bf16.mxu1 %v1354_v6  ;;  %v1364_v13 = vld [vmem:[%s1737_s5 + $0x34] ss:$8 sps:$4 sm:$0xff]   ;;  %v1368_v15 = vld [vmem:[%s1737_s5 + $0x30] ss:$8 sps:$4 sm:$0xff]   ;;  %v1370_v17 = vld [vmem:[%s1737_s5 + $0x44] ss:$8 sps:$4 sm:$0xff]  }
  0x53   : > { %v1366_v14 = vld [vmem:[%s1737_s5 + $0x134] ss:$8 sps:$4 sm:$0xff]   ;;  %v1369_v16 = vld [vmem:[%s1737_s5 + $0x130] ss:$8 sps:$4 sm:$0xff]   ;;  %v1372_v18 = vld [vmem:[%s1737_s5 + $0x144] ss:$8 sps:$4 sm:$0xff]  }
  0x54   : > { %961 = vmatpush1.bf16.msra.mxu0 %v1356_v7  ;;  %v1374_v19 = vld [vmem:[%s1737_s5 + $0x40] ss:$8 sps:$4 sm:$0xff]   ;;  %v1376_v21 = vld [vmem:[%s1737_s5 + $0x54] ss:$8 sps:$4 sm:$0xff]   ;;  %v1380_v23 = vld [vmem:[%s1737_s5 + $0x50] ss:$8 sps:$4 sm:$0xff]  }
  0x55   : > { %1002 = vmatpush1.bf16.msra.mxu1 %v1357_v8  ;;  %962 = vmatprep.subr.bf16.mxu0 %v1358_v9  ;;  %v1375_v20 = vld [vmem:[%s1737_s5 + $0x140] ss:$8 sps:$4 sm:$0xff]   ;;  %v1378_v22 = vld [vmem:[%s1737_s5 + $0x154] ss:$8 sps:$4 sm:$0xff]   ;;  %v1381_v24 = vld [vmem:[%s1737_s5 + $0x150] ss:$8 sps:$4 sm:$0xff]  }
  0x56   : > { %1003 = vmatprep.subr.bf16.mxu1 %v1360_v10  ;;  %v1382_v25 = vld [vmem:[%s1737_s5 + $0x64] ss:$8 sps:$4 sm:$0xff]   ;;  %v1386_v27 = vld [vmem:[%s1737_s5 + $0x60] ss:$8 sps:$4 sm:$0xff]   ;;  %v1388_v29 = vld [vmem:[%s1737_s5 + $0x74] ss:$8 sps:$4 sm:$0xff]  }
  0x57   : > { %v1384_v26 = vld [vmem:[%s1737_s5 + $0x164] ss:$8 sps:$4 sm:$0xff]   ;;  %v1387_v28 = vld [vmem:[%s1737_s5 + $0x160] ss:$8 sps:$4 sm:$0xff]   ;;  %v1390_v30 = vld [vmem:[%s1737_s5 + $0x174] ss:$8 sps:$4 sm:$0xff]  }
  0x58   : > { %963 = vmatpush1.bf16.msra.mxu0 %v1362_v11  ;;  %v1392_v31 = vld [vmem:[%s1737_s5 + $0x70] ss:$8 sps:$4 sm:$0xff]   ;;  %v1394_v33 = vld [vmem:[%s1737_s5 + $0x84] ss:$8 sps:$4 sm:$0xff]   ;;  %v1398_v35 = vld [vmem:[%s1737_s5 + $0x80] ss:$8 sps:$4 sm:$0xff]  }
  0x59   : > { %1004 = vmatpush1.bf16.msra.mxu1 %v1363_v12  ;;  %964 = vmatprep.subr.bf16.mxu0 %v1364_v13  ;;  %v1393_v32 = vld [vmem:[%s1737_s5 + $0x170] ss:$8 sps:$4 sm:$0xff]   ;;  %v1396_v34 = vld [vmem:[%s1737_s5 + $0x184] ss:$8 sps:$4 sm:$0xff]   ;;  %v1399_v36 = vld [vmem:[%s1737_s5 + $0x180] ss:$8 sps:$4 sm:$0xff]  }
  0x5a   : > { %1005 = vmatprep.subr.bf16.mxu1 %v1366_v14  ;;  %v1400_v37 = vld [vmem:[%s1737_s5 + $0x94] ss:$8 sps:$4 sm:$0xff]   ;;  %v1404_v39 = vld [vmem:[%s1737_s5 + $0x90] ss:$8 sps:$4 sm:$0xff]   ;;  %v1406_v41 = vld [vmem:[%s1737_s5 + $0xa4] ss:$8 sps:$4 sm:$0xff]  }
  0x5b   : > { %v1402_v38 = vld [vmem:[%s1737_s5 + $0x194] ss:$8 sps:$4 sm:$0xff]   ;;  %v1405_v40 = vld [vmem:[%s1737_s5 + $0x190] ss:$8 sps:$4 sm:$0xff]   ;;  %v1408_v42 = vld [vmem:[%s1737_s5 + $0x1a4] ss:$8 sps:$4 sm:$0xff]  }
  0x5c   : > { %965 = vmatpush1.bf16.msra.mxu0 %v1368_v15  ;;  %v1410_v43 = vld [vmem:[%s1737_s5 + $0xa0] ss:$8 sps:$4 sm:$0xff]   ;;  %v1412_v45 = vld [vmem:[%s1737_s5 + $0xb4] ss:$8 sps:$4 sm:$0xff]   ;;  %v1416_v50 = vld [vmem:[%s1737_s5 + $0xb0] ss:$8 sps:$4 sm:$0xff]  }
  0x5d   : > { %1006 = vmatpush1.bf16.msra.mxu1 %v1369_v16  ;;  %966 = vmatprep.subr.bf16.mxu0 %v1370_v17  ;;  %v1411_v44 = vld [vmem:[%s1737_s5 + $0x1a0] ss:$8 sps:$4 sm:$0xff]   ;;  %v1414_v46 = vld [vmem:[%s1737_s5 + $0x1b4] ss:$8 sps:$4 sm:$0xff]   ;;  %v1417_v51 = vld [vmem:[%s1737_s5 + $0x1b0] ss:$8 sps:$4 sm:$0xff]  }
  0x5e   : > { %1007 = vmatprep.subr.bf16.mxu1 %v1372_v18  ;;  %v558_v47 = vld [vmem:[%s1723_s26] sm:$0xff]  ;;  %v559_v49 = vld [vmem:[%s1723_s26 + $0x8] sm:$0xff]  ;;  %v1418_v53 = vld [vmem:[%s1737_s5 + $0xc4] ss:$8 sps:$4 sm:$0xff]   ;;  %p1283_p13 = scmp.ne.s32.totalorder %s1484_s14, 8 }
  0x5f   : > { %v1216_v48 = vcombine.high %v558_v47, %v558_v47  ;;  %v1218_v52 = vcombine.high %v559_v49, %v559_v49  ;;  %v1420_v54 = vld [vmem:[%s1737_s5 + $0x1c4] ss:$8 sps:$4 sm:$0xff]   ;;  %v1422_v55 = vld [vmem:[%s1737_s5 + $0xc0] ss:$8 sps:$4 sm:$0xff]   ;;  %v1424_v57 = vld [vmem:[%s1737_s5 + $0xd4] ss:$8 sps:$4 sm:$0xff]   ;;  %v1215_v5 = vcombine.low %v558_v47, %v558_v47  ;;  %v1217_v6 = vcombine.low %v559_v49, %v559_v49 }
  0x60   : > { %967 = vmatpush1.bf16.msra.mxu0 %v1374_v19  ;;  %v1423_v56 = vld [vmem:[%s1737_s5 + $0x1c0] ss:$8 sps:$4 sm:$0xff]   ;;  %v1426_v58 = vld [vmem:[%s1737_s5 + $0x1d4] ss:$8 sps:$4 sm:$0xff]   ;;  %v1428_v59 = vld [vmem:[%s1737_s5 + $0xd0] ss:$8 sps:$4 sm:$0xff]  }
  0x61   : > { %1008 = vmatpush1.bf16.msra.mxu1 %v1375_v20  ;;  %968 = vmatprep.subr.bf16.mxu0 %v1376_v21  ;;  %v1429_v60 = vld [vmem:[%s1737_s5 + $0x1d0] ss:$8 sps:$4 sm:$0xff]   ;;  %v1430_v61 = vld [vmem:[%s1737_s5 + $0xe4] ss:$8 sps:$4 sm:$0xff]   ;;  %v1434_v63 = vld [vmem:[%s1737_s5 + $0xe0] ss:$8 sps:$4 sm:$0xff]   ;;  %v1052_v21 = vlaneseq (!%p1283_p13) }
  0x62   : > { %1009 = vmatprep.subr.bf16.mxu1 %v1378_v22  ;;  %990 = vmatprep.mubr.bf16.mxu0 %v1216_v48  ;;  %v1432_v62 = vld [vmem:[%s1737_s5 + $0x1e4] ss:$8 sps:$4 sm:$0xff]   ;;  %v1435_v0 = vld [vmem:[%s1737_s5 + $0x1e0] ss:$8 sps:$4 sm:$0xff]   ;;  %v1436_v1 = vld [vmem:[%s1737_s5 + $0xf4] ss:$8 sps:$4 sm:$0xff]  }
  0x63   : > { %1031 = vmatprep.mubr.bf16.mxu1 %v1218_v52  ;;  %v1438_v2 = vld [vmem:[%s1737_s5 + $0x1f4] ss:$8 sps:$4 sm:$0xff]   ;;  %v1440_v3 = vld [vmem:[%s1737_s5 + $0xf0] ss:$8 sps:$4 sm:$0xff]   ;;  %v1053_v22 = vshrl.u32 (!%p1283_p13), %v1052_v21, 7 }
  0x64   : > { %969 = vmatpush1.bf16.msra.mxu0 %v1380_v23  ;;  %v1441_v4 = vld [vmem:[%s1737_s5 + $0x1f0] ss:$8 sps:$4 sm:$0xff]  }
  0x65   : > { %1010 = vmatpush1.bf16.msra.mxu1 %v1381_v24  ;;  %970 = vmatprep.subr.bf16.mxu0 %v1382_v25  ;;  %v556_v8 = vld [vmem:[#allocation2] sm:$0xff]  ;;  %v557_v12 = vld [vmem:[#allocation2 + $0x8] sm:$0xff]  ;;  %v1054_v24 = vsub.s32 (!%p1283_p13), 0, %v1053_v22  ;;  %v1058_v25 = vsub.s32 (!%p1283_p13), 1, %v1053_v22 }
  0x66   : > { %1011 = vmatprep.subr.bf16.mxu1 %v1384_v26  ;;  %v1050_v23 = vld [vmem:[%s538_s12] sm:$0x3] (!%p1283_p13) }
  0x68   : > { %971 = vmatpush1.bf16.msra.mxu0 %v1386_v27 }
  0x69   : > { %1012 = vmatpush1.bf16.msra.mxu1 %v1387_v28  ;;  %972 = vmatprep.subr.bf16.mxu0 %v1388_v29  ;;  %v1055_v28 = vrot.slane (!%p1283_p13), %v1050_v23, %v1054_v24  ;;  %v1059_v29 = vrot.slane (!%p1283_p13), %v1050_v23, %v1058_v25 }
  0x6a   : > { %1013 = vmatprep.subr.bf16.mxu1 %v1390_v30 }
  0x6c   : > { %973 = vmatpush1.bf16.msra.mxu0 %v1392_v31 }
  0x6d   : > { %1014 = vmatpush1.bf16.msra.mxu1 %v1393_v32  ;;  %974 = vmatprep.subr.bf16.mxu0 %v1394_v33 }
  0x6e   : > { %1015 = vmatprep.subr.bf16.mxu1 %v1396_v34 }
  0x70   : > { %975 = vmatpush1.bf16.msra.mxu0 %v1398_v35 }
  0x71   : > { %1016 = vmatpush1.bf16.msra.mxu1 %v1399_v36  ;;  %976 = vmatprep.subr.bf16.mxu0 %v1400_v37 }
  0x72   : > { %1017 = vmatprep.subr.bf16.mxu1 %v1402_v38 }
  0x74   : > { %977 = vmatpush1.bf16.msra.mxu0 %v1404_v39 }
  0x75   : > { %1018 = vmatpush1.bf16.msra.mxu1 %v1405_v40  ;;  %978 = vmatprep.subr.bf16.mxu0 %v1406_v41 }
  0x76   : > { %1019 = vmatprep.subr.bf16.mxu1 %v1408_v42 }
  0x78   : > { %979 = vmatpush1.bf16.msra.mxu0 %v1410_v43 }
  0x79   : > { %1020 = vmatpush1.bf16.msra.mxu1 %v1411_v44  ;;  %980 = vmatprep.subr.bf16.mxu0 %v1412_v45 }
  0x7a   : > { %1021 = vmatprep.subr.bf16.mxu1 %v1414_v46 }
  0x7c   : > { %981 = vmatpush1.bf16.msra.mxu0 %v1416_v50 }
  0x7d   : > { %1022 = vmatpush1.bf16.msra.mxu1 %v1417_v51  ;;  %982 = vmatprep.subr.bf16.mxu0 %v1418_v53 }
  0x7e   : > { %1023 = vmatprep.subr.bf16.mxu1 %v1420_v54 }
  0x80   : > { %983 = vmatpush1.bf16.msra.mxu0 %v1422_v55 }
  0x81   : > { %1024 = vmatpush1.bf16.msra.mxu1 %v1423_v56  ;;  %984 = vmatprep.subr.bf16.mxu0 %v1424_v57 }
  0x82   : > { %1025 = vmatprep.subr.bf16.mxu1 %v1426_v58 }
  0x84   : > { %985 = vmatpush1.bf16.msra.mxu0 %v1428_v59 }
  0x85   : > { %1026 = vmatpush1.bf16.msra.mxu1 %v1429_v60  ;;  %986 = vmatprep.subr.bf16.mxu0 %v1430_v61 }
  0x86   : > { %1027 = vmatprep.subr.bf16.mxu1 %v1432_v62 }
  0x88   : > { %987 = vmatpush1.bf16.msra.mxu0 %v1434_v63 }
  0x89   : > { %1028 = vmatpush1.bf16.msra.mxu1 %v1435_v0  ;;  %988 = vmatprep.subr.bf16.mxu0 %v1436_v1 }
  0x8a   : > { %1029 = vmatprep.subr.bf16.mxu1 %v1438_v2 }
  0x8c   : > { %989 = vmatpush1.bf16.msra.mxu0 %v1440_v3 }
  0x8d   : > { %1030 = vmatpush1.bf16.msra.mxu1 %v1441_v4 }
  0x8f   : > { %991 = vmatmul.mubr.bf16.vlgmr.msra.gmra.mrb[0].mxu0 %v1215_v5 }
  0x90   : > { %1032 = vmatmul.mubr.bf16.vlgmr.msra.gmra.mrb[0].mxu1 %v1217_v6 }
 0x162   : > { %v992_v7 = vpop.f32.mrb[0].mxu0 }
 0x163   : > { %v1033_v9 = vpop.f32.mrb[0].mxu1  ;;  %v994_v11 = vpop.f32.mrb[1].mxu0  ;;  %1047 = sbr.rel (%p1283_p13) target bundleno = 376 (0x178), region = 78 }
 0x164   : > { %v1034_v10 = vadd.f32 %v1033_v9, %v992_v7  ;;  %v1035_v13 = vpop.f32.mrb[1].mxu1  ;;  %v996_v15 = vpop.f32.mrb[2].mxu0 }
 0x165   : > { %v1036_v14 = vadd.f32 %v1035_v13, %v994_v11  ;;  %v1037_v16 = vpop.f32.mrb[2].mxu1  ;;  %v997_v18 = vpop.f32.mrb[3].mxu0 }
 0x166   : > { %v1040_v17 = vadd.f32 %v1034_v10, %v556_v8  ;;  %v1038_v19 = vpop.f32.mrb[3].mxu1 }
 0x167   : > { %v1041_v20 = vadd.f32 %v1036_v14, %v557_v12 }
 0x168   : > { %1042 = vst [vmem:[#allocation2] sm:$0xff] %v1040_v17 }
 0x169   : > { %1043 = vst [vmem:[#allocation2 + $0x8] sm:$0xff] %v1041_v20 }
 0x16f   : > { %v1048_v26 = vld [vmem:[#allocation2] sm:$0xff] }
 0x170   : > { %v1049_v27 = vld [vmem:[#allocation2 + $0x8] sm:$0xff]  ;;  %v1062_v30 = vadd.f32 %v1055_v28, %v1048_v26 }
 0x171   : > { %v1063_v31 = vadd.f32 %v1059_v29, %v1049_v27 }
 0x172   : > { %v1064_v32 = vmax.f32 %v1062_v30, 0.0 }
 0x173   : > { %v1065_v33 = vmax.f32 %v1063_v31, 0.0 }
 0x175   : > { %v1288_v34 = vpack.c.bf16 %v1065_v33, %v1064_v32 }
 0x177   : > { %1074 = vst [vmem:[%s1735_s15] sm:$0xff] %v1288_v34 }
 0x178 PF: > { %s13_s18 = sadd.s32 1, %s1500_s18   ;;  %s1838_s12 = smov %s1480_s13 }
 0x179   : > { %p10_p0 = scmp.ge.s32.totalorder %s13_s18, 20   ;;  %s1839_s13 = smov %s1574_s25 }
 0x17a   : > { %s1840_s14 = smov %s1492_s16  ;;  %s1841_s15 = smov %s1496_s17 }
 0x17b   : > { %s1842_s16 = smov %s1845_s19  ;;  %s1843_s17 = smov %s1849_s20 }
 0x17c   :  { %12 = sbr.rel (!%p10_p0) target bundleno = 4 (0x4), region = 119 }

// kernel: esac_scnet_forward.31
= control target key start
LH: loop header
LB: loop body
LE: loop exit
PB: predicated region body
PF: predicated region fallthrough
CT: control target
= control target key end

     0   :  { %s1483_s12 = smov 0   ;;  %s1485_s13 = smov 0   ;;  %s1767_s0 = inlined_call_operand.vmem [shape: bf16[8,512], index: 0, kind: input, shape index: {}]   ;;  %s1768_s1 = inlined_call_operand.vmem [shape: bf16[512,1024], index: 1, kind: input, shape index: {}]   ;;  %s1769_s2 = inlined_call_operand.vmem [shape: f32[1,1024], index: 2, kind: input, shape index: {}]   ;;  %s1770_s3 = inlined_call_operand.vmem [shape: bf16[8,1024], index: 3, kind: output, shape index: {}]  }
   0x1   :  { %s1487_s14 = smov 0   ;;  %s1489_s15 = smov 0  }
   0x2   :  { %s1491_s16 = smov 0  }
   0x3 LB: > { %s28_s17 = sadd.s32 1, %s1457_s15  ;;  %p76_p1 = scmp.ne.s32.totalorder %s1449_s13, %s1445_s12  ;;  %s1461_s16 = sphi %s1491_s16, %s13_s16   ;;  %s1457_s15 = sphi %s1489_s15, %s1774_s15   ;;  %s1453_s14 = sphi %s1487_s14, %s1773_s14   ;;  %s1449_s13 = sphi %s1485_s13, %s1772_s13   ;;  %s1445_s12 = sphi %s1483_s12, %s1771_s12  }
   0x4   : > { %p30_p0 = scmp.ge.s32.totalorder %s28_s17, 4  ;;  %p77_p2 = scmp.eq.s32.totalorder %s1461_s16, 0 }
   0x5   : > { %s69_s19 = sadd.s32 1, %s1449_s13  ;;  %p1201_p5 = scmp.ge.s32.totalorder %s1461_s16, 4 }
   0x6   : > { %s1776_s17 = smov (%p30_p0, %s28_s17), 0  ;;  %p78_p3 = por %p77_p2, %p76_p1 }
   0x7   : > { %s65_s18 = ssub.s32 %s1457_s15, %s1776_s17  ;;  %169 = sbr.rel (%p1201_p5) target bundleno = 82 (0x52), region = 20 }
   0x8   : > { %p67_p4 = scmp.eq.s32.totalorder %s65_s18, 0 }
   0xa   : > { %s1518_s20 = scalar_select %p67_p4, %s1449_s13, %s69_s19  }
   0xe   : > { %172 = sbr.rel (!%p78_p3) target bundleno = 82 (0x52), region = 24  ;;  %s174_s21 = sand.u32 (%p78_p3), 1, %s1449_s13  }
   0xf   : > { %s1281_s22 = sshll.u32 (%p78_p3), %s1457_s15, 3  ;;  %s1202_s23 = sshll.u32 (%p78_p3), %s174_s21, 9 }
  0x10   : > { %s1526_s26 = scalar_lea.vmem (%p78_p3), %s1768_s1, %s1281_s22  ;;  %s1531_s27 = scalar_lea.vmem (%p78_p3), [#allocation3], %s1202_s23 }
  0x11   : > { %v336_v0 = vld [vmem:[%s1526_s26] sm:$0xff] (%p78_p3) }
  0x12   : > { %v338_v1 = vld [vmem:[%s1526_s26 + $0x20] sm:$0xff] (%p78_p3)  ;;  %337 = vst [vmem:[%s1531_s27] sm:$0xff] (%p78_p3), %v336_v0 }
  0x13   : > { %v340_v2 = vld [vmem:[%s1526_s26 + $0x40] sm:$0xff] (%p78_p3)  ;;  %339 = vst [vmem:[%s1531_s27 + $0x8] sm:$0xff] (%p78_p3), %v338_v1 }
  0x14   : > { %341 = vst [vmem:[%s1531_s27 + $0x10] sm:$0xff] (%p78_p3), %v340_v2  ;;  %v342_v3 = vld [vmem:[%s1526_s26 + $0x60] sm:$0xff] (%p78_p3) }
  0x15   : > { %v344_v4 = vld [vmem:[%s1526_s26 + $0x80] sm:$0xff]  ;;  %343 = vst [vmem:[%s1531_s27 + $0x18] sm:$0xff] %v342_v3 }
  0x16   : > { %v346_v5 = vld [vmem:[%s1526_s26 + $0xa0] sm:$0xff]  ;;  %345 = vst [vmem:[%s1531_s27 + $0x20] sm:$0xff] %v344_v4 }
  0x17   : > { %347 = vst [vmem:[%s1531_s27 + $0x28] sm:$0xff] %v346_v5  ;;  %v348_v6 = vld [vmem:[%s1526_s26 + $0xc0] sm:$0xff] }
  0x18   : > { %v350_v7 = vld [vmem:[%s1526_s26 + $0xe0] sm:$0xff]  ;;  %349 = vst [vmem:[%s1531_s27 + $0x30] sm:$0xff] %v348_v6 }
  0x19   : > { %v352_v8 = vld [vmem:[%s1526_s26 + $0x100] sm:$0xff]  ;;  %351 = vst [vmem:[%s1531_s27 + $0x38] sm:$0xff] %v350_v7 }
  0x1a   : > { %353 = vst [vmem:[%s1531_s27 + $0x40] sm:$0xff] %v352_v8  ;;  %v354_v9 = vld [vmem:[%s1526_s26 + $0x120] sm:$0xff] }
  0x1b   : > { %v356_v10 = vld [vmem:[%s1526_s26 + $0x140] sm:$0xff]  ;;  %355 = vst [vmem:[%s1531_s27 + $0x48] sm:$0xff] %v354_v9 }
  0x1c   : > { %v358_v11 = vld [vmem:[%s1526_s26 + $0x160] sm:$0xff]  ;;  %357 = vst [vmem:[%s1531_s27 + $0x50] sm:$0xff] %v356_v10 }
  0x1d   : > { %359 = vst [vmem:[%s1531_s27 + $0x58] sm:$0xff] %v358_v11  ;;  %v360_v12 = vld [vmem:[%s1526_s26 + $0x180] sm:$0xff] }
  0x1e   : > { %v362_v13 = vld [vmem:[%s1526_s26 + $0x1a0] sm:$0xff]  ;;  %361 = vst [vmem:[%s1531_s27 + $0x60] sm:$0xff] %v360_v12 }
  0x1f   : > { %v364_v14 = vld [vmem:[%s1526_s26 + $0x1c0] sm:$0xff]  ;;  %363 = vst [vmem:[%s1531_s27 + $0x68] sm:$0xff] %v362_v13 }
  0x20   : > { %365 = vst [vmem:[%s1531_s27 + $0x70] sm:$0xff] %v364_v14  ;;  %v366_v15 = vld [vmem:[%s1526_s26 + $0x1e0] sm:$0xff] }
  0x21   : > { %v368_v16 = vld [vmem:[%s1526_s26 + $0x200] sm:$0xff]  ;;  %367 = vst [vmem:[%s1531_s27 + $0x78] sm:$0xff] %v366_v15 }
  0x22   : > { %v370_v17 = vld [vmem:[%s1526_s26 + $0x220] sm:$0xff]  ;;  %369 = vst [vmem:[%s1531_s27 + $0x80] sm:$0xff] %v368_v16 }
  0x23   : > { %371 = vst [vmem:[%s1531_s27 + $0x88] sm:$0xff] %v370_v17  ;;  %v372_v18 = vld [vmem:[%s1526_s26 + $0x240] sm:$0xff] }
  0x24   : > { %v374_v19 = vld [vmem:[%s1526_s26 + $0x260] sm:$0xff]  ;;  %373 = vst [vmem:[%s1531_s27 + $0x90] sm:$0xff] %v372_v18 }
  0x25   : > { %v376_v20 = vld [vmem:[%s1526_s26 + $0x280] sm:$0xff]  ;;  %375 = vst [vmem:[%s1531_s27 + $0x98] sm:$0xff] %v374_v19 }
  0x26   : > { %377 = vst [vmem:[%s1531_s27 + $0xa0] sm:$0xff] %v376_v20  ;;  %v378_v21 = vld [vmem:[%s1526_s26 + $0x2a0] sm:$0xff] }
  0x27   : > { %v380_v22 = vld [vmem:[%s1526_s26 + $0x2c0] sm:$0xff]  ;;  %379 = vst [vmem:[%s1531_s27 + $0xa8] sm:$0xff] %v378_v21 }
  0x28   : > { %v382_v23 = vld [vmem:[%s1526_s26 + $0x2e0] sm:$0xff]  ;;  %381 = vst [vmem:[%s1531_s27 + $0xb0] sm:$0xff] %v380_v22 }
  0x29   : > { %383 = vst [vmem:[%s1531_s27 + $0xb8] sm:$0xff] %v382_v23  ;;  %v384_v24 = vld [vmem:[%s1526_s26 + $0x300] sm:$0xff] }
  0x2a   : > { %v386_v25 = vld [vmem:[%s1526_s26 + $0x320] sm:$0xff]  ;;  %385 = vst [vmem:[%s1531_s27 + $0xc0] sm:$0xff] %v384_v24 }
  0x2b   : > { %v388_v26 = vld [vmem:[%s1526_s26 + $0x340] sm:$0xff]  ;;  %387 = vst [vmem:[%s1531_s27 + $0xc8] sm:$0xff] %v386_v25 }
  0x2c   : > { %389 = vst [vmem:[%s1531_s27 + $0xd0] sm:$0xff] %v388_v26  ;;  %v390_v27 = vld [vmem:[%s1526_s26 + $0x360] sm:$0xff] }
  0x2d   : > { %v392_v28 = vld [vmem:[%s1526_s26 + $0x380] sm:$0xff]  ;;  %391 = vst [vmem:[%s1531_s27 + $0xd8] sm:$0xff] %v390_v27 }
  0x2e   : > { %v394_v29 = vld [vmem:[%s1526_s26 + $0x3a0] sm:$0xff]  ;;  %393 = vst [vmem:[%s1531_s27 + $0xe0] sm:$0xff] %v392_v28 }
  0x2f   : > { %395 = vst [vmem:[%s1531_s27 + $0xe8] sm:$0xff] %v394_v29  ;;  %v396_v30 = vld [vmem:[%s1526_s26 + $0x3c0] sm:$0xff] }
  0x30   : > { %v398_v31 = vld [vmem:[%s1526_s26 + $0x3e0] sm:$0xff]  ;;  %397 = vst [vmem:[%s1531_s27 + $0xf0] sm:$0xff] %v396_v30 }
  0x31   : > { %v400_v32 = vld [vmem:[%s1526_s26 + $0x400] sm:$0xff]  ;;  %399 = vst [vmem:[%s1531_s27 + $0xf8] sm:$0xff] %v398_v31 }
  0x32   : > { %401 = vst [vmem:[%s1531_s27 + $0x100] sm:$0xff] %v400_v32  ;;  %v402_v33 = vld [vmem:[%s1526_s26 + $0x420] sm:$0xff] }
  0x33   : > { %v404_v34 = vld [vmem:[%s1526_s26 + $0x440] sm:$0xff]  ;;  %403 = vst [vmem:[%s1531_s27 + $0x108] sm:$0xff] %v402_v33 }
  0x34   : > { %v406_v35 = vld [vmem:[%s1526_s26 + $0x460] sm:$0xff]  ;;  %405 = vst [vmem:[%s1531_s27 + $0x110] sm:$0xff] %v404_v34 }
  0x35   : > { %407 = vst [vmem:[%s1531_s27 + $0x118] sm:$0xff] %v406_v35  ;;  %v408_v36 = vld [vmem:[%s1526_s26 + $0x480] sm:$0xff] }
  0x36   : > { %v410_v37 = vld [vmem:[%s1526_s26 + $0x4a0] sm:$0xff]  ;;  %409 = vst [vmem:[%s1531_s27 + $0x120] sm:$0xff] %v408_v36 }
  0x37   : > { %v412_v38 = vld [vmem:[%s1526_s26 + $0x4c0] sm:$0xff]  ;;  %411 = vst [vmem:[%s1531_s27 + $0x128] sm:$0xff] %v410_v37 }
  0x38   : > { %413 = vst [vmem:[%s1531_s27 + $0x130] sm:$0xff] %v412_v38  ;;  %v414_v39 = vld [vmem:[%s1526_s26 + $0x4e0] sm:$0xff] }
  0x39   : > { %v416_v40 = vld [vmem:[%s1526_s26 + $0x500] sm:$0xff]  ;;  %415 = vst [vmem:[%s1531_s27 + $0x138] sm:$0xff] %v414_v39 }
  0x3a   : > { %v418_v41 = vld [vmem:[%s1526_s26 + $0x520] sm:$0xff]  ;;  %417 = vst [vmem:[%s1531_s27 + $0x140] sm:$0xff] %v416_v40 }
  0x3b   : > { %419 = vst [vmem:[%s1531_s27 + $0x148] sm:$0xff] %v418_v41  ;;  %v420_v42 = vld [vmem:[%s1526_s26 + $0x540] sm:$0xff] }
  0x3c   : > { %v422_v43 = vld [vmem:[%s1526_s26 + $0x560] sm:$0xff]  ;;  %421 = vst [vmem:[%s1531_s27 + $0x150] sm:$0xff] %v420_v42 }
  0x3d   : > { %v424_v44 = vld [vmem:[%s1526_s26 + $0x580] sm:$0xff]  ;;  %423 = vst [vmem:[%s1531_s27 + $0x158] sm:$0xff] %v422_v43 }
  0x3e   : > { %425 = vst [vmem:[%s1531_s27 + $0x160] sm:$0xff] %v424_v44  ;;  %v426_v45 = vld [vmem:[%s1526_s26 + $0x5a0] sm:$0xff] }
  0x3f   : > { %v428_v46 = vld [vmem:[%s1526_s26 + $0x5c0] sm:$0xff]  ;;  %427 = vst [vmem:[%s1531_s27 + $0x168] sm:$0xff] %v426_v45 }
  0x40   : > { %v430_v47 = vld [vmem:[%s1526_s26 + $0x5e0] sm:$0xff]  ;;  %429 = vst [vmem:[%s1531_s27 + $0x170] sm:$0xff] %v428_v46 }
  0x41   : > { %431 = vst [vmem:[%s1531_s27 + $0x178] sm:$0xff] %v430_v47  ;;  %v432_v48 = vld [vmem:[%s1526_s26 + $0x600] sm:$0xff] }
  0x42   : > { %v434_v49 = vld [vmem:[%s1526_s26 + $0x620] sm:$0xff]  ;;  %433 = vst [vmem:[%s1531_s27 + $0x180] sm:$0xff] %v432_v48 }
  0x43   : > { %v436_v50 = vld [vmem:[%s1526_s26 + $0x640] sm:$0xff]  ;;  %435 = vst [vmem:[%s1531_s27 + $0x188] sm:$0xff] %v434_v49 }
  0x44   : > { %437 = vst [vmem:[%s1531_s27 + $0x190] sm:$0xff] %v436_v50  ;;  %v438_v51 = vld [vmem:[%s1526_s26 + $0x660] sm:$0xff] }
  0x45   : > { %v440_v52 = vld [vmem:[%s1526_s26 + $0x680] sm:$0xff]  ;;  %439 = vst [vmem:[%s1531_s27 + $0x198] sm:$0xff] %v438_v51 }
  0x46   : > { %v442_v53 = vld [vmem:[%s1526_s26 + $0x6a0] sm:$0xff]  ;;  %441 = vst [vmem:[%s1531_s27 + $0x1a0] sm:$0xff] %v440_v52 }
  0x47   : > { %443 = vst [vmem:[%s1531_s27 + $0x1a8] sm:$0xff] %v442_v53  ;;  %v444_v54 = vld [vmem:[%s1526_s26 + $0x6c0] sm:$0xff] }
  0x48   : > { %v446_v55 = vld [vmem:[%s1526_s26 + $0x6e0] sm:$0xff]  ;;  %445 = vst [vmem:[%s1531_s27 + $0x1b0] sm:$0xff] %v444_v54 }
  0x49   : > { %v448_v56 = vld [vmem:[%s1526_s26 + $0x700] sm:$0xff]  ;;  %447 = vst [vmem:[%s1531_s27 + $0x1b8] sm:$0xff] %v446_v55 }
  0x4a   : > { %449 = vst [vmem:[%s1531_s27 + $0x1c0] sm:$0xff] %v448_v56  ;;  %v450_v57 = vld [vmem:[%s1526_s26 + $0x720] sm:$0xff] }
  0x4b   : > { %v452_v58 = vld [vmem:[%s1526_s26 + $0x740] sm:$0xff]  ;;  %451 = vst [vmem:[%s1531_s27 + $0x1c8] sm:$0xff] %v450_v57 }
  0x4c   : > { %v454_v59 = vld [vmem:[%s1526_s26 + $0x760] sm:$0xff]  ;;  %453 = vst [vmem:[%s1531_s27 + $0x1d0] sm:$0xff] %v452_v58 }
  0x4d   : > { %455 = vst [vmem:[%s1531_s27 + $0x1d8] sm:$0xff] %v454_v59  ;;  %v456_v60 = vld [vmem:[%s1526_s26 + $0x780] sm:$0xff] }
  0x4e   : > { %v458_v61 = vld [vmem:[%s1526_s26 + $0x7a0] sm:$0xff]  ;;  %457 = vst [vmem:[%s1531_s27 + $0x1e0] sm:$0xff] %v456_v60 }
  0x4f   : > { %v460_v62 = vld [vmem:[%s1526_s26 + $0x7c0] sm:$0xff]  ;;  %459 = vst [vmem:[%s1531_s27 + $0x1e8] sm:$0xff] %v458_v61 }
  0x50   : > { %461 = vst [vmem:[%s1531_s27 + $0x1f0] sm:$0xff] %v460_v62  ;;  %v462_v63 = vld [vmem:[%s1526_s26 + $0x7e0] sm:$0xff] }
  0x51   : > { %463 = vst [vmem:[%s1531_s27 + $0x1f8] sm:$0xff] %v462_v63 }
  0x52 PF: > { %p1205_p6 = scmp.ge.s32.totalorder %s1461_s16, 1  ;;  %p476_p7 = scmp.lt.s32.totalorder %s1461_s16, 5 }
  0x54   : > { %p477_p8 = pnand %p1205_p6, %p476_p7 }
  0x55   : > { %s483_s28 = sand.u32 (!%p477_p8), 1, %s1445_s12   ;;  %v1664_v0 = vld [vmem:[%s1767_s0] sm:$0xff] (!%p477_p8)  ;;  %v1669_v1 = vld [vmem:[%s1767_s0 + $0x8] sm:$0xff] (!%p477_p8)  ;;  %s1207_s8 = sshll.u32 (!%p477_p8), %s1453_s14, 1 }
  0x56   : > { %480 = sbr.rel (%p477_p8) target bundleno = 376 (0x178), region = 66  ;;  %s1206_s6 = sshll.u32 (!%p477_p8), %s483_s28, 9  ;;  %v1211_v2 = vcombine.high (!%p477_p8), %v1664_v0, %v1664_v0  ;;  %v1213_v3 = vcombine.high (!%p477_p8), %v1669_v1, %v1669_v1 }
  0x57   : > { %s1675_s7 = scalar_lea.vmem (!%p477_p8), [#allocation3], %s1206_s6  ;;  %p536_p9 = scmp.lt.s32.totalorder (!%p477_p8), %s1207_s8, 7 }
  0x58   : > { %v1323_v4 = vld [vmem:[%s1675_s7 + $0x4] ss:$8 sps:$4 sm:$0xff] (!%p477_p8)   ;;  %990 = vmatprep.mubr.bf16.mxu0 (!%p477_p8), %v1211_v2  ;;  %1031 = vmatprep.mubr.bf16.mxu1 (!%p477_p8), %v1213_v3  ;;  %v1327_v6 = vld [vmem:[%s1675_s7] ss:$8 sps:$4 sm:$0xff] (!%p477_p8)   ;;  %v1329_v8 = vld [vmem:[%s1675_s7 + $0x14] ss:$8 sps:$4 sm:$0xff] (!%p477_p8)  }
  0x59   : > { %v1325_v5 = vld [vmem:[%s1675_s7 + $0x104] ss:$8 sps:$4 sm:$0xff] (!%p477_p8)   ;;  %958 = vmatprep.subr.bf16.mxu0 (!%p477_p8), %v1323_v4  ;;  %v1328_v7 = vld [vmem:[%s1675_s7 + $0x100] ss:$8 sps:$4 sm:$0xff] (!%p477_p8)   ;;  %v1331_v9 = vld [vmem:[%s1675_s7 + $0x114] ss:$8 sps:$4 sm:$0xff] (!%p477_p8)  }
  0x5a   : > { %999 = vmatprep.subr.bf16.mxu1 (!%p477_p8), %v1325_v5  ;;  %959 = vmatpush1.bf16.msra.mxu0 (!%p477_p8), %v1327_v6  ;;  %v1333_v10 = vld [vmem:[%s1675_s7 + $0x10] ss:$8 sps:$4 sm:$0xff] (!%p477_p8)   ;;  %v1335_v12 = vld [vmem:[%s1675_s7 + $0x24] ss:$8 sps:$4 sm:$0xff] (!%p477_p8)   ;;  %v1339_v14 = vld [vmem:[%s1675_s7 + $0x20] ss:$8 sps:$4 sm:$0xff] (!%p477_p8)   ;;  %v1210_v6 = vcombine.low (!%p477_p8), %v1664_v0, %v1664_v0 }
  0x5b   : > { %1000 = vmatpush1.bf16.msra.mxu1 (!%p477_p8), %v1328_v7  ;;  %960 = vmatprep.subr.bf16.mxu0 (!%p477_p8), %v1329_v8  ;;  %v1334_v11 = vld [vmem:[%s1675_s7 + $0x110] ss:$8 sps:$4 sm:$0xff] (!%p477_p8)   ;;  %v1337_v13 = vld [vmem:[%s1675_s7 + $0x124] ss:$8 sps:$4 sm:$0xff] (!%p477_p8)   ;;  %v1340_v15 = vld [vmem:[%s1675_s7 + $0x120] ss:$8 sps:$4 sm:$0xff] (!%p477_p8)   ;;  %v1212_v7 = vcombine.low (!%p477_p8), %v1669_v1, %v1669_v1  ;;  %v1051_v8 = vlaneseq (!%p477_p8) }
  0x5c   : > { %1001 = vmatprep.subr.bf16.mxu1 (!%p477_p8), %v1331_v9  ;;  %v1341_v16 = vld [vmem:[%s1675_s7 + $0x34] ss:$8 sps:$4 sm:$0xff] (!%p477_p8)   ;;  %v1345_v18 = vld [vmem:[%s1675_s7 + $0x30] ss:$8 sps:$4 sm:$0xff] (!%p477_p8)   ;;  %v1347_v20 = vld [vmem:[%s1675_s7 + $0x44] ss:$8 sps:$4 sm:$0xff] (!%p477_p8)  }
  0x5d   : > { %v1343_v17 = vld [vmem:[%s1675_s7 + $0x134] ss:$8 sps:$4 sm:$0xff]   ;;  %v1346_v19 = vld [vmem:[%s1675_s7 + $0x130] ss:$8 sps:$4 sm:$0xff]   ;;  %v1349_v21 = vld [vmem:[%s1675_s7 + $0x144] ss:$8 sps:$4 sm:$0xff]  }
  0x5e   : > { %961 = vmatpush1.bf16.msra.mxu0 %v1333_v10  ;;  %v1351_v22 = vld [vmem:[%s1675_s7 + $0x40] ss:$8 sps:$4 sm:$0xff]   ;;  %v1353_v24 = vld [vmem:[%s1675_s7 + $0x54] ss:$8 sps:$4 sm:$0xff]   ;;  %v1357_v26 = vld [vmem:[%s1675_s7 + $0x50] ss:$8 sps:$4 sm:$0xff]  }
  0x5f   : > { %1002 = vmatpush1.bf16.msra.mxu1 %v1334_v11  ;;  %962 = vmatprep.subr.bf16.mxu0 %v1335_v12  ;;  %v1352_v23 = vld [vmem:[%s1675_s7 + $0x140] ss:$8 sps:$4 sm:$0xff]   ;;  %v1355_v25 = vld [vmem:[%s1675_s7 + $0x154] ss:$8 sps:$4 sm:$0xff]   ;;  %v1358_v27 = vld [vmem:[%s1675_s7 + $0x150] ss:$8 sps:$4 sm:$0xff]  }
  0x60   : > { %1003 = vmatprep.subr.bf16.mxu1 %v1337_v13  ;;  %v1359_v28 = vld [vmem:[%s1675_s7 + $0x64] ss:$8 sps:$4 sm:$0xff]   ;;  %v1363_v30 = vld [vmem:[%s1675_s7 + $0x60] ss:$8 sps:$4 sm:$0xff]   ;;  %v1365_v32 = vld [vmem:[%s1675_s7 + $0x74] ss:$8 sps:$4 sm:$0xff]  }
  0x61   : > { %v1361_v29 = vld [vmem:[%s1675_s7 + $0x164] ss:$8 sps:$4 sm:$0xff]   ;;  %v1364_v31 = vld [vmem:[%s1675_s7 + $0x160] ss:$8 sps:$4 sm:$0xff]   ;;  %v1367_v33 = vld [vmem:[%s1675_s7 + $0x174] ss:$8 sps:$4 sm:$0xff]  }
  0x62   : > { %963 = vmatpush1.bf16.msra.mxu0 %v1339_v14  ;;  %v1369_v34 = vld [vmem:[%s1675_s7 + $0x70] ss:$8 sps:$4 sm:$0xff]   ;;  %v1371_v36 = vld [vmem:[%s1675_s7 + $0x84] ss:$8 sps:$4 sm:$0xff]   ;;  %v1375_v38 = vld [vmem:[%s1675_s7 + $0x80] ss:$8 sps:$4 sm:$0xff]  }
  0x63   : > { %1004 = vmatpush1.bf16.msra.mxu1 %v1340_v15  ;;  %964 = vmatprep.subr.bf16.mxu0 %v1341_v16  ;;  %v1370_v35 = vld [vmem:[%s1675_s7 + $0x170] ss:$8 sps:$4 sm:$0xff]   ;;  %v1373_v37 = vld [vmem:[%s1675_s7 + $0x184] ss:$8 sps:$4 sm:$0xff]   ;;  %v1376_v39 = vld [vmem:[%s1675_s7 + $0x180] ss:$8 sps:$4 sm:$0xff]  }
  0x64   : > { %1005 = vmatprep.subr.bf16.mxu1 %v1343_v17  ;;  %v1377_v40 = vld [vmem:[%s1675_s7 + $0x94] ss:$8 sps:$4 sm:$0xff]   ;;  %v1381_v42 = vld [vmem:[%s1675_s7 + $0x90] ss:$8 sps:$4 sm:$0xff]   ;;  %v1383_v44 = vld [vmem:[%s1675_s7 + $0xa4] ss:$8 sps:$4 sm:$0xff]  }
  0x65   : > { %v1379_v41 = vld [vmem:[%s1675_s7 + $0x194] ss:$8 sps:$4 sm:$0xff]   ;;  %v1382_v43 = vld [vmem:[%s1675_s7 + $0x190] ss:$8 sps:$4 sm:$0xff]   ;;  %v1385_v45 = vld [vmem:[%s1675_s7 + $0x1a4] ss:$8 sps:$4 sm:$0xff]  }
  0x66   : > { %965 = vmatpush1.bf16.msra.mxu0 %v1345_v18  ;;  %v1387_v46 = vld [vmem:[%s1675_s7 + $0xa0] ss:$8 sps:$4 sm:$0xff]   ;;  %v1389_v48 = vld [vmem:[%s1675_s7 + $0xb4] ss:$8 sps:$4 sm:$0xff]   ;;  %v1393_v50 = vld [vmem:[%s1675_s7 + $0xb0] ss:$8 sps:$4 sm:$0xff]  }
  0x67   : > { %1006 = vmatpush1.bf16.msra.mxu1 %v1346_v19  ;;  %966 = vmatprep.subr.bf16.mxu0 %v1347_v20  ;;  %v1388_v47 = vld [vmem:[%s1675_s7 + $0x1a0] ss:$8 sps:$4 sm:$0xff]   ;;  %v1391_v49 = vld [vmem:[%s1675_s7 + $0x1b4] ss:$8 sps:$4 sm:$0xff]   ;;  %v1394_v51 = vld [vmem:[%s1675_s7 + $0x1b0] ss:$8 sps:$4 sm:$0xff]  }
  0x68   : > { %1007 = vmatprep.subr.bf16.mxu1 %v1349_v21  ;;  %v1395_v52 = vld [vmem:[%s1675_s7 + $0xc4] ss:$8 sps:$4 sm:$0xff]   ;;  %v1399_v54 = vld [vmem:[%s1675_s7 + $0xc0] ss:$8 sps:$4 sm:$0xff]   ;;  %v1401_v56 = vld [vmem:[%s1675_s7 + $0xd4] ss:$8 sps:$4 sm:$0xff]  }
  0x69   : > { %v1397_v53 = vld [vmem:[%s1675_s7 + $0x1c4] ss:$8 sps:$4 sm:$0xff]   ;;  %v1400_v55 = vld [vmem:[%s1675_s7 + $0x1c0] ss:$8 sps:$4 sm:$0xff]   ;;  %v1403_v57 = vld [vmem:[%s1675_s7 + $0x1d4] ss:$8 sps:$4 sm:$0xff]  }
  0x6a   : > { %967 = vmatpush1.bf16.msra.mxu0 %v1351_v22  ;;  %v1405_v58 = vld [vmem:[%s1675_s7 + $0xd0] ss:$8 sps:$4 sm:$0xff]   ;;  %v1407_v60 = vld [vmem:[%s1675_s7 + $0xe4] ss:$8 sps:$4 sm:$0xff]   ;;  %v1411_v62 = vld [vmem:[%s1675_s7 + $0xe0] ss:$8 sps:$4 sm:$0xff]  }
  0x6b   : > { %1008 = vmatpush1.bf16.msra.mxu1 %v1352_v23  ;;  %968 = vmatprep.subr.bf16.mxu0 %v1353_v24  ;;  %v1406_v59 = vld [vmem:[%s1675_s7 + $0x1d0] ss:$8 sps:$4 sm:$0xff]   ;;  %v1409_v61 = vld [vmem:[%s1675_s7 + $0x1e4] ss:$8 sps:$4 sm:$0xff]   ;;  %v1412_v63 = vld [vmem:[%s1675_s7 + $0x1e0] ss:$8 sps:$4 sm:$0xff]  }
  0x6c   : > { %1009 = vmatprep.subr.bf16.mxu1 %v1355_v25  ;;  %v1413_v2 = vld [vmem:[%s1675_s7 + $0xf4] ss:$8 sps:$4 sm:$0xff]   ;;  %v1417_v4 = vld [vmem:[%s1675_s7 + $0xf0] ss:$8 sps:$4 sm:$0xff]   ;;  %s1778_s8 = smov (!%p536_p9, %s1207_s8), 7  ;;  %v1052_v9 = vshrl.u32 %v1051_v8, 7 }
  0x6d   : > { %v1415_v3 = vld [vmem:[%s1675_s7 + $0x1f4] ss:$8 sps:$4 sm:$0xff]   ;;  %v1418_v5 = vld [vmem:[%s1675_s7 + $0x1f0] ss:$8 sps:$4 sm:$0xff]   ;;  %s538_s11 = scalar_lea.vmem %s1769_s2, %s1778_s8  ;;  %s1209_s12 = sshll.u32 %s1778_s8, 2 }
  0x6e   : > { %969 = vmatpush1.bf16.msra.mxu0 %v1357_v26  ;;  %v1053_v10 = vsub.s32 0, %v1052_v9  ;;  %v1049_v11 = vld [vmem:[%s538_s11] sm:$0x3]  ;;  %v1057_v12 = vsub.s32 1, %v1052_v9  ;;  %s548_s19 = scalar_lea.vmem %s1770_s3, %s1209_s12 }
  0x6f   : > { %1010 = vmatpush1.bf16.msra.mxu1 %v1358_v27  ;;  %970 = vmatprep.subr.bf16.mxu0 %v1359_v28 }
  0x70   : > { %1011 = vmatprep.subr.bf16.mxu1 %v1361_v29  ;;  %v1054_v0 = vrot.slane %v1049_v11, %v1053_v10  ;;  %v1058_v1 = vrot.slane %v1049_v11, %v1057_v12 }
  0x72   : > { %971 = vmatpush1.bf16.msra.mxu0 %v1363_v30 }
  0x73   : > { %1012 = vmatpush1.bf16.msra.mxu1 %v1364_v31  ;;  %972 = vmatprep.subr.bf16.mxu0 %v1365_v32 }
  0x74   : > { %1013 = vmatprep.subr.bf16.mxu1 %v1367_v33 }
  0x76   : > { %973 = vmatpush1.bf16.msra.mxu0 %v1369_v34 }
  0x77   : > { %1014 = vmatpush1.bf16.msra.mxu1 %v1370_v35  ;;  %974 = vmatprep.subr.bf16.mxu0 %v1371_v36 }
  0x78   : > { %1015 = vmatprep.subr.bf16.mxu1 %v1373_v37 }
  0x7a   : > { %975 = vmatpush1.bf16.msra.mxu0 %v1375_v38 }
  0x7b   : > { %1016 = vmatpush1.bf16.msra.mxu1 %v1376_v39  ;;  %976 = vmatprep.subr.bf16.mxu0 %v1377_v40 }
  0x7c   : > { %1017 = vmatprep.subr.bf16.mxu1 %v1379_v41 }
  0x7e   : > { %977 = vmatpush1.bf16.msra.mxu0 %v1381_v42 }
  0x7f   : > { %1018 = vmatpush1.bf16.msra.mxu1 %v1382_v43  ;;  %978 = vmatprep.subr.bf16.mxu0 %v1383_v44 }
  0x80   : > { %1019 = vmatprep.subr.bf16.mxu1 %v1385_v45 }
  0x82   : > { %979 = vmatpush1.bf16.msra.mxu0 %v1387_v46 }
  0x83   : > { %1020 = vmatpush1.bf16.msra.mxu1 %v1388_v47  ;;  %980 = vmatprep.subr.bf16.mxu0 %v1389_v48 }
  0x84   : > { %1021 = vmatprep.subr.bf16.mxu1 %v1391_v49 }
  0x86   : > { %981 = vmatpush1.bf16.msra.mxu0 %v1393_v50 }
  0x87   : > { %1022 = vmatpush1.bf16.msra.mxu1 %v1394_v51  ;;  %982 = vmatprep.subr.bf16.mxu0 %v1395_v52 }
  0x88   : > { %1023 = vmatprep.subr.bf16.mxu1 %v1397_v53 }
  0x8a   : > { %983 = vmatpush1.bf16.msra.mxu0 %v1399_v54 }
  0x8b   : > { %1024 = vmatpush1.bf16.msra.mxu1 %v1400_v55  ;;  %984 = vmatprep.subr.bf16.mxu0 %v1401_v56 }
  0x8c   : > { %1025 = vmatprep.subr.bf16.mxu1 %v1403_v57 }
  0x8e   : > { %985 = vmatpush1.bf16.msra.mxu0 %v1405_v58 }
  0x8f   : > { %1026 = vmatpush1.bf16.msra.mxu1 %v1406_v59  ;;  %986 = vmatprep.subr.bf16.mxu0 %v1407_v60 }
  0x90   : > { %1027 = vmatprep.subr.bf16.mxu1 %v1409_v61 }
  0x92   : > { %987 = vmatpush1.bf16.msra.mxu0 %v1411_v62 }
  0x93   : > { %1028 = vmatpush1.bf16.msra.mxu1 %v1412_v63  ;;  %988 = vmatprep.subr.bf16.mxu0 %v1413_v2 }
  0x94   : > { %1029 = vmatprep.subr.bf16.mxu1 %v1415_v3 }
  0x96   : > { %989 = vmatpush1.bf16.msra.mxu0 %v1417_v4 }
  0x97   : > { %1030 = vmatpush1.bf16.msra.mxu1 %v1418_v5 }
  0x99   : > { %991 = vmatmul.mubr.bf16.vlgmr.msra.gmra.mrb[0].mxu0 %v1210_v6 }
  0x9a   : > { %1032 = vmatmul.mubr.bf16.vlgmr.msra.gmra.mrb[0].mxu1 %v1212_v7 }
 0x16c   : > { %v992_v13 = vpop.f32.mrb[0].mxu0 }
 0x16d   : > { %v1033_v14 = vpop.f32.mrb[0].mxu1  ;;  %v994_v16 = vpop.f32.mrb[1].mxu0 }
 0x16e   : > { %v1034_v15 = vadd.f32 %v1033_v14, %v992_v13  ;;  %v1035_v17 = vpop.f32.mrb[1].mxu1  ;;  %v996_v19 = vpop.f32.mrb[2].mxu0 }
 0x16f   : > { %v1036_v18 = vadd.f32 %v1035_v17, %v994_v16  ;;  %v1037_v20 = vpop.f32.mrb[2].mxu1  ;;  %v997_v22 = vpop.f32.mrb[3].mxu0 }
 0x170   : > { %v1061_v21 = vadd.f32 %v1054_v0, %v1034_v15  ;;  %v1038_v23 = vpop.f32.mrb[3].mxu1 }
 0x171   : > { %v1062_v24 = vadd.f32 %v1058_v1, %v1036_v18 }
 0x172   : > { %v1063_v25 = vmax.f32 %v1061_v21, 0.0 }
 0x173   : > { %v1064_v26 = vmax.f32 %v1062_v24, 0.0 }
 0x175   : > { %v1282_v27 = vpack.c.bf16 %v1064_v26, %v1063_v25 }
 0x177   : > { %1073 = vst [vmem:[%s548_s19] sm:$0xff] %v1282_v27 }
 0x178 PF: > { %s13_s16 = sadd.s32 1, %s1461_s16   ;;  %s1771_s12 = smov %s1449_s13 }
 0x179   : > { %p10_p10 = scmp.ge.s32.totalorder %s13_s16, 6   ;;  %s1772_s13 = smov %s1518_s20 }
 0x17a   : > { %s1773_s14 = smov %s1457_s15  ;;  %s1774_s15 = smov %s1776_s17 }
 0x17b   :  { %12 = sbr.rel (!%p10_p10) target bundleno = 3 (0x3), region = 119 }

// kernel: esac_scnet_forward.32
= control target key start
LH: loop header
LB: loop body
LE: loop exit
PB: predicated region body
PF: predicated region fallthrough
CT: control target
= control target key end

     0   :  { %s1523_s12 = smov 0   ;;  %s1525_s13 = smov 0   ;;  %s1834_s0 = inlined_call_operand.vmem [shape: bf16[8,1024], index: 0, kind: input, shape index: {}]   ;;  %s1835_s1 = inlined_call_operand.vmem [shape: bf16[1024,1024], index: 1, kind: input, shape index: {}]   ;;  %s1836_s2 = inlined_call_operand.vmem [shape: f32[1,1024], index: 2, kind: input, shape index: {}]   ;;  %s1837_s3 = inlined_call_operand.vmem [shape: bf16[8,1024], index: 3, kind: output, shape index: {}]  }
   0x1   :  { %s1527_s14 = smov 0   ;;  %s1529_s15 = smov 0  }
   0x2   :  { %s1531_s16 = smov 0   ;;  %s1533_s17 = smov 0  }
   0x3   :  { %s1535_s18 = smov 0  }
   0x4 LB: > { %s25_s19 = sadd.s32 1, %s1492_s16  ;;  %s28_s20 = sadd.s32 1, %s1496_s17  ;;  %s1500_s18 = sphi %s1535_s18, %s13_s18   ;;  %s1496_s17 = sphi %s1533_s17, %s1843_s17   ;;  %s1492_s16 = sphi %s1531_s16, %s1842_s16   ;;  %s1488_s15 = sphi %s1529_s15, %s1841_s15   ;;  %s1484_s14 = sphi %s1527_s14, %s1840_s14   ;;  %s1480_s13 = sphi %s1525_s13, %s1839_s13   ;;  %s1476_s12 = sphi %s1523_s12, %s1838_s12  }
   0x5   : > { %p26_p0 = scmp.ge.s32.totalorder %s25_s19, 2  ;;  %p76_p1 = scmp.ne.s32.totalorder %s1480_s13, %s1476_s12 }
   0x6   : > { %p77_p2 = scmp.eq.s32.totalorder %s1500_s18, 0  ;;  %s69_s24 = sadd.s32 1, %s1480_s13 }
   0x7   : > { %s1845_s19 = smov (%p26_p0, %s25_s19), 0  ;;  %s1847_s20 = smov (!%p26_p0, %s28_s20), %s1496_s17 }
   0x8   : > { %p78_p3 = por %p77_p2, %p76_p1  ;;  %p30_p4 = scmp.ge.s32.totalorder %s1847_s20, 4 }
   0x9   : > { %s64_s21 = ssub.s32 %s1492_s16, %s1845_s19  ;;  %p1201_p6 = scmp.ge.s32.totalorder %s1500_s18, 8 }
   0xa   : > { %s1849_s20 = smov (%p30_p4, %s1847_s20), 0 }
   0xb   : > { %s65_s22 = ssub.s32 %s1496_s17, %s1849_s20  ;;  %156 = sbr.rel (%p1201_p6) target bundleno = 89 (0x59), region = 16 }
   0xc   : > { %s66_s23 = sor.u32 %s65_s22, %s64_s21 }
   0xd   : > { %p67_p5 = scmp.eq.s32.totalorder %s66_s23, 0 }
   0xf   : > { %s1574_s25 = scalar_select %p67_p5, %s1480_s13, %s69_s24  }
  0x12   : > { %172 = sbr.rel (!%p78_p3) target bundleno = 89 (0x59), region = 24  ;;  %s174_s26 = sand.u32 (%p78_p3), 1, %s1480_s13  }
  0x13   : > { %s1204_s27 = sshll.u32 (%p78_p3), %s1496_s17, 1  ;;  %s1202_s28 = sshll.u32 (%p78_p3), %s174_s26, 9 }
  0x14   : > { %s1287_s29 = sshll.u32 (%p78_p3), %s1492_s16, 9  ;;  %s1588_s8 = scalar_lea.vmem (%p78_p3), [#allocation3], %s1202_s28 }
  0x15   : > { %s180_s30 = sadd.s32 (%p78_p3), %s1287_s29, %s1204_s27 }
  0x16   : > { %s1206_s4 = sshll.u32 (%p78_p3), %s180_s30, 2 }
  0x17   : > { %s1583_s7 = scalar_lea.vmem (%p78_p3), %s1835_s1, %s1206_s4 }
  0x18   : > { %v336_v0 = vld [vmem:[%s1583_s7] sm:$0xff] (%p78_p3) }
  0x19   : > { %v338_v1 = vld [vmem:[%s1583_s7 + $0x20] sm:$0xff]  ;;  %337 = vst [vmem:[%s1588_s8] sm:$0xff] %v336_v0 }
  0x1a   : > { %v340_v2 = vld [vmem:[%s1583_s7 + $0x40] sm:$0xff]  ;;  %339 = vst [vmem:[%s1588_s8 + $0x8] sm:$0xff] %v338_v1 }
  0x1b   : > { %341 = vst [vmem:[%s1588_s8 + $0x10] sm:$0xff] %v340_v2  ;;  %v342_v3 = vld [vmem:[%s1583_s7 + $0x60] sm:$0xff] }
  0x1c   : > { %v344_v4 = vld [vmem:[%s1583_s7 + $0x80] sm:$0xff]  ;;  %343 = vst [vmem:[%s1588_s8 + $0x18] sm:$0xff] %v342_v3 }
  0x1d   : > { %v346_v5 = vld [vmem:[%s1583_s7 + $0xa0] sm:$0xff]  ;;  %345 = vst [vmem:[%s1588_s8 + $0x20] sm:$0xff] %v344_v4 }
  0x1e   : > { %347 = vst [vmem:[%s1588_s8 + $0x28] sm:$0xff] %v346_v5  ;;  %v348_v6 = vld [vmem:[%s1583_s7 + $0xc0] sm:$0xff] }
  0x1f   : > { %v350_v7 = vld [vmem:[%s1583_s7 + $0xe0] sm:$0xff]  ;;  %349 = vst [vmem:[%s1588_s8 + $0x30] sm:$0xff] %v348_v6 }
  0x20   : > { %v352_v8 = vld [vmem:[%s1583_s7 + $0x100] sm:$0xff]  ;;  %351 = vst [vmem:[%s1588_s8 + $0x38] sm:$0xff] %v350_v7 }
  0x21   : > { %353 = vst [vmem:[%s1588_s8 + $0x40] sm:$0xff] %v352_v8  ;;  %v354_v9 = vld [vmem:[%s1583_s7 + $0x120] sm:$0xff] }
  0x22   : > { %v356_v10 = vld [vmem:[%s1583_s7 + $0x140] sm:$0xff]  ;;  %355 = vst [vmem:[%s1588_s8 + $0x48] sm:$0xff] %v354_v9 }
  0x23   : > { %v358_v11 = vld [vmem:[%s1583_s7 + $0x160] sm:$0xff]  ;;  %357 = vst [vmem:[%s1588_s8 + $0x50] sm:$0xff] %v356_v10 }
  0x24   : > { %359 = vst [vmem:[%s1588_s8 + $0x58] sm:$0xff] %v358_v11  ;;  %v360_v12 = vld [vmem:[%s1583_s7 + $0x180] sm:$0xff] }
  0x25   : > { %v362_v13 = vld [vmem:[%s1583_s7 + $0x1a0] sm:$0xff]  ;;  %361 = vst [vmem:[%s1588_s8 + $0x60] sm:$0xff] %v360_v12 }
  0x26   : > { %v364_v14 = vld [vmem:[%s1583_s7 + $0x1c0] sm:$0xff]  ;;  %363 = vst [vmem:[%s1588_s8 + $0x68] sm:$0xff] %v362_v13 }
  0x27   : > { %365 = vst [vmem:[%s1588_s8 + $0x70] sm:$0xff] %v364_v14  ;;  %v366_v15 = vld [vmem:[%s1583_s7 + $0x1e0] sm:$0xff] }
  0x28   : > { %v368_v16 = vld [vmem:[%s1583_s7 + $0x200] sm:$0xff]  ;;  %367 = vst [vmem:[%s1588_s8 + $0x78] sm:$0xff] %v366_v15 }
  0x29   : > { %v370_v17 = vld [vmem:[%s1583_s7 + $0x220] sm:$0xff]  ;;  %369 = vst [vmem:[%s1588_s8 + $0x80] sm:$0xff] %v368_v16 }
  0x2a   : > { %371 = vst [vmem:[%s1588_s8 + $0x88] sm:$0xff] %v370_v17  ;;  %v372_v18 = vld [vmem:[%s1583_s7 + $0x240] sm:$0xff] }
  0x2b   : > { %v374_v19 = vld [vmem:[%s1583_s7 + $0x260] sm:$0xff]  ;;  %373 = vst [vmem:[%s1588_s8 + $0x90] sm:$0xff] %v372_v18 }
  0x2c   : > { %v376_v20 = vld [vmem:[%s1583_s7 + $0x280] sm:$0xff]  ;;  %375 = vst [vmem:[%s1588_s8 + $0x98] sm:$0xff] %v374_v19 }
  0x2d   : > { %377 = vst [vmem:[%s1588_s8 + $0xa0] sm:$0xff] %v376_v20  ;;  %v378_v21 = vld [vmem:[%s1583_s7 + $0x2a0] sm:$0xff] }
  0x2e   : > { %v380_v22 = vld [vmem:[%s1583_s7 + $0x2c0] sm:$0xff]  ;;  %379 = vst [vmem:[%s1588_s8 + $0xa8] sm:$0xff] %v378_v21 }
  0x2f   : > { %v382_v23 = vld [vmem:[%s1583_s7 + $0x2e0] sm:$0xff]  ;;  %381 = vst [vmem:[%s1588_s8 + $0xb0] sm:$0xff] %v380_v22 }
  0x30   : > { %383 = vst [vmem:[%s1588_s8 + $0xb8] sm:$0xff] %v382_v23  ;;  %v384_v24 = vld [vmem:[%s1583_s7 + $0x300] sm:$0xff] }
  0x31   : > { %v386_v25 = vld [vmem:[%s1583_s7 + $0x320] sm:$0xff]  ;;  %385 = vst [vmem:[%s1588_s8 + $0xc0] sm:$0xff] %v384_v24 }
  0x32   : > { %v388_v26 = vld [vmem:[%s1583_s7 + $0x340] sm:$0xff]  ;;  %387 = vst [vmem:[%s1588_s8 + $0xc8] sm:$0xff] %v386_v25 }
  0x33   : > { %389 = vst [vmem:[%s1588_s8 + $0xd0] sm:$0xff] %v388_v26  ;;  %v390_v27 = vld [vmem:[%s1583_s7 + $0x360] sm:$0xff] }
  0x34   : > { %v392_v28 = vld [vmem:[%s1583_s7 + $0x380] sm:$0xff]  ;;  %391 = vst [vmem:[%s1588_s8 + $0xd8] sm:$0xff] %v390_v27 }
  0x35   : > { %v394_v29 = vld [vmem:[%s1583_s7 + $0x3a0] sm:$0xff]  ;;  %393 = vst [vmem:[%s1588_s8 + $0xe0] sm:$0xff] %v392_v28 }
  0x36   : > { %395 = vst [vmem:[%s1588_s8 + $0xe8] sm:$0xff] %v394_v29  ;;  %v396_v30 = vld [vmem:[%s1583_s7 + $0x3c0] sm:$0xff] }
  0x37   : > { %v398_v31 = vld [vmem:[%s1583_s7 + $0x3e0] sm:$0xff]  ;;  %397 = vst [vmem:[%s1588_s8 + $0xf0] sm:$0xff] %v396_v30 }
  0x38   : > { %v400_v32 = vld [vmem:[%s1583_s7 + $0x400] sm:$0xff]  ;;  %399 = vst [vmem:[%s1588_s8 + $0xf8] sm:$0xff] %v398_v31 }
  0x39   : > { %401 = vst [vmem:[%s1588_s8 + $0x100] sm:$0xff] %v400_v32  ;;  %v402_v33 = vld [vmem:[%s1583_s7 + $0x420] sm:$0xff] }
  0x3a   : > { %v404_v34 = vld [vmem:[%s1583_s7 + $0x440] sm:$0xff]  ;;  %403 = vst [vmem:[%s1588_s8 + $0x108] sm:$0xff] %v402_v33 }
  0x3b   : > { %v406_v35 = vld [vmem:[%s1583_s7 + $0x460] sm:$0xff]  ;;  %405 = vst [vmem:[%s1588_s8 + $0x110] sm:$0xff] %v404_v34 }
  0x3c   : > { %407 = vst [vmem:[%s1588_s8 + $0x118] sm:$0xff] %v406_v35  ;;  %v408_v36 = vld [vmem:[%s1583_s7 + $0x480] sm:$0xff] }
  0x3d   : > { %v410_v37 = vld [vmem:[%s1583_s7 + $0x4a0] sm:$0xff]  ;;  %409 = vst [vmem:[%s1588_s8 + $0x120] sm:$0xff] %v408_v36 }
  0x3e   : > { %v412_v38 = vld [vmem:[%s1583_s7 + $0x4c0] sm:$0xff]  ;;  %411 = vst [vmem:[%s1588_s8 + $0x128] sm:$0xff] %v410_v37 }
  0x3f   : > { %413 = vst [vmem:[%s1588_s8 + $0x130] sm:$0xff] %v412_v38  ;;  %v414_v39 = vld [vmem:[%s1583_s7 + $0x4e0] sm:$0xff] }
  0x40   : > { %v416_v40 = vld [vmem:[%s1583_s7 + $0x500] sm:$0xff]  ;;  %415 = vst [vmem:[%s1588_s8 + $0x138] sm:$0xff] %v414_v39 }
  0x41   : > { %v418_v41 = vld [vmem:[%s1583_s7 + $0x520] sm:$0xff]  ;;  %417 = vst [vmem:[%s1588_s8 + $0x140] sm:$0xff] %v416_v40 }
  0x42   : > { %419 = vst [vmem:[%s1588_s8 + $0x148] sm:$0xff] %v418_v41  ;;  %v420_v42 = vld [vmem:[%s1583_s7 + $0x540] sm:$0xff] }
  0x43   : > { %v422_v43 = vld [vmem:[%s1583_s7 + $0x560] sm:$0xff]  ;;  %421 = vst [vmem:[%s1588_s8 + $0x150] sm:$0xff] %v420_v42 }
  0x44   : > { %v424_v44 = vld [vmem:[%s1583_s7 + $0x580] sm:$0xff]  ;;  %423 = vst [vmem:[%s1588_s8 + $0x158] sm:$0xff] %v422_v43 }
  0x45   : > { %425 = vst [vmem:[%s1588_s8 + $0x160] sm:$0xff] %v424_v44  ;;  %v426_v45 = vld [vmem:[%s1583_s7 + $0x5a0] sm:$0xff] }
  0x46   : > { %v428_v46 = vld [vmem:[%s1583_s7 + $0x5c0] sm:$0xff]  ;;  %427 = vst [vmem:[%s1588_s8 + $0x168] sm:$0xff] %v426_v45 }
  0x47   : > { %v430_v47 = vld [vmem:[%s1583_s7 + $0x5e0] sm:$0xff]  ;;  %429 = vst [vmem:[%s1588_s8 + $0x170] sm:$0xff] %v428_v46 }
  0x48   : > { %431 = vst [vmem:[%s1588_s8 + $0x178] sm:$0xff] %v430_v47  ;;  %v432_v48 = vld [vmem:[%s1583_s7 + $0x600] sm:$0xff] }
  0x49   : > { %v434_v49 = vld [vmem:[%s1583_s7 + $0x620] sm:$0xff]  ;;  %433 = vst [vmem:[%s1588_s8 + $0x180] sm:$0xff] %v432_v48 }
  0x4a   : > { %v436_v50 = vld [vmem:[%s1583_s7 + $0x640] sm:$0xff]  ;;  %435 = vst [vmem:[%s1588_s8 + $0x188] sm:$0xff] %v434_v49 }
  0x4b   : > { %437 = vst [vmem:[%s1588_s8 + $0x190] sm:$0xff] %v436_v50  ;;  %v438_v51 = vld [vmem:[%s1583_s7 + $0x660] sm:$0xff] }
  0x4c   : > { %v440_v52 = vld [vmem:[%s1583_s7 + $0x680] sm:$0xff]  ;;  %439 = vst [vmem:[%s1588_s8 + $0x198] sm:$0xff] %v438_v51 }
  0x4d   : > { %v442_v53 = vld [vmem:[%s1583_s7 + $0x6a0] sm:$0xff]  ;;  %441 = vst [vmem:[%s1588_s8 + $0x1a0] sm:$0xff] %v440_v52 }
  0x4e   : > { %443 = vst [vmem:[%s1588_s8 + $0x1a8] sm:$0xff] %v442_v53  ;;  %v444_v54 = vld [vmem:[%s1583_s7 + $0x6c0] sm:$0xff] }
  0x4f   : > { %v446_v55 = vld [vmem:[%s1583_s7 + $0x6e0] sm:$0xff]  ;;  %445 = vst [vmem:[%s1588_s8 + $0x1b0] sm:$0xff] %v444_v54 }
  0x50   : > { %v448_v56 = vld [vmem:[%s1583_s7 + $0x700] sm:$0xff]  ;;  %447 = vst [vmem:[%s1588_s8 + $0x1b8] sm:$0xff] %v446_v55 }
  0x51   : > { %449 = vst [vmem:[%s1588_s8 + $0x1c0] sm:$0xff] %v448_v56  ;;  %v450_v57 = vld [vmem:[%s1583_s7 + $0x720] sm:$0xff] }
  0x52   : > { %v452_v58 = vld [vmem:[%s1583_s7 + $0x740] sm:$0xff]  ;;  %451 = vst [vmem:[%s1588_s8 + $0x1c8] sm:$0xff] %v450_v57 }
  0x53   : > { %v454_v59 = vld [vmem:[%s1583_s7 + $0x760] sm:$0xff]  ;;  %453 = vst [vmem:[%s1588_s8 + $0x1d0] sm:$0xff] %v452_v58 }
  0x54   : > { %455 = vst [vmem:[%s1588_s8 + $0x1d8] sm:$0xff] %v454_v59  ;;  %v456_v60 = vld [vmem:[%s1583_s7 + $0x780] sm:$0xff] }
  0x55   : > { %v458_v61 = vld [vmem:[%s1583_s7 + $0x7a0] sm:$0xff]  ;;  %457 = vst [vmem:[%s1588_s8 + $0x1e0] sm:$0xff] %v456_v60 }
  0x56   : > { %v460_v62 = vld [vmem:[%s1583_s7 + $0x7c0] sm:$0xff]  ;;  %459 = vst [vmem:[%s1588_s8 + $0x1e8] sm:$0xff] %v458_v61 }
  0x57   : > { %461 = vst [vmem:[%s1588_s8 + $0x1f0] sm:$0xff] %v460_v62  ;;  %v462_v63 = vld [vmem:[%s1583_s7 + $0x7e0] sm:$0xff] }
  0x58   : > { %463 = vst [vmem:[%s1588_s8 + $0x1f8] sm:$0xff] %v462_v63 }
  0x59 PF: > { %p1207_p7 = scmp.ge.s32.totalorder %s1500_s18, 1  ;;  %p476_p8 = scmp.lt.s32.totalorder %s1500_s18, 9 }
  0x5b   : > { %p477_p9 = pnand %p1207_p7, %p476_p8 }
  0x5c   : > { %s483_s9 = sand.u32 (!%p477_p9), 1, %s1476_s12   ;;  %s1209_s10 = sshll.u32 (!%p477_p9), %s1484_s14, 2 }
  0x5d   : > { %480 = sbr.rel (%p477_p9) target bundleno = 408 (0x198), region = 66  ;;  %s1208_s11 = sshll.u32 (!%p477_p9), %s483_s9, 9 }
  0x5e   : > { %p526_p10 = scmp.lt.s32.totalorder (!%p477_p9), %s1209_s10, 7  ;;  %s1211_s21 = sshll.u32 (!%p477_p9), %s1488_s15, 1 }
  0x5f   : > { %p536_p11 = scmp.lt.s32.totalorder (!%p477_p9), %s1211_s21, 7  ;;  %s1737_s5 = scalar_lea.vmem (!%p477_p9), [#allocation3], %s1208_s11 }
  0x60   : > { %p1214_p12 = scmp.ne.s32.totalorder (!%p477_p9), %s1484_s14, 0 }
  0x64   : > { %s1851_s10 = smov (!%p526_p10, %s1209_s10), 7  ;;  %s1853_s21 = smov (!%p536_p11, %s1211_s21), 7 }
  0x65   : > { %s1210_s22 = sshll.u32 %s1851_s10, 2  ;;  %s538_s12 = scalar_lea.vmem %s1836_s2, %s1853_s21  ;;  %v1502_v0 = vmov (!%p1214_p12), 0.0  }
  0x66   : > { %s1723_s26 = scalar_lea.vmem %s1834_s0, %s1210_s22  ;;  %s1213_s29 = sshll.u32 %s1853_s21, 2  ;;  %554 = vst [vmem:[#allocation2] sm:$0xff] (!%p1214_p12), %v1502_v0  ;;  %555 = vst [vmem:[#allocation2 + $0x8] sm:$0xff] (!%p1214_p12), %v1502_v0 }
  0x67   : > { %s1735_s15 = scalar_lea.vmem %s1837_s3, %s1213_s29  ;;  %553 = sbr.rel (%p1214_p12) target bundleno = 110 (0x6e), region = 74 }
  0x6e PF: > { %v1346_v1 = vld [vmem:[%s1737_s5 + $0x4] ss:$8 sps:$4 sm:$0xff]   ;;  %v1350_v3 = vld [vmem:[%s1737_s5] ss:$8 sps:$4 sm:$0xff]   ;;  %v1352_v5 = vld [vmem:[%s1737_s5 + $0x14] ss:$8 sps:$4 sm:$0xff]  }
  0x6f   : > { %v1348_v2 = vld [vmem:[%s1737_s5 + $0x104] ss:$8 sps:$4 sm:$0xff]   ;;  %958 = vmatprep.subr.bf16.mxu0 %v1346_v1  ;;  %v1351_v4 = vld [vmem:[%s1737_s5 + $0x100] ss:$8 sps:$4 sm:$0xff]   ;;  %v1354_v6 = vld [vmem:[%s1737_s5 + $0x114] ss:$8 sps:$4 sm:$0xff]  }
  0x70   : > { %999 = vmatprep.subr.bf16.mxu1 %v1348_v2  ;;  %959 = vmatpush1.bf16.msra.mxu0 %v1350_v3  ;;  %v1356_v7 = vld [vmem:[%s1737_s5 + $0x10] ss:$8 sps:$4 sm:$0xff]   ;;  %v1358_v9 = vld [vmem:[%s1737_s5 + $0x24] ss:$8 sps:$4 sm:$0xff]   ;;  %v1362_v11 = vld [vmem:[%s1737_s5 + $0x20] ss:$8 sps:$4 sm:$0xff]  }
  0x71   : > { %1000 = vmatpush1.bf16.msra.mxu1 %v1351_v4  ;;  %960 = vmatprep.subr.bf16.mxu0 %v1352_v5  ;;  %v1357_v8 = vld [vmem:[%s1737_s5 + $0x110] ss:$8 sps:$4 sm:$0xff]   ;;  %v1360_v10 = vld [vmem:[%s1737_s5 + $0x124] ss:$8 sps:$4 sm:$0xff]   ;;  %v1363_v12 = vld [vmem:[%s1737_s5 + $0x120] ss:$8 sps:$4 sm:$0xff]  }
  0x72   : > { %1001 = vmatprep.subr.bf16.mxu1 %v1354_v6  ;;  %v1364_v13 = vld [vmem:[%s1737_s5 + $0x34] ss:$8 sps:$4 sm:$0xff]   ;;  %v1368_v15 = vld [vmem:[%s1737_s5 + $0x30] ss:$8 sps:$4 sm:$0xff]   ;;  %v1370_v17 = vld [vmem:[%s1737_s5 + $0x44] ss:$8 sps:$4 sm:$0xff]  }
  0x73   : > { %v1366_v14 = vld [vmem:[%s1737_s5 + $0x134] ss:$8 sps:$4 sm:$0xff]   ;;  %v1369_v16 = vld [vmem:[%s1737_s5 + $0x130] ss:$8 sps:$4 sm:$0xff]   ;;  %v1372_v18 = vld [vmem:[%s1737_s5 + $0x144] ss:$8 sps:$4 sm:$0xff]  }
  0x74   : > { %961 = vmatpush1.bf16.msra.mxu0 %v1356_v7  ;;  %v1374_v19 = vld [vmem:[%s1737_s5 + $0x40] ss:$8 sps:$4 sm:$0xff]   ;;  %v1376_v21 = vld [vmem:[%s1737_s5 + $0x54] ss:$8 sps:$4 sm:$0xff]   ;;  %v1380_v23 = vld [vmem:[%s1737_s5 + $0x50] ss:$8 sps:$4 sm:$0xff]  }
  0x75   : > { %1002 = vmatpush1.bf16.msra.mxu1 %v1357_v8  ;;  %962 = vmatprep.subr.bf16.mxu0 %v1358_v9  ;;  %v1375_v20 = vld [vmem:[%s1737_s5 + $0x140] ss:$8 sps:$4 sm:$0xff]   ;;  %v1378_v22 = vld [vmem:[%s1737_s5 + $0x154] ss:$8 sps:$4 sm:$0xff]   ;;  %v1381_v24 = vld [vmem:[%s1737_s5 + $0x150] ss:$8 sps:$4 sm:$0xff]  }
  0x76   : > { %1003 = vmatprep.subr.bf16.mxu1 %v1360_v10  ;;  %v1382_v25 = vld [vmem:[%s1737_s5 + $0x64] ss:$8 sps:$4 sm:$0xff]   ;;  %v1386_v27 = vld [vmem:[%s1737_s5 + $0x60] ss:$8 sps:$4 sm:$0xff]   ;;  %v1388_v29 = vld [vmem:[%s1737_s5 + $0x74] ss:$8 sps:$4 sm:$0xff]  }
  0x77   : > { %v1384_v26 = vld [vmem:[%s1737_s5 + $0x164] ss:$8 sps:$4 sm:$0xff]   ;;  %v1387_v28 = vld [vmem:[%s1737_s5 + $0x160] ss:$8 sps:$4 sm:$0xff]   ;;  %v1390_v30 = vld [vmem:[%s1737_s5 + $0x174] ss:$8 sps:$4 sm:$0xff]  }
  0x78   : > { %963 = vmatpush1.bf16.msra.mxu0 %v1362_v11  ;;  %v1392_v31 = vld [vmem:[%s1737_s5 + $0x70] ss:$8 sps:$4 sm:$0xff]   ;;  %v1394_v33 = vld [vmem:[%s1737_s5 + $0x84] ss:$8 sps:$4 sm:$0xff]   ;;  %v1398_v35 = vld [vmem:[%s1737_s5 + $0x80] ss:$8 sps:$4 sm:$0xff]  }
  0x79   : > { %1004 = vmatpush1.bf16.msra.mxu1 %v1363_v12  ;;  %964 = vmatprep.subr.bf16.mxu0 %v1364_v13  ;;  %v1393_v32 = vld [vmem:[%s1737_s5 + $0x170] ss:$8 sps:$4 sm:$0xff]   ;;  %v1396_v34 = vld [vmem:[%s1737_s5 + $0x184] ss:$8 sps:$4 sm:$0xff]   ;;  %v1399_v36 = vld [vmem:[%s1737_s5 + $0x180] ss:$8 sps:$4 sm:$0xff]  }
  0x7a   : > { %1005 = vmatprep.subr.bf16.mxu1 %v1366_v14  ;;  %v1400_v37 = vld [vmem:[%s1737_s5 + $0x94] ss:$8 sps:$4 sm:$0xff]   ;;  %v1404_v39 = vld [vmem:[%s1737_s5 + $0x90] ss:$8 sps:$4 sm:$0xff]   ;;  %v1406_v41 = vld [vmem:[%s1737_s5 + $0xa4] ss:$8 sps:$4 sm:$0xff]  }
  0x7b   : > { %v1402_v38 = vld [vmem:[%s1737_s5 + $0x194] ss:$8 sps:$4 sm:$0xff]   ;;  %v1405_v40 = vld [vmem:[%s1737_s5 + $0x190] ss:$8 sps:$4 sm:$0xff]   ;;  %v1408_v42 = vld [vmem:[%s1737_s5 + $0x1a4] ss:$8 sps:$4 sm:$0xff]  }
  0x7c   : > { %965 = vmatpush1.bf16.msra.mxu0 %v1368_v15  ;;  %v1410_v43 = vld [vmem:[%s1737_s5 + $0xa0] ss:$8 sps:$4 sm:$0xff]   ;;  %v1412_v45 = vld [vmem:[%s1737_s5 + $0xb4] ss:$8 sps:$4 sm:$0xff]   ;;  %v1416_v50 = vld [vmem:[%s1737_s5 + $0xb0] ss:$8 sps:$4 sm:$0xff]  }
  0x7d   : > { %1006 = vmatpush1.bf16.msra.mxu1 %v1369_v16  ;;  %966 = vmatprep.subr.bf16.mxu0 %v1370_v17  ;;  %v1411_v44 = vld [vmem:[%s1737_s5 + $0x1a0] ss:$8 sps:$4 sm:$0xff]   ;;  %v1414_v46 = vld [vmem:[%s1737_s5 + $0x1b4] ss:$8 sps:$4 sm:$0xff]   ;;  %v1417_v51 = vld [vmem:[%s1737_s5 + $0x1b0] ss:$8 sps:$4 sm:$0xff]  }
  0x7e   : > { %1007 = vmatprep.subr.bf16.mxu1 %v1372_v18  ;;  %v558_v47 = vld [vmem:[%s1723_s26] sm:$0xff]  ;;  %v559_v49 = vld [vmem:[%s1723_s26 + $0x8] sm:$0xff]  ;;  %v1418_v53 = vld [vmem:[%s1737_s5 + $0xc4] ss:$8 sps:$4 sm:$0xff]   ;;  %p1283_p13 = scmp.ne.s32.totalorder %s1484_s14, 1 }
  0x7f   : > { %v1216_v48 = vcombine.high %v558_v47, %v558_v47  ;;  %v1218_v52 = vcombine.high %v559_v49, %v559_v49  ;;  %v1420_v54 = vld [vmem:[%s1737_s5 + $0x1c4] ss:$8 sps:$4 sm:$0xff]   ;;  %v1422_v55 = vld [vmem:[%s1737_s5 + $0xc0] ss:$8 sps:$4 sm:$0xff]   ;;  %v1424_v57 = vld [vmem:[%s1737_s5 + $0xd4] ss:$8 sps:$4 sm:$0xff]   ;;  %v1215_v5 = vcombine.low %v558_v47, %v558_v47  ;;  %v1217_v6 = vcombine.low %v559_v49, %v559_v49 }
  0x80   : > { %967 = vmatpush1.bf16.msra.mxu0 %v1374_v19  ;;  %v1423_v56 = vld [vmem:[%s1737_s5 + $0x1c0] ss:$8 sps:$4 sm:$0xff]   ;;  %v1426_v58 = vld [vmem:[%s1737_s5 + $0x1d4] ss:$8 sps:$4 sm:$0xff]   ;;  %v1428_v59 = vld [vmem:[%s1737_s5 + $0xd0] ss:$8 sps:$4 sm:$0xff]  }
  0x81   : > { %1008 = vmatpush1.bf16.msra.mxu1 %v1375_v20  ;;  %968 = vmatprep.subr.bf16.mxu0 %v1376_v21  ;;  %v1429_v60 = vld [vmem:[%s1737_s5 + $0x1d0] ss:$8 sps:$4 sm:$0xff]   ;;  %v1430_v61 = vld [vmem:[%s1737_s5 + $0xe4] ss:$8 sps:$4 sm:$0xff]   ;;  %v1434_v63 = vld [vmem:[%s1737_s5 + $0xe0] ss:$8 sps:$4 sm:$0xff]   ;;  %v1052_v21 = vlaneseq (!%p1283_p13) }
  0x82   : > { %1009 = vmatprep.subr.bf16.mxu1 %v1378_v22  ;;  %990 = vmatprep.mubr.bf16.mxu0 %v1216_v48  ;;  %v1432_v62 = vld [vmem:[%s1737_s5 + $0x1e4] ss:$8 sps:$4 sm:$0xff]   ;;  %v1435_v0 = vld [vmem:[%s1737_s5 + $0x1e0] ss:$8 sps:$4 sm:$0xff]   ;;  %v1436_v1 = vld [vmem:[%s1737_s5 + $0xf4] ss:$8 sps:$4 sm:$0xff]  }
  0x83   : > { %1031 = vmatprep.mubr.bf16.mxu1 %v1218_v52  ;;  %v1438_v2 = vld [vmem:[%s1737_s5 + $0x1f4] ss:$8 sps:$4 sm:$0xff]   ;;  %v1440_v3 = vld [vmem:[%s1737_s5 + $0xf0] ss:$8 sps:$4 sm:$0xff]   ;;  %v1053_v22 = vshrl.u32 (!%p1283_p13), %v1052_v21, 7 }
  0x84   : > { %969 = vmatpush1.bf16.msra.mxu0 %v1380_v23  ;;  %v1441_v4 = vld [vmem:[%s1737_s5 + $0x1f0] ss:$8 sps:$4 sm:$0xff]  }
  0x85   : > { %1010 = vmatpush1.bf16.msra.mxu1 %v1381_v24  ;;  %970 = vmatprep.subr.bf16.mxu0 %v1382_v25  ;;  %v556_v8 = vld [vmem:[#allocation2] sm:$0xff]  ;;  %v557_v12 = vld [vmem:[#allocation2 + $0x8] sm:$0xff]  ;;  %v1054_v24 = vsub.s32 (!%p1283_p13), 0, %v1053_v22  ;;  %v1058_v25 = vsub.s32 (!%p1283_p13), 1, %v1053_v22 }
  0x86   : > { %1011 = vmatprep.subr.bf16.mxu1 %v1384_v26  ;;  %v1050_v23 = vld [vmem:[%s538_s12] sm:$0x3] (!%p1283_p13) }
  0x88   : > { %971 = vmatpush1.bf16.msra.mxu0 %v1386_v27 }
  0x89   : > { %1012 = vmatpush1.bf16.msra.mxu1 %v1387_v28  ;;  %972 = vmatprep.subr.bf16.mxu0 %v1388_v29  ;;  %v1055_v28 = vrot.slane (!%p1283_p13), %v1050_v23, %v1054_v24  ;;  %v1059_v29 = vrot.slane (!%p1283_p13), %v1050_v23, %v1058_v25 }
  0x8a   : > { %1013 = vmatprep.subr.bf16.mxu1 %v1390_v30 }
  0x8c   : > { %973 = vmatpush1.bf16.msra.mxu0 %v1392_v31 }
  0x8d   : > { %1014 = vmatpush1.bf16.msra.mxu1 %v1393_v32  ;;  %974 = vmatprep.subr.bf16.mxu0 %v1394_v33 }
  0x8e   : > { %1015 = vmatprep.subr.bf16.mxu1 %v1396_v34 }
  0x90   : > { %975 = vmatpush1.bf16.msra.mxu0 %v1398_v35 }
  0x91   : > { %1016 = vmatpush1.bf16.msra.mxu1 %v1399_v36  ;;  %976 = vmatprep.subr.bf16.mxu0 %v1400_v37 }
  0x92   : > { %1017 = vmatprep.subr.bf16.mxu1 %v1402_v38 }
  0x94   : > { %977 = vmatpush1.bf16.msra.mxu0 %v1404_v39 }
  0x95   : > { %1018 = vmatpush1.bf16.msra.mxu1 %v1405_v40  ;;  %978 = vmatprep.subr.bf16.mxu0 %v1406_v41 }
  0x96   : > { %1019 = vmatprep.subr.bf16.mxu1 %v1408_v42 }
  0x98   : > { %979 = vmatpush1.bf16.msra.mxu0 %v1410_v43 }
  0x99   : > { %1020 = vmatpush1.bf16.msra.mxu1 %v1411_v44  ;;  %980 = vmatprep.subr.bf16.mxu0 %v1412_v45 }
  0x9a   : > { %1021 = vmatprep.subr.bf16.mxu1 %v1414_v46 }
  0x9c   : > { %981 = vmatpush1.bf16.msra.mxu0 %v1416_v50 }
  0x9d   : > { %1022 = vmatpush1.bf16.msra.mxu1 %v1417_v51  ;;  %982 = vmatprep.subr.bf16.mxu0 %v1418_v53 }
  0x9e   : > { %1023 = vmatprep.subr.bf16.mxu1 %v1420_v54 }
  0xa0   : > { %983 = vmatpush1.bf16.msra.mxu0 %v1422_v55 }
  0xa1   : > { %1024 = vmatpush1.bf16.msra.mxu1 %v1423_v56  ;;  %984 = vmatprep.subr.bf16.mxu0 %v1424_v57 }
  0xa2   : > { %1025 = vmatprep.subr.bf16.mxu1 %v1426_v58 }
  0xa4   : > { %985 = vmatpush1.bf16.msra.mxu0 %v1428_v59 }
  0xa5   : > { %1026 = vmatpush1.bf16.msra.mxu1 %v1429_v60  ;;  %986 = vmatprep.subr.bf16.mxu0 %v1430_v61 }
  0xa6   : > { %1027 = vmatprep.subr.bf16.mxu1 %v1432_v62 }
  0xa8   : > { %987 = vmatpush1.bf16.msra.mxu0 %v1434_v63 }
  0xa9   : > { %1028 = vmatpush1.bf16.msra.mxu1 %v1435_v0  ;;  %988 = vmatprep.subr.bf16.mxu0 %v1436_v1 }
  0xaa   : > { %1029 = vmatprep.subr.bf16.mxu1 %v1438_v2 }
  0xac   : > { %989 = vmatpush1.bf16.msra.mxu0 %v1440_v3 }
  0xad   : > { %1030 = vmatpush1.bf16.msra.mxu1 %v1441_v4 }
  0xaf   : > { %991 = vmatmul.mubr.bf16.vlgmr.msra.gmra.mrb[0].mxu0 %v1215_v5 }
  0xb0   : > { %1032 = vmatmul.mubr.bf16.vlgmr.msra.gmra.mrb[0].mxu1 %v1217_v6 }
 0x182   : > { %v992_v7 = vpop.f32.mrb[0].mxu0 }
 0x183   : > { %v1033_v9 = vpop.f32.mrb[0].mxu1  ;;  %v994_v11 = vpop.f32.mrb[1].mxu0  ;;  %1047 = sbr.rel (%p1283_p13) target bundleno = 408 (0x198), region = 78 }
 0x184   : > { %v1034_v10 = vadd.f32 %v1033_v9, %v992_v7  ;;  %v1035_v13 = vpop.f32.mrb[1].mxu1  ;;  %v996_v15 = vpop.f32.mrb[2].mxu0 }
 0x185   : > { %v1036_v14 = vadd.f32 %v1035_v13, %v994_v11  ;;  %v1037_v16 = vpop.f32.mrb[2].mxu1  ;;  %v997_v18 = vpop.f32.mrb[3].mxu0 }
 0x186   : > { %v1040_v17 = vadd.f32 %v1034_v10, %v556_v8  ;;  %v1038_v19 = vpop.f32.mrb[3].mxu1 }
 0x187   : > { %v1041_v20 = vadd.f32 %v1036_v14, %v557_v12 }
 0x188   : > { %1042 = vst [vmem:[#allocation2] sm:$0xff] %v1040_v17 }
 0x189   : > { %1043 = vst [vmem:[#allocation2 + $0x8] sm:$0xff] %v1041_v20 }
 0x18f   : > { %v1048_v26 = vld [vmem:[#allocation2] sm:$0xff] }
 0x190   : > { %v1049_v27 = vld [vmem:[#allocation2 + $0x8] sm:$0xff]  ;;  %v1062_v30 = vadd.f32 %v1055_v28, %v1048_v26 }
 0x191   : > { %v1063_v31 = vadd.f32 %v1059_v29, %v1049_v27 }
 0x192   : > { %v1064_v32 = vmax.f32 %v1062_v30, 0.0 }
 0x193   : > { %v1065_v33 = vmax.f32 %v1063_v31, 0.0 }
 0x195   : > { %v1288_v34 = vpack.c.bf16 %v1065_v33, %v1064_v32 }
 0x197   : > { %1074 = vst [vmem:[%s1735_s15] sm:$0xff] %v1288_v34 }
 0x198 PF: > { %s13_s18 = sadd.s32 1, %s1500_s18   ;;  %s1838_s12 = smov %s1480_s13 }
 0x199   : > { %p10_p0 = scmp.ge.s32.totalorder %s13_s18, 10   ;;  %s1839_s13 = smov %s1574_s25 }
 0x19a   : > { %s1840_s14 = smov %s1492_s16  ;;  %s1841_s15 = smov %s1496_s17 }
 0x19b   : > { %s1842_s16 = smov %s1845_s19  ;;  %s1843_s17 = smov %s1849_s20 }
 0x19c   :  { %12 = sbr.rel (!%p10_p0) target bundleno = 4 (0x4), region = 119 }

// kernel: esac_scnet_forward.33
= control target key start
LH: loop header
LB: loop body
LE: loop exit
PB: predicated region body
PF: predicated region fallthrough
CT: control target
= control target key end

     0   :  { %s940_s12 = smov 0   ;;  %s942_s13 = smov 0   ;;  %s1023_s0 = inlined_call_operand.vmem [shape: bf16[8,1024], index: 0, kind: input, shape index: {}]   ;;  %s1024_s1 = inlined_call_operand.vmem [shape: bf16[1024,128], index: 1, kind: input, shape index: {}]   ;;  %s1025_s2 = inlined_call_operand.vmem [shape: f32[1,128], index: 2, kind: input, shape index: {}]   ;;  %s1026_s3 = inlined_call_operand.vmem [shape: f32[8,128], index: 3, kind: output, shape index: {}]  }
   0x1   :  { %s944_s14 = smov 0  }
   0x2 LB: > { %s25_s15 = sadd.s32 1, %s913_s13  ;;  %p743_p0 = scmp.ge.s32.totalorder %s917_s14, 1  ;;  %s917_s14 = sphi %s944_s14, %s13_s14   ;;  %s913_s13 = sphi %s942_s13, %s1028_s13   ;;  %s909_s12 = sphi %s940_s12, %s1027_s12  }
   0x3   : > { %p26_p1 = scmp.ge.s32.totalorder %s25_s15, 2  ;;  %p189_p2 = scmp.lt.s32.totalorder %s917_s14, 3 }
   0x5   : > { %s1030_s15 = smov (%p26_p1, %s25_s15), 0  ;;  %p190_p3 = pnand %p743_p0, %p189_p2 }
   0x6   : > { %s744_s16 = sshll.u32 (!%p190_p3), %s909_s12, 2  ;;  %s746_s17 = sshll.u32 (!%p190_p3), %s909_s12, 6 }
   0x7   : > { %193 = sbr.rel (%p190_p3) target bundleno = 289 (0x121), region = 32  ;;  %p233_p4 = scmp.lt.s32.totalorder (!%p190_p3), %s744_s16, 7 }
   0x8   : > { %p241_p5 = scmp.lt.s32.totalorder (!%p190_p3), %s746_s17, 127  ;;  %p748_p6 = scmp.ne.s32.totalorder (!%p190_p3), %s909_s12, 0 }
   0xe   : > { %s1032_s16 = smov (!%p233_p4, %s744_s16), 7  ;;  %s1034_s17 = smov (!%p241_p5, %s746_s17), 127 }
   0xf   : > { %s745_s18 = sshll.u32 %s1032_s16, 2  ;;  %s747_s22 = sshll.u32 %s1034_s17, 2  ;;  %v919_v0 = vmov (!%p748_p6), 0.0  }
  0x10   : > { %s965_s21 = scalar_lea.vmem %s1023_s0, %s745_s18  ;;  %s970_s25 = scalar_lea.vmem %s1024_s1, %s747_s22  ;;  %264 = vst [vmem:[#allocation2] sm:$0xff] (!%p748_p6), %v919_v0 }
  0x11   : > { %263 = sbr.rel (%p748_p6) target bundleno = 24 (0x18), region = 36 }
  0x18 PF: > { %v859_v1 = vld [vmem:[%s970_s25 + $0x40] sm:$0xff]   ;;  %v863_v5 = vld [vmem:[%s970_s25 + $0x48] sm:$0xff]   ;;  %v867_v9 = vld [vmem:[%s970_s25 + $0x50] sm:$0xff]   ;;  %p785_p7 = scmp.ne.s32.totalorder %s909_s12, 1 }
  0x19   : > { %v860_v2 = vld [vmem:[%s970_s25 + $0xc0] sm:$0xff]   ;;  %790 = vmatprep.subr.bf16.mxu0 %v859_v1  ;;  %v864_v6 = vld [vmem:[%s970_s25 + $0xc8] sm:$0xff]   ;;  %v868_v10 = vld [vmem:[%s970_s25 + $0xd0] sm:$0xff]  }
  0x1a   : > { %v861_v3 = vld [vmem:[%s970_s25] sm:$0xff]   ;;  %812 = vmatprep.subr.bf16.mxu1 %v860_v2  ;;  %v865_v7 = vld [vmem:[%s970_s25 + $0x8] sm:$0xff]   ;;  %v869_v11 = vld [vmem:[%s970_s25 + $0x10] sm:$0xff]  }
  0x1b   : > { %v862_v4 = vld [vmem:[%s970_s25 + $0x80] sm:$0xff]   ;;  %791 = vmatpush3.bf16.msra.mxu0 %v861_v3  ;;  %v866_v8 = vld [vmem:[%s970_s25 + $0x88] sm:$0xff]   ;;  %v870_v12 = vld [vmem:[%s970_s25 + $0x90] sm:$0xff]  }
  0x1c   : > { %813 = vmatpush3.bf16.msra.mxu1 %v862_v4  ;;  %792 = vmatprep.subr.bf16.mxu0 %v863_v5  ;;  %v871_v13 = vld [vmem:[%s970_s25 + $0x58] sm:$0xff]   ;;  %v875_v17 = vld [vmem:[%s970_s25 + $0x60] sm:$0xff]   ;;  %v879_v21 = vld [vmem:[%s970_s25 + $0x68] sm:$0xff]  }
  0x1d   : > { %814 = vmatprep.subr.bf16.mxu1 %v864_v6  ;;  %v872_v14 = vld [vmem:[%s970_s25 + $0xd8] sm:$0xff]   ;;  %v876_v18 = vld [vmem:[%s970_s25 + $0xe0] sm:$0xff]   ;;  %v880_v22 = vld [vmem:[%s970_s25 + $0xe8] sm:$0xff]  }
  0x1e   : > { %v873_v15 = vld [vmem:[%s970_s25 + $0x18] sm:$0xff]   ;;  %v877_v19 = vld [vmem:[%s970_s25 + $0x20] sm:$0xff]   ;;  %v881_v23 = vld [vmem:[%s970_s25 + $0x28] sm:$0xff]  }
  0x1f   : > { %793 = vmatpush3.bf16.msra.mxu0 %v865_v7  ;;  %v874_v16 = vld [vmem:[%s970_s25 + $0x98] sm:$0xff]   ;;  %v878_v20 = vld [vmem:[%s970_s25 + $0xa0] sm:$0xff]   ;;  %v882_v24 = vld [vmem:[%s970_s25 + $0xa8] sm:$0xff]  }
  0x20   : > { %815 = vmatpush3.bf16.msra.mxu1 %v866_v8  ;;  %794 = vmatprep.subr.bf16.mxu0 %v867_v9  ;;  %v883_v25 = vld [vmem:[%s970_s25 + $0x70] sm:$0xff]   ;;  %v887_v29 = vld [vmem:[%s970_s25 + $0x78] sm:$0xff]   ;;  %v266_v33 = vld [vmem:[%s965_s21] sm:$0xff] }
  0x21   : > { %816 = vmatprep.subr.bf16.mxu1 %v868_v10  ;;  %v884_v26 = vld [vmem:[%s970_s25 + $0xf0] sm:$0xff]   ;;  %v888_v30 = vld [vmem:[%s970_s25 + $0xf8] sm:$0xff]   ;;  %v267_v34 = vld [vmem:[%s965_s21 + $0x8] sm:$0xff]  ;;  %v749_v35 = vcombine.low %v266_v33, %v266_v33  ;;  %v750_v36 = vcombine.high %v266_v33, %v266_v33 }
  0x22   : > { %v885_v27 = vld [vmem:[%s970_s25 + $0x30] sm:$0xff]   ;;  %v889_v31 = vld [vmem:[%s970_s25 + $0x38] sm:$0xff]   ;;  %v751_v37 = vcombine.low %v267_v34, %v267_v34  ;;  %v752_v38 = vcombine.high %v267_v34, %v267_v34  ;;  %v265_v47 = vld [vmem:[#allocation2] sm:$0xff] }
  0x23   : > { %795 = vmatpush3.bf16.msra.mxu0 %v869_v11  ;;  %v886_v28 = vld [vmem:[%s970_s25 + $0xb0] sm:$0xff]   ;;  %v890_v32 = vld [vmem:[%s970_s25 + $0xb8] sm:$0xff]   ;;  %570 = vmatprep.mubr.bf16.mxu0 %v750_v36  ;;  %v786_v53 = vld [vmem:[%s1025_s2] ss:$0 sm:$0xff] (!%p785_p7) }
  0x24   : > { %817 = vmatpush3.bf16.msra.mxu1 %v870_v12  ;;  %796 = vmatprep.subr.bf16.mxu0 %v871_v13 }
  0x25   : > { %818 = vmatprep.subr.bf16.mxu1 %v872_v14  ;;  %610 = vmatprep.mubr.bf16.mxu1 %v752_v38 }
  0x27   : > { %797 = vmatpush3.bf16.msra.mxu0 %v873_v15 }
  0x28   : > { %819 = vmatpush3.bf16.msra.mxu1 %v874_v16  ;;  %798 = vmatprep.subr.bf16.mxu0 %v875_v17 }
  0x29   : > { %820 = vmatprep.subr.bf16.mxu1 %v876_v18 }
  0x2b   : > { %799 = vmatpush3.bf16.msra.mxu0 %v877_v19 }
  0x2c   : > { %821 = vmatpush3.bf16.msra.mxu1 %v878_v20  ;;  %800 = vmatprep.subr.bf16.mxu0 %v879_v21 }
  0x2d   : > { %822 = vmatprep.subr.bf16.mxu1 %v880_v22 }
  0x2f   : > { %801 = vmatpush3.bf16.msra.mxu0 %v881_v23 }
  0x30   : > { %823 = vmatpush3.bf16.msra.mxu1 %v882_v24  ;;  %802 = vmatprep.subr.bf16.mxu0 %v883_v25 }
  0x31   : > { %824 = vmatprep.subr.bf16.mxu1 %v884_v26 }
  0x33   : > { %803 = vmatpush3.bf16.msra.mxu0 %v885_v27 }
  0x34   : > { %825 = vmatpush3.bf16.msra.mxu1 %v886_v28  ;;  %804 = vmatprep.subr.bf16.mxu0 %v887_v29 }
  0x35   : > { %826 = vmatprep.subr.bf16.mxu1 %v888_v30 }
  0x37   : > { %805 = vmatpush3.bf16.msra.mxu0 %v889_v31 }
  0x38   : > { %827 = vmatpush3.bf16.msra.mxu1 %v890_v32 }
  0x3a   : > { %571 = vmatmul.mubr.bf16.vlgmr.msra.gmra.mrb[0].mxu0 %v749_v35 }
  0x3b   : > { %611 = vmatmul.mubr.bf16.vlgmr.msra.gmra.mrb[0].mxu1 %v751_v37 }
 0x10d   : > { %v806_v39 = vpop.f32.mrb[0].mxu0 }
 0x10e   : > { %v828_v40 = vpop.f32.mrb[0].mxu1  ;;  %v807_v41 = vpop.f32.mrb[1].mxu0 }
 0x10f   : > { %v829_v42 = vpop.f32.mrb[1].mxu1  ;;  %v808_v43 = vadd.f32 %v807_v41, %v806_v39  ;;  %v809_v45 = vpop.f32.mrb[2].mxu0 }
 0x110   : > { %v830_v44 = vadd.f32 %v829_v42, %v828_v40  ;;  %v831_v46 = vpop.f32.mrb[2].mxu1  ;;  %v810_v48 = vpop.f32.mrb[3].mxu0  ;;  %623 = sbr.rel (%p785_p7) target bundleno = 289 (0x121), region = 40 }
 0x111   : > { %v832_v49 = vpop.f32.mrb[3].mxu1 }
 0x112   : > { %v613_v50 = vadd.f32 %v830_v44, %v808_v43 }
 0x114   : > { %v618_v51 = vadd.f32 %v613_v50, %v265_v47 }
 0x116   : > { %619 = vst [vmem:[#allocation2] sm:$0xff] %v618_v51 }
 0x11d   : > { %v624_v52 = vld [vmem:[#allocation2] sm:$0xff] }
 0x11e   : > { %v632_v54 = vadd.f32 %v786_v53, %v624_v52 }
 0x120   : > { %633 = vst [vmem:[%s1026_s3] sm:$0xff] %v632_v54 }
 0x121 PF: > { %s13_s14 = sadd.s32 1, %s917_s14   ;;  %s1027_s12 = smov %s913_s13 }
 0x122   : > { %p10_p8 = scmp.ge.s32.totalorder %s13_s14, 4   ;;  %s1028_s13 = smov %s1030_s15 }
 0x124   :  { %12 = sbr.rel (!%p10_p8) target bundleno = 2 (0x2), region = 76 }

</bundles_post_ra>
